<compile_context>
chip_gen: v7x
topology: tpu7x:2x2x1
jax: 0.10.0
libtpu: 0.0.40
codegen_flags: <defaults>
</compile_context>

<pallas_src>
import functools

import jax
import jax.numpy as jnp
from jax import lax
from jax.experimental import pallas as pl
from jax.experimental.pallas import tpu as pltpu  # noqa: F401  (available if needed)


_LANE = 128
_SUBLANE = 8
# PyTorch gate order is [i, f, g, o]; the kernel uses [i, f, o, g].
_GATE_PERM = (0, 1, 3, 2)


def _round_up(x, m):
    return ((x + m - 1) // m) * m


# ----------------------------------------------------------------------------
# Fused kernel: encoder layers -> bottleneck repeat -> decoder layers.
# ----------------------------------------------------------------------------
def _autoencoder_kernel(num_enc_layers, num_dec_layers,
                        x_ref, wx_ref, wh_ref, b_ref, out_ref):
    """Shapes (all padded, f32):
         x_ref   (T, BP, D)   encoder input, time-major
         wx_ref  (L, D, 4D)   W_ih^T per layer, gate order [i,f,o,g]
         wh_ref  (L, D, 4D)   W_hh^T per layer, gate order [i,f,o,g]
         b_ref   (L, 1, 4D)   b_ih + b_hh per layer, gate order [i,f,o,g]
         out_ref (T, BP, D)   output; also the inter-layer activation buffer
    """
    T, BP, D = x_ref.shape

    def run_layer(layer, get_x):
        # Layer weights are loaded once per (statically unrolled) layer and
        # stay resident in VMEM.
        wx = wx_ref[layer]            # (D, 4D)
        wh = wh_ref[layer]            # (D, 4D)
        b = b_ref[layer]              # (1, 4D)

        def step(t, carry):
            h, c = carry
            x_t = get_x(t)                                            # (BP, D)
            gates = (jnp.dot(x_t, wx, preferred_element_type=jnp.float32)
                     + jnp.dot(h, wh, preferred_element_type=jnp.float32)
                     + b)                                             # (BP, 4D)
            # Gate layout [ i | f | o | g ], each block D lanes (128-aligned):
            # one sigmoid over the first 3D lanes, one tanh over the last D.
            ifo = jax.nn.sigmoid(gates[:, :3 * D])
            g = jnp.tanh(gates[:, 3 * D:])
            c = ifo[:, D:2 * D] * c + ifo[:, :D] * g
            h = ifo[:, 2 * D:3 * D] * jnp.tanh(c)
            out_ref[t] = h            # doubles as next layer's input buffer
            return (h, c)

        zeros = jnp.zeros((BP, D), jnp.float32)
        h_last, _ = lax.fori_loop(0, T, step, (zeros, zeros), unroll=True)
        return h_last

    # ---- Encoder stack: layer 0 reads x, deeper layers read out_ref ----
    h_last = run_layer(0, lambda t: x_ref[t])
    for layer in range(1, num_enc_layers):
        h_last = run_layer(layer, lambda t: out_ref[t])

    # Bottleneck = hidden[-1] of the encoder; the decoder consumes it at every
    # timestep (the "unsqueeze(1).repeat(1, seq_len, 1)" of the PyTorch module
    # without ever materializing a (B, T, E) tensor).
    bottleneck = h_last

    # ---- Decoder stack ----
    run_layer(num_enc_layers, lambda t: bottleneck)
    for layer in range(num_enc_layers + 1, num_enc_layers + num_dec_layers):
        run_layer(layer, lambda t: out_ref[t])


# ----------------------------------------------------------------------------
# Parameter init (PyTorch-style) and lane-dense re-packing.
# ----------------------------------------------------------------------------
def init_lstm_raw(key, input_size, hidden_size, num_layers):
    """PyTorch nn.LSTM layout: w_ih (4H, I), w_hh (4H, H), b_ih/b_hh (4H,)."""
    params = []
    bound = 1.0 / float(hidden_size) ** 0.5
    for layer in range(num_layers):
        in_sz = input_size if layer == 0 else hidden_size
        key, k1, k2, k3, k4 = jax.random.split(key, 5)
        params.append({
            "w_ih": jax.random.uniform(k1, (4 * hidden_size, in_sz),
                                       jnp.float32, -bound, bound),
            "w_hh": jax.random.uniform(k2, (4 * hidden_size, hidden_size),
                                       jnp.float32, -bound, bound),
            "b_ih": jax.random.uniform(k3, (4 * hidden_size,),
                                       jnp.float32, -bound, bound),
            "b_hh": jax.random.uniform(k4, (4 * hidden_size,),
                                       jnp.float32, -bound, bound),
        })
    return params, key


def _pack_layer(p, in_size, hidden, dpad):
    """Pad one layer's weights to (dpad, 4*dpad) and reorder gates to [i,f,o,g]."""
    H = hidden
    w_ih_t = p["w_ih"].T            # (I, 4H)
    w_hh_t = p["w_hh"].T            # (H, 4H)
    bias = p["b_ih"] + p["b_hh"]    # (4H,)
    wx = jnp.zeros((dpad, 4 * dpad), jnp.float32)
    wh = jnp.zeros((dpad, 4 * dpad), jnp.float32)
    b = jnp.zeros((1, 4 * dpad), jnp.float32)
    for dst, src in enumerate(_GATE_PERM):
        wx = wx.at[:in_size, dst * dpad:dst * dpad + H].set(
            w_ih_t[:, src * H:(src + 1) * H])
        wh = wh.at[:H, dst * dpad:dst * dpad + H].set(
            w_hh_t[:, src * H:(src + 1) * H])
        b = b.at[0, dst * dpad:dst * dpad + H].set(bias[src * H:(src + 1) * H])
    return wx, wh, b


def pack_autoencoder_params(enc_params, dec_params, n_features, embedding_size):
    """Stack encoder+decoder layers into lane-dense padded slabs (one-time)."""
    dpad = _round_up(max(n_features, embedding_size), _LANE)
    packed = []
    for li, p in enumerate(enc_params):
        in_sz = n_features if li == 0 else embedding_size
        packed.append(_pack_layer(p, in_sz, embedding_size, dpad))
    for li, p in enumerate(dec_params):
        in_sz = embedding_size if li == 0 else n_features
        packed.append(_pack_layer(p, in_sz, n_features, dpad))
    wx = jnp.stack([w for w, _, _ in packed])   # (L, D, 4D)
    wh = jnp.stack([w for _, w, _ in packed])   # (L, D, 4D)
    b = jnp.stack([w for _, _, w in packed])    # (L, 1, 4D)
    return wx, wh, b, dpad


# ----------------------------------------------------------------------------
# Forward (single fused pallas_call).
# ----------------------------------------------------------------------------
@functools.partial(jax.jit, static_argnames=("num_layers", "n_features", "dpad"))
def recurrent_autoencoder_forward(x, wx, wh, b, *, num_layers, n_features, dpad):
    """x: (B, T, n_features) batch_first.  Returns (B, T, n_features)."""
    B, T, F = x.shape
    bp = _round_up(B, _SUBLANE)
    # One-time padding in the wrapper: time-major, batch -> mult of 8,
    # features -> dpad (mult of 128).  Tiny tensors; all further work in VMEM.
    x_tm = jnp.transpose(x.astype(jnp.float32), (1, 0, 2))            # (T, B, F)
    x_pad = jnp.zeros((T, bp, dpad), jnp.float32).at[:, :B, :F].set(x_tm)

    out_pad = pl.pallas_call(
        functools.partial(_autoencoder_kernel, num_layers, num_layers),
        out_shape=jax.ShapeDtypeStruct((T, bp, dpad), jnp.float32),
    )(x_pad, wx, wh, b)

    return jnp.transpose(out_pad[:, :B, :n_features], (1, 0, 2))      # (B, T, F)


# ----------------------------------------------------------------------------
# Pure-JAX reference (lax.scan, PyTorch gate order, unpadded) for correctness.
# ----------------------------------------------------------------------------
def _ref_lstm_layer(x_btf, w_ih, w_hh, b_ih, b_hh, H):
    B = x_btf.shape[0]
    w_ih_t, w_hh_t = w_ih.T, w_hh.T
    bias = b_ih + b_hh

    def step(carry, x_t):
        h, c = carry
        gates = x_t @ w_ih_t + h @ w_hh_t + bias
        i = jax.nn.sigmoid(gates[:, 0 * H:1 * H])
        f = jax.nn.sigmoid(gates[:, 1 * H:2 * H])
        g = jnp.tanh(gates[:, 2 * H:3 * H])
        o = jax.nn.sigmoid(gates[:, 3 * H:4 * H])
        c = f * c + i * g
        h = o * jnp.tanh(c)
        return (h, c), h

    h0 = jnp.zeros((B, H), jnp.float32)
    c0 = jnp.zeros((B, H), jnp.float32)
    (hT, _), hs = jax.lax.scan(step, (h0, c0), jnp.transpose(x_btf, (1, 0, 2)))
    return jnp.transpose(hs, (1, 0, 2)), hT


def _ref_forward(x, enc_raw, dec_raw, seq_len, n_features, embedding_size):
    h = x
    hT = None
    for p in enc_raw:
        h, hT = _ref_lstm_layer(h, p["w_ih"], p["w_hh"], p["b_ih"], p["b_hh"],
                                embedding_size)
    hidden = hT                                            # hidden[-1]
    d = jnp.repeat(hidden[:, None, :], seq_len, axis=1)
    for p in dec_raw:
        d, _ = _ref_lstm_layer(d, p["w_ih"], p["w_hh"], p["b_ih"], p["b_hh"],
                               n_features)
    return d


# ----------------------------------------------------------------------------
if __name__ == "__main__":
    batch = 2
    seq_len = 8
    n_features = 4
    embedding_size = 32
    num_layers = 2

    key = jax.random.PRNGKey(0)
    key, kx = jax.random.split(key)
    x = jax.random.normal(kx, (batch, seq_len, n_features), jnp.float32)

    enc_raw, key = init_lstm_raw(key, n_features, embedding_size, num_layers)
    dec_raw, key = init_lstm_raw(key, embedding_size, n_features, num_layers)
    wx, wh, b, dpad = pack_autoencoder_params(enc_raw, dec_raw,
                                              n_features, embedding_size)

    out = recurrent_autoencoder_forward(
        x, wx, wh, b, num_layers=num_layers, n_features=n_features, dpad=dpad)
    out = jax.block_until_ready(out)

    ref = _ref_forward(x, enc_raw, dec_raw, seq_len, n_features, embedding_size)
    assert out.shape == (batch, seq_len, n_features), out.shape
    assert jnp.allclose(out, ref, atol=1e-3, rtol=1e-3), (
        "mismatch vs reference: max abs err = %s" % jnp.max(jnp.abs(out - ref)))

    print("KERNEL_OK")
</pallas_src>

<mosaic_0001>
module attributes {stable_mosaic.version = 11 : i64} {
  func.func @_autoencoder_kernel(%arg0: memref<8x8x128xf32, #tpu.memory_space<vmem>>, %arg1: memref<4x128x512xf32, #tpu.memory_space<vmem>>, %arg2: memref<4x128x512xf32, #tpu.memory_space<vmem>>, %arg3: memref<4x1x512xf32, #tpu.memory_space<vmem>>, %arg4: memref<8x8x128xf32, #tpu.memory_space<vmem>>) attributes {dimension_semantics = [], scalar_prefetch = 0 : i64, scratch_operands = 0 : i64, tpu.core_type = #tpu.core_type<tc>} {
    %c0 = arith.constant 0 : index
    %c0_0 = arith.constant 0 : index
    %c0_1 = arith.constant 0 : index
    %0 = vector.load %arg1[%c0, %c0_0, %c0_1] : memref<4x128x512xf32, #tpu.memory_space<vmem>>, vector<1x128x512xf32>
    %1 = vector.shape_cast %0 : vector<1x128x512xf32> to vector<128x512xf32>
    %c0_2 = arith.constant 0 : index
    %c0_3 = arith.constant 0 : index
    %c0_4 = arith.constant 0 : index
    %2 = vector.load %arg2[%c0_2, %c0_3, %c0_4] : memref<4x128x512xf32, #tpu.memory_space<vmem>>, vector<1x128x512xf32>
    %3 = vector.shape_cast %2 : vector<1x128x512xf32> to vector<128x512xf32>
    %c0_5 = arith.constant 0 : index
    %c0_6 = arith.constant 0 : index
    %c0_7 = arith.constant 0 : index
    %4 = vector.load %arg3[%c0_5, %c0_6, %c0_7] : memref<4x1x512xf32, #tpu.memory_space<vmem>>, vector<1x1x512xf32>
    %5 = vector.shape_cast %4 : vector<1x1x512xf32> to vector<1x512xf32>
    %cst = arith.constant 0.000000e+00 : f32
    %6 = vector.broadcast %cst : f32 to vector<8x128xf32>
    %c0_i32 = arith.constant 0 : i32
    %7 = arith.index_cast %c0_i32 : i32 to index
    %c0_8 = arith.constant 0 : index
    %c0_9 = arith.constant 0 : index
    %8 = vector.load %arg0[%7, %c0_8, %c0_9] : memref<8x8x128xf32, #tpu.memory_space<vmem>>, vector<1x8x128xf32>
    %9 = vector.shape_cast %8 : vector<1x8x128xf32> to vector<8x128xf32>
    %cst_10 = arith.constant dense<0.000000e+00> : vector<8x512xf32>
    %10 = tpu.matmul %9, %1, %cst_10 {dimension_numbers = #tpu.dot_dimension_numbers<[1], [0], [0], [1], [0, 0, 1, 1], [], []>} : vector<8x128xf32>, vector<128x512xf32>, vector<8x512xf32> -> vector<8x512xf32>
    %cst_11 = arith.constant dense<0.000000e+00> : vector<8x512xf32>
    %11 = tpu.matmul %6, %3, %cst_11 {dimension_numbers = #tpu.dot_dimension_numbers<[1], [0], [0], [1], [0, 0, 1, 1], [], []>} : vector<8x128xf32>, vector<128x512xf32>, vector<8x512xf32> -> vector<8x512xf32>
    %12 = arith.addf %10, %11 : vector<8x512xf32>
    %13 = vector.broadcast %5 : vector<1x512xf32> to vector<8x512xf32>
    %14 = arith.addf %12, %13 : vector<8x512xf32>
    %15 = vector.extract_strided_slice %14 {offsets = [0, 0], sizes = [8, 384], strides = [1, 1]} : vector<8x512xf32> to vector<8x384xf32>
    %16 = arith.negf %15 : vector<8x384xf32>
    %17 = math.exp %16 : vector<8x384xf32>
    %cst_12 = arith.constant 1.000000e+00 : f32
    %18 = vector.broadcast %cst_12 : f32 to vector<8x384xf32>
    %19 = arith.addf %18, %17 : vector<8x384xf32>
    %20 = arith.divf %18, %19 : vector<8x384xf32>
    %21 = vector.extract_strided_slice %14 {offsets = [0, 384], sizes = [8, 128], strides = [1, 1]} : vector<8x512xf32> to vector<8x128xf32>
    %22 = math.tanh %21 : vector<8x128xf32>
    %23 = vector.extract_strided_slice %20 {offsets = [0, 128], sizes = [8, 128], strides = [1, 1]} : vector<8x384xf32> to vector<8x128xf32>
    %24 = arith.mulf %23, %6 : vector<8x128xf32>
    %25 = vector.extract_strided_slice %20 {offsets = [0, 0], sizes = [8, 128], strides = [1, 1]} : vector<8x384xf32> to vector<8x128xf32>
    %26 = arith.mulf %25, %22 : vector<8x128xf32>
    %27 = arith.addf %24, %26 : vector<8x128xf32>
    %28 = vector.extract_strided_slice %20 {offsets = [0, 256], sizes = [8, 128], strides = [1, 1]} : vector<8x384xf32> to vector<8x128xf32>
    %29 = math.tanh %27 : vector<8x128xf32>
    %30 = arith.mulf %28, %29 : vector<8x128xf32>
    %31 = arith.index_cast %c0_i32 : i32 to index
    %c0_13 = arith.constant 0 : index
    %c0_14 = arith.constant 0 : index
    %32 = vector.load %arg4[%31, %c0_13, %c0_14] : memref<8x8x128xf32, #tpu.memory_space<vmem>>, vector<1x8x128xf32>
    %33 = vector.shape_cast %32 : vector<1x8x128xf32> to vector<8x128xf32>
    %34 = vector.shape_cast %30 : vector<8x128xf32> to vector<1x8x128xf32>
    tpu.vector_store %arg4[%31, %c0_13, %c0_14], %34 {strides = array<i32>} : memref<8x8x128xf32, #tpu.memory_space<vmem>>, vector<1x8x128xf32>,
    %c1_i32 = arith.constant 1 : i32
    %35 = arith.index_cast %c1_i32 : i32 to index
    %c0_15 = arith.constant 0 : index
    %c0_16 = arith.constant 0 : index
    %36 = vector.load %arg0[%35, %c0_15, %c0_16] : memref<8x8x128xf32, #tpu.memory_space<vmem>>, vector<1x8x128xf32>
    %37 = vector.shape_cast %36 : vector<1x8x128xf32> to vector<8x128xf32>
    %cst_17 = arith.constant dense<0.000000e+00> : vector<8x512xf32>
    %38 = tpu.matmul %37, %1, %cst_17 {dimension_numbers = #tpu.dot_dimension_numbers<[1], [0], [0], [1], [0, 0, 1, 1], [], []>} : vector<8x128xf32>, vector<128x512xf32>, vector<8x512xf32> -> vector<8x512xf32>
    %cst_18 = arith.constant dense<0.000000e+00> : vector<8x512xf32>
    %39 = tpu.matmul %30, %3, %cst_18 {dimension_numbers = #tpu.dot_dimension_numbers<[1], [0], [0], [1], [0, 0, 1, 1], [], []>} : vector<8x128xf32>, vector<128x512xf32>, vector<8x512xf32> -> vector<8x512xf32>
    %40 = arith.addf %38, %39 : vector<8x512xf32>
    %41 = vector.broadcast %5 : vector<1x512xf32> to vector<8x512xf32>
    %42 = arith.addf %40, %41 : vector<8x512xf32>
    %43 = vector.extract_strided_slice %42 {offsets = [0, 0], sizes = [8, 384], strides = [1, 1]} : vector<8x512xf32> to vector<8x384xf32>
    %44 = arith.negf %43 : vector<8x384xf32>
    %45 = math.exp %44 : vector<8x384xf32>
    %cst_19 = arith.constant 1.000000e+00 : f32
    %46 = vector.broadcast %cst_19 : f32 to vector<8x384xf32>
    %47 = arith.addf %46, %45 : vector<8x384xf32>
    %48 = arith.divf %46, %47 : vector<8x384xf32>
    %49 = vector.extract_strided_slice %42 {offsets = [0, 384], sizes = [8, 128], strides = [1, 1]} : vector<8x512xf32> to vector<8x128xf32>
    %50 = math.tanh %49 : vector<8x128xf32>
    %51 = vector.extract_strided_slice %48 {offsets = [0, 128], sizes = [8, 128], strides = [1, 1]} : vector<8x384xf32> to vector<8x128xf32>
    %52 = arith.mulf %51, %27 : vector<8x128xf32>
    %53 = vector.extract_strided_slice %48 {offsets = [0, 0], sizes = [8, 128], strides = [1, 1]} : vector<8x384xf32> to vector<8x128xf32>
    %54 = arith.mulf %53, %50 : vector<8x128xf32>
    %55 = arith.addf %52, %54 : vector<8x128xf32>
    %56 = vector.extract_strided_slice %48 {offsets = [0, 256], sizes = [8, 128], strides = [1, 1]} : vector<8x384xf32> to vector<8x128xf32>
    %57 = math.tanh %55 : vector<8x128xf32>
    %58 = arith.mulf %56, %57 : vector<8x128xf32>
    %59 = arith.index_cast %c1_i32 : i32 to index
    %c0_20 = arith.constant 0 : index
    %c0_21 = arith.constant 0 : index
    %60 = vector.load %arg4[%59, %c0_20, %c0_21] : memref<8x8x128xf32, #tpu.memory_space<vmem>>, vector<1x8x128xf32>
    %61 = vector.shape_cast %60 : vector<1x8x128xf32> to vector<8x128xf32>
    %62 = vector.shape_cast %58 : vector<8x128xf32> to vector<1x8x128xf32>
    tpu.vector_store %arg4[%59, %c0_20, %c0_21], %62 {strides = array<i32>} : memref<8x8x128xf32, #tpu.memory_space<vmem>>, vector<1x8x128xf32>,
    %c2_i32 = arith.constant 2 : i32
    %63 = arith.index_cast %c2_i32 : i32 to index
    %c0_22 = arith.constant 0 : index
    %c0_23 = arith.constant 0 : index
    %64 = vector.load %arg0[%63, %c0_22, %c0_23] : memref<8x8x128xf32, #tpu.memory_space<vmem>>, vector<1x8x128xf32>
    %65 = vector.shape_cast %64 : vector<1x8x128xf32> to vector<8x128xf32>
    %cst_24 = arith.constant dense<0.000000e+00> : vector<8x512xf32>
    %66 = tpu.matmul %65, %1, %cst_24 {dimension_numbers = #tpu.dot_dimension_numbers<[1], [0], [0], [1], [0, 0, 1, 1], [], []>} : vector<8x128xf32>, vector<128x512xf32>, vector<8x512xf32> -> vector<8x512xf32>
    %cst_25 = arith.constant dense<0.000000e+00> : vector<8x512xf32>
    %67 = tpu.matmul %58, %3, %cst_25 {dimension_numbers = #tpu.dot_dimension_numbers<[1], [0], [0], [1], [0, 0, 1, 1], [], []>} : vector<8x128xf32>, vector<128x512xf32>, vector<8x512xf32> -> vector<8x512xf32>
    %68 = arith.addf %66, %67 : vector<8x512xf32>
    %69 = vector.broadcast %5 : vector<1x512xf32> to vector<8x512xf32>
    %70 = arith.addf %68, %69 : vector<8x512xf32>
    %71 = vector.extract_strided_slice %70 {offsets = [0, 0], sizes = [8, 384], strides = [1, 1]} : vector<8x512xf32> to vector<8x384xf32>
    %72 = arith.negf %71 : vector<8x384xf32>
    %73 = math.exp %72 : vector<8x384xf32>
    %cst_26 = arith.constant 1.000000e+00 : f32
    %74 = vector.broadcast %cst_26 : f32 to vector<8x384xf32>
    %75 = arith.addf %74, %73 : vector<8x384xf32>
    %76 = arith.divf %74, %75 : vector<8x384xf32>
    %77 = vector.extract_strided_slice %70 {offsets = [0, 384], sizes = [8, 128], strides = [1, 1]} : vector<8x512xf32> to vector<8x128xf32>
    %78 = math.tanh %77 : vector<8x128xf32>
    %79 = vector.extract_strided_slice %76 {offsets = [0, 128], sizes = [8, 128], strides = [1, 1]} : vector<8x384xf32> to vector<8x128xf32>
    %80 = arith.mulf %79, %55 : vector<8x128xf32>
    %81 = vector.extract_strided_slice %76 {offsets = [0, 0], sizes = [8, 128], strides = [1, 1]} : vector<8x384xf32> to vector<8x128xf32>
    %82 = arith.mulf %81, %78 : vector<8x128xf32>
    %83 = arith.addf %80, %82 : vector<8x128xf32>
    %84 = vector.extract_strided_slice %76 {offsets = [0, 256], sizes = [8, 128], strides = [1, 1]} : vector<8x384xf32> to vector<8x128xf32>
    %85 = math.tanh %83 : vector<8x128xf32>
    %86 = arith.mulf %84, %85 : vector<8x128xf32>
    %87 = arith.index_cast %c2_i32 : i32 to index
    %c0_27 = arith.constant 0 : index
    %c0_28 = arith.constant 0 : index
    %88 = vector.load %arg4[%87, %c0_27, %c0_28] : memref<8x8x128xf32, #tpu.memory_space<vmem>>, vector<1x8x128xf32>
    %89 = vector.shape_cast %88 : vector<1x8x128xf32> to vector<8x128xf32>
    %90 = vector.shape_cast %86 : vector<8x128xf32> to vector<1x8x128xf32>
    tpu.vector_store %arg4[%87, %c0_27, %c0_28], %90 {strides = array<i32>} : memref<8x8x128xf32, #tpu.memory_space<vmem>>, vector<1x8x128xf32>,
    %c3_i32 = arith.constant 3 : i32
    %91 = arith.index_cast %c3_i32 : i32 to index
    %c0_29 = arith.constant 0 : index
    %c0_30 = arith.constant 0 : index
    %92 = vector.load %arg0[%91, %c0_29, %c0_30] : memref<8x8x128xf32, #tpu.memory_space<vmem>>, vector<1x8x128xf32>
    %93 = vector.shape_cast %92 : vector<1x8x128xf32> to vector<8x128xf32>
    %cst_31 = arith.constant dense<0.000000e+00> : vector<8x512xf32>
    %94 = tpu.matmul %93, %1, %cst_31 {dimension_numbers = #tpu.dot_dimension_numbers<[1], [0], [0], [1], [0, 0, 1, 1], [], []>} : vector<8x128xf32>, vector<128x512xf32>, vector<8x512xf32> -> vector<8x512xf32>
    %cst_32 = arith.constant dense<0.000000e+00> : vector<8x512xf32>
    %95 = tpu.matmul %86, %3, %cst_32 {dimension_numbers = #tpu.dot_dimension_numbers<[1], [0], [0], [1], [0, 0, 1, 1], [], []>} : vector<8x128xf32>, vector<128x512xf32>, vector<8x512xf32> -> vector<8x512xf32>
    %96 = arith.addf %94, %95 : vector<8x512xf32>
    %97 = vector.broadcast %5 : vector<1x512xf32> to vector<8x512xf32>
    %98 = arith.addf %96, %97 : vector<8x512xf32>
    %99 = vector.extract_strided_slice %98 {offsets = [0, 0], sizes = [8, 384], strides = [1, 1]} : vector<8x512xf32> to vector<8x384xf32>
    %100 = arith.negf %99 : vector<8x384xf32>
    %101 = math.exp %100 : vector<8x384xf32>
    %cst_33 = arith.constant 1.000000e+00 : f32
    %102 = vector.broadcast %cst_33 : f32 to vector<8x384xf32>
    %103 = arith.addf %102, %101 : vector<8x384xf32>
    %104 = arith.divf %102, %103 : vector<8x384xf32>
    %105 = vector.extract_strided_slice %98 {offsets = [0, 384], sizes = [8, 128], strides = [1, 1]} : vector<8x512xf32> to vector<8x128xf32>
    %106 = math.tanh %105 : vector<8x128xf32>
    %107 = vector.extract_strided_slice %104 {offsets = [0, 128], sizes = [8, 128], strides = [1, 1]} : vector<8x384xf32> to vector<8x128xf32>
    %108 = arith.mulf %107, %83 : vector<8x128xf32>
    %109 = vector.extract_strided_slice %104 {offsets = [0, 0], sizes = [8, 128], strides = [1, 1]} : vector<8x384xf32> to vector<8x128xf32>
    %110 = arith.mulf %109, %106 : vector<8x128xf32>
    %111 = arith.addf %108, %110 : vector<8x128xf32>
    %112 = vector.extract_strided_slice %104 {offsets = [0, 256], sizes = [8, 128], strides = [1, 1]} : vector<8x384xf32> to vector<8x128xf32>
    %113 = math.tanh %111 : vector<8x128xf32>
    %114 = arith.mulf %112, %113 : vector<8x128xf32>
    %115 = arith.index_cast %c3_i32 : i32 to index
    %c0_34 = arith.constant 0 : index
    %c0_35 = arith.constant 0 : index
    %116 = vector.load %arg4[%115, %c0_34, %c0_35] : memref<8x8x128xf32, #tpu.memory_space<vmem>>, vector<1x8x128xf32>
    %117 = vector.shape_cast %116 : vector<1x8x128xf32> to vector<8x128xf32>
    %118 = vector.shape_cast %114 : vector<8x128xf32> to vector<1x8x128xf32>
    tpu.vector_store %arg4[%115, %c0_34, %c0_35], %118 {strides = array<i32>} : memref<8x8x128xf32, #tpu.memory_space<vmem>>, vector<1x8x128xf32>,
    %c4_i32 = arith.constant 4 : i32
    %119 = arith.index_cast %c4_i32 : i32 to index
    %c0_36 = arith.constant 0 : index
    %c0_37 = arith.constant 0 : index
    %120 = vector.load %arg0[%119, %c0_36, %c0_37] : memref<8x8x128xf32, #tpu.memory_space<vmem>>, vector<1x8x128xf32>
    %121 = vector.shape_cast %120 : vector<1x8x128xf32> to vector<8x128xf32>
    %cst_38 = arith.constant dense<0.000000e+00> : vector<8x512xf32>
    %122 = tpu.matmul %121, %1, %cst_38 {dimension_numbers = #tpu.dot_dimension_numbers<[1], [0], [0], [1], [0, 0, 1, 1], [], []>} : vector<8x128xf32>, vector<128x512xf32>, vector<8x512xf32> -> vector<8x512xf32>
    %cst_39 = arith.constant dense<0.000000e+00> : vector<8x512xf32>
    %123 = tpu.matmul %114, %3, %cst_39 {dimension_numbers = #tpu.dot_dimension_numbers<[1], [0], [0], [1], [0, 0, 1, 1], [], []>} : vector<8x128xf32>, vector<128x512xf32>, vector<8x512xf32> -> vector<8x512xf32>
    %124 = arith.addf %122, %123 : vector<8x512xf32>
    %125 = vector.broadcast %5 : vector<1x512xf32> to vector<8x512xf32>
    %126 = arith.addf %124, %125 : vector<8x512xf32>
    %127 = vector.extract_strided_slice %126 {offsets = [0, 0], sizes = [8, 384], strides = [1, 1]} : vector<8x512xf32> to vector<8x384xf32>
    %128 = arith.negf %127 : vector<8x384xf32>
    %129 = math.exp %128 : vector<8x384xf32>
    %cst_40 = arith.constant 1.000000e+00 : f32
    %130 = vector.broadcast %cst_40 : f32 to vector<8x384xf32>
    %131 = arith.addf %130, %129 : vector<8x384xf32>
    %132 = arith.divf %130, %131 : vector<8x384xf32>
    %133 = vector.extract_strided_slice %126 {offsets = [0, 384], sizes = [8, 128], strides = [1, 1]} : vector<8x512xf32> to vector<8x128xf32>
    %134 = math.tanh %133 : vector<8x128xf32>
    %135 = vector.extract_strided_slice %132 {offsets = [0, 128], sizes = [8, 128], strides = [1, 1]} : vector<8x384xf32> to vector<8x128xf32>
    %136 = arith.mulf %135, %111 : vector<8x128xf32>
    %137 = vector.extract_strided_slice %132 {offsets = [0, 0], sizes = [8, 128], strides = [1, 1]} : vector<8x384xf32> to vector<8x128xf32>
    %138 = arith.mulf %137, %134 : vector<8x128xf32>
    %139 = arith.addf %136, %138 : vector<8x128xf32>
    %140 = vector.extract_strided_slice %132 {offsets = [0, 256], sizes = [8, 128], strides = [1, 1]} : vector<8x384xf32> to vector<8x128xf32>
    %141 = math.tanh %139 : vector<8x128xf32>
    %142 = arith.mulf %140, %141 : vector<8x128xf32>
    %143 = arith.index_cast %c4_i32 : i32 to index
    %c0_41 = arith.constant 0 : index
    %c0_42 = arith.constant 0 : index
    %144 = vector.load %arg4[%143, %c0_41, %c0_42] : memref<8x8x128xf32, #tpu.memory_space<vmem>>, vector<1x8x128xf32>
    %145 = vector.shape_cast %144 : vector<1x8x128xf32> to vector<8x128xf32>
    %146 = vector.shape_cast %142 : vector<8x128xf32> to vector<1x8x128xf32>
    tpu.vector_store %arg4[%143, %c0_41, %c0_42], %146 {strides = array<i32>} : memref<8x8x128xf32, #tpu.memory_space<vmem>>, vector<1x8x128xf32>,
    %c5_i32 = arith.constant 5 : i32
    %147 = arith.index_cast %c5_i32 : i32 to index
    %c0_43 = arith.constant 0 : index
    %c0_44 = arith.constant 0 : index
    %148 = vector.load %arg0[%147, %c0_43, %c0_44] : memref<8x8x128xf32, #tpu.memory_space<vmem>>, vector<1x8x128xf32>
    %149 = vector.shape_cast %148 : vector<1x8x128xf32> to vector<8x128xf32>
    %cst_45 = arith.constant dense<0.000000e+00> : vector<8x512xf32>
    %150 = tpu.matmul %149, %1, %cst_45 {dimension_numbers = #tpu.dot_dimension_numbers<[1], [0], [0], [1], [0, 0, 1, 1], [], []>} : vector<8x128xf32>, vector<128x512xf32>, vector<8x512xf32> -> vector<8x512xf32>
    %cst_46 = arith.constant dense<0.000000e+00> : vector<8x512xf32>
    %151 = tpu.matmul %142, %3, %cst_46 {dimension_numbers = #tpu.dot_dimension_numbers<[1], [0], [0], [1], [0, 0, 1, 1], [], []>} : vector<8x128xf32>, vector<128x512xf32>, vector<8x512xf32> -> vector<8x512xf32>
    %152 = arith.addf %150, %151 : vector<8x512xf32>
    %153 = vector.broadcast %5 : vector<1x512xf32> to vector<8x512xf32>
    %154 = arith.addf %152, %153 : vector<8x512xf32>
    %155 = vector.extract_strided_slice %154 {offsets = [0, 0], sizes = [8, 384], strides = [1, 1]} : vector<8x512xf32> to vector<8x384xf32>
    %156 = arith.negf %155 : vector<8x384xf32>
    %157 = math.exp %156 : vector<8x384xf32>
    %cst_47 = arith.constant 1.000000e+00 : f32
    %158 = vector.broadcast %cst_47 : f32 to vector<8x384xf32>
    %159 = arith.addf %158, %157 : vector<8x384xf32>
    %160 = arith.divf %158, %159 : vector<8x384xf32>
    %161 = vector.extract_strided_slice %154 {offsets = [0, 384], sizes = [8, 128], strides = [1, 1]} : vector<8x512xf32> to vector<8x128xf32>
    %162 = math.tanh %161 : vector<8x128xf32>
    %163 = vector.extract_strided_slice %160 {offsets = [0, 128], sizes = [8, 128], strides = [1, 1]} : vector<8x384xf32> to vector<8x128xf32>
    %164 = arith.mulf %163, %139 : vector<8x128xf32>
    %165 = vector.extract_strided_slice %160 {offsets = [0, 0], sizes = [8, 128], strides = [1, 1]} : vector<8x384xf32> to vector<8x128xf32>
    %166 = arith.mulf %165, %162 : vector<8x128xf32>
    %167 = arith.addf %164, %166 : vector<8x128xf32>
    %168 = vector.extract_strided_slice %160 {offsets = [0, 256], sizes = [8, 128], strides = [1, 1]} : vector<8x384xf32> to vector<8x128xf32>
    %169 = math.tanh %167 : vector<8x128xf32>
    %170 = arith.mulf %168, %169 : vector<8x128xf32>
    %171 = arith.index_cast %c5_i32 : i32 to index
    %c0_48 = arith.constant 0 : index
    %c0_49 = arith.constant 0 : index
    %172 = vector.load %arg4[%171, %c0_48, %c0_49] : memref<8x8x128xf32, #tpu.memory_space<vmem>>, vector<1x8x128xf32>
    %173 = vector.shape_cast %172 : vector<1x8x128xf32> to vector<8x128xf32>
    %174 = vector.shape_cast %170 : vector<8x128xf32> to vector<1x8x128xf32>
    tpu.vector_store %arg4[%171, %c0_48, %c0_49], %174 {strides = array<i32>} : memref<8x8x128xf32, #tpu.memory_space<vmem>>, vector<1x8x128xf32>,
    %c6_i32 = arith.constant 6 : i32
    %175 = arith.index_cast %c6_i32 : i32 to index
    %c0_50 = arith.constant 0 : index
    %c0_51 = arith.constant 0 : index
    %176 = vector.load %arg0[%175, %c0_50, %c0_51] : memref<8x8x128xf32, #tpu.memory_space<vmem>>, vector<1x8x128xf32>
    %177 = vector.shape_cast %176 : vector<1x8x128xf32> to vector<8x128xf32>
    %cst_52 = arith.constant dense<0.000000e+00> : vector<8x512xf32>
    %178 = tpu.matmul %177, %1, %cst_52 {dimension_numbers = #tpu.dot_dimension_numbers<[1], [0], [0], [1], [0, 0, 1, 1], [], []>} : vector<8x128xf32>, vector<128x512xf32>, vector<8x512xf32> -> vector<8x512xf32>
    %cst_53 = arith.constant dense<0.000000e+00> : vector<8x512xf32>
    %179 = tpu.matmul %170, %3, %cst_53 {dimension_numbers = #tpu.dot_dimension_numbers<[1], [0], [0], [1], [0, 0, 1, 1], [], []>} : vector<8x128xf32>, vector<128x512xf32>, vector<8x512xf32> -> vector<8x512xf32>
    %180 = arith.addf %178, %179 : vector<8x512xf32>
    %181 = vector.broadcast %5 : vector<1x512xf32> to vector<8x512xf32>
    %182 = arith.addf %180, %181 : vector<8x512xf32>
    %183 = vector.extract_strided_slice %182 {offsets = [0, 0], sizes = [8, 384], strides = [1, 1]} : vector<8x512xf32> to vector<8x384xf32>
    %184 = arith.negf %183 : vector<8x384xf32>
    %185 = math.exp %184 : vector<8x384xf32>
    %cst_54 = arith.constant 1.000000e+00 : f32
    %186 = vector.broadcast %cst_54 : f32 to vector<8x384xf32>
    %187 = arith.addf %186, %185 : vector<8x384xf32>
    %188 = arith.divf %186, %187 : vector<8x384xf32>
    %189 = vector.extract_strided_slice %182 {offsets = [0, 384], sizes = [8, 128], strides = [1, 1]} : vector<8x512xf32> to vector<8x128xf32>
    %190 = math.tanh %189 : vector<8x128xf32>
    %191 = vector.extract_strided_slice %188 {offsets = [0, 128], sizes = [8, 128], strides = [1, 1]} : vector<8x384xf32> to vector<8x128xf32>
    %192 = arith.mulf %191, %167 : vector<8x128xf32>
    %193 = vector.extract_strided_slice %188 {offsets = [0, 0], sizes = [8, 128], strides = [1, 1]} : vector<8x384xf32> to vector<8x128xf32>
    %194 = arith.mulf %193, %190 : vector<8x128xf32>
    %195 = arith.addf %192, %194 : vector<8x128xf32>
    %196 = vector.extract_strided_slice %188 {offsets = [0, 256], sizes = [8, 128], strides = [1, 1]} : vector<8x384xf32> to vector<8x128xf32>
    %197 = math.tanh %195 : vector<8x128xf32>
    %198 = arith.mulf %196, %197 : vector<8x128xf32>
    %199 = arith.index_cast %c6_i32 : i32 to index
    %c0_55 = arith.constant 0 : index
    %c0_56 = arith.constant 0 : index
    %200 = vector.load %arg4[%199, %c0_55, %c0_56] : memref<8x8x128xf32, #tpu.memory_space<vmem>>, vector<1x8x128xf32>
    %201 = vector.shape_cast %200 : vector<1x8x128xf32> to vector<8x128xf32>
    %202 = vector.shape_cast %198 : vector<8x128xf32> to vector<1x8x128xf32>
    tpu.vector_store %arg4[%199, %c0_55, %c0_56], %202 {strides = array<i32>} : memref<8x8x128xf32, #tpu.memory_space<vmem>>, vector<1x8x128xf32>,
    %c7_i32 = arith.constant 7 : i32
    %203 = arith.index_cast %c7_i32 : i32 to index
    %c0_57 = arith.constant 0 : index
    %c0_58 = arith.constant 0 : index
    %204 = vector.load %arg0[%203, %c0_57, %c0_58] : memref<8x8x128xf32, #tpu.memory_space<vmem>>, vector<1x8x128xf32>
    %205 = vector.shape_cast %204 : vector<1x8x128xf32> to vector<8x128xf32>
    %cst_59 = arith.constant dense<0.000000e+00> : vector<8x512xf32>
    %206 = tpu.matmul %205, %1, %cst_59 {dimension_numbers = #tpu.dot_dimension_numbers<[1], [0], [0], [1], [0, 0, 1, 1], [], []>} : vector<8x128xf32>, vector<128x512xf32>, vector<8x512xf32> -> vector<8x512xf32>
    %cst_60 = arith.constant dense<0.000000e+00> : vector<8x512xf32>
    %207 = tpu.matmul %198, %3, %cst_60 {dimension_numbers = #tpu.dot_dimension_numbers<[1], [0], [0], [1], [0, 0, 1, 1], [], []>} : vector<8x128xf32>, vector<128x512xf32>, vector<8x512xf32> -> vector<8x512xf32>
    %208 = arith.addf %206, %207 : vector<8x512xf32>
    %209 = vector.broadcast %5 : vector<1x512xf32> to vector<8x512xf32>
    %210 = arith.addf %208, %209 : vector<8x512xf32>
    %211 = vector.extract_strided_slice %210 {offsets = [0, 0], sizes = [8, 384], strides = [1, 1]} : vector<8x512xf32> to vector<8x384xf32>
    %212 = arith.negf %211 : vector<8x384xf32>
    %213 = math.exp %212 : vector<8x384xf32>
    %cst_61 = arith.constant 1.000000e+00 : f32
    %214 = vector.broadcast %cst_61 : f32 to vector<8x384xf32>
    %215 = arith.addf %214, %213 : vector<8x384xf32>
    %216 = arith.divf %214, %215 : vector<8x384xf32>
    %217 = vector.extract_strided_slice %210 {offsets = [0, 384], sizes = [8, 128], strides = [1, 1]} : vector<8x512xf32> to vector<8x128xf32>
    %218 = math.tanh %217 : vector<8x128xf32>
    %219 = vector.extract_strided_slice %216 {offsets = [0, 128], sizes = [8, 128], strides = [1, 1]} : vector<8x384xf32> to vector<8x128xf32>
    %220 = arith.mulf %219, %195 : vector<8x128xf32>
    %221 = vector.extract_strided_slice %216 {offsets = [0, 0], sizes = [8, 128], strides = [1, 1]} : vector<8x384xf32> to vector<8x128xf32>
    %222 = arith.mulf %221, %218 : vector<8x128xf32>
    %223 = arith.addf %220, %222 : vector<8x128xf32>
    %224 = vector.extract_strided_slice %216 {offsets = [0, 256], sizes = [8, 128], strides = [1, 1]} : vector<8x384xf32> to vector<8x128xf32>
    %225 = math.tanh %223 : vector<8x128xf32>
    %226 = arith.mulf %224, %225 : vector<8x128xf32>
    %227 = arith.index_cast %c7_i32 : i32 to index
    %c0_62 = arith.constant 0 : index
    %c0_63 = arith.constant 0 : index
    %228 = vector.load %arg4[%227, %c0_62, %c0_63] : memref<8x8x128xf32, #tpu.memory_space<vmem>>, vector<1x8x128xf32>
    %229 = vector.shape_cast %228 : vector<1x8x128xf32> to vector<8x128xf32>
    %230 = vector.shape_cast %226 : vector<8x128xf32> to vector<1x8x128xf32>
    tpu.vector_store %arg4[%227, %c0_62, %c0_63], %230 {strides = array<i32>} : memref<8x8x128xf32, #tpu.memory_space<vmem>>, vector<1x8x128xf32>,
    %c8_i32 = arith.constant 8 : i32
    %c1 = arith.constant 1 : index
    %c0_64 = arith.constant 0 : index
    %c0_65 = arith.constant 0 : index
    %231 = vector.load %arg1[%c1, %c0_64, %c0_65] : memref<4x128x512xf32, #tpu.memory_space<vmem>>, vector<1x128x512xf32>
    %232 = vector.shape_cast %231 : vector<1x128x512xf32> to vector<128x512xf32>
    %c1_66 = arith.constant 1 : index
    %c0_67 = arith.constant 0 : index
    %c0_68 = arith.constant 0 : index
    %233 = vector.load %arg2[%c1_66, %c0_67, %c0_68] : memref<4x128x512xf32, #tpu.memory_space<vmem>>, vector<1x128x512xf32>
    %234 = vector.shape_cast %233 : vector<1x128x512xf32> to vector<128x512xf32>
    %c1_69 = arith.constant 1 : index
    %c0_70 = arith.constant 0 : index
    %c0_71 = arith.constant 0 : index
    %235 = vector.load %arg3[%c1_69, %c0_70, %c0_71] : memref<4x1x512xf32, #tpu.memory_space<vmem>>, vector<1x1x512xf32>
    %236 = vector.shape_cast %235 : vector<1x1x512xf32> to vector<1x512xf32>
    %cst_72 = arith.constant 0.000000e+00 : f32
    %237 = vector.broadcast %cst_72 : f32 to vector<8x128xf32>
    %c0_i32_73 = arith.constant 0 : i32
    %238 = arith.index_cast %c0_i32_73 : i32 to index
    %c0_74 = arith.constant 0 : index
    %c0_75 = arith.constant 0 : index
    %239 = vector.load %arg4[%238, %c0_74, %c0_75] : memref<8x8x128xf32, #tpu.memory_space<vmem>>, vector<1x8x128xf32>
    %240 = vector.shape_cast %239 : vector<1x8x128xf32> to vector<8x128xf32>
    %cst_76 = arith.constant dense<0.000000e+00> : vector<8x512xf32>
    %241 = tpu.matmul %240, %232, %cst_76 {dimension_numbers = #tpu.dot_dimension_numbers<[1], [0], [0], [1], [0, 0, 1, 1], [], []>} : vector<8x128xf32>, vector<128x512xf32>, vector<8x512xf32> -> vector<8x512xf32>
    %cst_77 = arith.constant dense<0.000000e+00> : vector<8x512xf32>
    %242 = tpu.matmul %237, %234, %cst_77 {dimension_numbers = #tpu.dot_dimension_numbers<[1], [0], [0], [1], [0, 0, 1, 1], [], []>} : vector<8x128xf32>, vector<128x512xf32>, vector<8x512xf32> -> vector<8x512xf32>
    %243 = arith.addf %241, %242 : vector<8x512xf32>
    %244 = vector.broadcast %236 : vector<1x512xf32> to vector<8x512xf32>
    %245 = arith.addf %243, %244 : vector<8x512xf32>
    %246 = vector.extract_strided_slice %245 {offsets = [0, 0], sizes = [8, 384], strides = [1, 1]} : vector<8x512xf32> to vector<8x384xf32>
    %247 = arith.negf %246 : vector<8x384xf32>
    %248 = math.exp %247 : vector<8x384xf32>
    %cst_78 = arith.constant 1.000000e+00 : f32
    %249 = vector.broadcast %cst_78 : f32 to vector<8x384xf32>
    %250 = arith.addf %249, %248 : vector<8x384xf32>
    %251 = arith.divf %249, %250 : vector<8x384xf32>
    %252 = vector.extract_strided_slice %245 {offsets = [0, 384], sizes = [8, 128], strides = [1, 1]} : vector<8x512xf32> to vector<8x128xf32>
    %253 = math.tanh %252 : vector<8x128xf32>
    %254 = vector.extract_strided_slice %251 {offsets = [0, 128], sizes = [8, 128], strides = [1, 1]} : vector<8x384xf32> to vector<8x128xf32>
    %255 = arith.mulf %254, %237 : vector<8x128xf32>
    %256 = vector.extract_strided_slice %251 {offsets = [0, 0], sizes = [8, 128], strides = [1, 1]} : vector<8x384xf32> to vector<8x128xf32>
    %257 = arith.mulf %256, %253 : vector<8x128xf32>
    %258 = arith.addf %255, %257 : vector<8x128xf32>
    %259 = vector.extract_strided_slice %251 {offsets = [0, 256], sizes = [8, 128], strides = [1, 1]} : vector<8x384xf32> to vector<8x128xf32>
    %260 = math.tanh %258 : vector<8x128xf32>
    %261 = arith.mulf %259, %260 : vector<8x128xf32>
    %262 = arith.index_cast %c0_i32_73 : i32 to index
    %c0_79 = arith.constant 0 : index
    %c0_80 = arith.constant 0 : index
    %263 = vector.load %arg4[%262, %c0_79, %c0_80] : memref<8x8x128xf32, #tpu.memory_space<vmem>>, vector<1x8x128xf32>
    %264 = vector.shape_cast %263 : vector<1x8x128xf32> to vector<8x128xf32>
    %265 = vector.shape_cast %261 : vector<8x128xf32> to vector<1x8x128xf32>
    tpu.vector_store %arg4[%262, %c0_79, %c0_80], %265 {strides = array<i32>} : memref<8x8x128xf32, #tpu.memory_space<vmem>>, vector<1x8x128xf32>,
    %c1_i32_81 = arith.constant 1 : i32
    %266 = arith.index_cast %c1_i32_81 : i32 to index
    %c0_82 = arith.constant 0 : index
    %c0_83 = arith.constant 0 : index
    %267 = vector.load %arg4[%266, %c0_82, %c0_83] : memref<8x8x128xf32, #tpu.memory_space<vmem>>, vector<1x8x128xf32>
    %268 = vector.shape_cast %267 : vector<1x8x128xf32> to vector<8x128xf32>
    %cst_84 = arith.constant dense<0.000000e+00> : vector<8x512xf32>
    %269 = tpu.matmul %268, %232, %cst_84 {dimension_numbers = #tpu.dot_dimension_numbers<[1], [0], [0], [1], [0, 0, 1, 1], [], []>} : vector<8x128xf32>, vector<128x512xf32>, vector<8x512xf32> -> vector<8x512xf32>
    %cst_85 = arith.constant dense<0.000000e+00> : vector<8x512xf32>
    %270 = tpu.matmul %261, %234, %cst_85 {dimension_numbers = #tpu.dot_dimension_numbers<[1], [0], [0], [1], [0, 0, 1, 1], [], []>} : vector<8x128xf32>, vector<128x512xf32>, vector<8x512xf32> -> vector<8x512xf32>
    %271 = arith.addf %269, %270 : vector<8x512xf32>
    %272 = vector.broadcast %236 : vector<1x512xf32> to vector<8x512xf32>
    %273 = arith.addf %271, %272 : vector<8x512xf32>
    %274 = vector.extract_strided_slice %273 {offsets = [0, 0], sizes = [8, 384], strides = [1, 1]} : vector<8x512xf32> to vector<8x384xf32>
    %275 = arith.negf %274 : vector<8x384xf32>
    %276 = math.exp %275 : vector<8x384xf32>
    %cst_86 = arith.constant 1.000000e+00 : f32
    %277 = vector.broadcast %cst_86 : f32 to vector<8x384xf32>
    %278 = arith.addf %277, %276 : vector<8x384xf32>
    %279 = arith.divf %277, %278 : vector<8x384xf32>
    %280 = vector.extract_strided_slice %273 {offsets = [0, 384], sizes = [8, 128], strides = [1, 1]} : vector<8x512xf32> to vector<8x128xf32>
    %281 = math.tanh %280 : vector<8x128xf32>
    %282 = vector.extract_strided_slice %279 {offsets = [0, 128], sizes = [8, 128], strides = [1, 1]} : vector<8x384xf32> to vector<8x128xf32>
    %283 = arith.mulf %282, %258 : vector<8x128xf32>
    %284 = vector.extract_strided_slice %279 {offsets = [0, 0], sizes = [8, 128], strides = [1, 1]} : vector<8x384xf32> to vector<8x128xf32>
    %285 = arith.mulf %284, %281 : vector<8x128xf32>
    %286 = arith.addf %283, %285 : vector<8x128xf32>
    %287 = vector.extract_strided_slice %279 {offsets = [0, 256], sizes = [8, 128], strides = [1, 1]} : vector<8x384xf32> to vector<8x128xf32>
    %288 = math.tanh %286 : vector<8x128xf32>
    %289 = arith.mulf %287, %288 : vector<8x128xf32>
    %290 = arith.index_cast %c1_i32_81 : i32 to index
    %c0_87 = arith.constant 0 : index
    %c0_88 = arith.constant 0 : index
    %291 = vector.load %arg4[%290, %c0_87, %c0_88] : memref<8x8x128xf32, #tpu.memory_space<vmem>>, vector<1x8x128xf32>
    %292 = vector.shape_cast %291 : vector<1x8x128xf32> to vector<8x128xf32>
    %293 = vector.shape_cast %289 : vector<8x128xf32> to vector<1x8x128xf32>
    tpu.vector_store %arg4[%290, %c0_87, %c0_88], %293 {strides = array<i32>} : memref<8x8x128xf32, #tpu.memory_space<vmem>>, vector<1x8x128xf32>,
    %c2_i32_89 = arith.constant 2 : i32
    %294 = arith.index_cast %c2_i32_89 : i32 to index
    %c0_90 = arith.constant 0 : index
    %c0_91 = arith.constant 0 : index
    %295 = vector.load %arg4[%294, %c0_90, %c0_91] : memref<8x8x128xf32, #tpu.memory_space<vmem>>, vector<1x8x128xf32>
    %296 = vector.shape_cast %295 : vector<1x8x128xf32> to vector<8x128xf32>
    %cst_92 = arith.constant dense<0.000000e+00> : vector<8x512xf32>
    %297 = tpu.matmul %296, %232, %cst_92 {dimension_numbers = #tpu.dot_dimension_numbers<[1], [0], [0], [1], [0, 0, 1, 1], [], []>} : vector<8x128xf32>, vector<128x512xf32>, vector<8x512xf32> -> vector<8x512xf32>
    %cst_93 = arith.constant dense<0.000000e+00> : vector<8x512xf32>
    %298 = tpu.matmul %289, %234, %cst_93 {dimension_numbers = #tpu.dot_dimension_numbers<[1], [0], [0], [1], [0, 0, 1, 1], [], []>} : vector<8x128xf32>, vector<128x512xf32>, vector<8x512xf32> -> vector<8x512xf32>
    %299 = arith.addf %297, %298 : vector<8x512xf32>
    %300 = vector.broadcast %236 : vector<1x512xf32> to vector<8x512xf32>
    %301 = arith.addf %299, %300 : vector<8x512xf32>
    %302 = vector.extract_strided_slice %301 {offsets = [0, 0], sizes = [8, 384], strides = [1, 1]} : vector<8x512xf32> to vector<8x384xf32>
    %303 = arith.negf %302 : vector<8x384xf32>
    %304 = math.exp %303 : vector<8x384xf32>
    %cst_94 = arith.constant 1.000000e+00 : f32
    %305 = vector.broadcast %cst_94 : f32 to vector<8x384xf32>
    %306 = arith.addf %305, %304 : vector<8x384xf32>
    %307 = arith.divf %305, %306 : vector<8x384xf32>
    %308 = vector.extract_strided_slice %301 {offsets = [0, 384], sizes = [8, 128], strides = [1, 1]} : vector<8x512xf32> to vector<8x128xf32>
    %309 = math.tanh %308 : vector<8x128xf32>
    %310 = vector.extract_strided_slice %307 {offsets = [0, 128], sizes = [8, 128], strides = [1, 1]} : vector<8x384xf32> to vector<8x128xf32>
    %311 = arith.mulf %310, %286 : vector<8x128xf32>
    %312 = vector.extract_strided_slice %307 {offsets = [0, 0], sizes = [8, 128], strides = [1, 1]} : vector<8x384xf32> to vector<8x128xf32>
    %313 = arith.mulf %312, %309 : vector<8x128xf32>
    %314 = arith.addf %311, %313 : vector<8x128xf32>
    %315 = vector.extract_strided_slice %307 {offsets = [0, 256], sizes = [8, 128], strides = [1, 1]} : vector<8x384xf32> to vector<8x128xf32>
    %316 = math.tanh %314 : vector<8x128xf32>
    %317 = arith.mulf %315, %316 : vector<8x128xf32>
    %318 = arith.index_cast %c2_i32_89 : i32 to index
    %c0_95 = arith.constant 0 : index
    %c0_96 = arith.constant 0 : index
    %319 = vector.load %arg4[%318, %c0_95, %c0_96] : memref<8x8x128xf32, #tpu.memory_space<vmem>>, vector<1x8x128xf32>
    %320 = vector.shape_cast %319 : vector<1x8x128xf32> to vector<8x128xf32>
    %321 = vector.shape_cast %317 : vector<8x128xf32> to vector<1x8x128xf32>
    tpu.vector_store %arg4[%318, %c0_95, %c0_96], %321 {strides = array<i32>} : memref<8x8x128xf32, #tpu.memory_space<vmem>>, vector<1x8x128xf32>,
    %c3_i32_97 = arith.constant 3 : i32
    %322 = arith.index_cast %c3_i32_97 : i32 to index
    %c0_98 = arith.constant 0 : index
    %c0_99 = arith.constant 0 : index
    %323 = vector.load %arg4[%322, %c0_98, %c0_99] : memref<8x8x128xf32, #tpu.memory_space<vmem>>, vector<1x8x128xf32>
    %324 = vector.shape_cast %323 : vector<1x8x128xf32> to vector<8x128xf32>
    %cst_100 = arith.constant dense<0.000000e+00> : vector<8x512xf32>
    %325 = tpu.matmul %324, %232, %cst_100 {dimension_numbers = #tpu.dot_dimension_numbers<[1], [0], [0], [1], [0, 0, 1, 1], [], []>} : vector<8x128xf32>, vector<128x512xf32>, vector<8x512xf32> -> vector<8x512xf32>
    %cst_101 = arith.constant dense<0.000000e+00> : vector<8x512xf32>
    %326 = tpu.matmul %317, %234, %cst_101 {dimension_numbers = #tpu.dot_dimension_numbers<[1], [0], [0], [1], [0, 0, 1, 1], [], []>} : vector<8x128xf32>, vector<128x512xf32>, vector<8x512xf32> -> vector<8x512xf32>
    %327 = arith.addf %325, %326 : vector<8x512xf32>
    %328 = vector.broadcast %236 : vector<1x512xf32> to vector<8x512xf32>
    %329 = arith.addf %327, %328 : vector<8x512xf32>
    %330 = vector.extract_strided_slice %329 {offsets = [0, 0], sizes = [8, 384], strides = [1, 1]} : vector<8x512xf32> to vector<8x384xf32>
    %331 = arith.negf %330 : vector<8x384xf32>
    %332 = math.exp %331 : vector<8x384xf32>
    %cst_102 = arith.constant 1.000000e+00 : f32
    %333 = vector.broadcast %cst_102 : f32 to vector<8x384xf32>
    %334 = arith.addf %333, %332 : vector<8x384xf32>
    %335 = arith.divf %333, %334 : vector<8x384xf32>
    %336 = vector.extract_strided_slice %329 {offsets = [0, 384], sizes = [8, 128], strides = [1, 1]} : vector<8x512xf32> to vector<8x128xf32>
    %337 = math.tanh %336 : vector<8x128xf32>
    %338 = vector.extract_strided_slice %335 {offsets = [0, 128], sizes = [8, 128], strides = [1, 1]} : vector<8x384xf32> to vector<8x128xf32>
    %339 = arith.mulf %338, %314 : vector<8x128xf32>
    %340 = vector.extract_strided_slice %335 {offsets = [0, 0], sizes = [8, 128], strides = [1, 1]} : vector<8x384xf32> to vector<8x128xf32>
    %341 = arith.mulf %340, %337 : vector<8x128xf32>
    %342 = arith.addf %339, %341 : vector<8x128xf32>
    %343 = vector.extract_strided_slice %335 {offsets = [0, 256], sizes = [8, 128], strides = [1, 1]} : vector<8x384xf32> to vector<8x128xf32>
    %344 = math.tanh %342 : vector<8x128xf32>
    %345 = arith.mulf %343, %344 : vector<8x128xf32>
    %346 = arith.index_cast %c3_i32_97 : i32 to index
    %c0_103 = arith.constant 0 : index
    %c0_104 = arith.constant 0 : index
    %347 = vector.load %arg4[%346, %c0_103, %c0_104] : memref<8x8x128xf32, #tpu.memory_space<vmem>>, vector<1x8x128xf32>
    %348 = vector.shape_cast %347 : vector<1x8x128xf32> to vector<8x128xf32>
    %349 = vector.shape_cast %345 : vector<8x128xf32> to vector<1x8x128xf32>
    tpu.vector_store %arg4[%346, %c0_103, %c0_104], %349 {strides = array<i32>} : memref<8x8x128xf32, #tpu.memory_space<vmem>>, vector<1x8x128xf32>,
    %c4_i32_105 = arith.constant 4 : i32
    %350 = arith.index_cast %c4_i32_105 : i32 to index
    %c0_106 = arith.constant 0 : index
    %c0_107 = arith.constant 0 : index
    %351 = vector.load %arg4[%350, %c0_106, %c0_107] : memref<8x8x128xf32, #tpu.memory_space<vmem>>, vector<1x8x128xf32>
    %352 = vector.shape_cast %351 : vector<1x8x128xf32> to vector<8x128xf32>
    %cst_108 = arith.constant dense<0.000000e+00> : vector<8x512xf32>
    %353 = tpu.matmul %352, %232, %cst_108 {dimension_numbers = #tpu.dot_dimension_numbers<[1], [0], [0], [1], [0, 0, 1, 1], [], []>} : vector<8x128xf32>, vector<128x512xf32>, vector<8x512xf32> -> vector<8x512xf32>
    %cst_109 = arith.constant dense<0.000000e+00> : vector<8x512xf32>
    %354 = tpu.matmul %345, %234, %cst_109 {dimension_numbers = #tpu.dot_dimension_numbers<[1], [0], [0], [1], [0, 0, 1, 1], [], []>} : vector<8x128xf32>, vector<128x512xf32>, vector<8x512xf32> -> vector<8x512xf32>
    %355 = arith.addf %353, %354 : vector<8x512xf32>
    %356 = vector.broadcast %236 : vector<1x512xf32> to vector<8x512xf32>
    %357 = arith.addf %355, %356 : vector<8x512xf32>
    %358 = vector.extract_strided_slice %357 {offsets = [0, 0], sizes = [8, 384], strides = [1, 1]} : vector<8x512xf32> to vector<8x384xf32>
    %359 = arith.negf %358 : vector<8x384xf32>
    %360 = math.exp %359 : vector<8x384xf32>
    %cst_110 = arith.constant 1.000000e+00 : f32
    %361 = vector.broadcast %cst_110 : f32 to vector<8x384xf32>
    %362 = arith.addf %361, %360 : vector<8x384xf32>
    %363 = arith.divf %361, %362 : vector<8x384xf32>
    %364 = vector.extract_strided_slice %357 {offsets = [0, 384], sizes = [8, 128], strides = [1, 1]} : vector<8x512xf32> to vector<8x128xf32>
    %365 = math.tanh %364 : vector<8x128xf32>
    %366 = vector.extract_strided_slice %363 {offsets = [0, 128], sizes = [8, 128], strides = [1, 1]} : vector<8x384xf32> to vector<8x128xf32>
    %367 = arith.mulf %366, %342 : vector<8x128xf32>
    %368 = vector.extract_strided_slice %363 {offsets = [0, 0], sizes = [8, 128], strides = [1, 1]} : vector<8x384xf32> to vector<8x128xf32>
    %369 = arith.mulf %368, %365 : vector<8x128xf32>
    %370 = arith.addf %367, %369 : vector<8x128xf32>
    %371 = vector.extract_strided_slice %363 {offsets = [0, 256], sizes = [8, 128], strides = [1, 1]} : vector<8x384xf32> to vector<8x128xf32>
    %372 = math.tanh %370 : vector<8x128xf32>
    %373 = arith.mulf %371, %372 : vector<8x128xf32>
    %374 = arith.index_cast %c4_i32_105 : i32 to index
    %c0_111 = arith.constant 0 : index
    %c0_112 = arith.constant 0 : index
    %375 = vector.load %arg4[%374, %c0_111, %c0_112] : memref<8x8x128xf32, #tpu.memory_space<vmem>>, vector<1x8x128xf32>
    %376 = vector.shape_cast %375 : vector<1x8x128xf32> to vector<8x128xf32>
    %377 = vector.shape_cast %373 : vector<8x128xf32> to vector<1x8x128xf32>
    tpu.vector_store %arg4[%374, %c0_111, %c0_112], %377 {strides = array<i32>} : memref<8x8x128xf32, #tpu.memory_space<vmem>>, vector<1x8x128xf32>,
    %c5_i32_113 = arith.constant 5 : i32
    %378 = arith.index_cast %c5_i32_113 : i32 to index
    %c0_114 = arith.constant 0 : index
    %c0_115 = arith.constant 0 : index
    %379 = vector.load %arg4[%378, %c0_114, %c0_115] : memref<8x8x128xf32, #tpu.memory_space<vmem>>, vector<1x8x128xf32>
    %380 = vector.shape_cast %379 : vector<1x8x128xf32> to vector<8x128xf32>
    %cst_116 = arith.constant dense<0.000000e+00> : vector<8x512xf32>
    %381 = tpu.matmul %380, %232, %cst_116 {dimension_numbers = #tpu.dot_dimension_numbers<[1], [0], [0], [1], [0, 0, 1, 1], [], []>} : vector<8x128xf32>, vector<128x512xf32>, vector<8x512xf32> -> vector<8x512xf32>
    %cst_117 = arith.constant dense<0.000000e+00> : vector<8x512xf32>
    %382 = tpu.matmul %373, %234, %cst_117 {dimension_numbers = #tpu.dot_dimension_numbers<[1], [0], [0], [1], [0, 0, 1, 1], [], []>} : vector<8x128xf32>, vector<128x512xf32>, vector<8x512xf32> -> vector<8x512xf32>
    %383 = arith.addf %381, %382 : vector<8x512xf32>
    %384 = vector.broadcast %236 : vector<1x512xf32> to vector<8x512xf32>
    %385 = arith.addf %383, %384 : vector<8x512xf32>
    %386 = vector.extract_strided_slice %385 {offsets = [0, 0], sizes = [8, 384], strides = [1, 1]} : vector<8x512xf32> to vector<8x384xf32>
    %387 = arith.negf %386 : vector<8x384xf32>
    %388 = math.exp %387 : vector<8x384xf32>
    %cst_118 = arith.constant 1.000000e+00 : f32
    %389 = vector.broadcast %cst_118 : f32 to vector<8x384xf32>
    %390 = arith.addf %389, %388 : vector<8x384xf32>
    %391 = arith.divf %389, %390 : vector<8x384xf32>
    %392 = vector.extract_strided_slice %385 {offsets = [0, 384], sizes = [8, 128], strides = [1, 1]} : vector<8x512xf32> to vector<8x128xf32>
    %393 = math.tanh %392 : vector<8x128xf32>
    %394 = vector.extract_strided_slice %391 {offsets = [0, 128], sizes = [8, 128], strides = [1, 1]} : vector<8x384xf32> to vector<8x128xf32>
    %395 = arith.mulf %394, %370 : vector<8x128xf32>
    %396 = vector.extract_strided_slice %391 {offsets = [0, 0], sizes = [8, 128], strides = [1, 1]} : vector<8x384xf32> to vector<8x128xf32>
    %397 = arith.mulf %396, %393 : vector<8x128xf32>
    %398 = arith.addf %395, %397 : vector<8x128xf32>
    %399 = vector.extract_strided_slice %391 {offsets = [0, 256], sizes = [8, 128], strides = [1, 1]} : vector<8x384xf32> to vector<8x128xf32>
    %400 = math.tanh %398 : vector<8x128xf32>
    %401 = arith.mulf %399, %400 : vector<8x128xf32>
    %402 = arith.index_cast %c5_i32_113 : i32 to index
    %c0_119 = arith.constant 0 : index
    %c0_120 = arith.constant 0 : index
    %403 = vector.load %arg4[%402, %c0_119, %c0_120] : memref<8x8x128xf32, #tpu.memory_space<vmem>>, vector<1x8x128xf32>
    %404 = vector.shape_cast %403 : vector<1x8x128xf32> to vector<8x128xf32>
    %405 = vector.shape_cast %401 : vector<8x128xf32> to vector<1x8x128xf32>
    tpu.vector_store %arg4[%402, %c0_119, %c0_120], %405 {strides = array<i32>} : memref<8x8x128xf32, #tpu.memory_space<vmem>>, vector<1x8x128xf32>,
    %c6_i32_121 = arith.constant 6 : i32
    %406 = arith.index_cast %c6_i32_121 : i32 to index
    %c0_122 = arith.constant 0 : index
    %c0_123 = arith.constant 0 : index
    %407 = vector.load %arg4[%406, %c0_122, %c0_123] : memref<8x8x128xf32, #tpu.memory_space<vmem>>, vector<1x8x128xf32>
    %408 = vector.shape_cast %407 : vector<1x8x128xf32> to vector<8x128xf32>
    %cst_124 = arith.constant dense<0.000000e+00> : vector<8x512xf32>
    %409 = tpu.matmul %408, %232, %cst_124 {dimension_numbers = #tpu.dot_dimension_numbers<[1], [0], [0], [1], [0, 0, 1, 1], [], []>} : vector<8x128xf32>, vector<128x512xf32>, vector<8x512xf32> -> vector<8x512xf32>
    %cst_125 = arith.constant dense<0.000000e+00> : vector<8x512xf32>
    %410 = tpu.matmul %401, %234, %cst_125 {dimension_numbers = #tpu.dot_dimension_numbers<[1], [0], [0], [1], [0, 0, 1, 1], [], []>} : vector<8x128xf32>, vector<128x512xf32>, vector<8x512xf32> -> vector<8x512xf32>
    %411 = arith.addf %409, %410 : vector<8x512xf32>
    %412 = vector.broadcast %236 : vector<1x512xf32> to vector<8x512xf32>
    %413 = arith.addf %411, %412 : vector<8x512xf32>
    %414 = vector.extract_strided_slice %413 {offsets = [0, 0], sizes = [8, 384], strides = [1, 1]} : vector<8x512xf32> to vector<8x384xf32>
    %415 = arith.negf %414 : vector<8x384xf32>
    %416 = math.exp %415 : vector<8x384xf32>
    %cst_126 = arith.constant 1.000000e+00 : f32
    %417 = vector.broadcast %cst_126 : f32 to vector<8x384xf32>
    %418 = arith.addf %417, %416 : vector<8x384xf32>
    %419 = arith.divf %417, %418 : vector<8x384xf32>
    %420 = vector.extract_strided_slice %413 {offsets = [0, 384], sizes = [8, 128], strides = [1, 1]} : vector<8x512xf32> to vector<8x128xf32>
    %421 = math.tanh %420 : vector<8x128xf32>
    %422 = vector.extract_strided_slice %419 {offsets = [0, 128], sizes = [8, 128], strides = [1, 1]} : vector<8x384xf32> to vector<8x128xf32>
    %423 = arith.mulf %422, %398 : vector<8x128xf32>
    %424 = vector.extract_strided_slice %419 {offsets = [0, 0], sizes = [8, 128], strides = [1, 1]} : vector<8x384xf32> to vector<8x128xf32>
    %425 = arith.mulf %424, %421 : vector<8x128xf32>
    %426 = arith.addf %423, %425 : vector<8x128xf32>
    %427 = vector.extract_strided_slice %419 {offsets = [0, 256], sizes = [8, 128], strides = [1, 1]} : vector<8x384xf32> to vector<8x128xf32>
    %428 = math.tanh %426 : vector<8x128xf32>
    %429 = arith.mulf %427, %428 : vector<8x128xf32>
    %430 = arith.index_cast %c6_i32_121 : i32 to index
    %c0_127 = arith.constant 0 : index
    %c0_128 = arith.constant 0 : index
    %431 = vector.load %arg4[%430, %c0_127, %c0_128] : memref<8x8x128xf32, #tpu.memory_space<vmem>>, vector<1x8x128xf32>
    %432 = vector.shape_cast %431 : vector<1x8x128xf32> to vector<8x128xf32>
    %433 = vector.shape_cast %429 : vector<8x128xf32> to vector<1x8x128xf32>
    tpu.vector_store %arg4[%430, %c0_127, %c0_128], %433 {strides = array<i32>} : memref<8x8x128xf32, #tpu.memory_space<vmem>>, vector<1x8x128xf32>,
    %c7_i32_129 = arith.constant 7 : i32
    %434 = arith.index_cast %c7_i32_129 : i32 to index
    %c0_130 = arith.constant 0 : index
    %c0_131 = arith.constant 0 : index
    %435 = vector.load %arg4[%434, %c0_130, %c0_131] : memref<8x8x128xf32, #tpu.memory_space<vmem>>, vector<1x8x128xf32>
    %436 = vector.shape_cast %435 : vector<1x8x128xf32> to vector<8x128xf32>
    %cst_132 = arith.constant dense<0.000000e+00> : vector<8x512xf32>
    %437 = tpu.matmul %436, %232, %cst_132 {dimension_numbers = #tpu.dot_dimension_numbers<[1], [0], [0], [1], [0, 0, 1, 1], [], []>} : vector<8x128xf32>, vector<128x512xf32>, vector<8x512xf32> -> vector<8x512xf32>
    %cst_133 = arith.constant dense<0.000000e+00> : vector<8x512xf32>
    %438 = tpu.matmul %429, %234, %cst_133 {dimension_numbers = #tpu.dot_dimension_numbers<[1], [0], [0], [1], [0, 0, 1, 1], [], []>} : vector<8x128xf32>, vector<128x512xf32>, vector<8x512xf32> -> vector<8x512xf32>
    %439 = arith.addf %437, %438 : vector<8x512xf32>
    %440 = vector.broadcast %236 : vector<1x512xf32> to vector<8x512xf32>
    %441 = arith.addf %439, %440 : vector<8x512xf32>
    %442 = vector.extract_strided_slice %441 {offsets = [0, 0], sizes = [8, 384], strides = [1, 1]} : vector<8x512xf32> to vector<8x384xf32>
    %443 = arith.negf %442 : vector<8x384xf32>
    %444 = math.exp %443 : vector<8x384xf32>
    %cst_134 = arith.constant 1.000000e+00 : f32
    %445 = vector.broadcast %cst_134 : f32 to vector<8x384xf32>
    %446 = arith.addf %445, %444 : vector<8x384xf32>
    %447 = arith.divf %445, %446 : vector<8x384xf32>
    %448 = vector.extract_strided_slice %441 {offsets = [0, 384], sizes = [8, 128], strides = [1, 1]} : vector<8x512xf32> to vector<8x128xf32>
    %449 = math.tanh %448 : vector<8x128xf32>
    %450 = vector.extract_strided_slice %447 {offsets = [0, 128], sizes = [8, 128], strides = [1, 1]} : vector<8x384xf32> to vector<8x128xf32>
    %451 = arith.mulf %450, %426 : vector<8x128xf32>
    %452 = vector.extract_strided_slice %447 {offsets = [0, 0], sizes = [8, 128], strides = [1, 1]} : vector<8x384xf32> to vector<8x128xf32>
    %453 = arith.mulf %452, %449 : vector<8x128xf32>
    %454 = arith.addf %451, %453 : vector<8x128xf32>
    %455 = vector.extract_strided_slice %447 {offsets = [0, 256], sizes = [8, 128], strides = [1, 1]} : vector<8x384xf32> to vector<8x128xf32>
    %456 = math.tanh %454 : vector<8x128xf32>
    %457 = arith.mulf %455, %456 : vector<8x128xf32>
    %458 = arith.index_cast %c7_i32_129 : i32 to index
    %c0_135 = arith.constant 0 : index
    %c0_136 = arith.constant 0 : index
    %459 = vector.load %arg4[%458, %c0_135, %c0_136] : memref<8x8x128xf32, #tpu.memory_space<vmem>>, vector<1x8x128xf32>
    %460 = vector.shape_cast %459 : vector<1x8x128xf32> to vector<8x128xf32>
    %461 = vector.shape_cast %457 : vector<8x128xf32> to vector<1x8x128xf32>
    tpu.vector_store %arg4[%458, %c0_135, %c0_136], %461 {strides = array<i32>} : memref<8x8x128xf32, #tpu.memory_space<vmem>>, vector<1x8x128xf32>,
    %c8_i32_137 = arith.constant 8 : i32
    %c2 = arith.constant 2 : index
    %c0_138 = arith.constant 0 : index
    %c0_139 = arith.constant 0 : index
    %462 = vector.load %arg1[%c2, %c0_138, %c0_139] : memref<4x128x512xf32, #tpu.memory_space<vmem>>, vector<1x128x512xf32>
    %463 = vector.shape_cast %462 : vector<1x128x512xf32> to vector<128x512xf32>
    %c2_140 = arith.constant 2 : index
    %c0_141 = arith.constant 0 : index
    %c0_142 = arith.constant 0 : index
    %464 = vector.load %arg2[%c2_140, %c0_141, %c0_142] : memref<4x128x512xf32, #tpu.memory_space<vmem>>, vector<1x128x512xf32>
    %465 = vector.shape_cast %464 : vector<1x128x512xf32> to vector<128x512xf32>
    %c2_143 = arith.constant 2 : index
    %c0_144 = arith.constant 0 : index
    %c0_145 = arith.constant 0 : index
    %466 = vector.load %arg3[%c2_143, %c0_144, %c0_145] : memref<4x1x512xf32, #tpu.memory_space<vmem>>, vector<1x1x512xf32>
    %467 = vector.shape_cast %466 : vector<1x1x512xf32> to vector<1x512xf32>
    %cst_146 = arith.constant 0.000000e+00 : f32
    %468 = vector.broadcast %cst_146 : f32 to vector<8x128xf32>
    %c0_i32_147 = arith.constant 0 : i32
    %cst_148 = arith.constant dense<0.000000e+00> : vector<8x512xf32>
    %469 = tpu.matmul %457, %463, %cst_148 {dimension_numbers = #tpu.dot_dimension_numbers<[1], [0], [0], [1], [0, 0, 1, 1], [], []>} : vector<8x128xf32>, vector<128x512xf32>, vector<8x512xf32> -> vector<8x512xf32>
    %cst_149 = arith.constant dense<0.000000e+00> : vector<8x512xf32>
    %470 = tpu.matmul %468, %465, %cst_149 {dimension_numbers = #tpu.dot_dimension_numbers<[1], [0], [0], [1], [0, 0, 1, 1], [], []>} : vector<8x128xf32>, vector<128x512xf32>, vector<8x512xf32> -> vector<8x512xf32>
    %471 = arith.addf %469, %470 : vector<8x512xf32>
    %472 = vector.broadcast %467 : vector<1x512xf32> to vector<8x512xf32>
    %473 = arith.addf %471, %472 : vector<8x512xf32>
    %474 = vector.extract_strided_slice %473 {offsets = [0, 0], sizes = [8, 384], strides = [1, 1]} : vector<8x512xf32> to vector<8x384xf32>
    %475 = arith.negf %474 : vector<8x384xf32>
    %476 = math.exp %475 : vector<8x384xf32>
    %cst_150 = arith.constant 1.000000e+00 : f32
    %477 = vector.broadcast %cst_150 : f32 to vector<8x384xf32>
    %478 = arith.addf %477, %476 : vector<8x384xf32>
    %479 = arith.divf %477, %478 : vector<8x384xf32>
    %480 = vector.extract_strided_slice %473 {offsets = [0, 384], sizes = [8, 128], strides = [1, 1]} : vector<8x512xf32> to vector<8x128xf32>
    %481 = math.tanh %480 : vector<8x128xf32>
    %482 = vector.extract_strided_slice %479 {offsets = [0, 128], sizes = [8, 128], strides = [1, 1]} : vector<8x384xf32> to vector<8x128xf32>
    %483 = arith.mulf %482, %468 : vector<8x128xf32>
    %484 = vector.extract_strided_slice %479 {offsets = [0, 0], sizes = [8, 128], strides = [1, 1]} : vector<8x384xf32> to vector<8x128xf32>
    %485 = arith.mulf %484, %481 : vector<8x128xf32>
    %486 = arith.addf %483, %485 : vector<8x128xf32>
    %487 = vector.extract_strided_slice %479 {offsets = [0, 256], sizes = [8, 128], strides = [1, 1]} : vector<8x384xf32> to vector<8x128xf32>
    %488 = math.tanh %486 : vector<8x128xf32>
    %489 = arith.mulf %487, %488 : vector<8x128xf32>
    %490 = arith.index_cast %c0_i32_147 : i32 to index
    %c0_151 = arith.constant 0 : index
    %c0_152 = arith.constant 0 : index
    %491 = vector.load %arg4[%490, %c0_151, %c0_152] : memref<8x8x128xf32, #tpu.memory_space<vmem>>, vector<1x8x128xf32>
    %492 = vector.shape_cast %491 : vector<1x8x128xf32> to vector<8x128xf32>
    %493 = vector.shape_cast %489 : vector<8x128xf32> to vector<1x8x128xf32>
    tpu.vector_store %arg4[%490, %c0_151, %c0_152], %493 {strides = array<i32>} : memref<8x8x128xf32, #tpu.memory_space<vmem>>, vector<1x8x128xf32>,
    %c1_i32_153 = arith.constant 1 : i32
    %cst_154 = arith.constant dense<0.000000e+00> : vector<8x512xf32>
    %494 = tpu.matmul %457, %463, %cst_154 {dimension_numbers = #tpu.dot_dimension_numbers<[1], [0], [0], [1], [0, 0, 1, 1], [], []>} : vector<8x128xf32>, vector<128x512xf32>, vector<8x512xf32> -> vector<8x512xf32>
    %cst_155 = arith.constant dense<0.000000e+00> : vector<8x512xf32>
    %495 = tpu.matmul %489, %465, %cst_155 {dimension_numbers = #tpu.dot_dimension_numbers<[1], [0], [0], [1], [0, 0, 1, 1], [], []>} : vector<8x128xf32>, vector<128x512xf32>, vector<8x512xf32> -> vector<8x512xf32>
    %496 = arith.addf %494, %495 : vector<8x512xf32>
    %497 = vector.broadcast %467 : vector<1x512xf32> to vector<8x512xf32>
    %498 = arith.addf %496, %497 : vector<8x512xf32>
    %499 = vector.extract_strided_slice %498 {offsets = [0, 0], sizes = [8, 384], strides = [1, 1]} : vector<8x512xf32> to vector<8x384xf32>
    %500 = arith.negf %499 : vector<8x384xf32>
    %501 = math.exp %500 : vector<8x384xf32>
    %cst_156 = arith.constant 1.000000e+00 : f32
    %502 = vector.broadcast %cst_156 : f32 to vector<8x384xf32>
    %503 = arith.addf %502, %501 : vector<8x384xf32>
    %504 = arith.divf %502, %503 : vector<8x384xf32>
    %505 = vector.extract_strided_slice %498 {offsets = [0, 384], sizes = [8, 128], strides = [1, 1]} : vector<8x512xf32> to vector<8x128xf32>
    %506 = math.tanh %505 : vector<8x128xf32>
    %507 = vector.extract_strided_slice %504 {offsets = [0, 128], sizes = [8, 128], strides = [1, 1]} : vector<8x384xf32> to vector<8x128xf32>
    %508 = arith.mulf %507, %486 : vector<8x128xf32>
    %509 = vector.extract_strided_slice %504 {offsets = [0, 0], sizes = [8, 128], strides = [1, 1]} : vector<8x384xf32> to vector<8x128xf32>
    %510 = arith.mulf %509, %506 : vector<8x128xf32>
    %511 = arith.addf %508, %510 : vector<8x128xf32>
    %512 = vector.extract_strided_slice %504 {offsets = [0, 256], sizes = [8, 128], strides = [1, 1]} : vector<8x384xf32> to vector<8x128xf32>
    %513 = math.tanh %511 : vector<8x128xf32>
    %514 = arith.mulf %512, %513 : vector<8x128xf32>
    %515 = arith.index_cast %c1_i32_153 : i32 to index
    %c0_157 = arith.constant 0 : index
    %c0_158 = arith.constant 0 : index
    %516 = vector.load %arg4[%515, %c0_157, %c0_158] : memref<8x8x128xf32, #tpu.memory_space<vmem>>, vector<1x8x128xf32>
    %517 = vector.shape_cast %516 : vector<1x8x128xf32> to vector<8x128xf32>
    %518 = vector.shape_cast %514 : vector<8x128xf32> to vector<1x8x128xf32>
    tpu.vector_store %arg4[%515, %c0_157, %c0_158], %518 {strides = array<i32>} : memref<8x8x128xf32, #tpu.memory_space<vmem>>, vector<1x8x128xf32>,
    %c2_i32_159 = arith.constant 2 : i32
    %cst_160 = arith.constant dense<0.000000e+00> : vector<8x512xf32>
    %519 = tpu.matmul %457, %463, %cst_160 {dimension_numbers = #tpu.dot_dimension_numbers<[1], [0], [0], [1], [0, 0, 1, 1], [], []>} : vector<8x128xf32>, vector<128x512xf32>, vector<8x512xf32> -> vector<8x512xf32>
    %cst_161 = arith.constant dense<0.000000e+00> : vector<8x512xf32>
    %520 = tpu.matmul %514, %465, %cst_161 {dimension_numbers = #tpu.dot_dimension_numbers<[1], [0], [0], [1], [0, 0, 1, 1], [], []>} : vector<8x128xf32>, vector<128x512xf32>, vector<8x512xf32> -> vector<8x512xf32>
    %521 = arith.addf %519, %520 : vector<8x512xf32>
    %522 = vector.broadcast %467 : vector<1x512xf32> to vector<8x512xf32>
    %523 = arith.addf %521, %522 : vector<8x512xf32>
    %524 = vector.extract_strided_slice %523 {offsets = [0, 0], sizes = [8, 384], strides = [1, 1]} : vector<8x512xf32> to vector<8x384xf32>
    %525 = arith.negf %524 : vector<8x384xf32>
    %526 = math.exp %525 : vector<8x384xf32>
    %cst_162 = arith.constant 1.000000e+00 : f32
    %527 = vector.broadcast %cst_162 : f32 to vector<8x384xf32>
    %528 = arith.addf %527, %526 : vector<8x384xf32>
    %529 = arith.divf %527, %528 : vector<8x384xf32>
    %530 = vector.extract_strided_slice %523 {offsets = [0, 384], sizes = [8, 128], strides = [1, 1]} : vector<8x512xf32> to vector<8x128xf32>
    %531 = math.tanh %530 : vector<8x128xf32>
    %532 = vector.extract_strided_slice %529 {offsets = [0, 128], sizes = [8, 128], strides = [1, 1]} : vector<8x384xf32> to vector<8x128xf32>
    %533 = arith.mulf %532, %511 : vector<8x128xf32>
    %534 = vector.extract_strided_slice %529 {offsets = [0, 0], sizes = [8, 128], strides = [1, 1]} : vector<8x384xf32> to vector<8x128xf32>
    %535 = arith.mulf %534, %531 : vector<8x128xf32>
    %536 = arith.addf %533, %535 : vector<8x128xf32>
    %537 = vector.extract_strided_slice %529 {offsets = [0, 256], sizes = [8, 128], strides = [1, 1]} : vector<8x384xf32> to vector<8x128xf32>
    %538 = math.tanh %536 : vector<8x128xf32>
    %539 = arith.mulf %537, %538 : vector<8x128xf32>
    %540 = arith.index_cast %c2_i32_159 : i32 to index
    %c0_163 = arith.constant 0 : index
    %c0_164 = arith.constant 0 : index
    %541 = vector.load %arg4[%540, %c0_163, %c0_164] : memref<8x8x128xf32, #tpu.memory_space<vmem>>, vector<1x8x128xf32>
    %542 = vector.shape_cast %541 : vector<1x8x128xf32> to vector<8x128xf32>
    %543 = vector.shape_cast %539 : vector<8x128xf32> to vector<1x8x128xf32>
    tpu.vector_store %arg4[%540, %c0_163, %c0_164], %543 {strides = array<i32>} : memref<8x8x128xf32, #tpu.memory_space<vmem>>, vector<1x8x128xf32>,
    %c3_i32_165 = arith.constant 3 : i32
    %cst_166 = arith.constant dense<0.000000e+00> : vector<8x512xf32>
    %544 = tpu.matmul %457, %463, %cst_166 {dimension_numbers = #tpu.dot_dimension_numbers<[1], [0], [0], [1], [0, 0, 1, 1], [], []>} : vector<8x128xf32>, vector<128x512xf32>, vector<8x512xf32> -> vector<8x512xf32>
    %cst_167 = arith.constant dense<0.000000e+00> : vector<8x512xf32>
    %545 = tpu.matmul %539, %465, %cst_167 {dimension_numbers = #tpu.dot_dimension_numbers<[1], [0], [0], [1], [0, 0, 1, 1], [], []>} : vector<8x128xf32>, vector<128x512xf32>, vector<8x512xf32> -> vector<8x512xf32>
    %546 = arith.addf %544, %545 : vector<8x512xf32>
    %547 = vector.broadcast %467 : vector<1x512xf32> to vector<8x512xf32>
    %548 = arith.addf %546, %547 : vector<8x512xf32>
    %549 = vector.extract_strided_slice %548 {offsets = [0, 0], sizes = [8, 384], strides = [1, 1]} : vector<8x512xf32> to vector<8x384xf32>
    %550 = arith.negf %549 : vector<8x384xf32>
    %551 = math.exp %550 : vector<8x384xf32>
    %cst_168 = arith.constant 1.000000e+00 : f32
    %552 = vector.broadcast %cst_168 : f32 to vector<8x384xf32>
    %553 = arith.addf %552, %551 : vector<8x384xf32>
    %554 = arith.divf %552, %553 : vector<8x384xf32>
    %555 = vector.extract_strided_slice %548 {offsets = [0, 384], sizes = [8, 128], strides = [1, 1]} : vector<8x512xf32> to vector<8x128xf32>
    %556 = math.tanh %555 : vector<8x128xf32>
    %557 = vector.extract_strided_slice %554 {offsets = [0, 128], sizes = [8, 128], strides = [1, 1]} : vector<8x384xf32> to vector<8x128xf32>
    %558 = arith.mulf %557, %536 : vector<8x128xf32>
    %559 = vector.extract_strided_slice %554 {offsets = [0, 0], sizes = [8, 128], strides = [1, 1]} : vector<8x384xf32> to vector<8x128xf32>
    %560 = arith.mulf %559, %556 : vector<8x128xf32>
    %561 = arith.addf %558, %560 : vector<8x128xf32>
    %562 = vector.extract_strided_slice %554 {offsets = [0, 256], sizes = [8, 128], strides = [1, 1]} : vector<8x384xf32> to vector<8x128xf32>
    %563 = math.tanh %561 : vector<8x128xf32>
    %564 = arith.mulf %562, %563 : vector<8x128xf32>
    %565 = arith.index_cast %c3_i32_165 : i32 to index
    %c0_169 = arith.constant 0 : index
    %c0_170 = arith.constant 0 : index
    %566 = vector.load %arg4[%565, %c0_169, %c0_170] : memref<8x8x128xf32, #tpu.memory_space<vmem>>, vector<1x8x128xf32>
    %567 = vector.shape_cast %566 : vector<1x8x128xf32> to vector<8x128xf32>
    %568 = vector.shape_cast %564 : vector<8x128xf32> to vector<1x8x128xf32>
    tpu.vector_store %arg4[%565, %c0_169, %c0_170], %568 {strides = array<i32>} : memref<8x8x128xf32, #tpu.memory_space<vmem>>, vector<1x8x128xf32>,
    %c4_i32_171 = arith.constant 4 : i32
    %cst_172 = arith.constant dense<0.000000e+00> : vector<8x512xf32>
    %569 = tpu.matmul %457, %463, %cst_172 {dimension_numbers = #tpu.dot_dimension_numbers<[1], [0], [0], [1], [0, 0, 1, 1], [], []>} : vector<8x128xf32>, vector<128x512xf32>, vector<8x512xf32> -> vector<8x512xf32>
    %cst_173 = arith.constant dense<0.000000e+00> : vector<8x512xf32>
    %570 = tpu.matmul %564, %465, %cst_173 {dimension_numbers = #tpu.dot_dimension_numbers<[1], [0], [0], [1], [0, 0, 1, 1], [], []>} : vector<8x128xf32>, vector<128x512xf32>, vector<8x512xf32> -> vector<8x512xf32>
    %571 = arith.addf %569, %570 : vector<8x512xf32>
    %572 = vector.broadcast %467 : vector<1x512xf32> to vector<8x512xf32>
    %573 = arith.addf %571, %572 : vector<8x512xf32>
    %574 = vector.extract_strided_slice %573 {offsets = [0, 0], sizes = [8, 384], strides = [1, 1]} : vector<8x512xf32> to vector<8x384xf32>
    %575 = arith.negf %574 : vector<8x384xf32>
    %576 = math.exp %575 : vector<8x384xf32>
    %cst_174 = arith.constant 1.000000e+00 : f32
    %577 = vector.broadcast %cst_174 : f32 to vector<8x384xf32>
    %578 = arith.addf %577, %576 : vector<8x384xf32>
    %579 = arith.divf %577, %578 : vector<8x384xf32>
    %580 = vector.extract_strided_slice %573 {offsets = [0, 384], sizes = [8, 128], strides = [1, 1]} : vector<8x512xf32> to vector<8x128xf32>
    %581 = math.tanh %580 : vector<8x128xf32>
    %582 = vector.extract_strided_slice %579 {offsets = [0, 128], sizes = [8, 128], strides = [1, 1]} : vector<8x384xf32> to vector<8x128xf32>
    %583 = arith.mulf %582, %561 : vector<8x128xf32>
    %584 = vector.extract_strided_slice %579 {offsets = [0, 0], sizes = [8, 128], strides = [1, 1]} : vector<8x384xf32> to vector<8x128xf32>
    %585 = arith.mulf %584, %581 : vector<8x128xf32>
    %586 = arith.addf %583, %585 : vector<8x128xf32>
    %587 = vector.extract_strided_slice %579 {offsets = [0, 256], sizes = [8, 128], strides = [1, 1]} : vector<8x384xf32> to vector<8x128xf32>
    %588 = math.tanh %586 : vector<8x128xf32>
    %589 = arith.mulf %587, %588 : vector<8x128xf32>
    %590 = arith.index_cast %c4_i32_171 : i32 to index
    %c0_175 = arith.constant 0 : index
    %c0_176 = arith.constant 0 : index
    %591 = vector.load %arg4[%590, %c0_175, %c0_176] : memref<8x8x128xf32, #tpu.memory_space<vmem>>, vector<1x8x128xf32>
    %592 = vector.shape_cast %591 : vector<1x8x128xf32> to vector<8x128xf32>
    %593 = vector.shape_cast %589 : vector<8x128xf32> to vector<1x8x128xf32>
    tpu.vector_store %arg4[%590, %c0_175, %c0_176], %593 {strides = array<i32>} : memref<8x8x128xf32, #tpu.memory_space<vmem>>, vector<1x8x128xf32>,
    %c5_i32_177 = arith.constant 5 : i32
    %cst_178 = arith.constant dense<0.000000e+00> : vector<8x512xf32>
    %594 = tpu.matmul %457, %463, %cst_178 {dimension_numbers = #tpu.dot_dimension_numbers<[1], [0], [0], [1], [0, 0, 1, 1], [], []>} : vector<8x128xf32>, vector<128x512xf32>, vector<8x512xf32> -> vector<8x512xf32>
    %cst_179 = arith.constant dense<0.000000e+00> : vector<8x512xf32>
    %595 = tpu.matmul %589, %465, %cst_179 {dimension_numbers = #tpu.dot_dimension_numbers<[1], [0], [0], [1], [0, 0, 1, 1], [], []>} : vector<8x128xf32>, vector<128x512xf32>, vector<8x512xf32> -> vector<8x512xf32>
    %596 = arith.addf %594, %595 : vector<8x512xf32>
    %597 = vector.broadcast %467 : vector<1x512xf32> to vector<8x512xf32>
    %598 = arith.addf %596, %597 : vector<8x512xf32>
    %599 = vector.extract_strided_slice %598 {offsets = [0, 0], sizes = [8, 384], strides = [1, 1]} : vector<8x512xf32> to vector<8x384xf32>
    %600 = arith.negf %599 : vector<8x384xf32>
    %601 = math.exp %600 : vector<8x384xf32>
    %cst_180 = arith.constant 1.000000e+00 : f32
    %602 = vector.broadcast %cst_180 : f32 to vector<8x384xf32>
    %603 = arith.addf %602, %601 : vector<8x384xf32>
    %604 = arith.divf %602, %603 : vector<8x384xf32>
    %605 = vector.extract_strided_slice %598 {offsets = [0, 384], sizes = [8, 128], strides = [1, 1]} : vector<8x512xf32> to vector<8x128xf32>
    %606 = math.tanh %605 : vector<8x128xf32>
    %607 = vector.extract_strided_slice %604 {offsets = [0, 128], sizes = [8, 128], strides = [1, 1]} : vector<8x384xf32> to vector<8x128xf32>
    %608 = arith.mulf %607, %586 : vector<8x128xf32>
    %609 = vector.extract_strided_slice %604 {offsets = [0, 0], sizes = [8, 128], strides = [1, 1]} : vector<8x384xf32> to vector<8x128xf32>
    %610 = arith.mulf %609, %606 : vector<8x128xf32>
    %611 = arith.addf %608, %610 : vector<8x128xf32>
    %612 = vector.extract_strided_slice %604 {offsets = [0, 256], sizes = [8, 128], strides = [1, 1]} : vector<8x384xf32> to vector<8x128xf32>
    %613 = math.tanh %611 : vector<8x128xf32>
    %614 = arith.mulf %612, %613 : vector<8x128xf32>
    %615 = arith.index_cast %c5_i32_177 : i32 to index
    %c0_181 = arith.constant 0 : index
    %c0_182 = arith.constant 0 : index
    %616 = vector.load %arg4[%615, %c0_181, %c0_182] : memref<8x8x128xf32, #tpu.memory_space<vmem>>, vector<1x8x128xf32>
    %617 = vector.shape_cast %616 : vector<1x8x128xf32> to vector<8x128xf32>
    %618 = vector.shape_cast %614 : vector<8x128xf32> to vector<1x8x128xf32>
    tpu.vector_store %arg4[%615, %c0_181, %c0_182], %618 {strides = array<i32>} : memref<8x8x128xf32, #tpu.memory_space<vmem>>, vector<1x8x128xf32>,
    %c6_i32_183 = arith.constant 6 : i32
    %cst_184 = arith.constant dense<0.000000e+00> : vector<8x512xf32>
    %619 = tpu.matmul %457, %463, %cst_184 {dimension_numbers = #tpu.dot_dimension_numbers<[1], [0], [0], [1], [0, 0, 1, 1], [], []>} : vector<8x128xf32>, vector<128x512xf32>, vector<8x512xf32> -> vector<8x512xf32>
    %cst_185 = arith.constant dense<0.000000e+00> : vector<8x512xf32>
    %620 = tpu.matmul %614, %465, %cst_185 {dimension_numbers = #tpu.dot_dimension_numbers<[1], [0], [0], [1], [0, 0, 1, 1], [], []>} : vector<8x128xf32>, vector<128x512xf32>, vector<8x512xf32> -> vector<8x512xf32>
    %621 = arith.addf %619, %620 : vector<8x512xf32>
    %622 = vector.broadcast %467 : vector<1x512xf32> to vector<8x512xf32>
    %623 = arith.addf %621, %622 : vector<8x512xf32>
    %624 = vector.extract_strided_slice %623 {offsets = [0, 0], sizes = [8, 384], strides = [1, 1]} : vector<8x512xf32> to vector<8x384xf32>
    %625 = arith.negf %624 : vector<8x384xf32>
    %626 = math.exp %625 : vector<8x384xf32>
    %cst_186 = arith.constant 1.000000e+00 : f32
    %627 = vector.broadcast %cst_186 : f32 to vector<8x384xf32>
    %628 = arith.addf %627, %626 : vector<8x384xf32>
    %629 = arith.divf %627, %628 : vector<8x384xf32>
    %630 = vector.extract_strided_slice %623 {offsets = [0, 384], sizes = [8, 128], strides = [1, 1]} : vector<8x512xf32> to vector<8x128xf32>
    %631 = math.tanh %630 : vector<8x128xf32>
    %632 = vector.extract_strided_slice %629 {offsets = [0, 128], sizes = [8, 128], strides = [1, 1]} : vector<8x384xf32> to vector<8x128xf32>
    %633 = arith.mulf %632, %611 : vector<8x128xf32>
    %634 = vector.extract_strided_slice %629 {offsets = [0, 0], sizes = [8, 128], strides = [1, 1]} : vector<8x384xf32> to vector<8x128xf32>
    %635 = arith.mulf %634, %631 : vector<8x128xf32>
    %636 = arith.addf %633, %635 : vector<8x128xf32>
    %637 = vector.extract_strided_slice %629 {offsets = [0, 256], sizes = [8, 128], strides = [1, 1]} : vector<8x384xf32> to vector<8x128xf32>
    %638 = math.tanh %636 : vector<8x128xf32>
    %639 = arith.mulf %637, %638 : vector<8x128xf32>
    %640 = arith.index_cast %c6_i32_183 : i32 to index
    %c0_187 = arith.constant 0 : index
    %c0_188 = arith.constant 0 : index
    %641 = vector.load %arg4[%640, %c0_187, %c0_188] : memref<8x8x128xf32, #tpu.memory_space<vmem>>, vector<1x8x128xf32>
    %642 = vector.shape_cast %641 : vector<1x8x128xf32> to vector<8x128xf32>
    %643 = vector.shape_cast %639 : vector<8x128xf32> to vector<1x8x128xf32>
    tpu.vector_store %arg4[%640, %c0_187, %c0_188], %643 {strides = array<i32>} : memref<8x8x128xf32, #tpu.memory_space<vmem>>, vector<1x8x128xf32>,
    %c7_i32_189 = arith.constant 7 : i32
    %cst_190 = arith.constant dense<0.000000e+00> : vector<8x512xf32>
    %644 = tpu.matmul %457, %463, %cst_190 {dimension_numbers = #tpu.dot_dimension_numbers<[1], [0], [0], [1], [0, 0, 1, 1], [], []>} : vector<8x128xf32>, vector<128x512xf32>, vector<8x512xf32> -> vector<8x512xf32>
    %cst_191 = arith.constant dense<0.000000e+00> : vector<8x512xf32>
    %645 = tpu.matmul %639, %465, %cst_191 {dimension_numbers = #tpu.dot_dimension_numbers<[1], [0], [0], [1], [0, 0, 1, 1], [], []>} : vector<8x128xf32>, vector<128x512xf32>, vector<8x512xf32> -> vector<8x512xf32>
    %646 = arith.addf %644, %645 : vector<8x512xf32>
    %647 = vector.broadcast %467 : vector<1x512xf32> to vector<8x512xf32>
    %648 = arith.addf %646, %647 : vector<8x512xf32>
    %649 = vector.extract_strided_slice %648 {offsets = [0, 0], sizes = [8, 384], strides = [1, 1]} : vector<8x512xf32> to vector<8x384xf32>
    %650 = arith.negf %649 : vector<8x384xf32>
    %651 = math.exp %650 : vector<8x384xf32>
    %cst_192 = arith.constant 1.000000e+00 : f32
    %652 = vector.broadcast %cst_192 : f32 to vector<8x384xf32>
    %653 = arith.addf %652, %651 : vector<8x384xf32>
    %654 = arith.divf %652, %653 : vector<8x384xf32>
    %655 = vector.extract_strided_slice %648 {offsets = [0, 384], sizes = [8, 128], strides = [1, 1]} : vector<8x512xf32> to vector<8x128xf32>
    %656 = math.tanh %655 : vector<8x128xf32>
    %657 = vector.extract_strided_slice %654 {offsets = [0, 128], sizes = [8, 128], strides = [1, 1]} : vector<8x384xf32> to vector<8x128xf32>
    %658 = arith.mulf %657, %636 : vector<8x128xf32>
    %659 = vector.extract_strided_slice %654 {offsets = [0, 0], sizes = [8, 128], strides = [1, 1]} : vector<8x384xf32> to vector<8x128xf32>
    %660 = arith.mulf %659, %656 : vector<8x128xf32>
    %661 = arith.addf %658, %660 : vector<8x128xf32>
    %662 = vector.extract_strided_slice %654 {offsets = [0, 256], sizes = [8, 128], strides = [1, 1]} : vector<8x384xf32> to vector<8x128xf32>
    %663 = math.tanh %661 : vector<8x128xf32>
    %664 = arith.mulf %662, %663 : vector<8x128xf32>
    %665 = arith.index_cast %c7_i32_189 : i32 to index
    %c0_193 = arith.constant 0 : index
    %c0_194 = arith.constant 0 : index
    %666 = vector.load %arg4[%665, %c0_193, %c0_194] : memref<8x8x128xf32, #tpu.memory_space<vmem>>, vector<1x8x128xf32>
    %667 = vector.shape_cast %666 : vector<1x8x128xf32> to vector<8x128xf32>
    %668 = vector.shape_cast %664 : vector<8x128xf32> to vector<1x8x128xf32>
    tpu.vector_store %arg4[%665, %c0_193, %c0_194], %668 {strides = array<i32>} : memref<8x8x128xf32, #tpu.memory_space<vmem>>, vector<1x8x128xf32>,
    %c8_i32_195 = arith.constant 8 : i32
    %c3 = arith.constant 3 : index
    %c0_196 = arith.constant 0 : index
    %c0_197 = arith.constant 0 : index
    %669 = vector.load %arg1[%c3, %c0_196, %c0_197] : memref<4x128x512xf32, #tpu.memory_space<vmem>>, vector<1x128x512xf32>
    %670 = vector.shape_cast %669 : vector<1x128x512xf32> to vector<128x512xf32>
    %c3_198 = arith.constant 3 : index
    %c0_199 = arith.constant 0 : index
    %c0_200 = arith.constant 0 : index
    %671 = vector.load %arg2[%c3_198, %c0_199, %c0_200] : memref<4x128x512xf32, #tpu.memory_space<vmem>>, vector<1x128x512xf32>
    %672 = vector.shape_cast %671 : vector<1x128x512xf32> to vector<128x512xf32>
    %c3_201 = arith.constant 3 : index
    %c0_202 = arith.constant 0 : index
    %c0_203 = arith.constant 0 : index
    %673 = vector.load %arg3[%c3_201, %c0_202, %c0_203] : memref<4x1x512xf32, #tpu.memory_space<vmem>>, vector<1x1x512xf32>
    %674 = vector.shape_cast %673 : vector<1x1x512xf32> to vector<1x512xf32>
    %cst_204 = arith.constant 0.000000e+00 : f32
    %675 = vector.broadcast %cst_204 : f32 to vector<8x128xf32>
    %c0_i32_205 = arith.constant 0 : i32
    %676 = arith.index_cast %c0_i32_205 : i32 to index
    %c0_206 = arith.constant 0 : index
    %c0_207 = arith.constant 0 : index
    %677 = vector.load %arg4[%676, %c0_206, %c0_207] : memref<8x8x128xf32, #tpu.memory_space<vmem>>, vector<1x8x128xf32>
    %678 = vector.shape_cast %677 : vector<1x8x128xf32> to vector<8x128xf32>
    %cst_208 = arith.constant dense<0.000000e+00> : vector<8x512xf32>
    %679 = tpu.matmul %678, %670, %cst_208 {dimension_numbers = #tpu.dot_dimension_numbers<[1], [0], [0], [1], [0, 0, 1, 1], [], []>} : vector<8x128xf32>, vector<128x512xf32>, vector<8x512xf32> -> vector<8x512xf32>
    %cst_209 = arith.constant dense<0.000000e+00> : vector<8x512xf32>
    %680 = tpu.matmul %675, %672, %cst_209 {dimension_numbers = #tpu.dot_dimension_numbers<[1], [0], [0], [1], [0, 0, 1, 1], [], []>} : vector<8x128xf32>, vector<128x512xf32>, vector<8x512xf32> -> vector<8x512xf32>
    %681 = arith.addf %679, %680 : vector<8x512xf32>
    %682 = vector.broadcast %674 : vector<1x512xf32> to vector<8x512xf32>
    %683 = arith.addf %681, %682 : vector<8x512xf32>
    %684 = vector.extract_strided_slice %683 {offsets = [0, 0], sizes = [8, 384], strides = [1, 1]} : vector<8x512xf32> to vector<8x384xf32>
    %685 = arith.negf %684 : vector<8x384xf32>
    %686 = math.exp %685 : vector<8x384xf32>
    %cst_210 = arith.constant 1.000000e+00 : f32
    %687 = vector.broadcast %cst_210 : f32 to vector<8x384xf32>
    %688 = arith.addf %687, %686 : vector<8x384xf32>
    %689 = arith.divf %687, %688 : vector<8x384xf32>
    %690 = vector.extract_strided_slice %683 {offsets = [0, 384], sizes = [8, 128], strides = [1, 1]} : vector<8x512xf32> to vector<8x128xf32>
    %691 = math.tanh %690 : vector<8x128xf32>
    %692 = vector.extract_strided_slice %689 {offsets = [0, 128], sizes = [8, 128], strides = [1, 1]} : vector<8x384xf32> to vector<8x128xf32>
    %693 = arith.mulf %692, %675 : vector<8x128xf32>
    %694 = vector.extract_strided_slice %689 {offsets = [0, 0], sizes = [8, 128], strides = [1, 1]} : vector<8x384xf32> to vector<8x128xf32>
    %695 = arith.mulf %694, %691 : vector<8x128xf32>
    %696 = arith.addf %693, %695 : vector<8x128xf32>
    %697 = vector.extract_strided_slice %689 {offsets = [0, 256], sizes = [8, 128], strides = [1, 1]} : vector<8x384xf32> to vector<8x128xf32>
    %698 = math.tanh %696 : vector<8x128xf32>
    %699 = arith.mulf %697, %698 : vector<8x128xf32>
    %700 = arith.index_cast %c0_i32_205 : i32 to index
    %c0_211 = arith.constant 0 : index
    %c0_212 = arith.constant 0 : index
    %701 = vector.load %arg4[%700, %c0_211, %c0_212] : memref<8x8x128xf32, #tpu.memory_space<vmem>>, vector<1x8x128xf32>
    %702 = vector.shape_cast %701 : vector<1x8x128xf32> to vector<8x128xf32>
    %703 = vector.shape_cast %699 : vector<8x128xf32> to vector<1x8x128xf32>
    tpu.vector_store %arg4[%700, %c0_211, %c0_212], %703 {strides = array<i32>} : memref<8x8x128xf32, #tpu.memory_space<vmem>>, vector<1x8x128xf32>,
    %c1_i32_213 = arith.constant 1 : i32
    %704 = arith.index_cast %c1_i32_213 : i32 to index
    %c0_214 = arith.constant 0 : index
    %c0_215 = arith.constant 0 : index
    %705 = vector.load %arg4[%704, %c0_214, %c0_215] : memref<8x8x128xf32, #tpu.memory_space<vmem>>, vector<1x8x128xf32>
    %706 = vector.shape_cast %705 : vector<1x8x128xf32> to vector<8x128xf32>
    %cst_216 = arith.constant dense<0.000000e+00> : vector<8x512xf32>
    %707 = tpu.matmul %706, %670, %cst_216 {dimension_numbers = #tpu.dot_dimension_numbers<[1], [0], [0], [1], [0, 0, 1, 1], [], []>} : vector<8x128xf32>, vector<128x512xf32>, vector<8x512xf32> -> vector<8x512xf32>
    %cst_217 = arith.constant dense<0.000000e+00> : vector<8x512xf32>
    %708 = tpu.matmul %699, %672, %cst_217 {dimension_numbers = #tpu.dot_dimension_numbers<[1], [0], [0], [1], [0, 0, 1, 1], [], []>} : vector<8x128xf32>, vector<128x512xf32>, vector<8x512xf32> -> vector<8x512xf32>
    %709 = arith.addf %707, %708 : vector<8x512xf32>
    %710 = vector.broadcast %674 : vector<1x512xf32> to vector<8x512xf32>
    %711 = arith.addf %709, %710 : vector<8x512xf32>
    %712 = vector.extract_strided_slice %711 {offsets = [0, 0], sizes = [8, 384], strides = [1, 1]} : vector<8x512xf32> to vector<8x384xf32>
    %713 = arith.negf %712 : vector<8x384xf32>
    %714 = math.exp %713 : vector<8x384xf32>
    %cst_218 = arith.constant 1.000000e+00 : f32
    %715 = vector.broadcast %cst_218 : f32 to vector<8x384xf32>
    %716 = arith.addf %715, %714 : vector<8x384xf32>
    %717 = arith.divf %715, %716 : vector<8x384xf32>
    %718 = vector.extract_strided_slice %711 {offsets = [0, 384], sizes = [8, 128], strides = [1, 1]} : vector<8x512xf32> to vector<8x128xf32>
    %719 = math.tanh %718 : vector<8x128xf32>
    %720 = vector.extract_strided_slice %717 {offsets = [0, 128], sizes = [8, 128], strides = [1, 1]} : vector<8x384xf32> to vector<8x128xf32>
    %721 = arith.mulf %720, %696 : vector<8x128xf32>
    %722 = vector.extract_strided_slice %717 {offsets = [0, 0], sizes = [8, 128], strides = [1, 1]} : vector<8x384xf32> to vector<8x128xf32>
    %723 = arith.mulf %722, %719 : vector<8x128xf32>
    %724 = arith.addf %721, %723 : vector<8x128xf32>
    %725 = vector.extract_strided_slice %717 {offsets = [0, 256], sizes = [8, 128], strides = [1, 1]} : vector<8x384xf32> to vector<8x128xf32>
    %726 = math.tanh %724 : vector<8x128xf32>
    %727 = arith.mulf %725, %726 : vector<8x128xf32>
    %728 = arith.index_cast %c1_i32_213 : i32 to index
    %c0_219 = arith.constant 0 : index
    %c0_220 = arith.constant 0 : index
    %729 = vector.load %arg4[%728, %c0_219, %c0_220] : memref<8x8x128xf32, #tpu.memory_space<vmem>>, vector<1x8x128xf32>
    %730 = vector.shape_cast %729 : vector<1x8x128xf32> to vector<8x128xf32>
    %731 = vector.shape_cast %727 : vector<8x128xf32> to vector<1x8x128xf32>
    tpu.vector_store %arg4[%728, %c0_219, %c0_220], %731 {strides = array<i32>} : memref<8x8x128xf32, #tpu.memory_space<vmem>>, vector<1x8x128xf32>,
    %c2_i32_221 = arith.constant 2 : i32
    %732 = arith.index_cast %c2_i32_221 : i32 to index
    %c0_222 = arith.constant 0 : index
    %c0_223 = arith.constant 0 : index
    %733 = vector.load %arg4[%732, %c0_222, %c0_223] : memref<8x8x128xf32, #tpu.memory_space<vmem>>, vector<1x8x128xf32>
    %734 = vector.shape_cast %733 : vector<1x8x128xf32> to vector<8x128xf32>
    %cst_224 = arith.constant dense<0.000000e+00> : vector<8x512xf32>
    %735 = tpu.matmul %734, %670, %cst_224 {dimension_numbers = #tpu.dot_dimension_numbers<[1], [0], [0], [1], [0, 0, 1, 1], [], []>} : vector<8x128xf32>, vector<128x512xf32>, vector<8x512xf32> -> vector<8x512xf32>
    %cst_225 = arith.constant dense<0.000000e+00> : vector<8x512xf32>
    %736 = tpu.matmul %727, %672, %cst_225 {dimension_numbers = #tpu.dot_dimension_numbers<[1], [0], [0], [1], [0, 0, 1, 1], [], []>} : vector<8x128xf32>, vector<128x512xf32>, vector<8x512xf32> -> vector<8x512xf32>
    %737 = arith.addf %735, %736 : vector<8x512xf32>
    %738 = vector.broadcast %674 : vector<1x512xf32> to vector<8x512xf32>
    %739 = arith.addf %737, %738 : vector<8x512xf32>
    %740 = vector.extract_strided_slice %739 {offsets = [0, 0], sizes = [8, 384], strides = [1, 1]} : vector<8x512xf32> to vector<8x384xf32>
    %741 = arith.negf %740 : vector<8x384xf32>
    %742 = math.exp %741 : vector<8x384xf32>
    %cst_226 = arith.constant 1.000000e+00 : f32
    %743 = vector.broadcast %cst_226 : f32 to vector<8x384xf32>
    %744 = arith.addf %743, %742 : vector<8x384xf32>
    %745 = arith.divf %743, %744 : vector<8x384xf32>
    %746 = vector.extract_strided_slice %739 {offsets = [0, 384], sizes = [8, 128], strides = [1, 1]} : vector<8x512xf32> to vector<8x128xf32>
    %747 = math.tanh %746 : vector<8x128xf32>
    %748 = vector.extract_strided_slice %745 {offsets = [0, 128], sizes = [8, 128], strides = [1, 1]} : vector<8x384xf32> to vector<8x128xf32>
    %749 = arith.mulf %748, %724 : vector<8x128xf32>
    %750 = vector.extract_strided_slice %745 {offsets = [0, 0], sizes = [8, 128], strides = [1, 1]} : vector<8x384xf32> to vector<8x128xf32>
    %751 = arith.mulf %750, %747 : vector<8x128xf32>
    %752 = arith.addf %749, %751 : vector<8x128xf32>
    %753 = vector.extract_strided_slice %745 {offsets = [0, 256], sizes = [8, 128], strides = [1, 1]} : vector<8x384xf32> to vector<8x128xf32>
    %754 = math.tanh %752 : vector<8x128xf32>
    %755 = arith.mulf %753, %754 : vector<8x128xf32>
    %756 = arith.index_cast %c2_i32_221 : i32 to index
    %c0_227 = arith.constant 0 : index
    %c0_228 = arith.constant 0 : index
    %757 = vector.load %arg4[%756, %c0_227, %c0_228] : memref<8x8x128xf32, #tpu.memory_space<vmem>>, vector<1x8x128xf32>
    %758 = vector.shape_cast %757 : vector<1x8x128xf32> to vector<8x128xf32>
    %759 = vector.shape_cast %755 : vector<8x128xf32> to vector<1x8x128xf32>
    tpu.vector_store %arg4[%756, %c0_227, %c0_228], %759 {strides = array<i32>} : memref<8x8x128xf32, #tpu.memory_space<vmem>>, vector<1x8x128xf32>,
    %c3_i32_229 = arith.constant 3 : i32
    %760 = arith.index_cast %c3_i32_229 : i32 to index
    %c0_230 = arith.constant 0 : index
    %c0_231 = arith.constant 0 : index
    %761 = vector.load %arg4[%760, %c0_230, %c0_231] : memref<8x8x128xf32, #tpu.memory_space<vmem>>, vector<1x8x128xf32>
    %762 = vector.shape_cast %761 : vector<1x8x128xf32> to vector<8x128xf32>
    %cst_232 = arith.constant dense<0.000000e+00> : vector<8x512xf32>
    %763 = tpu.matmul %762, %670, %cst_232 {dimension_numbers = #tpu.dot_dimension_numbers<[1], [0], [0], [1], [0, 0, 1, 1], [], []>} : vector<8x128xf32>, vector<128x512xf32>, vector<8x512xf32> -> vector<8x512xf32>
    %cst_233 = arith.constant dense<0.000000e+00> : vector<8x512xf32>
    %764 = tpu.matmul %755, %672, %cst_233 {dimension_numbers = #tpu.dot_dimension_numbers<[1], [0], [0], [1], [0, 0, 1, 1], [], []>} : vector<8x128xf32>, vector<128x512xf32>, vector<8x512xf32> -> vector<8x512xf32>
    %765 = arith.addf %763, %764 : vector<8x512xf32>
    %766 = vector.broadcast %674 : vector<1x512xf32> to vector<8x512xf32>
    %767 = arith.addf %765, %766 : vector<8x512xf32>
    %768 = vector.extract_strided_slice %767 {offsets = [0, 0], sizes = [8, 384], strides = [1, 1]} : vector<8x512xf32> to vector<8x384xf32>
    %769 = arith.negf %768 : vector<8x384xf32>
    %770 = math.exp %769 : vector<8x384xf32>
    %cst_234 = arith.constant 1.000000e+00 : f32
    %771 = vector.broadcast %cst_234 : f32 to vector<8x384xf32>
    %772 = arith.addf %771, %770 : vector<8x384xf32>
    %773 = arith.divf %771, %772 : vector<8x384xf32>
    %774 = vector.extract_strided_slice %767 {offsets = [0, 384], sizes = [8, 128], strides = [1, 1]} : vector<8x512xf32> to vector<8x128xf32>
    %775 = math.tanh %774 : vector<8x128xf32>
    %776 = vector.extract_strided_slice %773 {offsets = [0, 128], sizes = [8, 128], strides = [1, 1]} : vector<8x384xf32> to vector<8x128xf32>
    %777 = arith.mulf %776, %752 : vector<8x128xf32>
    %778 = vector.extract_strided_slice %773 {offsets = [0, 0], sizes = [8, 128], strides = [1, 1]} : vector<8x384xf32> to vector<8x128xf32>
    %779 = arith.mulf %778, %775 : vector<8x128xf32>
    %780 = arith.addf %777, %779 : vector<8x128xf32>
    %781 = vector.extract_strided_slice %773 {offsets = [0, 256], sizes = [8, 128], strides = [1, 1]} : vector<8x384xf32> to vector<8x128xf32>
    %782 = math.tanh %780 : vector<8x128xf32>
    %783 = arith.mulf %781, %782 : vector<8x128xf32>
    %784 = arith.index_cast %c3_i32_229 : i32 to index
    %c0_235 = arith.constant 0 : index
    %c0_236 = arith.constant 0 : index
    %785 = vector.load %arg4[%784, %c0_235, %c0_236] : memref<8x8x128xf32, #tpu.memory_space<vmem>>, vector<1x8x128xf32>
    %786 = vector.shape_cast %785 : vector<1x8x128xf32> to vector<8x128xf32>
    %787 = vector.shape_cast %783 : vector<8x128xf32> to vector<1x8x128xf32>
    tpu.vector_store %arg4[%784, %c0_235, %c0_236], %787 {strides = array<i32>} : memref<8x8x128xf32, #tpu.memory_space<vmem>>, vector<1x8x128xf32>,
    %c4_i32_237 = arith.constant 4 : i32
    %788 = arith.index_cast %c4_i32_237 : i32 to index
    %c0_238 = arith.constant 0 : index
    %c0_239 = arith.constant 0 : index
    %789 = vector.load %arg4[%788, %c0_238, %c0_239] : memref<8x8x128xf32, #tpu.memory_space<vmem>>, vector<1x8x128xf32>
    %790 = vector.shape_cast %789 : vector<1x8x128xf32> to vector<8x128xf32>
    %cst_240 = arith.constant dense<0.000000e+00> : vector<8x512xf32>
    %791 = tpu.matmul %790, %670, %cst_240 {dimension_numbers = #tpu.dot_dimension_numbers<[1], [0], [0], [1], [0, 0, 1, 1], [], []>} : vector<8x128xf32>, vector<128x512xf32>, vector<8x512xf32> -> vector<8x512xf32>
    %cst_241 = arith.constant dense<0.000000e+00> : vector<8x512xf32>
    %792 = tpu.matmul %783, %672, %cst_241 {dimension_numbers = #tpu.dot_dimension_numbers<[1], [0], [0], [1], [0, 0, 1, 1], [], []>} : vector<8x128xf32>, vector<128x512xf32>, vector<8x512xf32> -> vector<8x512xf32>
    %793 = arith.addf %791, %792 : vector<8x512xf32>
    %794 = vector.broadcast %674 : vector<1x512xf32> to vector<8x512xf32>
    %795 = arith.addf %793, %794 : vector<8x512xf32>
    %796 = vector.extract_strided_slice %795 {offsets = [0, 0], sizes = [8, 384], strides = [1, 1]} : vector<8x512xf32> to vector<8x384xf32>
    %797 = arith.negf %796 : vector<8x384xf32>
    %798 = math.exp %797 : vector<8x384xf32>
    %cst_242 = arith.constant 1.000000e+00 : f32
    %799 = vector.broadcast %cst_242 : f32 to vector<8x384xf32>
    %800 = arith.addf %799, %798 : vector<8x384xf32>
    %801 = arith.divf %799, %800 : vector<8x384xf32>
    %802 = vector.extract_strided_slice %795 {offsets = [0, 384], sizes = [8, 128], strides = [1, 1]} : vector<8x512xf32> to vector<8x128xf32>
    %803 = math.tanh %802 : vector<8x128xf32>
    %804 = vector.extract_strided_slice %801 {offsets = [0, 128], sizes = [8, 128], strides = [1, 1]} : vector<8x384xf32> to vector<8x128xf32>
    %805 = arith.mulf %804, %780 : vector<8x128xf32>
    %806 = vector.extract_strided_slice %801 {offsets = [0, 0], sizes = [8, 128], strides = [1, 1]} : vector<8x384xf32> to vector<8x128xf32>
    %807 = arith.mulf %806, %803 : vector<8x128xf32>
    %808 = arith.addf %805, %807 : vector<8x128xf32>
    %809 = vector.extract_strided_slice %801 {offsets = [0, 256], sizes = [8, 128], strides = [1, 1]} : vector<8x384xf32> to vector<8x128xf32>
    %810 = math.tanh %808 : vector<8x128xf32>
    %811 = arith.mulf %809, %810 : vector<8x128xf32>
    %812 = arith.index_cast %c4_i32_237 : i32 to index
    %c0_243 = arith.constant 0 : index
    %c0_244 = arith.constant 0 : index
    %813 = vector.load %arg4[%812, %c0_243, %c0_244] : memref<8x8x128xf32, #tpu.memory_space<vmem>>, vector<1x8x128xf32>
    %814 = vector.shape_cast %813 : vector<1x8x128xf32> to vector<8x128xf32>
    %815 = vector.shape_cast %811 : vector<8x128xf32> to vector<1x8x128xf32>
    tpu.vector_store %arg4[%812, %c0_243, %c0_244], %815 {strides = array<i32>} : memref<8x8x128xf32, #tpu.memory_space<vmem>>, vector<1x8x128xf32>,
    %c5_i32_245 = arith.constant 5 : i32
    %816 = arith.index_cast %c5_i32_245 : i32 to index
    %c0_246 = arith.constant 0 : index
    %c0_247 = arith.constant 0 : index
    %817 = vector.load %arg4[%816, %c0_246, %c0_247] : memref<8x8x128xf32, #tpu.memory_space<vmem>>, vector<1x8x128xf32>
    %818 = vector.shape_cast %817 : vector<1x8x128xf32> to vector<8x128xf32>
    %cst_248 = arith.constant dense<0.000000e+00> : vector<8x512xf32>
    %819 = tpu.matmul %818, %670, %cst_248 {dimension_numbers = #tpu.dot_dimension_numbers<[1], [0], [0], [1], [0, 0, 1, 1], [], []>} : vector<8x128xf32>, vector<128x512xf32>, vector<8x512xf32> -> vector<8x512xf32>
    %cst_249 = arith.constant dense<0.000000e+00> : vector<8x512xf32>
    %820 = tpu.matmul %811, %672, %cst_249 {dimension_numbers = #tpu.dot_dimension_numbers<[1], [0], [0], [1], [0, 0, 1, 1], [], []>} : vector<8x128xf32>, vector<128x512xf32>, vector<8x512xf32> -> vector<8x512xf32>
    %821 = arith.addf %819, %820 : vector<8x512xf32>
    %822 = vector.broadcast %674 : vector<1x512xf32> to vector<8x512xf32>
    %823 = arith.addf %821, %822 : vector<8x512xf32>
    %824 = vector.extract_strided_slice %823 {offsets = [0, 0], sizes = [8, 384], strides = [1, 1]} : vector<8x512xf32> to vector<8x384xf32>
    %825 = arith.negf %824 : vector<8x384xf32>
    %826 = math.exp %825 : vector<8x384xf32>
    %cst_250 = arith.constant 1.000000e+00 : f32
    %827 = vector.broadcast %cst_250 : f32 to vector<8x384xf32>
    %828 = arith.addf %827, %826 : vector<8x384xf32>
    %829 = arith.divf %827, %828 : vector<8x384xf32>
    %830 = vector.extract_strided_slice %823 {offsets = [0, 384], sizes = [8, 128], strides = [1, 1]} : vector<8x512xf32> to vector<8x128xf32>
    %831 = math.tanh %830 : vector<8x128xf32>
    %832 = vector.extract_strided_slice %829 {offsets = [0, 128], sizes = [8, 128], strides = [1, 1]} : vector<8x384xf32> to vector<8x128xf32>
    %833 = arith.mulf %832, %808 : vector<8x128xf32>
    %834 = vector.extract_strided_slice %829 {offsets = [0, 0], sizes = [8, 128], strides = [1, 1]} : vector<8x384xf32> to vector<8x128xf32>
    %835 = arith.mulf %834, %831 : vector<8x128xf32>
    %836 = arith.addf %833, %835 : vector<8x128xf32>
    %837 = vector.extract_strided_slice %829 {offsets = [0, 256], sizes = [8, 128], strides = [1, 1]} : vector<8x384xf32> to vector<8x128xf32>
    %838 = math.tanh %836 : vector<8x128xf32>
    %839 = arith.mulf %837, %838 : vector<8x128xf32>
    %840 = arith.index_cast %c5_i32_245 : i32 to index
    %c0_251 = arith.constant 0 : index
    %c0_252 = arith.constant 0 : index
    %841 = vector.load %arg4[%840, %c0_251, %c0_252] : memref<8x8x128xf32, #tpu.memory_space<vmem>>, vector<1x8x128xf32>
    %842 = vector.shape_cast %841 : vector<1x8x128xf32> to vector<8x128xf32>
    %843 = vector.shape_cast %839 : vector<8x128xf32> to vector<1x8x128xf32>
    tpu.vector_store %arg4[%840, %c0_251, %c0_252], %843 {strides = array<i32>} : memref<8x8x128xf32, #tpu.memory_space<vmem>>, vector<1x8x128xf32>,
    %c6_i32_253 = arith.constant 6 : i32
    %844 = arith.index_cast %c6_i32_253 : i32 to index
    %c0_254 = arith.constant 0 : index
    %c0_255 = arith.constant 0 : index
    %845 = vector.load %arg4[%844, %c0_254, %c0_255] : memref<8x8x128xf32, #tpu.memory_space<vmem>>, vector<1x8x128xf32>
    %846 = vector.shape_cast %845 : vector<1x8x128xf32> to vector<8x128xf32>
    %cst_256 = arith.constant dense<0.000000e+00> : vector<8x512xf32>
    %847 = tpu.matmul %846, %670, %cst_256 {dimension_numbers = #tpu.dot_dimension_numbers<[1], [0], [0], [1], [0, 0, 1, 1], [], []>} : vector<8x128xf32>, vector<128x512xf32>, vector<8x512xf32> -> vector<8x512xf32>
    %cst_257 = arith.constant dense<0.000000e+00> : vector<8x512xf32>
    %848 = tpu.matmul %839, %672, %cst_257 {dimension_numbers = #tpu.dot_dimension_numbers<[1], [0], [0], [1], [0, 0, 1, 1], [], []>} : vector<8x128xf32>, vector<128x512xf32>, vector<8x512xf32> -> vector<8x512xf32>
    %849 = arith.addf %847, %848 : vector<8x512xf32>
    %850 = vector.broadcast %674 : vector<1x512xf32> to vector<8x512xf32>
    %851 = arith.addf %849, %850 : vector<8x512xf32>
    %852 = vector.extract_strided_slice %851 {offsets = [0, 0], sizes = [8, 384], strides = [1, 1]} : vector<8x512xf32> to vector<8x384xf32>
    %853 = arith.negf %852 : vector<8x384xf32>
    %854 = math.exp %853 : vector<8x384xf32>
    %cst_258 = arith.constant 1.000000e+00 : f32
    %855 = vector.broadcast %cst_258 : f32 to vector<8x384xf32>
    %856 = arith.addf %855, %854 : vector<8x384xf32>
    %857 = arith.divf %855, %856 : vector<8x384xf32>
    %858 = vector.extract_strided_slice %851 {offsets = [0, 384], sizes = [8, 128], strides = [1, 1]} : vector<8x512xf32> to vector<8x128xf32>
    %859 = math.tanh %858 : vector<8x128xf32>
    %860 = vector.extract_strided_slice %857 {offsets = [0, 128], sizes = [8, 128], strides = [1, 1]} : vector<8x384xf32> to vector<8x128xf32>
    %861 = arith.mulf %860, %836 : vector<8x128xf32>
    %862 = vector.extract_strided_slice %857 {offsets = [0, 0], sizes = [8, 128], strides = [1, 1]} : vector<8x384xf32> to vector<8x128xf32>
    %863 = arith.mulf %862, %859 : vector<8x128xf32>
    %864 = arith.addf %861, %863 : vector<8x128xf32>
    %865 = vector.extract_strided_slice %857 {offsets = [0, 256], sizes = [8, 128], strides = [1, 1]} : vector<8x384xf32> to vector<8x128xf32>
    %866 = math.tanh %864 : vector<8x128xf32>
    %867 = arith.mulf %865, %866 : vector<8x128xf32>
    %868 = arith.index_cast %c6_i32_253 : i32 to index
    %c0_259 = arith.constant 0 : index
    %c0_260 = arith.constant 0 : index
    %869 = vector.load %arg4[%868, %c0_259, %c0_260] : memref<8x8x128xf32, #tpu.memory_space<vmem>>, vector<1x8x128xf32>
    %870 = vector.shape_cast %869 : vector<1x8x128xf32> to vector<8x128xf32>
    %871 = vector.shape_cast %867 : vector<8x128xf32> to vector<1x8x128xf32>
    tpu.vector_store %arg4[%868, %c0_259, %c0_260], %871 {strides = array<i32>} : memref<8x8x128xf32, #tpu.memory_space<vmem>>, vector<1x8x128xf32>,
    %c7_i32_261 = arith.constant 7 : i32
    %872 = arith.index_cast %c7_i32_261 : i32 to index
    %c0_262 = arith.constant 0 : index
    %c0_263 = arith.constant 0 : index
    %873 = vector.load %arg4[%872, %c0_262, %c0_263] : memref<8x8x128xf32, #tpu.memory_space<vmem>>, vector<1x8x128xf32>
    %874 = vector.shape_cast %873 : vector<1x8x128xf32> to vector<8x128xf32>
    %cst_264 = arith.constant dense<0.000000e+00> : vector<8x512xf32>
    %875 = tpu.matmul %874, %670, %cst_264 {dimension_numbers = #tpu.dot_dimension_numbers<[1], [0], [0], [1], [0, 0, 1, 1], [], []>} : vector<8x128xf32>, vector<128x512xf32>, vector<8x512xf32> -> vector<8x512xf32>
    %cst_265 = arith.constant dense<0.000000e+00> : vector<8x512xf32>
    %876 = tpu.matmul %867, %672, %cst_265 {dimension_numbers = #tpu.dot_dimension_numbers<[1], [0], [0], [1], [0, 0, 1, 1], [], []>} : vector<8x128xf32>, vector<128x512xf32>, vector<8x512xf32> -> vector<8x512xf32>
    %877 = arith.addf %875, %876 : vector<8x512xf32>
    %878 = vector.broadcast %674 : vector<1x512xf32> to vector<8x512xf32>
    %879 = arith.addf %877, %878 : vector<8x512xf32>
    %880 = vector.extract_strided_slice %879 {offsets = [0, 0], sizes = [8, 384], strides = [1, 1]} : vector<8x512xf32> to vector<8x384xf32>
    %881 = arith.negf %880 : vector<8x384xf32>
    %882 = math.exp %881 : vector<8x384xf32>
    %cst_266 = arith.constant 1.000000e+00 : f32
    %883 = vector.broadcast %cst_266 : f32 to vector<8x384xf32>
    %884 = arith.addf %883, %882 : vector<8x384xf32>
    %885 = arith.divf %883, %884 : vector<8x384xf32>
    %886 = vector.extract_strided_slice %879 {offsets = [0, 384], sizes = [8, 128], strides = [1, 1]} : vector<8x512xf32> to vector<8x128xf32>
    %887 = math.tanh %886 : vector<8x128xf32>
    %888 = vector.extract_strided_slice %885 {offsets = [0, 128], sizes = [8, 128], strides = [1, 1]} : vector<8x384xf32> to vector<8x128xf32>
    %889 = arith.mulf %888, %864 : vector<8x128xf32>
    %890 = vector.extract_strided_slice %885 {offsets = [0, 0], sizes = [8, 128], strides = [1, 1]} : vector<8x384xf32> to vector<8x128xf32>
    %891 = arith.mulf %890, %887 : vector<8x128xf32>
    %892 = arith.addf %889, %891 : vector<8x128xf32>
    %893 = vector.extract_strided_slice %885 {offsets = [0, 256], sizes = [8, 128], strides = [1, 1]} : vector<8x384xf32> to vector<8x128xf32>
    %894 = math.tanh %892 : vector<8x128xf32>
    %895 = arith.mulf %893, %894 : vector<8x128xf32>
    %896 = arith.index_cast %c7_i32_261 : i32 to index
    %c0_267 = arith.constant 0 : index
    %c0_268 = arith.constant 0 : index
    %897 = vector.load %arg4[%896, %c0_267, %c0_268] : memref<8x8x128xf32, #tpu.memory_space<vmem>>, vector<1x8x128xf32>
    %898 = vector.shape_cast %897 : vector<1x8x128xf32> to vector<8x128xf32>
    %899 = vector.shape_cast %895 : vector<8x128xf32> to vector<1x8x128xf32>
    tpu.vector_store %arg4[%896, %c0_267, %c0_268], %899 {strides = array<i32>} : memref<8x8x128xf32, #tpu.memory_space<vmem>>, vector<1x8x128xf32>,
    %c8_i32_269 = arith.constant 8 : i32
    return
  }
}

</mosaic_0001>

<bundles_post_ra>
// kernel: recurrent_autoencoder_forward.1
= control target key start
LH: loop header
LB: loop body
LE: loop exit
PB: predicated region body
PF: predicated region fallthrough
CT: control target
= control target key end

     0   :  { %9 = vsyncpa [#allocation3], 0  ;;  %s18871_s0 = inlined_call_operand.vmem [shape: f32[8,8,128], index: 0, kind: input, shape index: {}]   ;;  %s18872_s1 = inlined_call_operand.hbm [shape: f32[4,128,512], index: 1, kind: input, shape index: {}]   ;;  %s18873_s2 = inlined_call_operand.hbm [shape: f32[4,128,512], index: 2, kind: input, shape index: {}]   ;;  %s18874_s3 = inlined_call_operand.vmem [shape: f32[4,1,512], index: 3, kind: input, shape index: {}]   ;;  %s18875_s4 = inlined_call_operand.vmem [shape: f32[8,8,128], index: 4, kind: output, shape index: {}]  }
   0x1   :  { %10 = vsyncpa [#allocation5], 0  ;;  %s15651_s15 = smov [#allocation2]   ;;  %s15603_s19 = scalar_lea.hbm %s18872_s1, 32768 }
   0x2   :  { %s18_s16 = sshll.u32 %s15651_s15, 4  ;;  %p15604_p0 = scmp.ne.s32.totalorder %s18872_s1, %s15603_s19  ;;  %s19_s16 = int_to_ptr.vmem [resolvable:$true] %s18_s16 }
   0x3   :  { %p15607_p1 = scmp.lt.u32.totalorder %s15603_s19, %s18872_s1 }
   0x5   :  { %p15609_p2 = pnand %p15607_p1, %p15604_p0 }
   0x7   :  { %15612 = shalt.err (!%p15609_p2)
}
   0x8   :  { %s15613_s24 = scalar_lea.vmem %s19_s16, 32768  ;;  %p15618_p4 = scmp.lt.s32.totalorder %s19_s16, %s19_s16 }
   0x9   :  { %p15614_p3 = scmp.ne.s32.totalorder %s19_s16, %s15613_s24  ;;  %p15619_p5 = scmp.lt.s32.totalorder %s15613_s24, %s15613_s24 }
   0xb   :  { %p15620_p6 = por %p15619_p5, %p15618_p4 }
   0xd   :  { %p15621_p7 = pnand %p15620_p6, %p15614_p3 }
   0xf   :  { %15624 = shalt.err (!%p15621_p7)
}
  0x10   :  { %s15652_s25 = smov 512   ;;  %s15653_s26 = smov 32  }
  0x11   :  { %24 = dma.hbm_to_vmem [thread:$0]  %s18872_s1, 32768, %s19_s16, [#allocation3], %s15652_s25, %s15652_s25, %s15653_s26  }
  0x12   :  { %s15654_s29 = smov [#allocation4]   ;;  %s15625_s7 = scalar_lea.hbm %s18873_s2, 32768 }
  0x13   :  { %s30_s30 = sshll.u32 %s15654_s29, 4  ;;  %p15626_p8 = scmp.ne.s32.totalorder %s18873_s2, %s15625_s7  ;;  %s31_s30 = int_to_ptr.vmem [resolvable:$true] %s30_s30 }
  0x14   :  { %p15629_p9 = scmp.lt.u32.totalorder %s15625_s7, %s18873_s2 }
  0x16   :  { %p15631_p10 = pnand %p15629_p9, %p15626_p8 }
  0x18   :  { %15634 = shalt.err (!%p15631_p10)
}
  0x19   :  { %s15635_s12 = scalar_lea.vmem %s31_s30, 32768  ;;  %p15640_p12 = scmp.lt.s32.totalorder %s31_s30, %s31_s30 }
  0x1a   :  { %p15636_p11 = scmp.ne.s32.totalorder %s31_s30, %s15635_s12  ;;  %p15641_p13 = scmp.lt.s32.totalorder %s15635_s12, %s15635_s12 }
  0x1c   :  { %p15642_p0 = por %p15641_p13, %p15640_p12 }
  0x1e   :  { %p15643_p1 = pnand %p15642_p0, %p15636_p11 }
  0x20   :  { %15646 = shalt.err (!%p15643_p1)
}
  0x21   :  { %36 = dma.hbm_to_vmem [thread:$0]  %s18873_s2, 32768, %s31_s30, [#allocation5], %s15652_s25, %s15652_s25, %s15653_s26  }
  0x22   :  { %15647 = dma.done.wait [#allocation3], 32768  }
  0x23   :  { %15648 = vsyncadd [#allocation3], 4294934528 }
  0x24   :  { %15649 = dma.done.wait [#allocation5], 32768  }
  0x25   :  { %15650 = vsyncadd [#allocation5], 4294934528  ;;  %v18876_v0 = vmov 0.0   ;;  %v110_v1 = vld [vmem:[#allocation4 + $0x8] sm:$0xff]  ;;  %v112_v3 = vld [vmem:[#allocation4 + $0x18] sm:$0xff] }
  0x26   :  { %239 = vmatprep.mubr.f32.mxu0 %v18876_v0  ;;  %310 = vmatprep.mubr.f32.mxu1 %v18876_v0  ;;  %v114_v2 = vld [vmem:[#allocation4 + $0x28] sm:$0xff]  ;;  %v116_v5 = vld [vmem:[#allocation4 + $0x38] sm:$0xff]  ;;  %v109_v6 = vld [vmem:[#allocation4] sm:$0xff] }
  0x27   :  { %v15707_v4 = vpack.c.bf16 %v114_v2, %v110_v1  ;;  %v113_v7 = vld [vmem:[#allocation4 + $0x20] sm:$0xff]  ;;  %v15709_v8 = vpack.c.bf16 %v116_v5, %v112_v3  ;;  %v111_v10 = vld [vmem:[#allocation4 + $0x10] sm:$0xff]  ;;  %v118_v12 = vld [vmem:[#allocation4 + $0x48] sm:$0xff] }
  0x28   :  { %v15711_v9 = vpack.c.bf16 %v113_v7, %v109_v6  ;;  %v115_v11 = vld [vmem:[#allocation4 + $0x30] sm:$0xff]  ;;  %v122_v14 = vld [vmem:[#allocation4 + $0x68] sm:$0xff]  ;;  %v120_v15 = vld [vmem:[#allocation4 + $0x58] sm:$0xff] }
  0x29   :  { %10863 = vmatprep.subr.bf16.mxu0 %v15707_v4  ;;  %v15714_v13 = vpack.c.bf16 %v115_v11, %v111_v10  ;;  %v124_v16 = vld [vmem:[#allocation4 + $0x78] sm:$0xff]  ;;  %10895 = vmatprep.subr.bf16.mxu1 %v15709_v8  ;;  %v15718_v17 = vpack.c.bf16 %v122_v14, %v118_v12  ;;  %v117_v19 = vld [vmem:[#allocation4 + $0x40] sm:$0xff]  ;;  %v119_v21 = vld [vmem:[#allocation4 + $0x50] sm:$0xff] }
  0x2a   :  { %10865 = vmatpush1.bf16.msra.mxu0 %v15711_v9  ;;  %v15720_v18 = vpack.c.bf16 %v124_v16, %v120_v15  ;;  %v121_v20 = vld [vmem:[#allocation4 + $0x60] sm:$0xff]  ;;  %v123_v23 = vld [vmem:[#allocation4 + $0x70] sm:$0xff]  ;;  %v126_v24 = vld [vmem:[#allocation4 + $0x88] sm:$0xff] }
  0x2b   :  { %10897 = vmatpush1.bf16.msra.mxu1 %v15714_v13  ;;  %v15723_v22 = vpack.c.bf16 %v121_v20, %v117_v19  ;;  %v130_v25 = vld [vmem:[#allocation4 + $0xa8] sm:$0xff]  ;;  %10867 = vmatprep.subr.bf16.mxu0 %v15718_v17  ;;  %v15727_v26 = vpack.c.bf16 %v123_v23, %v119_v21  ;;  %v128_v28 = vld [vmem:[#allocation4 + $0x98] sm:$0xff]  ;;  %v125_v30 = vld [vmem:[#allocation4 + $0x80] sm:$0xff] }
  0x2c   :  { %10899 = vmatprep.subr.bf16.mxu1 %v15720_v18  ;;  %v15729_v27 = vpack.c.bf16 %v130_v25, %v126_v24  ;;  %v132_v29 = vld [vmem:[#allocation4 + $0xb8] sm:$0xff]  ;;  %v129_v32 = vld [vmem:[#allocation4 + $0xa0] sm:$0xff]  ;;  %v127_v33 = vld [vmem:[#allocation4 + $0x90] sm:$0xff] }
  0x2d   :  { %v15731_v31 = vpack.c.bf16 %v132_v29, %v128_v28  ;;  %v131_v34 = vld [vmem:[#allocation4 + $0xb0] sm:$0xff]  ;;  %v15734_v35 = vpack.c.bf16 %v129_v32, %v125_v30  ;;  %v134_v36 = vld [vmem:[#allocation4 + $0xc8] sm:$0xff]  ;;  %v136_v38 = vld [vmem:[#allocation4 + $0xd8] sm:$0xff] }
  0x2e   :  { %10869 = vmatpush1.bf16.msra.mxu0 %v15723_v22  ;;  %v138_v37 = vld [vmem:[#allocation4 + $0xe8] sm:$0xff]  ;;  %v15738_v39 = vpack.c.bf16 %v131_v34, %v127_v33  ;;  %v140_v41 = vld [vmem:[#allocation4 + $0xf8] sm:$0xff]  ;;  %v133_v42 = vld [vmem:[#allocation4 + $0xc0] sm:$0xff] }
  0x2f   :  { %10901 = vmatpush1.bf16.msra.mxu1 %v15727_v26  ;;  %10871 = vmatprep.subr.bf16.mxu0 %v15729_v27  ;;  %v15740_v40 = vpack.c.bf16 %v138_v37, %v134_v36  ;;  %v137_v43 = vld [vmem:[#allocation4 + $0xe0] sm:$0xff]  ;;  %v15743_v44 = vpack.c.bf16 %v140_v41, %v136_v38  ;;  %v135_v45 = vld [vmem:[#allocation4 + $0xd0] sm:$0xff]  ;;  %v142_v47 = vld [vmem:[#allocation4 + $0x108] sm:$0xff] }
  0x30   :  { %10903 = vmatprep.subr.bf16.mxu1 %v15731_v31  ;;  %v139_v46 = vld [vmem:[#allocation4 + $0xf0] sm:$0xff]  ;;  %v146_v48 = vld [vmem:[#allocation4 + $0x128] sm:$0xff]  ;;  %v144_v49 = vld [vmem:[#allocation4 + $0x118] sm:$0xff]  ;;  %v15746_v51 = vpack.c.bf16 %v137_v43, %v133_v42 }
  0x31   :  { %19204 = vst [vmem:[#allocation8_spill] sm:$0xff] %v15743_v44  ;;  %v148_v50 = vld [vmem:[#allocation4 + $0x138] sm:$0xff]  ;;  %v15750_v52 = vpack.c.bf16 %v139_v46, %v135_v45  ;;  %v15752_v53 = vpack.c.bf16 %v146_v48, %v142_v47  ;;  %v141_v54 = vld [vmem:[#allocation4 + $0x100] sm:$0xff]  ;;  %v143_v56 = vld [vmem:[#allocation4 + $0x110] sm:$0xff] }
  0x32   :  { %10873 = vmatpush1.bf16.msra.mxu0 %v15734_v35  ;;  %19205 = vst [vmem:[#allocation9_spill] sm:$0xff] %v15746_v51  ;;  %v145_v55 = vld [vmem:[#allocation4 + $0x120] sm:$0xff]  ;;  %v15755_v57 = vpack.c.bf16 %v148_v50, %v144_v49  ;;  %v147_v58 = vld [vmem:[#allocation4 + $0x130] sm:$0xff]  ;;  %v150_v59 = vld [vmem:[#allocation4 + $0x148] sm:$0xff] }
  0x33   :  { %10905 = vmatpush1.bf16.msra.mxu1 %v15738_v39  ;;  %10875 = vmatprep.subr.bf16.mxu0 %v15740_v40  ;;  %19206 = vst [vmem:[#allocation10_spill] sm:$0xff] %v15750_v52  ;;  %19207 = vst [vmem:[#allocation11_spill] sm:$0xff] %v15752_v53  ;;  %v154_v60 = vld [vmem:[#allocation4 + $0x168] sm:$0xff]  ;;  %v152_v61 = vld [vmem:[#allocation4 + $0x158] sm:$0xff]  ;;  %v15758_v63 = vpack.c.bf16 %v145_v55, %v141_v54  ;;  %v15762_v1 = vpack.c.bf16 %v147_v58, %v143_v56 }
  0x34   :  { %10907 = vmatprep.subr.bf16.mxu1 %v15743_v44  ;;  %19208 = vst [vmem:[#allocation12_spill] sm:$0xff] %v15755_v57  ;;  %v156_v62 = vld [vmem:[#allocation4 + $0x178] sm:$0xff]  ;;  %v15764_v2 = vpack.c.bf16 %v154_v60, %v150_v59  ;;  %v149_v3 = vld [vmem:[#allocation4 + $0x140] sm:$0xff]  ;;  %v151_v6 = vld [vmem:[#allocation4 + $0x150] sm:$0xff] }
  0x35   :  { %19209 = vst [vmem:[#allocation13_spill] sm:$0xff] %v15758_v63  ;;  %19210 = vst [vmem:[#allocation14_spill] sm:$0xff] %v15762_v1  ;;  %v153_v5 = vld [vmem:[#allocation4 + $0x160] sm:$0xff]  ;;  %v15767_v7 = vpack.c.bf16 %v156_v62, %v152_v61  ;;  %v155_v10 = vld [vmem:[#allocation4 + $0x170] sm:$0xff] }
  0x36   :  { %10877 = vmatpush1.bf16.msra.mxu0 %v15746_v51  ;;  %19211 = vst [vmem:[#allocation15_spill] sm:$0xff] %v15764_v2  ;;  %v158_v11 = vld [vmem:[#allocation4 + $0x188] sm:$0xff]  ;;  %v160_v14 = vld [vmem:[#allocation4 + $0x198] sm:$0xff]  ;;  %v15770_v16 = vpack.c.bf16 %v153_v5, %v149_v3  ;;  %v15774_v19 = vpack.c.bf16 %v155_v10, %v151_v6  ;;  %v157_v21 = vld [vmem:[#allocation4 + $0x180] sm:$0xff] }
  0x37   :  { %10909 = vmatpush1.bf16.msra.mxu1 %v15750_v52  ;;  %10879 = vmatprep.subr.bf16.mxu0 %v15752_v53  ;;  %19212 = vst [vmem:[#allocation16_spill] sm:$0xff] %v15767_v7  ;;  %v162_v12 = vld [vmem:[#allocation4 + $0x1a8] sm:$0xff]  ;;  %v164_v15 = vld [vmem:[#allocation4 + $0x1b8] sm:$0xff]  ;;  %v161_v23 = vld [vmem:[#allocation4 + $0x1a0] sm:$0xff] }
  0x38   :  { %10911 = vmatprep.subr.bf16.mxu1 %v15755_v57  ;;  %19213 = vst [vmem:[#allocation17_spill] sm:$0xff] %v15770_v16  ;;  %19214 = vst [vmem:[#allocation18_spill] sm:$0xff] %v15774_v19  ;;  %v15776_v20 = vpack.c.bf16 %v162_v12, %v158_v11  ;;  %v159_v24 = vld [vmem:[#allocation4 + $0x190] sm:$0xff]  ;;  %v15779_v25 = vpack.c.bf16 %v164_v15, %v160_v14  ;;  %v166_v29 = vld [vmem:[#allocation4 + $0x1c8] sm:$0xff]  ;;  %v15782_v34 = vpack.c.bf16 %v161_v23, %v157_v21 }
  0x39   :  { %v163_v28 = vld [vmem:[#allocation4 + $0x1b0] sm:$0xff]  ;;  %v170_v30 = vld [vmem:[#allocation4 + $0x1e8] sm:$0xff]  ;;  %v168_v32 = vld [vmem:[#allocation4 + $0x1d8] sm:$0xff] }
  0x3a   :  { %10881 = vmatpush1.bf16.msra.mxu0 %v15758_v63  ;;  %19215 = vst [vmem:[#allocation19_spill] sm:$0xff] %v15776_v20  ;;  %19216 = vst [vmem:[#allocation20_spill] sm:$0xff] %v15779_v25  ;;  %v172_v33 = vld [vmem:[#allocation4 + $0x1f8] sm:$0xff]  ;;  %v15786_v36 = vpack.c.bf16 %v163_v28, %v159_v24  ;;  %v15788_v37 = vpack.c.bf16 %v170_v30, %v166_v29  ;;  %v165_v38 = vld [vmem:[#allocation4 + $0x1c0] sm:$0xff] }
  0x3b   :  { %10913 = vmatpush1.bf16.msra.mxu1 %v15762_v1  ;;  %10883 = vmatprep.subr.bf16.mxu0 %v15764_v2  ;;  %19217 = vst [vmem:[#allocation21_spill] sm:$0xff] %v15782_v34  ;;  %v169_v41 = vld [vmem:[#allocation4 + $0x1e0] sm:$0xff]  ;;  %v167_v42 = vld [vmem:[#allocation4 + $0x1d0] sm:$0xff]  ;;  %v15791_v43 = vpack.c.bf16 %v172_v33, %v168_v32  ;;  %v46_v46 = vld [vmem:[#allocation2 + $0x8] sm:$0xff] }
  0x3c   :  { %10915 = vmatprep.subr.bf16.mxu1 %v15767_v7  ;;  %19218 = vst [vmem:[#allocation22_spill] sm:$0xff] %v15786_v36  ;;  %19219 = vst [vmem:[#allocation23_spill] sm:$0xff] %v15788_v37  ;;  %v171_v45 = vld [vmem:[#allocation4 + $0x1f0] sm:$0xff]  ;;  %v50_v47 = vld [vmem:[#allocation2 + $0x28] sm:$0xff]  ;;  %v15794_v50 = vpack.c.bf16 %v169_v41, %v165_v38 }
  0x3d   :  { %19220 = vst [vmem:[#allocation24_spill] sm:$0xff] %v15791_v43  ;;  %v48_v48 = vld [vmem:[#allocation2 + $0x18] sm:$0xff]  ;;  %v15798_v54 = vpack.c.bf16 %v171_v45, %v167_v42  ;;  %v15800_v55 = vpack.c.bf16 %v50_v47, %v46_v46  ;;  %v45_v56 = vld [vmem:[#allocation2] sm:$0xff]  ;;  %v47_v59 = vld [vmem:[#allocation2 + $0x10] sm:$0xff] }
  0x3e   :  { %10885 = vmatpush1.bf16.msra.mxu0 %v15770_v16  ;;  %v52_v49 = vld [vmem:[#allocation2 + $0x38] sm:$0xff]  ;;  %19221 = vst [vmem:[#allocation25_spill] sm:$0xff] %v15794_v50  ;;  %v49_v58 = vld [vmem:[#allocation2 + $0x20] sm:$0xff]  ;;  %v51_v61 = vld [vmem:[#allocation2 + $0x30] sm:$0xff] }
  0x3f   :  { %10917 = vmatpush1.bf16.msra.mxu1 %v15774_v19  ;;  %10887 = vmatprep.subr.bf16.mxu0 %v15776_v20  ;;  %19222 = vst [vmem:[#allocation26_spill] sm:$0xff] %v15798_v54  ;;  %19223 = vst [vmem:[#allocation27_spill] sm:$0xff] %v15800_v55  ;;  %v15803_v60 = vpack.c.bf16 %v52_v49, %v48_v48  ;;  %v54_v62 = vld [vmem:[#allocation2 + $0x48] sm:$0xff]  ;;  %v56_v5 = vld [vmem:[#allocation2 + $0x58] sm:$0xff]  ;;  %v15806_v10 = vpack.c.bf16 %v49_v58, %v45_v56 }
  0x40   :  { %10919 = vmatprep.subr.bf16.mxu1 %v15779_v25  ;;  %v58_v3 = vld [vmem:[#allocation2 + $0x68] sm:$0xff]  ;;  %v60_v6 = vld [vmem:[#allocation2 + $0x78] sm:$0xff]  ;;  %v15810_v11 = vpack.c.bf16 %v51_v61, %v47_v59  ;;  %v53_v14 = vld [vmem:[#allocation2 + $0x40] sm:$0xff] }
  0x41   :  { %19224 = vst [vmem:[#allocation28_spill] sm:$0xff] %v15803_v60  ;;  %v15812_v12 = vpack.c.bf16 %v58_v3, %v54_v62  ;;  %v57_v15 = vld [vmem:[#allocation2 + $0x60] sm:$0xff]  ;;  %v55_v21 = vld [vmem:[#allocation2 + $0x50] sm:$0xff]  ;;  %v15815_v23 = vpack.c.bf16 %v60_v6, %v56_v5  ;;  %v62_v28 = vld [vmem:[#allocation2 + $0x88] sm:$0xff] }
  0x42   :  { %10889 = vmatpush1.bf16.msra.mxu0 %v15782_v34  ;;  %v59_v24 = vld [vmem:[#allocation2 + $0x70] sm:$0xff]  ;;  %v66_v29 = vld [vmem:[#allocation2 + $0xa8] sm:$0xff]  ;;  %v64_v30 = vld [vmem:[#allocation2 + $0x98] sm:$0xff]  ;;  %v15820_v33 = vpack.c.bf16 %v57_v15, %v53_v14 }
  0x43   :  { %10921 = vmatpush1.bf16.msra.mxu1 %v15786_v36  ;;  %10891 = vmatprep.subr.bf16.mxu0 %v15788_v37  ;;  %v68_v32 = vld [vmem:[#allocation2 + $0xb8] sm:$0xff]  ;;  %v15824_v38 = vpack.c.bf16 %v59_v24, %v55_v21  ;;  %v15826_v41 = vpack.c.bf16 %v66_v29, %v62_v28  ;;  %v61_v42 = vld [vmem:[#allocation2 + $0x80] sm:$0xff]  ;;  %v63_v46 = vld [vmem:[#allocation2 + $0x90] sm:$0xff] }
  0x44   :  { %10923 = vmatprep.subr.bf16.mxu1 %v15791_v43  ;;  %v65_v45 = vld [vmem:[#allocation2 + $0xa0] sm:$0xff]  ;;  %v15829_v47 = vpack.c.bf16 %v68_v32, %v64_v30  ;;  %v67_v48 = vld [vmem:[#allocation2 + $0xb0] sm:$0xff]  ;;  %v70_v49 = vld [vmem:[#allocation2 + $0xc8] sm:$0xff] }
  0x45   :  { %v74_v56 = vld [vmem:[#allocation2 + $0xe8] sm:$0xff]  ;;  %v72_v58 = vld [vmem:[#allocation2 + $0xd8] sm:$0xff]  ;;  %v15834_v61 = vpack.c.bf16 %v65_v45, %v61_v42  ;;  %v15838_v62 = vpack.c.bf16 %v67_v48, %v63_v46  ;;  %v69_v5 = vld [vmem:[#allocation2 + $0xc0] sm:$0xff] }
  0x46   :  { %10893 = vmatpush1.bf16.msra.mxu0 %v15794_v50  ;;  %v76_v59 = vld [vmem:[#allocation2 + $0xf8] sm:$0xff]  ;;  %v15840_v3 = vpack.c.bf16 %v74_v56, %v70_v49  ;;  %v73_v6 = vld [vmem:[#allocation2 + $0xe0] sm:$0xff]  ;;  %v71_v14 = vld [vmem:[#allocation2 + $0xd0] sm:$0xff] }
  0x47   :  { %10925 = vmatpush1.bf16.msra.mxu1 %v15798_v54  ;;  %10927 = vmatprep.subr.bf16.mxu0 %v15800_v55  ;;  %19225 = vst [vmem:[#allocation29_spill] sm:$0xff] %v15838_v62  ;;  %v15843_v15 = vpack.c.bf16 %v76_v59, %v72_v58  ;;  %v75_v21 = vld [vmem:[#allocation2 + $0xf0] sm:$0xff]  ;;  %v78_v24 = vld [vmem:[#allocation2 + $0x108] sm:$0xff]  ;;  %v80_v29 = vld [vmem:[#allocation2 + $0x118] sm:$0xff]  ;;  %v15846_v32 = vpack.c.bf16 %v73_v6, %v69_v5 }
  0x48   :  { %10959 = vmatprep.subr.bf16.mxu1 %v15803_v60  ;;  %19226 = vst [vmem:[#allocation30_spill] sm:$0xff] %v15840_v3  ;;  %v82_v28 = vld [vmem:[#allocation2 + $0x128] sm:$0xff]  ;;  %v84_v30 = vld [vmem:[#allocation2 + $0x138] sm:$0xff]  ;;  %v15850_v42 = vpack.c.bf16 %v75_v21, %v71_v14  ;;  %v77_v46 = vld [vmem:[#allocation2 + $0x100] sm:$0xff] }
  0x49   :  { %240 = vmatmul.mubr.f32.vlgmr.msra.gmra.mrb[0].mxu0 %v18876_v0  ;;  %19227 = vst [vmem:[#allocation31_spill] sm:$0xff] %v15843_v15  ;;  %19228 = vst [vmem:[#allocation32_spill] sm:$0xff] %v15846_v32  ;;  %v15852_v45 = vpack.c.bf16 %v82_v28, %v78_v24  ;;  %v81_v48 = vld [vmem:[#allocation2 + $0x120] sm:$0xff]  ;;  %v79_v49 = vld [vmem:[#allocation2 + $0x110] sm:$0xff]  ;;  %v15855_v56 = vpack.c.bf16 %v84_v30, %v80_v29 }
  0x4a   :  { %311 = vmatmul.mubr.f32.vlgmr.msra.gmra.mrb[0].mxu1 %v18876_v0  ;;  %10929 = vmatpush1.bf16.msra.mxu0 %v15806_v10  ;;  %19229 = vst [vmem:[#allocation33_spill] sm:$0xff] %v15850_v42  ;;  %v83_v58 = vld [vmem:[#allocation2 + $0x130] sm:$0xff]  ;;  %v86_v59 = vld [vmem:[#allocation2 + $0x148] sm:$0xff]  ;;  %v88_v5 = vld [vmem:[#allocation2 + $0x158] sm:$0xff] }
  0x4b   :  { %10961 = vmatpush1.bf16.msra.mxu1 %v15810_v11  ;;  %10931 = vmatprep.subr.bf16.mxu0 %v15812_v12  ;;  %19230 = vst [vmem:[#allocation34_spill] sm:$0xff] %v15852_v45  ;;  %19231 = vst [vmem:[#allocation35_spill] sm:$0xff] %v15855_v56  ;;  %v92_v6 = vld [vmem:[#allocation2 + $0x178] sm:$0xff]  ;;  %v15862_v14 = vpack.c.bf16 %v83_v58, %v79_v49  ;;  %v85_v24 = vld [vmem:[#allocation2 + $0x140] sm:$0xff] }
  0x4c   :  { %10963 = vmatprep.subr.bf16.mxu1 %v15815_v23  ;;  %381 = vmatprep.mubr.f32.mxu0 %v18876_v0  ;;  %v89_v28 = vld [vmem:[#allocation2 + $0x160] sm:$0xff]  ;;  %v87_v29 = vld [vmem:[#allocation2 + $0x150] sm:$0xff]  ;;  %v15867_v30 = vpack.c.bf16 %v92_v6, %v88_v5 }
  0x4d   :  { %452 = vmatprep.mubr.f32.mxu1 %v18876_v0  ;;  %v90_v0 = vld [vmem:[#allocation2 + $0x168] sm:$0xff]  ;;  %19233 = vst [vmem:[#allocation37_spill] sm:$0xff] %v15862_v14  ;;  %v93_v58 = vld [vmem:[#allocation2 + $0x180] sm:$0xff]  ;;  %v95_v5 = vld [vmem:[#allocation2 + $0x190] sm:$0xff] }
  0x4e   :  { %10933 = vmatpush1.bf16.msra.mxu0 %v15820_v33  ;;  %v15864_v21 = vpack.c.bf16 %v90_v0, %v86_v59  ;;  %19234 = vst [vmem:[#allocation38_spill] sm:$0xff] %v15867_v30  ;;  %v97_v59 = vld [vmem:[#allocation2 + $0x1a0] sm:$0xff] }
  0x4f   :  { %10965 = vmatpush1.bf16.msra.mxu1 %v15824_v38  ;;  %10935 = vmatprep.subr.bf16.mxu0 %v15826_v41 }
  0x50   :  { %10967 = vmatprep.subr.bf16.mxu1 %v15829_v47 }
  0x52   :  { %10937 = vmatpush1.bf16.msra.mxu0 %v15834_v61 }
  0x53   :  { %10969 = vmatpush1.bf16.msra.mxu1 %v15838_v62  ;;  %10939 = vmatprep.subr.bf16.mxu0 %v15840_v3  ;;  %v15858_v62 = vpack.c.bf16 %v81_v48, %v77_v46  ;;  %v94_v3 = vld [vmem:[#allocation2 + $0x188] sm:$0xff]  ;;  %v96_v46 = vld [vmem:[#allocation2 + $0x198] sm:$0xff] }
  0x54   :  { %10971 = vmatprep.subr.bf16.mxu1 %v15843_v15  ;;  %v91_v15 = vld [vmem:[#allocation2 + $0x170] sm:$0xff]  ;;  %v100_v48 = vld [vmem:[#allocation2 + $0x1b8] sm:$0xff] }
  0x55   :  { %19232 = vst [vmem:[#allocation36_spill] sm:$0xff] %v15858_v62  ;;  %v15874_v0 = vpack.c.bf16 %v91_v15, %v87_v29  ;;  %v15879_v6 = vpack.c.bf16 %v100_v48, %v96_v46  ;;  %v105_v29 = vld [vmem:[#allocation2 + $0x1e0] sm:$0xff]  ;;  %v103_v48 = vld [vmem:[#allocation2 + $0x1d0] sm:$0xff] }
  0x56   :  { %10941 = vmatpush1.bf16.msra.mxu0 %v15846_v32  ;;  %v98_v32 = vld [vmem:[#allocation2 + $0x1a8] sm:$0xff] }
  0x57   :  { %10973 = vmatpush1.bf16.msra.mxu1 %v15850_v42  ;;  %10943 = vmatprep.subr.bf16.mxu0 %v15852_v45  ;;  %v15870_v42 = vpack.c.bf16 %v89_v28, %v85_v24  ;;  %v15876_v49 = vpack.c.bf16 %v98_v32, %v94_v3  ;;  %v102_v45 = vld [vmem:[#allocation2 + $0x1c8] sm:$0xff]  ;;  %v104_v24 = vld [vmem:[#allocation2 + $0x1d8] sm:$0xff]  ;;  %v101_v32 = vld [vmem:[#allocation2 + $0x1c0] sm:$0xff] }
  0x58   :  { %10975 = vmatprep.subr.bf16.mxu1 %v15855_v56  ;;  %v99_v56 = vld [vmem:[#allocation2 + $0x1b0] sm:$0xff]  ;;  %v108_v28 = vld [vmem:[#allocation2 + $0x1f8] sm:$0xff] }
  0x59   :  { %v15886_v3 = vpack.c.bf16 %v99_v56, %v95_v5  ;;  %v15891_v46 = vpack.c.bf16 %v108_v28, %v104_v24  ;;  %v173_v24 = vld [vmem:[%s18874_s3] sm:$0xf] }
  0x5a   :  { %10945 = vmatpush1.bf16.msra.mxu0 %v15858_v62  ;;  %v106_v62 = vld [vmem:[#allocation2 + $0x1e8] sm:$0xff] }
  0x5b   :  { %10977 = vmatpush1.bf16.msra.mxu1 %v15862_v14  ;;  %10947 = vmatprep.subr.bf16.mxu0 %v15864_v21  ;;  %v15882_v14 = vpack.c.bf16 %v97_v59, %v93_v58  ;;  %v15888_v15 = vpack.c.bf16 %v106_v62, %v102_v45  ;;  %v15894_v58 = vpack.c.bf16 %v105_v29, %v101_v32  ;;  %v174_v62 = vld [vmem:[%s18871_s0] sm:$0xff]  ;;  %v19235_v45 = vmov 0.0  }
  0x5c   :  { %10979 = vmatprep.subr.bf16.mxu1 %v15867_v30  ;;  %v107_v30 = vld [vmem:[#allocation2 + $0x1f0] sm:$0xff] }
  0x5d   :  { %v15898_v56 = vpack.c.bf16 %v107_v30, %v103_v48  ;;  %v460_v30 = vlaneseq }
  0x5e   :  { %10949 = vmatpush1.bf16.msra.mxu0 %v15870_v42 }
  0x5f   :  { %10981 = vmatpush1.bf16.msra.mxu1 %v15874_v0  ;;  %10951 = vmatprep.subr.bf16.mxu0 %v15876_v49  ;;  %v461_v59 = vshrl.u32 %v460_v30, 7 }
  0x60   :  { %10983 = vmatprep.subr.bf16.mxu1 %v15879_v6 }
  0x61   :  { %v15942_v5 = vsub.s32 0, %v461_v59  ;;  %v15947_v28 = vsub.s32 1, %v461_v59 }
  0x62   :  { %10953 = vmatpush1.bf16.msra.mxu0 %v15882_v14 }
  0x63   :  { %10985 = vmatpush1.bf16.msra.mxu1 %v15886_v3  ;;  %10955 = vmatprep.subr.bf16.mxu0 %v15888_v15  ;;  %19236 = vst [vmem:[#allocation39_spill] sm:$0xff] %v15942_v5  ;;  %19237 = vst [vmem:[#allocation40_spill] sm:$0xff] %v15947_v28  ;;  %v15950_v32 = vrot.slane %v173_v24, %v15942_v5  ;;  %v15953_v29 = vrot.slane %v173_v24, %v15947_v28  ;;  %v15962_v5 = vsub.s32 3, %v461_v59 }
  0x64   :  { %10987 = vmatprep.subr.bf16.mxu1 %v15891_v46 }
  0x65   :  { %19238 = vst [vmem:[#allocation41_spill] sm:$0xff] %v15950_v32  ;;  %19239 = vst [vmem:[#allocation42_spill] sm:$0xff] %v15953_v29 }
  0x66   :  { %10957 = vmatpush1.bf16.msra.mxu0 %v15894_v58  ;;  %19242 = vst [vmem:[#allocation45_spill] sm:$0xff] %v15962_v5 }
  0x67   :  { %10989 = vmatpush1.bf16.msra.mxu1 %v15898_v56  ;;  %10991 = vmatprep.subr.bf16.mxu0 %v15707_v4 }
  0x68   :  { %11023 = vmatprep.subr.bf16.mxu1 %v15709_v8 }
  0x69   :  { %382 = vmatmul.mubr.f32.vlgmr.msra.gmra.mrb[0].mxu0 %v174_v62 }
  0x6a   :  { %453 = vmatmul.mubr.f32.vlgmr.msra.gmra.mrb[0].mxu1 %v174_v62  ;;  %10993 = vmatpush1.bf16.msra.mxu0 %v15711_v9  ;;  %v15955_v62 = vsub.s32 2, %v461_v59 }
  0x6b   :  { %11025 = vmatpush1.bf16.msra.mxu1 %v15714_v13  ;;  %10995 = vmatprep.subr.bf16.mxu0 %v15718_v17 }
  0x6c   :  { %11027 = vmatprep.subr.bf16.mxu1 %v15720_v18  ;;  %575 = vmatprep.mubr.f32.mxu0 %v19235_v45  ;;  %19240 = vst [vmem:[#allocation43_spill] sm:$0xff] %v15955_v62 }
  0x6d   :  { %646 = vmatprep.mubr.f32.mxu1 %v19235_v45 }
  0x6e   :  { %10997 = vmatpush1.bf16.msra.mxu0 %v15723_v22 }
  0x6f   :  { %11029 = vmatpush1.bf16.msra.mxu1 %v15727_v26  ;;  %10999 = vmatprep.subr.bf16.mxu0 %v15729_v27 }
  0x70   :  { %11031 = vmatprep.subr.bf16.mxu1 %v15731_v31 }
  0x72   :  { %11001 = vmatpush1.bf16.msra.mxu0 %v15734_v35 }
  0x73   :  { %11033 = vmatpush1.bf16.msra.mxu1 %v15738_v39  ;;  %11003 = vmatprep.subr.bf16.mxu0 %v15740_v40 }
  0x74   :  { %11035 = vmatprep.subr.bf16.mxu1 %v15743_v44 }
  0x76   :  { %11005 = vmatpush1.bf16.msra.mxu0 %v15746_v51 }
  0x77   :  { %11037 = vmatpush1.bf16.msra.mxu1 %v15750_v52  ;;  %11007 = vmatprep.subr.bf16.mxu0 %v15752_v53 }
  0x78   :  { %11039 = vmatprep.subr.bf16.mxu1 %v15755_v57 }
  0x7a   :  { %11009 = vmatpush1.bf16.msra.mxu0 %v15758_v63 }
  0x7b   :  { %11041 = vmatpush1.bf16.msra.mxu1 %v15762_v1  ;;  %11011 = vmatprep.subr.bf16.mxu0 %v15764_v2 }
  0x7c   :  { %11043 = vmatprep.subr.bf16.mxu1 %v15767_v7 }
  0x7e   :  { %11013 = vmatpush1.bf16.msra.mxu0 %v15770_v16 }
  0x7f   :  { %11045 = vmatpush1.bf16.msra.mxu1 %v15774_v19  ;;  %11015 = vmatprep.subr.bf16.mxu0 %v15776_v20 }
  0x80   :  { %11047 = vmatprep.subr.bf16.mxu1 %v15779_v25 }
  0x82   :  { %11017 = vmatpush1.bf16.msra.mxu0 %v15782_v34  ;;  %v15966_v34 = vrot.slane %v173_v24, %v15962_v5  ;;  %v19258_v5 = vld [vmem:[#allocation25_spill] sm:$0xff] }
  0x83   :  { %11049 = vmatpush1.bf16.msra.mxu1 %v15786_v36  ;;  %11019 = vmatprep.subr.bf16.mxu0 %v15788_v37  ;;  %v15960_v37 = vrot.slane %v173_v24, %v15955_v62 }
  0x84   :  { %11051 = vmatprep.subr.bf16.mxu1 %v15791_v43 }
  0x85   :  { %19241 = vst [vmem:[#allocation44_spill] sm:$0xff] %v15960_v37 }
  0x86   :  { %11021 = vmatpush1.bf16.msra.mxu0 %v15794_v50 }
  0x87   :  { %11053 = vmatpush1.bf16.msra.mxu1 %v15798_v54  ;;  %11055 = vmatprep.subr.bf16.mxu0 %v15800_v55 }
  0x88   :  { %11087 = vmatprep.subr.bf16.mxu1 %v15803_v60 }
 0x13c   :  { %v383_v48 = vpop.f32.mrb[0].mxu0 }
 0x13d   :  { %v480_v60 = vadd.f32 %v15950_v32, %v383_v48  ;;  %v454_v30 = vpop.f32.mrb[0].mxu1  ;;  %v385_v55 = vpop.f32.mrb[1].mxu0 }
 0x13e   :  { %v481_v54 = vadd.f32 %v15953_v29, %v385_v55  ;;  %v456_v50 = vpop.f32.mrb[1].mxu1  ;;  %v482_v28 = vadd.f32 %v15960_v37, %v454_v30 }
 0x13f   :  { %v10714_v43 = vmul.f32 -1.442695, %v480_v60  ;;  %v483_v32 = vadd.f32 %v15966_v34, %v456_v50 }
 0x140   :  { %v10715_v36 = vmul.f32 -1.442695, %v481_v54  ;;  %v10716_v48 = vmul.f32 -1.442695, %v482_v28 }
 0x141   :  { %15091 = vpow2.f32 %v10714_v43 }
 0x142   :  { %15093 = vpow2.f32 %v10715_v36 }
 0x143   :  { %15095 = vpow2.f32 %v10716_v48  ;;  %v19247_v48 = vld [vmem:[#allocation33_spill] sm:$0xff] }
 0x144   :  { %15097 = vtanh.f32 %v483_v32  ;;  %v19244_v32 = vld [vmem:[#allocation30_spill] sm:$0xff] }
 0x14b   :  { %v15092_v25 = vpop.eup %15091 }
 0x14c   :  { %v493_v55 = vadd.f32 1.0, %v15092_v25  ;;  %v15094_v60 = vpop.eup %15093 }
 0x14d   :  { %v494_v62 = vadd.f32 1.0, %v15094_v60  ;;  %v15096_v43 = vpop.eup %15095  ;;  %v19249_v60 = vld [vmem:[#allocation35_spill] sm:$0xff] }
 0x14e   :  { %15099 = vrcp.f32 %v493_v55  ;;  %v15098_v54 = vpop.eup %15097  ;;  %v495_v30 = vadd.f32 1.0, %v15096_v43  ;;  %v19248_v55 = vld [vmem:[#allocation34_spill] sm:$0xff]  ;;  %v19250_v43 = vld [vmem:[#allocation36_spill] sm:$0xff] }
 0x14f   :  { %15101 = vrcp.f32 %v494_v62  ;;  %v19246_v62 = vld [vmem:[#allocation32_spill] sm:$0xff] }
 0x150   :  { %15103 = vrcp.f32 %v495_v30  ;;  %v19253_v30 = vld [vmem:[#allocation20_spill] sm:$0xff] }
 0x158   :  { %v15100_v59 = vpop.eup %15099 }
 0x159   :  { %v504_v36 = vmul.f32 %v15100_v59, %v15098_v54  ;;  %v15102_v29 = vpop.eup %15101  ;;  %v19251_v54 = vld [vmem:[#allocation37_spill] sm:$0xff]  ;;  %v19252_v59 = vld [vmem:[#allocation38_spill] sm:$0xff] }
 0x15a   :  { %v503_v37 = vmul.f32 0.0, %v15102_v29  ;;  %v15104_v50 = vpop.eup %15103  ;;  %v19245_v29 = vld [vmem:[#allocation31_spill] sm:$0xff] }
 0x15c   :  { %v15969_v24 = vadd.f32 %v504_v36, %v503_v37  ;;  %v19243_v37 = vld [vmem:[#allocation29_spill] sm:$0xff] }
 0x15d   :  { %v10717_v36 = vld [vmem:[%s18871_s0 + $0x8] sm:$0xff] }
 0x15e   :  { %15105 = vtanh.f32 %v15969_v24 }
 0x168   :  { %v15106_v25 = vpop.eup %15105 }
 0x169   :  { %v507_v28 = vmul.f32 %v15106_v25, %v15104_v50  ;;  %v19254_v50 = vld [vmem:[#allocation21_spill] sm:$0xff]  ;;  %v19255_v25 = vld [vmem:[#allocation22_spill] sm:$0xff] }
 0x16b   :  { %508 = vst [vmem:[%s18875_s4] sm:$0xff] %v507_v28  ;;  %576 = vmatmul.mubr.f32.vlgmr.msra.gmra.mrb[2].mxu0 %v507_v28  ;;  %647 = vmatmul.mubr.f32.vlgmr.msra.gmra.mrb[2].mxu1 %v507_v28  ;;  %v19256_v28 = vld [vmem:[#allocation23_spill] sm:$0xff] }
 0x16c   :  { %11057 = vmatpush1.bf16.msra.mxu0 %v15806_v10  ;;  %11089 = vmatpush1.bf16.msra.mxu1 %v15810_v11 }
 0x16d   :  { %11059 = vmatprep.subr.bf16.mxu0 %v15812_v12  ;;  %11091 = vmatprep.subr.bf16.mxu1 %v15815_v23 }
 0x16e   :  { %717 = vmatprep.mubr.f32.mxu0 %v19235_v45  ;;  %788 = vmatprep.mubr.f32.mxu1 %v19235_v45 }
 0x170   :  { %11061 = vmatpush1.bf16.msra.mxu0 %v15820_v33  ;;  %11093 = vmatpush1.bf16.msra.mxu1 %v15824_v38 }
 0x171   :  { %11063 = vmatprep.subr.bf16.mxu0 %v15826_v41  ;;  %11095 = vmatprep.subr.bf16.mxu1 %v15829_v47 }
 0x174   :  { %11065 = vmatpush1.bf16.msra.mxu0 %v15834_v61  ;;  %11097 = vmatpush1.bf16.msra.mxu1 %v19243_v37 }
 0x175   :  { %11067 = vmatprep.subr.bf16.mxu0 %v19244_v32  ;;  %11099 = vmatprep.subr.bf16.mxu1 %v19245_v29 }
 0x178   :  { %11069 = vmatpush1.bf16.msra.mxu0 %v19246_v62  ;;  %11101 = vmatpush1.bf16.msra.mxu1 %v19247_v48 }
 0x179   :  { %11071 = vmatprep.subr.bf16.mxu0 %v19248_v55  ;;  %11103 = vmatprep.subr.bf16.mxu1 %v19249_v60 }
 0x17c   :  { %11073 = vmatpush1.bf16.msra.mxu0 %v19250_v43  ;;  %11105 = vmatpush1.bf16.msra.mxu1 %v19251_v54 }
 0x17d   :  { %11075 = vmatprep.subr.bf16.mxu0 %v15864_v21  ;;  %11107 = vmatprep.subr.bf16.mxu1 %v19252_v59 }
 0x180   :  { %11077 = vmatpush1.bf16.msra.mxu0 %v15870_v42  ;;  %11109 = vmatpush1.bf16.msra.mxu1 %v15874_v0 }
 0x181   :  { %11079 = vmatprep.subr.bf16.mxu0 %v15876_v49  ;;  %11111 = vmatprep.subr.bf16.mxu1 %v15879_v6 }
 0x184   :  { %11081 = vmatpush1.bf16.msra.mxu0 %v15882_v14  ;;  %11113 = vmatpush1.bf16.msra.mxu1 %v15886_v3 }
 0x185   :  { %11083 = vmatprep.subr.bf16.mxu0 %v15888_v15  ;;  %11115 = vmatprep.subr.bf16.mxu1 %v15891_v46 }
 0x188   :  { %11085 = vmatpush1.bf16.msra.mxu0 %v15894_v58  ;;  %11117 = vmatpush1.bf16.msra.mxu1 %v15898_v56 }
 0x189   :  { %11119 = vmatprep.subr.bf16.mxu0 %v15707_v4  ;;  %11151 = vmatprep.subr.bf16.mxu1 %v15709_v8 }
 0x18b   :  { %718 = vmatmul.mubr.f32.vlgmr.msra.gmra.mrb[2].mxu0 %v10717_v36  ;;  %789 = vmatmul.mubr.f32.vlgmr.msra.gmra.mrb[2].mxu1 %v10717_v36  ;;  %v19257_v36 = vld [vmem:[#allocation24_spill] sm:$0xff] }
 0x18c   :  { %11121 = vmatpush1.bf16.msra.mxu0 %v15711_v9  ;;  %11153 = vmatpush1.bf16.msra.mxu1 %v15714_v13 }
 0x18d   :  { %11123 = vmatprep.subr.bf16.mxu0 %v15718_v17  ;;  %11155 = vmatprep.subr.bf16.mxu1 %v15720_v18 }
 0x18e   :  { %891 = vmatprep.mubr.f32.mxu0 %v19235_v45  ;;  %962 = vmatprep.mubr.f32.mxu1 %v19235_v45 }
 0x190   :  { %11125 = vmatpush1.bf16.msra.mxu0 %v15723_v22  ;;  %11157 = vmatpush1.bf16.msra.mxu1 %v15727_v26 }
 0x191   :  { %11127 = vmatprep.subr.bf16.mxu0 %v15729_v27  ;;  %11159 = vmatprep.subr.bf16.mxu1 %v15731_v31 }
 0x194   :  { %11129 = vmatpush1.bf16.msra.mxu0 %v15734_v35  ;;  %11161 = vmatpush1.bf16.msra.mxu1 %v15738_v39 }
 0x195   :  { %11131 = vmatprep.subr.bf16.mxu0 %v15740_v40  ;;  %11163 = vmatprep.subr.bf16.mxu1 %v15743_v44 }
 0x198   :  { %11133 = vmatpush1.bf16.msra.mxu0 %v15746_v51  ;;  %11165 = vmatpush1.bf16.msra.mxu1 %v15750_v52 }
 0x199   :  { %11135 = vmatprep.subr.bf16.mxu0 %v15752_v53  ;;  %11167 = vmatprep.subr.bf16.mxu1 %v15755_v57  ;;  %v19263_v57 = vld [vmem:[#allocation42_spill] sm:$0xff] }
 0x19c   :  { %11137 = vmatpush1.bf16.msra.mxu0 %v15758_v63  ;;  %11169 = vmatpush1.bf16.msra.mxu1 %v15762_v1  ;;  %v19262_v1 = vld [vmem:[#allocation41_spill] sm:$0xff] }
 0x19d   :  { %11139 = vmatprep.subr.bf16.mxu0 %v15764_v2  ;;  %11171 = vmatprep.subr.bf16.mxu1 %v15767_v7  ;;  %v19259_v2 = vld [vmem:[#allocation26_spill] sm:$0xff]  ;;  %v19260_v7 = vld [vmem:[#allocation27_spill] sm:$0xff] }
 0x1a0   :  { %11141 = vmatpush1.bf16.msra.mxu0 %v15770_v16  ;;  %11173 = vmatpush1.bf16.msra.mxu1 %v15774_v19  ;;  %v19261_v16 = vld [vmem:[#allocation28_spill] sm:$0xff] }
 0x1a1   :  { %11143 = vmatprep.subr.bf16.mxu0 %v15776_v20  ;;  %11175 = vmatprep.subr.bf16.mxu1 %v19253_v30 }
 0x1a4   :  { %11145 = vmatpush1.bf16.msra.mxu0 %v19254_v50  ;;  %11177 = vmatpush1.bf16.msra.mxu1 %v19255_v25 }
 0x1a5   :  { %11147 = vmatprep.subr.bf16.mxu0 %v19256_v28  ;;  %11179 = vmatprep.subr.bf16.mxu1 %v19257_v36  ;;  %v19264_v36 = vld [vmem:[#allocation44_spill] sm:$0xff] }
 0x1a8   :  { %11149 = vmatpush1.bf16.msra.mxu0 %v19258_v5  ;;  %11181 = vmatpush1.bf16.msra.mxu1 %v19259_v2 }
 0x1a9   :  { %11183 = vmatprep.subr.bf16.mxu0 %v19260_v7  ;;  %11215 = vmatprep.subr.bf16.mxu1 %v19261_v16 }
 0x25e   :  { %v719_v19 = vpop.f32.mrb[2].mxu0  ;;  %v790_v20 = vpop.f32.mrb[2].mxu1 }
 0x25f   :  { %v795_v30 = vadd.f32 %v719_v19, %v19262_v1  ;;  %v721_v63 = vpop.f32.mrb[3].mxu0  ;;  %v792_v50 = vpop.f32.mrb[3].mxu1  ;;  %v797_v5 = vadd.f32 %v790_v20, %v19264_v36 }
 0x260   :  { %v796_v25 = vadd.f32 %v721_v63, %v19263_v57  ;;  %v798_v2 = vadd.f32 %v792_v50, %v15966_v34  ;;  %v19270_v50 = vld [vmem:[#allocation13_spill] sm:$0xff] }
 0x261   :  { %v10718_v53 = vmul.f32 -1.442695, %v795_v30  ;;  %v10720_v52 = vmul.f32 -1.442695, %v797_v5 }
 0x262   :  { %v10719_v28 = vmul.f32 -1.442695, %v796_v25 }
 0x263   :  { %15107 = vpow2.f32 %v10718_v53 }
 0x264   :  { %15109 = vpow2.f32 %v10719_v28 }
 0x265   :  { %15111 = vtanh.f32 %v798_v2 }
 0x266   :  { %15113 = vpow2.f32 %v10720_v52  ;;  %v19266_v52 = vld [vmem:[#allocation9_spill] sm:$0xff] }
 0x26d   :  { %v15108_v7 = vpop.eup %15107 }
 0x26e   :  { %v808_v51 = vadd.f32 1.0, %v15108_v7  ;;  %v15110_v16 = vpop.eup %15109 }
 0x26f   :  { %v809_v19 = vadd.f32 1.0, %v15110_v16  ;;  %v15112_v1 = vpop.eup %15111  ;;  %v19268_v16 = vld [vmem:[#allocation11_spill] sm:$0xff] }
 0x270   :  { %15115 = vrcp.f32 %v808_v51  ;;  %v15114_v44 = vpop.eup %15113  ;;  %v19265_v51 = vld [vmem:[#allocation8_spill] sm:$0xff] }
 0x271   :  { %15117 = vrcp.f32 %v809_v19  ;;  %v810_v53 = vadd.f32 1.0, %v15114_v44  ;;  %v10722_v44 = vld [vmem:[%s18871_s0 + $0x10] sm:$0xff] }
 0x272   :  { %v19271_v19 = vld [vmem:[#allocation14_spill] sm:$0xff] }
 0x273   :  { %15119 = vrcp.f32 %v810_v53  ;;  %v19275_v53 = vld [vmem:[#allocation18_spill] sm:$0xff] }
 0x27a   :  { %v15116_v63 = vpop.eup %15115 }
 0x27b   :  { %v819_v30 = vmul.f32 %v15116_v63, %v15112_v1  ;;  %v15118_v25 = vpop.eup %15117  ;;  %v19267_v1 = vld [vmem:[#allocation10_spill] sm:$0xff]  ;;  %v19272_v63 = vld [vmem:[#allocation15_spill] sm:$0xff] }
 0x27c   :  { %v818_v28 = vmul.f32 %v15118_v25, %v15969_v24  ;;  %v19269_v24 = vld [vmem:[#allocation12_spill] sm:$0xff]  ;;  %v19274_v25 = vld [vmem:[#allocation17_spill] sm:$0xff] }
 0x27d   :  { %v15120_v7 = vpop.eup %15119 }
 0x27e   :  { %v16051_v20 = vadd.f32 %v819_v30, %v818_v28  ;;  %v19273_v30 = vld [vmem:[#allocation16_spill] sm:$0xff]  ;;  %v19276_v28 = vld [vmem:[#allocation19_spill] sm:$0xff] }
 0x280   :  { %15121 = vtanh.f32 %v16051_v20 }
 0x28a   :  { %v15122_v2 = vpop.eup %15121 }
 0x28b   :  { %v822_v5 = vmul.f32 %v15122_v2, %v15120_v7  ;;  %v19277_v7 = vld [vmem:[#allocation20_spill] sm:$0xff]  ;;  %v19278_v2 = vld [vmem:[#allocation21_spill] sm:$0xff] }
 0x28d   :  { %10721 = vst [vmem:[%s18875_s4 + $0x8] sm:$0xff] %v822_v5  ;;  %892 = vmatmul.mubr.f32.vlgmr.msra.gmra.mrb[4].mxu0 %v822_v5  ;;  %963 = vmatmul.mubr.f32.vlgmr.msra.gmra.mrb[4].mxu1 %v822_v5  ;;  %v19279_v5 = vld [vmem:[#allocation22_spill] sm:$0xff] }
 0x28e   :  { %11185 = vmatpush1.bf16.msra.mxu0 %v15806_v10  ;;  %11217 = vmatpush1.bf16.msra.mxu1 %v15810_v11 }
 0x28f   :  { %11187 = vmatprep.subr.bf16.mxu0 %v15812_v12  ;;  %11219 = vmatprep.subr.bf16.mxu1 %v15815_v23 }
 0x290   :  { %1033 = vmatprep.mubr.f32.mxu0 %v19235_v45  ;;  %1104 = vmatprep.mubr.f32.mxu1 %v19235_v45 }
 0x292   :  { %11189 = vmatpush1.bf16.msra.mxu0 %v15820_v33  ;;  %11221 = vmatpush1.bf16.msra.mxu1 %v15824_v38 }
 0x293   :  { %11191 = vmatprep.subr.bf16.mxu0 %v15826_v41  ;;  %11223 = vmatprep.subr.bf16.mxu1 %v15829_v47 }
 0x296   :  { %11193 = vmatpush1.bf16.msra.mxu0 %v15834_v61  ;;  %11225 = vmatpush1.bf16.msra.mxu1 %v19243_v37 }
 0x297   :  { %11195 = vmatprep.subr.bf16.mxu0 %v19244_v32  ;;  %11227 = vmatprep.subr.bf16.mxu1 %v19245_v29 }
 0x29a   :  { %11197 = vmatpush1.bf16.msra.mxu0 %v19246_v62  ;;  %11229 = vmatpush1.bf16.msra.mxu1 %v19247_v48 }
 0x29b   :  { %11199 = vmatprep.subr.bf16.mxu0 %v19248_v55  ;;  %11231 = vmatprep.subr.bf16.mxu1 %v19249_v60 }
 0x29e   :  { %11201 = vmatpush1.bf16.msra.mxu0 %v19250_v43  ;;  %11233 = vmatpush1.bf16.msra.mxu1 %v19251_v54 }
 0x29f   :  { %11203 = vmatprep.subr.bf16.mxu0 %v15864_v21  ;;  %11235 = vmatprep.subr.bf16.mxu1 %v19252_v59 }
 0x2a2   :  { %11205 = vmatpush1.bf16.msra.mxu0 %v15870_v42  ;;  %11237 = vmatpush1.bf16.msra.mxu1 %v15874_v0 }
 0x2a3   :  { %11207 = vmatprep.subr.bf16.mxu0 %v15876_v49  ;;  %11239 = vmatprep.subr.bf16.mxu1 %v15879_v6 }
 0x2a6   :  { %11209 = vmatpush1.bf16.msra.mxu0 %v15882_v14  ;;  %11241 = vmatpush1.bf16.msra.mxu1 %v15886_v3 }
 0x2a7   :  { %11211 = vmatprep.subr.bf16.mxu0 %v15888_v15  ;;  %11243 = vmatprep.subr.bf16.mxu1 %v15891_v46 }
 0x2aa   :  { %11213 = vmatpush1.bf16.msra.mxu0 %v15894_v58  ;;  %11245 = vmatpush1.bf16.msra.mxu1 %v15898_v56 }
 0x2ab   :  { %11247 = vmatprep.subr.bf16.mxu0 %v15707_v4  ;;  %11279 = vmatprep.subr.bf16.mxu1 %v15709_v8 }
 0x2ad   :  { %1034 = vmatmul.mubr.f32.vlgmr.msra.gmra.mrb[4].mxu0 %v10722_v44  ;;  %1105 = vmatmul.mubr.f32.vlgmr.msra.gmra.mrb[4].mxu1 %v10722_v44  ;;  %v19280_v44 = vld [vmem:[#allocation23_spill] sm:$0xff] }
 0x2ae   :  { %11249 = vmatpush1.bf16.msra.mxu0 %v15711_v9  ;;  %11281 = vmatpush1.bf16.msra.mxu1 %v15714_v13 }
 0x2af   :  { %11251 = vmatprep.subr.bf16.mxu0 %v15718_v17  ;;  %11283 = vmatprep.subr.bf16.mxu1 %v15720_v18 }
 0x2b0   :  { %1207 = vmatprep.mubr.f32.mxu0 %v19235_v45  ;;  %1278 = vmatprep.mubr.f32.mxu1 %v19235_v45 }
 0x2b2   :  { %11253 = vmatpush1.bf16.msra.mxu0 %v15723_v22  ;;  %11285 = vmatpush1.bf16.msra.mxu1 %v15727_v26 }
 0x2b3   :  { %11255 = vmatprep.subr.bf16.mxu0 %v15729_v27  ;;  %11287 = vmatprep.subr.bf16.mxu1 %v15731_v31 }
 0x2b6   :  { %11257 = vmatpush1.bf16.msra.mxu0 %v15734_v35  ;;  %11289 = vmatpush1.bf16.msra.mxu1 %v15738_v39 }
 0x2b7   :  { %11259 = vmatprep.subr.bf16.mxu0 %v15740_v40  ;;  %11291 = vmatprep.subr.bf16.mxu1 %v19265_v51 }
 0x2ba   :  { %11261 = vmatpush1.bf16.msra.mxu0 %v19266_v52  ;;  %11293 = vmatpush1.bf16.msra.mxu1 %v19267_v1 }
 0x2bb   :  { %11263 = vmatprep.subr.bf16.mxu0 %v19268_v16  ;;  %11295 = vmatprep.subr.bf16.mxu1 %v19269_v24  ;;  %v19286_v24 = vld [vmem:[#allocation41_spill] sm:$0xff] }
 0x2be   :  { %11265 = vmatpush1.bf16.msra.mxu0 %v19270_v50  ;;  %11297 = vmatpush1.bf16.msra.mxu1 %v19271_v19  ;;  %v19281_v50 = vld [vmem:[#allocation24_spill] sm:$0xff]  ;;  %v19282_v19 = vld [vmem:[#allocation25_spill] sm:$0xff] }
 0x2bf   :  { %11267 = vmatprep.subr.bf16.mxu0 %v19272_v63  ;;  %11299 = vmatprep.subr.bf16.mxu1 %v19273_v30  ;;  %v19283_v63 = vld [vmem:[#allocation26_spill] sm:$0xff]  ;;  %v19284_v30 = vld [vmem:[#allocation27_spill] sm:$0xff] }
 0x2c2   :  { %11269 = vmatpush1.bf16.msra.mxu0 %v19274_v25  ;;  %11301 = vmatpush1.bf16.msra.mxu1 %v19275_v53  ;;  %v19285_v25 = vld [vmem:[#allocation28_spill] sm:$0xff] }
 0x2c3   :  { %11271 = vmatprep.subr.bf16.mxu0 %v19276_v28  ;;  %11303 = vmatprep.subr.bf16.mxu1 %v19277_v7 }
 0x2c6   :  { %11273 = vmatpush1.bf16.msra.mxu0 %v19278_v2  ;;  %11305 = vmatpush1.bf16.msra.mxu1 %v19279_v5 }
 0x2c7   :  { %11275 = vmatprep.subr.bf16.mxu0 %v19280_v44  ;;  %11307 = vmatprep.subr.bf16.mxu1 %v19281_v50 }
 0x2ca   :  { %11277 = vmatpush1.bf16.msra.mxu0 %v19282_v19  ;;  %11309 = vmatpush1.bf16.msra.mxu1 %v19283_v63 }
 0x2cb   :  { %11311 = vmatprep.subr.bf16.mxu0 %v19284_v30  ;;  %11343 = vmatprep.subr.bf16.mxu1 %v19285_v25 }
 0x380   :  { %v1035_v53 = vpop.f32.mrb[4].mxu0  ;;  %v1106_v28 = vpop.f32.mrb[4].mxu1 }
 0x381   :  { %v1111_v7 = vadd.f32 %v1035_v53, %v19286_v24  ;;  %v1037_v16 = vpop.f32.mrb[5].mxu0  ;;  %v1108_v2 = vpop.f32.mrb[5].mxu1  ;;  %v1113_v19 = vadd.f32 %v1106_v28, %v19264_v36 }
 0x382   :  { %v1112_v5 = vadd.f32 %v1037_v16, %v19263_v57  ;;  %v1114_v63 = vadd.f32 %v1108_v2, %v15966_v34  ;;  %v19292_v2 = vld [vmem:[#allocation13_spill] sm:$0xff] }
 0x383   :  { %v10723_v1 = vmul.f32 -1.442695, %v1111_v7  ;;  %v10725_v50 = vmul.f32 -1.442695, %v1113_v19 }
 0x384   :  { %v10724_v44 = vmul.f32 -1.442695, %v1112_v5 }
 0x385   :  { %15123 = vpow2.f32 %v10723_v1 }
 0x386   :  { %15125 = vpow2.f32 %v10724_v44 }
 0x387   :  { %15127 = vtanh.f32 %v1114_v63 }
 0x388   :  { %15129 = vpow2.f32 %v10725_v50  ;;  %v19290_v50 = vld [vmem:[#allocation11_spill] sm:$0xff] }
 0x38f   :  { %v15124_v30 = vpop.eup %15123 }
 0x390   :  { %v1124_v52 = vadd.f32 1.0, %v15124_v30  ;;  %v15126_v25 = vpop.eup %15125 }
 0x391   :  { %v1125_v53 = vadd.f32 1.0, %v15126_v25  ;;  %v15128_v24 = vpop.eup %15127  ;;  %v19291_v25 = vld [vmem:[#allocation12_spill] sm:$0xff] }
 0x392   :  { %15131 = vrcp.f32 %v1124_v52  ;;  %v15130_v51 = vpop.eup %15129  ;;  %v19288_v52 = vld [vmem:[#allocation9_spill] sm:$0xff] }
 0x393   :  { %15133 = vrcp.f32 %v1125_v53  ;;  %v1126_v1 = vadd.f32 1.0, %v15130_v51  ;;  %v19287_v51 = vld [vmem:[#allocation8_spill] sm:$0xff]  ;;  %v19293_v53 = vld [vmem:[#allocation14_spill] sm:$0xff] }
 0x395   :  { %15135 = vrcp.f32 %v1126_v1  ;;  %v19297_v1 = vld [vmem:[#allocation18_spill] sm:$0xff] }
 0x39c   :  { %v15132_v16 = vpop.eup %15131 }
 0x39d   :  { %v1135_v7 = vmul.f32 %v15132_v16, %v15128_v24  ;;  %v15134_v5 = vpop.eup %15133  ;;  %v19289_v24 = vld [vmem:[#allocation10_spill] sm:$0xff]  ;;  %v19294_v16 = vld [vmem:[#allocation15_spill] sm:$0xff] }
 0x39e   :  { %v1134_v44 = vmul.f32 %v15134_v5, %v16051_v20  ;;  %v10727_v20 = vld [vmem:[%s18871_s0 + $0x18] sm:$0xff]  ;;  %v19296_v5 = vld [vmem:[#allocation17_spill] sm:$0xff] }
 0x39f   :  { %v15136_v19 = vpop.eup %15135 }
 0x3a0   :  { %v16133_v28 = vadd.f32 %v1135_v7, %v1134_v44  ;;  %v19295_v7 = vld [vmem:[#allocation16_spill] sm:$0xff]  ;;  %v19298_v44 = vld [vmem:[#allocation19_spill] sm:$0xff] }
 0x3a2   :  { %15137 = vtanh.f32 %v16133_v28 }
 0x3ac   :  { %v15138_v63 = vpop.eup %15137 }
 0x3ad   :  { %v1138_v30 = vmul.f32 %v15138_v63, %v15136_v19  ;;  %v19299_v19 = vld [vmem:[#allocation20_spill] sm:$0xff]  ;;  %v19300_v63 = vld [vmem:[#allocation21_spill] sm:$0xff] }
 0x3af   :  { %10726 = vst [vmem:[%s18875_s4 + $0x10] sm:$0xff] %v1138_v30  ;;  %1208 = vmatmul.mubr.f32.vlgmr.msra.gmra.mrb[6].mxu0 %v1138_v30  ;;  %1279 = vmatmul.mubr.f32.vlgmr.msra.gmra.mrb[6].mxu1 %v1138_v30  ;;  %v19301_v30 = vld [vmem:[#allocation22_spill] sm:$0xff] }
 0x3b0   :  { %11313 = vmatpush1.bf16.msra.mxu0 %v15806_v10  ;;  %11345 = vmatpush1.bf16.msra.mxu1 %v15810_v11 }
 0x3b1   :  { %11315 = vmatprep.subr.bf16.mxu0 %v15812_v12  ;;  %11347 = vmatprep.subr.bf16.mxu1 %v15815_v23 }
 0x3b2   :  { %1349 = vmatprep.mubr.f32.mxu0 %v19235_v45  ;;  %1420 = vmatprep.mubr.f32.mxu1 %v19235_v45 }
 0x3b4   :  { %11317 = vmatpush1.bf16.msra.mxu0 %v15820_v33  ;;  %11349 = vmatpush1.bf16.msra.mxu1 %v15824_v38 }
 0x3b5   :  { %11319 = vmatprep.subr.bf16.mxu0 %v15826_v41  ;;  %11351 = vmatprep.subr.bf16.mxu1 %v15829_v47 }
 0x3b8   :  { %11321 = vmatpush1.bf16.msra.mxu0 %v15834_v61  ;;  %11353 = vmatpush1.bf16.msra.mxu1 %v19243_v37 }
 0x3b9   :  { %11323 = vmatprep.subr.bf16.mxu0 %v19244_v32  ;;  %11355 = vmatprep.subr.bf16.mxu1 %v19245_v29 }
 0x3bc   :  { %11325 = vmatpush1.bf16.msra.mxu0 %v19246_v62  ;;  %11357 = vmatpush1.bf16.msra.mxu1 %v19247_v48 }
 0x3bd   :  { %11327 = vmatprep.subr.bf16.mxu0 %v19248_v55  ;;  %11359 = vmatprep.subr.bf16.mxu1 %v19249_v60 }
 0x3c0   :  { %11329 = vmatpush1.bf16.msra.mxu0 %v19250_v43  ;;  %11361 = vmatpush1.bf16.msra.mxu1 %v19251_v54 }
 0x3c1   :  { %11331 = vmatprep.subr.bf16.mxu0 %v15864_v21  ;;  %11363 = vmatprep.subr.bf16.mxu1 %v19252_v59 }
 0x3c4   :  { %11333 = vmatpush1.bf16.msra.mxu0 %v15870_v42  ;;  %11365 = vmatpush1.bf16.msra.mxu1 %v15874_v0 }
 0x3c5   :  { %11335 = vmatprep.subr.bf16.mxu0 %v15876_v49  ;;  %11367 = vmatprep.subr.bf16.mxu1 %v15879_v6 }
 0x3c8   :  { %11337 = vmatpush1.bf16.msra.mxu0 %v15882_v14  ;;  %11369 = vmatpush1.bf16.msra.mxu1 %v15886_v3 }
 0x3c9   :  { %11339 = vmatprep.subr.bf16.mxu0 %v15888_v15  ;;  %11371 = vmatprep.subr.bf16.mxu1 %v15891_v46 }
 0x3cc   :  { %11341 = vmatpush1.bf16.msra.mxu0 %v15894_v58  ;;  %11373 = vmatpush1.bf16.msra.mxu1 %v15898_v56 }
 0x3cd   :  { %11375 = vmatprep.subr.bf16.mxu0 %v15707_v4  ;;  %11407 = vmatprep.subr.bf16.mxu1 %v15709_v8 }
 0x3cf   :  { %1350 = vmatmul.mubr.f32.vlgmr.msra.gmra.mrb[6].mxu0 %v10727_v20  ;;  %1421 = vmatmul.mubr.f32.vlgmr.msra.gmra.mrb[6].mxu1 %v10727_v20  ;;  %v19302_v20 = vld [vmem:[#allocation23_spill] sm:$0xff] }
 0x3d0   :  { %11377 = vmatpush1.bf16.msra.mxu0 %v15711_v9  ;;  %11409 = vmatpush1.bf16.msra.mxu1 %v15714_v13 }
 0x3d1   :  { %11379 = vmatprep.subr.bf16.mxu0 %v15718_v17  ;;  %11411 = vmatprep.subr.bf16.mxu1 %v15720_v18 }
 0x3d2   :  { %1523 = vmatprep.mubr.f32.mxu0 %v19235_v45  ;;  %1594 = vmatprep.mubr.f32.mxu1 %v19235_v45 }
 0x3d4   :  { %11381 = vmatpush1.bf16.msra.mxu0 %v15723_v22  ;;  %11413 = vmatpush1.bf16.msra.mxu1 %v15727_v26 }
 0x3d5   :  { %11383 = vmatprep.subr.bf16.mxu0 %v15729_v27  ;;  %11415 = vmatprep.subr.bf16.mxu1 %v15731_v31 }
 0x3d8   :  { %11385 = vmatpush1.bf16.msra.mxu0 %v15734_v35  ;;  %11417 = vmatpush1.bf16.msra.mxu1 %v15738_v39 }
 0x3d9   :  { %11387 = vmatprep.subr.bf16.mxu0 %v15740_v40  ;;  %11419 = vmatprep.subr.bf16.mxu1 %v19287_v51 }
 0x3dc   :  { %11389 = vmatpush1.bf16.msra.mxu0 %v19288_v52  ;;  %11421 = vmatpush1.bf16.msra.mxu1 %v19289_v24 }
 0x3dd   :  { %11391 = vmatprep.subr.bf16.mxu0 %v19290_v50  ;;  %11423 = vmatprep.subr.bf16.mxu1 %v19291_v25  ;;  %v19308_v25 = vld [vmem:[#allocation41_spill] sm:$0xff] }
 0x3e0   :  { %11393 = vmatpush1.bf16.msra.mxu0 %v19292_v2  ;;  %11425 = vmatpush1.bf16.msra.mxu1 %v19293_v53  ;;  %v19303_v2 = vld [vmem:[#allocation24_spill] sm:$0xff]  ;;  %v19304_v53 = vld [vmem:[#allocation25_spill] sm:$0xff] }
 0x3e1   :  { %11395 = vmatprep.subr.bf16.mxu0 %v19294_v16  ;;  %11427 = vmatprep.subr.bf16.mxu1 %v19295_v7  ;;  %v19305_v16 = vld [vmem:[#allocation26_spill] sm:$0xff]  ;;  %v19306_v7 = vld [vmem:[#allocation27_spill] sm:$0xff] }
 0x3e4   :  { %11397 = vmatpush1.bf16.msra.mxu0 %v19296_v5  ;;  %11429 = vmatpush1.bf16.msra.mxu1 %v19297_v1  ;;  %v19307_v5 = vld [vmem:[#allocation28_spill] sm:$0xff] }
 0x3e5   :  { %11399 = vmatprep.subr.bf16.mxu0 %v19298_v44  ;;  %11431 = vmatprep.subr.bf16.mxu1 %v19299_v19 }
 0x3e8   :  { %11401 = vmatpush1.bf16.msra.mxu0 %v19300_v63  ;;  %11433 = vmatpush1.bf16.msra.mxu1 %v19301_v30 }
 0x3e9   :  { %11403 = vmatprep.subr.bf16.mxu0 %v19302_v20  ;;  %11435 = vmatprep.subr.bf16.mxu1 %v19303_v2 }
 0x3ec   :  { %11405 = vmatpush1.bf16.msra.mxu0 %v19304_v53  ;;  %11437 = vmatpush1.bf16.msra.mxu1 %v19305_v16 }
 0x3ed   :  { %11439 = vmatprep.subr.bf16.mxu0 %v19306_v7  ;;  %11471 = vmatprep.subr.bf16.mxu1 %v19307_v5 }
 0x4a2   :  { %v1351_v1 = vpop.f32.mrb[6].mxu0  ;;  %v1422_v44 = vpop.f32.mrb[6].mxu1 }
 0x4a3   :  { %v1427_v19 = vadd.f32 %v1351_v1, %v19308_v25  ;;  %v1353_v50 = vpop.f32.mrb[7].mxu0  ;;  %v1424_v63 = vpop.f32.mrb[7].mxu1  ;;  %v1429_v53 = vadd.f32 %v1422_v44, %v19264_v36 }
 0x4a4   :  { %v1428_v30 = vadd.f32 %v1353_v50, %v19263_v57  ;;  %v1430_v16 = vadd.f32 %v1424_v63, %v15966_v34  ;;  %v19314_v63 = vld [vmem:[#allocation13_spill] sm:$0xff] }
 0x4a5   :  { %v10728_v24 = vmul.f32 -1.442695, %v1427_v19  ;;  %v10730_v2 = vmul.f32 -1.442695, %v1429_v53 }
 0x4a6   :  { %v10729_v20 = vmul.f32 -1.442695, %v1428_v30 }
 0x4a7   :  { %15139 = vpow2.f32 %v10728_v24 }
 0x4a8   :  { %15141 = vpow2.f32 %v10729_v20 }
 0x4a9   :  { %15143 = vtanh.f32 %v1430_v16 }
 0x4aa   :  { %15145 = vpow2.f32 %v10730_v2  ;;  %v19312_v2 = vld [vmem:[#allocation11_spill] sm:$0xff] }
 0x4b1   :  { %v15140_v7 = vpop.eup %15139 }
 0x4b2   :  { %v1440_v52 = vadd.f32 1.0, %v15140_v7  ;;  %v15142_v5 = vpop.eup %15141 }
 0x4b3   :  { %v1441_v1 = vadd.f32 1.0, %v15142_v5  ;;  %v15144_v25 = vpop.eup %15143  ;;  %v19313_v5 = vld [vmem:[#allocation12_spill] sm:$0xff] }
 0x4b4   :  { %15147 = vrcp.f32 %v1440_v52  ;;  %v15146_v51 = vpop.eup %15145  ;;  %v19310_v52 = vld [vmem:[#allocation9_spill] sm:$0xff] }
 0x4b5   :  { %15149 = vrcp.f32 %v1441_v1  ;;  %v1442_v24 = vadd.f32 1.0, %v15146_v51  ;;  %v19309_v51 = vld [vmem:[#allocation8_spill] sm:$0xff]  ;;  %v19315_v1 = vld [vmem:[#allocation14_spill] sm:$0xff] }
 0x4b7   :  { %15151 = vrcp.f32 %v1442_v24  ;;  %v19319_v24 = vld [vmem:[#allocation18_spill] sm:$0xff] }
 0x4be   :  { %v15148_v50 = vpop.eup %15147 }
 0x4bf   :  { %v1451_v19 = vmul.f32 %v15148_v50, %v15144_v25  ;;  %v15150_v30 = vpop.eup %15149  ;;  %v19311_v25 = vld [vmem:[#allocation10_spill] sm:$0xff]  ;;  %v19316_v50 = vld [vmem:[#allocation15_spill] sm:$0xff] }
 0x4c0   :  { %v1450_v20 = vmul.f32 %v15150_v30, %v16133_v28  ;;  %v10732_v28 = vld [vmem:[%s18871_s0 + $0x20] sm:$0xff]  ;;  %v19318_v30 = vld [vmem:[#allocation17_spill] sm:$0xff] }
 0x4c1   :  { %v15152_v53 = vpop.eup %15151 }
 0x4c2   :  { %v16215_v44 = vadd.f32 %v1451_v19, %v1450_v20  ;;  %v19317_v19 = vld [vmem:[#allocation16_spill] sm:$0xff]  ;;  %v19320_v20 = vld [vmem:[#allocation19_spill] sm:$0xff] }
 0x4c4   :  { %15153 = vtanh.f32 %v16215_v44 }
 0x4ce   :  { %v15154_v16 = vpop.eup %15153 }
 0x4cf   :  { %v1454_v7 = vmul.f32 %v15154_v16, %v15152_v53  ;;  %v19321_v53 = vld [vmem:[#allocation20_spill] sm:$0xff]  ;;  %v19322_v16 = vld [vmem:[#allocation21_spill] sm:$0xff] }
 0x4d1   :  { %10731 = vst [vmem:[%s18875_s4 + $0x18] sm:$0xff] %v1454_v7  ;;  %1524 = vmatmul.mubr.f32.vlgmr.msra.gmra.mrb[8].mxu0 %v1454_v7  ;;  %1595 = vmatmul.mubr.f32.vlgmr.msra.gmra.mrb[8].mxu1 %v1454_v7  ;;  %v19323_v7 = vld [vmem:[#allocation22_spill] sm:$0xff] }
 0x4d2   :  { %11441 = vmatpush1.bf16.msra.mxu0 %v15806_v10  ;;  %11473 = vmatpush1.bf16.msra.mxu1 %v15810_v11 }
 0x4d3   :  { %11443 = vmatprep.subr.bf16.mxu0 %v15812_v12  ;;  %11475 = vmatprep.subr.bf16.mxu1 %v15815_v23 }
 0x4d4   :  { %1665 = vmatprep.mubr.f32.mxu0 %v19235_v45  ;;  %1736 = vmatprep.mubr.f32.mxu1 %v19235_v45 }
 0x4d6   :  { %11445 = vmatpush1.bf16.msra.mxu0 %v15820_v33  ;;  %11477 = vmatpush1.bf16.msra.mxu1 %v15824_v38 }
 0x4d7   :  { %11447 = vmatprep.subr.bf16.mxu0 %v15826_v41  ;;  %11479 = vmatprep.subr.bf16.mxu1 %v15829_v47 }
 0x4da   :  { %11449 = vmatpush1.bf16.msra.mxu0 %v15834_v61  ;;  %11481 = vmatpush1.bf16.msra.mxu1 %v19243_v37 }
 0x4db   :  { %11451 = vmatprep.subr.bf16.mxu0 %v19244_v32  ;;  %11483 = vmatprep.subr.bf16.mxu1 %v19245_v29 }
 0x4de   :  { %11453 = vmatpush1.bf16.msra.mxu0 %v19246_v62  ;;  %11485 = vmatpush1.bf16.msra.mxu1 %v19247_v48 }
 0x4df   :  { %11455 = vmatprep.subr.bf16.mxu0 %v19248_v55  ;;  %11487 = vmatprep.subr.bf16.mxu1 %v19249_v60 }
 0x4e2   :  { %11457 = vmatpush1.bf16.msra.mxu0 %v19250_v43  ;;  %11489 = vmatpush1.bf16.msra.mxu1 %v19251_v54 }
 0x4e3   :  { %11459 = vmatprep.subr.bf16.mxu0 %v15864_v21  ;;  %11491 = vmatprep.subr.bf16.mxu1 %v19252_v59 }
 0x4e6   :  { %11461 = vmatpush1.bf16.msra.mxu0 %v15870_v42  ;;  %11493 = vmatpush1.bf16.msra.mxu1 %v15874_v0 }
 0x4e7   :  { %11463 = vmatprep.subr.bf16.mxu0 %v15876_v49  ;;  %11495 = vmatprep.subr.bf16.mxu1 %v15879_v6 }
 0x4ea   :  { %11465 = vmatpush1.bf16.msra.mxu0 %v15882_v14  ;;  %11497 = vmatpush1.bf16.msra.mxu1 %v15886_v3 }
 0x4eb   :  { %11467 = vmatprep.subr.bf16.mxu0 %v15888_v15  ;;  %11499 = vmatprep.subr.bf16.mxu1 %v15891_v46 }
 0x4ee   :  { %11469 = vmatpush1.bf16.msra.mxu0 %v15894_v58  ;;  %11501 = vmatpush1.bf16.msra.mxu1 %v15898_v56 }
 0x4ef   :  { %11503 = vmatprep.subr.bf16.mxu0 %v15707_v4  ;;  %11535 = vmatprep.subr.bf16.mxu1 %v15709_v8 }
 0x4f1   :  { %1666 = vmatmul.mubr.f32.vlgmr.msra.gmra.mrb[8].mxu0 %v10732_v28  ;;  %1737 = vmatmul.mubr.f32.vlgmr.msra.gmra.mrb[8].mxu1 %v10732_v28  ;;  %v19324_v28 = vld [vmem:[#allocation23_spill] sm:$0xff] }
 0x4f2   :  { %11505 = vmatpush1.bf16.msra.mxu0 %v15711_v9  ;;  %11537 = vmatpush1.bf16.msra.mxu1 %v15714_v13 }
 0x4f3   :  { %11507 = vmatprep.subr.bf16.mxu0 %v15718_v17  ;;  %11539 = vmatprep.subr.bf16.mxu1 %v15720_v18 }
 0x4f4   :  { %1839 = vmatprep.mubr.f32.mxu0 %v19235_v45  ;;  %1910 = vmatprep.mubr.f32.mxu1 %v19235_v45 }
 0x4f6   :  { %11509 = vmatpush1.bf16.msra.mxu0 %v15723_v22  ;;  %11541 = vmatpush1.bf16.msra.mxu1 %v15727_v26 }
 0x4f7   :  { %11511 = vmatprep.subr.bf16.mxu0 %v15729_v27  ;;  %11543 = vmatprep.subr.bf16.mxu1 %v15731_v31 }
 0x4fa   :  { %11513 = vmatpush1.bf16.msra.mxu0 %v15734_v35  ;;  %11545 = vmatpush1.bf16.msra.mxu1 %v15738_v39 }
 0x4fb   :  { %11515 = vmatprep.subr.bf16.mxu0 %v15740_v40  ;;  %11547 = vmatprep.subr.bf16.mxu1 %v19309_v51 }
 0x4fe   :  { %11517 = vmatpush1.bf16.msra.mxu0 %v19310_v52  ;;  %11549 = vmatpush1.bf16.msra.mxu1 %v19311_v25 }
 0x4ff   :  { %11519 = vmatprep.subr.bf16.mxu0 %v19312_v2  ;;  %11551 = vmatprep.subr.bf16.mxu1 %v19313_v5  ;;  %v19330_v5 = vld [vmem:[#allocation41_spill] sm:$0xff] }
 0x502   :  { %11521 = vmatpush1.bf16.msra.mxu0 %v19314_v63  ;;  %11553 = vmatpush1.bf16.msra.mxu1 %v19315_v1  ;;  %v19325_v63 = vld [vmem:[#allocation24_spill] sm:$0xff]  ;;  %v19326_v1 = vld [vmem:[#allocation25_spill] sm:$0xff] }
 0x503   :  { %11523 = vmatprep.subr.bf16.mxu0 %v19316_v50  ;;  %11555 = vmatprep.subr.bf16.mxu1 %v19317_v19  ;;  %v19327_v50 = vld [vmem:[#allocation26_spill] sm:$0xff]  ;;  %v19328_v19 = vld [vmem:[#allocation27_spill] sm:$0xff] }
 0x506   :  { %11525 = vmatpush1.bf16.msra.mxu0 %v19318_v30  ;;  %11557 = vmatpush1.bf16.msra.mxu1 %v19319_v24  ;;  %v19329_v30 = vld [vmem:[#allocation28_spill] sm:$0xff] }
 0x507   :  { %11527 = vmatprep.subr.bf16.mxu0 %v19320_v20  ;;  %11559 = vmatprep.subr.bf16.mxu1 %v19321_v53 }
 0x50a   :  { %11529 = vmatpush1.bf16.msra.mxu0 %v19322_v16  ;;  %11561 = vmatpush1.bf16.msra.mxu1 %v19323_v7 }
 0x50b   :  { %11531 = vmatprep.subr.bf16.mxu0 %v19324_v28  ;;  %11563 = vmatprep.subr.bf16.mxu1 %v19325_v63 }
 0x50e   :  { %11533 = vmatpush1.bf16.msra.mxu0 %v19326_v1  ;;  %11565 = vmatpush1.bf16.msra.mxu1 %v19327_v50 }
 0x50f   :  { %11567 = vmatprep.subr.bf16.mxu0 %v19328_v19  ;;  %11599 = vmatprep.subr.bf16.mxu1 %v19329_v30 }
 0x5c4   :  { %v1667_v24 = vpop.f32.mrb[8].mxu0  ;;  %v1738_v20 = vpop.f32.mrb[8].mxu1 }
 0x5c5   :  { %v1743_v53 = vadd.f32 %v1667_v24, %v19330_v5  ;;  %v1669_v2 = vpop.f32.mrb[9].mxu0  ;;  %v1740_v16 = vpop.f32.mrb[9].mxu1  ;;  %v1745_v1 = vadd.f32 %v1738_v20, %v19264_v36 }
 0x5c6   :  { %v1744_v7 = vadd.f32 %v1669_v2, %v19263_v57  ;;  %v1746_v50 = vadd.f32 %v1740_v16, %v15966_v34  ;;  %v19336_v16 = vld [vmem:[#allocation13_spill] sm:$0xff] }
 0x5c7   :  { %v10733_v25 = vmul.f32 -1.442695, %v1743_v53  ;;  %v10735_v63 = vmul.f32 -1.442695, %v1745_v1 }
 0x5c8   :  { %v10734_v28 = vmul.f32 -1.442695, %v1744_v7 }
 0x5c9   :  { %15155 = vpow2.f32 %v10733_v25 }
 0x5ca   :  { %15157 = vpow2.f32 %v10734_v28 }
 0x5cb   :  { %15159 = vtanh.f32 %v1746_v50 }
 0x5cc   :  { %15161 = vpow2.f32 %v10735_v63  ;;  %v19334_v63 = vld [vmem:[#allocation11_spill] sm:$0xff] }
 0x5d3   :  { %v15156_v19 = vpop.eup %15155 }
 0x5d4   :  { %v1756_v52 = vadd.f32 1.0, %v15156_v19  ;;  %v15158_v30 = vpop.eup %15157 }
 0x5d5   :  { %v1757_v24 = vadd.f32 1.0, %v15158_v30  ;;  %v15160_v5 = vpop.eup %15159  ;;  %v19335_v30 = vld [vmem:[#allocation12_spill] sm:$0xff] }
 0x5d6   :  { %15163 = vrcp.f32 %v1756_v52  ;;  %v15162_v51 = vpop.eup %15161  ;;  %v19332_v52 = vld [vmem:[#allocation9_spill] sm:$0xff] }
 0x5d7   :  { %15165 = vrcp.f32 %v1757_v24  ;;  %v1758_v25 = vadd.f32 1.0, %v15162_v51  ;;  %v19331_v51 = vld [vmem:[#allocation8_spill] sm:$0xff]  ;;  %v19337_v24 = vld [vmem:[#allocation14_spill] sm:$0xff] }
 0x5d9   :  { %15167 = vrcp.f32 %v1758_v25  ;;  %v19341_v25 = vld [vmem:[#allocation18_spill] sm:$0xff] }
 0x5e0   :  { %v15164_v2 = vpop.eup %15163 }
 0x5e1   :  { %v1767_v53 = vmul.f32 %v15164_v2, %v15160_v5  ;;  %v15166_v7 = vpop.eup %15165  ;;  %v19333_v5 = vld [vmem:[#allocation10_spill] sm:$0xff]  ;;  %v19338_v2 = vld [vmem:[#allocation15_spill] sm:$0xff] }
 0x5e2   :  { %v1766_v28 = vmul.f32 %v15166_v7, %v16215_v44  ;;  %v10737_v44 = vld [vmem:[%s18871_s0 + $0x28] sm:$0xff] }
 0x5e3   :  { %v15168_v1 = vpop.eup %15167  ;;  %v19340_v7 = vld [vmem:[#allocation17_spill] sm:$0xff] }
 0x5e4   :  { %v16297_v20 = vadd.f32 %v1767_v53, %v1766_v28  ;;  %v19339_v53 = vld [vmem:[#allocation16_spill] sm:$0xff]  ;;  %v19342_v28 = vld [vmem:[#allocation19_spill] sm:$0xff] }
 0x5e6   :  { %15169 = vtanh.f32 %v16297_v20 }
 0x5f0   :  { %v15170_v50 = vpop.eup %15169 }
 0x5f1   :  { %v1770_v19 = vmul.f32 %v15170_v50, %v15168_v1  ;;  %v19343_v1 = vld [vmem:[#allocation20_spill] sm:$0xff]  ;;  %v19344_v50 = vld [vmem:[#allocation21_spill] sm:$0xff] }
 0x5f3   :  { %10736 = vst [vmem:[%s18875_s4 + $0x20] sm:$0xff] %v1770_v19  ;;  %1840 = vmatmul.mubr.f32.vlgmr.msra.gmra.mrb[10].mxu0 %v1770_v19  ;;  %1911 = vmatmul.mubr.f32.vlgmr.msra.gmra.mrb[10].mxu1 %v1770_v19  ;;  %v19345_v19 = vld [vmem:[#allocation22_spill] sm:$0xff] }
 0x5f4   :  { %11569 = vmatpush1.bf16.msra.mxu0 %v15806_v10  ;;  %11601 = vmatpush1.bf16.msra.mxu1 %v15810_v11 }
 0x5f5   :  { %11571 = vmatprep.subr.bf16.mxu0 %v15812_v12  ;;  %11603 = vmatprep.subr.bf16.mxu1 %v15815_v23 }
 0x5f6   :  { %1981 = vmatprep.mubr.f32.mxu0 %v19235_v45  ;;  %2052 = vmatprep.mubr.f32.mxu1 %v19235_v45 }
 0x5f8   :  { %11573 = vmatpush1.bf16.msra.mxu0 %v15820_v33  ;;  %11605 = vmatpush1.bf16.msra.mxu1 %v15824_v38 }
 0x5f9   :  { %11575 = vmatprep.subr.bf16.mxu0 %v15826_v41  ;;  %11607 = vmatprep.subr.bf16.mxu1 %v15829_v47 }
 0x5fc   :  { %11577 = vmatpush1.bf16.msra.mxu0 %v15834_v61  ;;  %11609 = vmatpush1.bf16.msra.mxu1 %v19243_v37 }
 0x5fd   :  { %11579 = vmatprep.subr.bf16.mxu0 %v19244_v32  ;;  %11611 = vmatprep.subr.bf16.mxu1 %v19245_v29 }
 0x600   :  { %11581 = vmatpush1.bf16.msra.mxu0 %v19246_v62  ;;  %11613 = vmatpush1.bf16.msra.mxu1 %v19247_v48 }
 0x601   :  { %11583 = vmatprep.subr.bf16.mxu0 %v19248_v55  ;;  %11615 = vmatprep.subr.bf16.mxu1 %v19249_v60 }
 0x604   :  { %11585 = vmatpush1.bf16.msra.mxu0 %v19250_v43  ;;  %11617 = vmatpush1.bf16.msra.mxu1 %v19251_v54 }
 0x605   :  { %11587 = vmatprep.subr.bf16.mxu0 %v15864_v21  ;;  %11619 = vmatprep.subr.bf16.mxu1 %v19252_v59 }
 0x608   :  { %11589 = vmatpush1.bf16.msra.mxu0 %v15870_v42  ;;  %11621 = vmatpush1.bf16.msra.mxu1 %v15874_v0 }
 0x609   :  { %11591 = vmatprep.subr.bf16.mxu0 %v15876_v49  ;;  %11623 = vmatprep.subr.bf16.mxu1 %v15879_v6 }
 0x60c   :  { %11593 = vmatpush1.bf16.msra.mxu0 %v15882_v14  ;;  %11625 = vmatpush1.bf16.msra.mxu1 %v15886_v3 }
 0x60d   :  { %11595 = vmatprep.subr.bf16.mxu0 %v15888_v15  ;;  %11627 = vmatprep.subr.bf16.mxu1 %v15891_v46 }
 0x610   :  { %11597 = vmatpush1.bf16.msra.mxu0 %v15894_v58  ;;  %11629 = vmatpush1.bf16.msra.mxu1 %v15898_v56 }
 0x611   :  { %11631 = vmatprep.subr.bf16.mxu0 %v15707_v4  ;;  %11663 = vmatprep.subr.bf16.mxu1 %v15709_v8 }
 0x613   :  { %1982 = vmatmul.mubr.f32.vlgmr.msra.gmra.mrb[10].mxu0 %v10737_v44  ;;  %2053 = vmatmul.mubr.f32.vlgmr.msra.gmra.mrb[10].mxu1 %v10737_v44  ;;  %v19346_v44 = vld [vmem:[#allocation23_spill] sm:$0xff] }
 0x614   :  { %11633 = vmatpush1.bf16.msra.mxu0 %v15711_v9  ;;  %11665 = vmatpush1.bf16.msra.mxu1 %v15714_v13 }
 0x615   :  { %11635 = vmatprep.subr.bf16.mxu0 %v15718_v17  ;;  %11667 = vmatprep.subr.bf16.mxu1 %v15720_v18 }
 0x616   :  { %2155 = vmatprep.mubr.f32.mxu0 %v19235_v45  ;;  %2226 = vmatprep.mubr.f32.mxu1 %v19235_v45 }
 0x618   :  { %11637 = vmatpush1.bf16.msra.mxu0 %v15723_v22  ;;  %11669 = vmatpush1.bf16.msra.mxu1 %v15727_v26 }
 0x619   :  { %11639 = vmatprep.subr.bf16.mxu0 %v15729_v27  ;;  %11671 = vmatprep.subr.bf16.mxu1 %v15731_v31 }
 0x61c   :  { %11641 = vmatpush1.bf16.msra.mxu0 %v15734_v35  ;;  %11673 = vmatpush1.bf16.msra.mxu1 %v15738_v39 }
 0x61d   :  { %11643 = vmatprep.subr.bf16.mxu0 %v15740_v40  ;;  %11675 = vmatprep.subr.bf16.mxu1 %v19331_v51 }
 0x620   :  { %11645 = vmatpush1.bf16.msra.mxu0 %v19332_v52  ;;  %11677 = vmatpush1.bf16.msra.mxu1 %v19333_v5 }
 0x621   :  { %11647 = vmatprep.subr.bf16.mxu0 %v19334_v63  ;;  %11679 = vmatprep.subr.bf16.mxu1 %v19335_v30  ;;  %v19352_v30 = vld [vmem:[#allocation41_spill] sm:$0xff] }
 0x624   :  { %11649 = vmatpush1.bf16.msra.mxu0 %v19336_v16  ;;  %11681 = vmatpush1.bf16.msra.mxu1 %v19337_v24  ;;  %v19347_v16 = vld [vmem:[#allocation24_spill] sm:$0xff]  ;;  %v19348_v24 = vld [vmem:[#allocation25_spill] sm:$0xff] }
 0x625   :  { %11651 = vmatprep.subr.bf16.mxu0 %v19338_v2  ;;  %11683 = vmatprep.subr.bf16.mxu1 %v19339_v53  ;;  %v19349_v2 = vld [vmem:[#allocation26_spill] sm:$0xff]  ;;  %v19350_v53 = vld [vmem:[#allocation27_spill] sm:$0xff] }
 0x628   :  { %11653 = vmatpush1.bf16.msra.mxu0 %v19340_v7  ;;  %11685 = vmatpush1.bf16.msra.mxu1 %v19341_v25  ;;  %v19351_v7 = vld [vmem:[#allocation28_spill] sm:$0xff] }
 0x629   :  { %11655 = vmatprep.subr.bf16.mxu0 %v19342_v28  ;;  %11687 = vmatprep.subr.bf16.mxu1 %v19343_v1 }
 0x62c   :  { %11657 = vmatpush1.bf16.msra.mxu0 %v19344_v50  ;;  %11689 = vmatpush1.bf16.msra.mxu1 %v19345_v19 }
 0x62d   :  { %11659 = vmatprep.subr.bf16.mxu0 %v19346_v44  ;;  %11691 = vmatprep.subr.bf16.mxu1 %v19347_v16 }
 0x630   :  { %11661 = vmatpush1.bf16.msra.mxu0 %v19348_v24  ;;  %11693 = vmatpush1.bf16.msra.mxu1 %v19349_v2 }
 0x631   :  { %11695 = vmatprep.subr.bf16.mxu0 %v19350_v53  ;;  %11727 = vmatprep.subr.bf16.mxu1 %v19351_v7 }
 0x6e6   :  { %v1983_v25 = vpop.f32.mrb[10].mxu0  ;;  %v2054_v28 = vpop.f32.mrb[10].mxu1 }
 0x6e7   :  { %v2059_v1 = vadd.f32 %v1983_v25, %v19352_v30  ;;  %v1985_v63 = vpop.f32.mrb[11].mxu0  ;;  %v2056_v50 = vpop.f32.mrb[11].mxu1  ;;  %v2061_v24 = vadd.f32 %v2054_v28, %v19264_v36 }
 0x6e8   :  { %v2060_v19 = vadd.f32 %v1985_v63, %v19263_v57  ;;  %v2062_v2 = vadd.f32 %v2056_v50, %v15966_v34  ;;  %v19371_v50 = vld [vmem:[#allocation26_spill] sm:$0xff] }
 0x6e9   :  { %v10738_v5 = vmul.f32 -1.442695, %v2059_v1  ;;  %v10740_v16 = vmul.f32 -1.442695, %v2061_v24 }
 0x6ea   :  { %v10739_v44 = vmul.f32 -1.442695, %v2060_v19 }
 0x6eb   :  { %15171 = vpow2.f32 %v10738_v5 }
 0x6ec   :  { %15173 = vpow2.f32 %v10739_v44 }
 0x6ed   :  { %15175 = vtanh.f32 %v2062_v2 }
 0x6ee   :  { %15177 = vpow2.f32 %v10740_v16  ;;  %v19369_v16 = vld [vmem:[#allocation24_spill] sm:$0xff] }
 0x6f5   :  { %v15172_v53 = vpop.eup %15171 }
 0x6f6   :  { %v2072_v52 = vadd.f32 1.0, %v15172_v53  ;;  %v15174_v7 = vpop.eup %15173 }
 0x6f7   :  { %v2073_v25 = vadd.f32 1.0, %v15174_v7  ;;  %v15176_v30 = vpop.eup %15175  ;;  %v19370_v7 = vld [vmem:[#allocation25_spill] sm:$0xff] }
 0x6f8   :  { %15179 = vrcp.f32 %v2072_v52  ;;  %v15178_v51 = vpop.eup %15177  ;;  %v19367_v52 = vld [vmem:[#allocation22_spill] sm:$0xff] }
 0x6f9   :  { %15181 = vrcp.f32 %v2073_v25  ;;  %v2074_v5 = vadd.f32 1.0, %v15178_v51  ;;  %v19366_v51 = vld [vmem:[#allocation21_spill] sm:$0xff]  ;;  %v19372_v25 = vld [vmem:[#allocation27_spill] sm:$0xff] }
 0x6fb   :  { %15183 = vrcp.f32 %v2074_v5  ;;  %v19374_v5 = vld [vmem:[#allocation41_spill] sm:$0xff] }
 0x702   :  { %v15180_v63 = vpop.eup %15179 }
 0x703   :  { %v2083_v1 = vmul.f32 %v15180_v63, %v15176_v30  ;;  %v15182_v19 = vpop.eup %15181  ;;  %v19368_v30 = vld [vmem:[#allocation23_spill] sm:$0xff]  ;;  %v19373_v63 = vld [vmem:[#allocation28_spill] sm:$0xff] }
 0x704   :  { %v2082_v44 = vmul.f32 %v15182_v19, %v16297_v20  ;;  %v10742_v20 = vld [vmem:[%s18871_s0 + $0x30] sm:$0xff] }
 0x705   :  { %v15184_v24 = vpop.eup %15183 }
 0x706   :  { %v16379_v28 = vadd.f32 %v2083_v1, %v2082_v44 }
 0x708   :  { %15185 = vtanh.f32 %v16379_v28 }
 0x712   :  { %v15186_v2 = vpop.eup %15185 }
 0x713   :  { %v2086_v53 = vmul.f32 %v15186_v2, %v15184_v24 }
 0x715   :  { %10741 = vst [vmem:[%s18875_s4 + $0x28] sm:$0xff] %v2086_v53  ;;  %2156 = vmatmul.mubr.f32.vlgmr.msra.gmra.mrb[12].mxu0 %v2086_v53  ;;  %2227 = vmatmul.mubr.f32.vlgmr.msra.gmra.mrb[12].mxu1 %v2086_v53 }
 0x716   :  { %11697 = vmatpush1.bf16.msra.mxu0 %v15806_v10  ;;  %11729 = vmatpush1.bf16.msra.mxu1 %v15810_v11 }
 0x717   :  { %11699 = vmatprep.subr.bf16.mxu0 %v15812_v12  ;;  %11731 = vmatprep.subr.bf16.mxu1 %v15815_v23 }
 0x718   :  { %2297 = vmatprep.mubr.f32.mxu0 %v19235_v45  ;;  %2368 = vmatprep.mubr.f32.mxu1 %v19235_v45 }
 0x71a   :  { %11701 = vmatpush1.bf16.msra.mxu0 %v15820_v33  ;;  %11733 = vmatpush1.bf16.msra.mxu1 %v15824_v38 }
 0x71b   :  { %11703 = vmatprep.subr.bf16.mxu0 %v15826_v41  ;;  %11735 = vmatprep.subr.bf16.mxu1 %v15829_v47 }
 0x71e   :  { %11705 = vmatpush1.bf16.msra.mxu0 %v15834_v61  ;;  %11737 = vmatpush1.bf16.msra.mxu1 %v19243_v37 }
 0x71f   :  { %11707 = vmatprep.subr.bf16.mxu0 %v19244_v32  ;;  %11739 = vmatprep.subr.bf16.mxu1 %v19245_v29 }
 0x722   :  { %11709 = vmatpush1.bf16.msra.mxu0 %v19246_v62  ;;  %11741 = vmatpush1.bf16.msra.mxu1 %v19247_v48 }
 0x723   :  { %11711 = vmatprep.subr.bf16.mxu0 %v19248_v55  ;;  %11743 = vmatprep.subr.bf16.mxu1 %v19249_v60 }
 0x726   :  { %11713 = vmatpush1.bf16.msra.mxu0 %v19250_v43  ;;  %11745 = vmatpush1.bf16.msra.mxu1 %v19251_v54 }
 0x727   :  { %11715 = vmatprep.subr.bf16.mxu0 %v15864_v21  ;;  %11747 = vmatprep.subr.bf16.mxu1 %v19252_v59 }
 0x72a   :  { %11717 = vmatpush1.bf16.msra.mxu0 %v15870_v42  ;;  %11749 = vmatpush1.bf16.msra.mxu1 %v15874_v0 }
 0x72b   :  { %11719 = vmatprep.subr.bf16.mxu0 %v15876_v49  ;;  %11751 = vmatprep.subr.bf16.mxu1 %v15879_v6 }
 0x72e   :  { %11721 = vmatpush1.bf16.msra.mxu0 %v15882_v14  ;;  %11753 = vmatpush1.bf16.msra.mxu1 %v15886_v3 }
 0x72f   :  { %11723 = vmatprep.subr.bf16.mxu0 %v15888_v15  ;;  %11755 = vmatprep.subr.bf16.mxu1 %v15891_v46 }
 0x732   :  { %11725 = vmatpush1.bf16.msra.mxu0 %v15894_v58  ;;  %11757 = vmatpush1.bf16.msra.mxu1 %v15898_v56 }
 0x733   :  { %11759 = vmatprep.subr.bf16.mxu0 %v15707_v4  ;;  %11791 = vmatprep.subr.bf16.mxu1 %v15709_v8  ;;  %v19353_v4 = vld [vmem:[#allocation8_spill] sm:$0xff]  ;;  %v19354_v8 = vld [vmem:[#allocation9_spill] sm:$0xff] }
 0x735   :  { %2298 = vmatmul.mubr.f32.vlgmr.msra.gmra.mrb[12].mxu0 %v10742_v20  ;;  %2369 = vmatmul.mubr.f32.vlgmr.msra.gmra.mrb[12].mxu1 %v10742_v20 }
 0x736   :  { %11761 = vmatpush1.bf16.msra.mxu0 %v15711_v9  ;;  %11793 = vmatpush1.bf16.msra.mxu1 %v15714_v13  ;;  %v19355_v9 = vld [vmem:[#allocation10_spill] sm:$0xff]  ;;  %v19356_v13 = vld [vmem:[#allocation11_spill] sm:$0xff] }
 0x737   :  { %11763 = vmatprep.subr.bf16.mxu0 %v15718_v17  ;;  %11795 = vmatprep.subr.bf16.mxu1 %v15720_v18  ;;  %v19357_v17 = vld [vmem:[#allocation12_spill] sm:$0xff]  ;;  %v19358_v18 = vld [vmem:[#allocation13_spill] sm:$0xff] }
 0x738   :  { %2471 = vmatprep.mubr.f32.mxu0 %v19235_v45  ;;  %2542 = vmatprep.mubr.f32.mxu1 %v19235_v45 }
 0x73a   :  { %11765 = vmatpush1.bf16.msra.mxu0 %v15723_v22  ;;  %11797 = vmatpush1.bf16.msra.mxu1 %v15727_v26  ;;  %v19359_v22 = vld [vmem:[#allocation14_spill] sm:$0xff]  ;;  %v19360_v26 = vld [vmem:[#allocation15_spill] sm:$0xff] }
 0x73b   :  { %11767 = vmatprep.subr.bf16.mxu0 %v15729_v27  ;;  %11799 = vmatprep.subr.bf16.mxu1 %v15731_v31  ;;  %v19361_v27 = vld [vmem:[#allocation16_spill] sm:$0xff]  ;;  %v19362_v31 = vld [vmem:[#allocation17_spill] sm:$0xff] }
 0x73e   :  { %11769 = vmatpush1.bf16.msra.mxu0 %v15734_v35  ;;  %11801 = vmatpush1.bf16.msra.mxu1 %v15738_v39  ;;  %v19363_v35 = vld [vmem:[#allocation18_spill] sm:$0xff]  ;;  %v19364_v39 = vld [vmem:[#allocation19_spill] sm:$0xff] }
 0x73f   :  { %11771 = vmatprep.subr.bf16.mxu0 %v15740_v40  ;;  %11803 = vmatprep.subr.bf16.mxu1 %v19353_v4  ;;  %v19365_v40 = vld [vmem:[#allocation20_spill] sm:$0xff] }
 0x742   :  { %11773 = vmatpush1.bf16.msra.mxu0 %v19354_v8  ;;  %11805 = vmatpush1.bf16.msra.mxu1 %v19355_v9 }
 0x743   :  { %11775 = vmatprep.subr.bf16.mxu0 %v19356_v13  ;;  %11807 = vmatprep.subr.bf16.mxu1 %v19357_v17 }
 0x746   :  { %11777 = vmatpush1.bf16.msra.mxu0 %v19358_v18  ;;  %11809 = vmatpush1.bf16.msra.mxu1 %v19359_v22 }
 0x747   :  { %11779 = vmatprep.subr.bf16.mxu0 %v19360_v26  ;;  %11811 = vmatprep.subr.bf16.mxu1 %v19361_v27 }
 0x74a   :  { %11781 = vmatpush1.bf16.msra.mxu0 %v19362_v31  ;;  %11813 = vmatpush1.bf16.msra.mxu1 %v19363_v35 }
 0x74b   :  { %11783 = vmatprep.subr.bf16.mxu0 %v19364_v39  ;;  %11815 = vmatprep.subr.bf16.mxu1 %v19365_v40 }
 0x74e   :  { %11785 = vmatpush1.bf16.msra.mxu0 %v19366_v51  ;;  %11817 = vmatpush1.bf16.msra.mxu1 %v19367_v52 }
 0x74f   :  { %11787 = vmatprep.subr.bf16.mxu0 %v19368_v30  ;;  %11819 = vmatprep.subr.bf16.mxu1 %v19369_v16 }
 0x752   :  { %11789 = vmatpush1.bf16.msra.mxu0 %v19370_v7  ;;  %11821 = vmatpush1.bf16.msra.mxu1 %v19371_v50 }
 0x753   :  { %11823 = vmatprep.subr.bf16.mxu0 %v19372_v25  ;;  %11855 = vmatprep.subr.bf16.mxu1 %v19373_v63 }
 0x808   :  { %v2299_v1 = vpop.f32.mrb[12].mxu0  ;;  %v2370_v19 = vpop.f32.mrb[12].mxu1 }
 0x809   :  { %v2375_v44 = vadd.f32 %v2299_v1, %v19374_v5  ;;  %v2301_v24 = vpop.f32.mrb[13].mxu0  ;;  %v2372_v2 = vpop.f32.mrb[13].mxu1  ;;  %v2377_v8 = vadd.f32 %v2370_v19, %v19264_v36  ;;  %v2805_v1 = vld [vmem:[#allocation4 + $0x290] sm:$0xff] }
 0x80a   :  { %v2376_v53 = vadd.f32 %v2301_v24, %v19263_v57  ;;  %v2378_v9 = vadd.f32 %v2372_v2, %v15966_v34  ;;  %v2809_v19 = vld [vmem:[#allocation4 + $0x2b0] sm:$0xff]  ;;  %v2816_v24 = vld [vmem:[#allocation4 + $0x2e8] sm:$0xff]  ;;  %v2814_v2 = vld [vmem:[#allocation4 + $0x2d8] sm:$0xff] }
 0x80b   :  { %v10743_v20 = vmul.f32 -1.442695, %v2375_v44  ;;  %v10745_v13 = vmul.f32 -1.442695, %v2377_v8  ;;  %v2812_v44 = vld [vmem:[#allocation4 + $0x2c8] sm:$0xff]  ;;  %v2811_v8 = vld [vmem:[#allocation4 + $0x2c0] sm:$0xff] }
 0x80c   :  { %v10744_v4 = vmul.f32 -1.442695, %v2376_v53  ;;  %v2818_v53 = vld [vmem:[#allocation4 + $0x2f8] sm:$0xff] }
 0x80d   :  { %15187 = vpow2.f32 %v10743_v20 }
 0x80e   :  { %15189 = vpow2.f32 %v10744_v4  ;;  %v16534_v4 = vpack.c.bf16 %v2809_v19, %v2805_v1  ;;  %v2837_v1 = vld [vmem:[#allocation4 + $0x390] sm:$0xff] }
 0x80f   :  { %15191 = vtanh.f32 %v2378_v9  ;;  %v2815_v9 = vld [vmem:[#allocation4 + $0x2e0] sm:$0xff]  ;;  %v2841_v19 = vld [vmem:[#allocation4 + $0x3b0] sm:$0xff] }
 0x810   :  { %15193 = vpow2.f32 %v10745_v13  ;;  %v16538_v13 = vpack.c.bf16 %v2816_v24, %v2812_v44  ;;  %v2844_v44 = vld [vmem:[#allocation4 + $0x3c8] sm:$0xff] }
 0x811   :  { %v2848_v24 = vld [vmem:[#allocation4 + $0x3e8] sm:$0xff] }
 0x817   :  { %v15188_v17 = vpop.eup %15187 }
 0x818   :  { %v2388_v18 = vadd.f32 1.0, %v15188_v17  ;;  %v15190_v22 = vpop.eup %15189  ;;  %v16540_v17 = vpack.c.bf16 %v2818_v53, %v2814_v2  ;;  %v2846_v2 = vld [vmem:[#allocation4 + $0x3d8] sm:$0xff] }
 0x819   :  { %v2389_v26 = vadd.f32 1.0, %v15190_v22  ;;  %v15192_v27 = vpop.eup %15191  ;;  %v2817_v22 = vld [vmem:[#allocation4 + $0x2f0] sm:$0xff]  ;;  %v2850_v53 = vld [vmem:[#allocation4 + $0x3f8] sm:$0xff] }
 0x81a   :  { %15195 = vrcp.f32 %v2388_v18  ;;  %v15194_v31 = vpop.eup %15193  ;;  %19375 = vst [vmem:[#allocation29_spill] sm:$0xff] %v16540_v17  ;;  %v2813_v18 = vld [vmem:[#allocation4 + $0x2d0] sm:$0xff] }
 0x81b   :  { %15197 = vrcp.f32 %v2389_v26  ;;  %v2390_v51 = vadd.f32 1.0, %v15194_v31  ;;  %v2820_v26 = vld [vmem:[#allocation4 + $0x308] sm:$0xff]  ;;  %v2822_v31 = vld [vmem:[#allocation4 + $0x318] sm:$0xff] }
 0x81d   :  { %15199 = vrcp.f32 %v2390_v51  ;;  %v2819_v51 = vld [vmem:[#allocation4 + $0x300] sm:$0xff] }
 0x824   :  { %v15196_v35 = vpop.eup %15195 }
 0x825   :  { %v2399_v39 = vmul.f32 %v15196_v35, %v15192_v27  ;;  %v15198_v40 = vpop.eup %15197  ;;  %v2824_v27 = vld [vmem:[#allocation4 + $0x328] sm:$0xff]  ;;  %v2826_v35 = vld [vmem:[#allocation4 + $0x338] sm:$0xff] }
 0x826   :  { %v2398_v52 = vmul.f32 %v15198_v40, %v16379_v28  ;;  %v2807_v28 = vld [vmem:[#allocation4 + $0x2a0] sm:$0xff]  ;;  %v16546_v40 = vpack.c.bf16 %v2817_v22, %v2813_v18 }
 0x827   :  { %v15200_v16 = vpop.eup %15199  ;;  %v2843_v18 = vld [vmem:[#allocation4 + $0x3c0] sm:$0xff] }
 0x828   :  { %v16461_v30 = vadd.f32 %v2399_v39, %v2398_v52  ;;  %v16544_v39 = vpack.c.bf16 %v2815_v9, %v2811_v8  ;;  %19377 = vst [vmem:[#allocation31_spill] sm:$0xff] %v16546_v40  ;;  %v2823_v52 = vld [vmem:[#allocation4 + $0x320] sm:$0xff]  ;;  %v16582_v9 = vpack.c.bf16 %v2841_v19, %v2837_v1 }
 0x829   :  { %v2847_v22 = vld [vmem:[#allocation4 + $0x3e0] sm:$0xff] }
 0x82a   :  { %15201 = vtanh.f32 %v16461_v30  ;;  %19376 = vst [vmem:[#allocation30_spill] sm:$0xff] %v16544_v39  ;;  %19389 = vst [vmem:[#allocation10_spill] sm:$0xff] %v16582_v9  ;;  %v2730_v1 = vld [vmem:[#allocation2 + $0x240] sm:$0xff] }
 0x82b   :  { %v2734_v19 = vld [vmem:[#allocation2 + $0x260] sm:$0xff] }
 0x834   :  { %v15202_v7 = vpop.eup %15201 }
 0x835   :  { %v2402_v50 = vmul.f32 %v15202_v7, %v15200_v16  ;;  %v16550_v16 = vpack.c.bf16 %v2824_v27, %v2820_v26  ;;  %v16552_v7 = vpack.c.bf16 %v2826_v35, %v2822_v31  ;;  %v16586_v26 = vpack.c.bf16 %v2848_v24, %v2844_v44  ;;  %v2845_v31 = vld [vmem:[#allocation4 + $0x3d0] sm:$0xff] }
 0x836   :  { %v16588_v27 = vpack.c.bf16 %v2850_v53, %v2846_v2  ;;  %v2849_v35 = vld [vmem:[#allocation4 + $0x3f0] sm:$0xff] }
 0x837   :  { %10746 = vst [vmem:[%s18875_s4 + $0x30] sm:$0xff] %v2402_v50  ;;  %2472 = vmatmul.mubr.f32.vlgmr.msra.gmra.mrb[14].mxu0 %v2402_v50  ;;  %2543 = vmatmul.mubr.f32.vlgmr.msra.gmra.mrb[14].mxu1 %v2402_v50  ;;  %19378 = vst [vmem:[#allocation32_spill] sm:$0xff] %v16550_v16  ;;  %v2821_v50 = vld [vmem:[#allocation4 + $0x310] sm:$0xff] }
 0x838   :  { %11825 = vmatpush1.bf16.msra.mxu0 %v15806_v10  ;;  %11857 = vmatpush1.bf16.msra.mxu1 %v15810_v11  ;;  %v2788_v10 = vld [vmem:[#allocation4 + $0x208] sm:$0xff]  ;;  %19379 = vst [vmem:[#allocation33_spill] sm:$0xff] %v16552_v7  ;;  %19390 = vst [vmem:[#allocation11_spill] sm:$0xff] %v16586_v26  ;;  %v2732_v2 = vld [vmem:[#allocation2 + $0x250] sm:$0xff] }
 0x839   :  { %11827 = vmatprep.subr.bf16.mxu0 %v15812_v12  ;;  %11859 = vmatprep.subr.bf16.mxu1 %v15815_v23  ;;  %v2792_v11 = vld [vmem:[#allocation4 + $0x228] sm:$0xff]  ;;  %v2790_v12 = vld [vmem:[#allocation4 + $0x218] sm:$0xff]  ;;  %19391 = vst [vmem:[#allocation12_spill] sm:$0xff] %v16588_v27  ;;  %v2736_v53 = vld [vmem:[#allocation2 + $0x270] sm:$0xff] }
 0x83a   :  { %2613 = vmatprep.mubr.f32.mxu0 %v19235_v45  ;;  %2684 = vmatprep.mubr.f32.mxu1 %v19235_v45  ;;  %v2794_v23 = vld [vmem:[#allocation4 + $0x238] sm:$0xff] }
 0x83c   :  { %11829 = vmatpush1.bf16.msra.mxu0 %v15820_v33  ;;  %11861 = vmatpush1.bf16.msra.mxu1 %v15824_v38  ;;  %v2787_v33 = vld [vmem:[#allocation4 + $0x200] sm:$0xff] }
 0x83d   :  { %11831 = vmatprep.subr.bf16.mxu0 %v15826_v41  ;;  %11863 = vmatprep.subr.bf16.mxu1 %v15829_v47  ;;  %v2791_v38 = vld [vmem:[#allocation4 + $0x220] sm:$0xff]  ;;  %v16497_v41 = vpack.c.bf16 %v2792_v11, %v2788_v10  ;;  %v16499_v47 = vpack.c.bf16 %v2794_v23, %v2790_v12  ;;  %v2825_v10 = vld [vmem:[#allocation4 + $0x330] sm:$0xff]  ;;  %v2828_v11 = vld [vmem:[#allocation4 + $0x348] sm:$0xff] }
 0x83e   :  { %v2832_v12 = vld [vmem:[#allocation4 + $0x368] sm:$0xff]  ;;  %v2830_v23 = vld [vmem:[#allocation4 + $0x358] sm:$0xff] }
 0x840   :  { %11833 = vmatpush1.bf16.msra.mxu0 %v15834_v61  ;;  %11865 = vmatpush1.bf16.msra.mxu1 %v19243_v37  ;;  %v2789_v61 = vld [vmem:[#allocation4 + $0x210] sm:$0xff]  ;;  %v2799_v37 = vld [vmem:[#allocation4 + $0x260] sm:$0xff] }
 0x841   :  { %11835 = vmatprep.subr.bf16.mxu0 %v19244_v32  ;;  %11867 = vmatprep.subr.bf16.mxu1 %v19245_v29 }
 0x844   :  { %11837 = vmatpush1.bf16.msra.mxu0 %v19246_v62  ;;  %11869 = vmatpush1.bf16.msra.mxu1 %v19247_v48  ;;  %v2804_v62 = vld [vmem:[#allocation4 + $0x288] sm:$0xff] }
 0x845   :  { %11839 = vmatprep.subr.bf16.mxu0 %v19248_v55  ;;  %11871 = vmatprep.subr.bf16.mxu1 %v19249_v60  ;;  %v2808_v48 = vld [vmem:[#allocation4 + $0x2a8] sm:$0xff]  ;;  %v2806_v55 = vld [vmem:[#allocation4 + $0x298] sm:$0xff] }
 0x846   :  { %v2810_v60 = vld [vmem:[#allocation4 + $0x2b8] sm:$0xff]  ;;  %v16524_v25 = vpack.c.bf16 %v2808_v48, %v2804_v62 }
 0x847   :  { %v16526_v63 = vpack.c.bf16 %v2810_v60, %v2806_v55  ;;  %v2835_v55 = vld [vmem:[#allocation4 + $0x380] sm:$0xff] }
 0x848   :  { %11841 = vmatpush1.bf16.msra.mxu0 %v19250_v43  ;;  %11873 = vmatpush1.bf16.msra.mxu1 %v19251_v54  ;;  %v2839_v60 = vld [vmem:[#allocation4 + $0x3a0] sm:$0xff] }
 0x849   :  { %11843 = vmatprep.subr.bf16.mxu0 %v15864_v21  ;;  %11875 = vmatprep.subr.bf16.mxu1 %v19252_v59  ;;  %v2796_v21 = vld [vmem:[#allocation4 + $0x248] sm:$0xff]  ;;  %v2803_v59 = vld [vmem:[#allocation4 + $0x280] sm:$0xff]  ;;  %v16580_v8 = vpack.c.bf16 %v2839_v60, %v2835_v55 }
 0x84a   :  { %v16532_v20 = vpack.c.bf16 %v2807_v28, %v2803_v59 }
 0x84b   :  { %19388 = vst [vmem:[#allocation9_spill] sm:$0xff] %v16580_v8 }
 0x84c   :  { %11845 = vmatpush1.bf16.msra.mxu0 %v15870_v42  ;;  %11877 = vmatpush1.bf16.msra.mxu1 %v15874_v0  ;;  %v2793_v42 = vld [vmem:[#allocation4 + $0x230] sm:$0xff]  ;;  %v2800_v0 = vld [vmem:[#allocation4 + $0x268] sm:$0xff] }
 0x84d   :  { %11847 = vmatprep.subr.bf16.mxu0 %v15876_v49  ;;  %11879 = vmatprep.subr.bf16.mxu1 %v15879_v6  ;;  %v2798_v49 = vld [vmem:[#allocation4 + $0x258] sm:$0xff]  ;;  %v16512_v32 = vpack.c.bf16 %v2800_v0, %v2796_v21  ;;  %v2831_v21 = vld [vmem:[#allocation4 + $0x360] sm:$0xff]  ;;  %v16562_v0 = vpack.c.bf16 %v2832_v12, %v2828_v11  ;;  %v16592_v11 = vpack.c.bf16 %v2847_v22, %v2843_v18  ;;  %v2739_v18 = vld [vmem:[#allocation2 + $0x288] sm:$0xff] }
 0x84e   :  { %v2802_v6 = vld [vmem:[#allocation4 + $0x278] sm:$0xff]  ;;  %v16594_v12 = vpack.c.bf16 %v2849_v35, %v2845_v31  ;;  %v2743_v22 = vld [vmem:[#allocation2 + $0x2a8] sm:$0xff] }
 0x84f   :  { %v16514_v29 = vpack.c.bf16 %v2802_v6, %v2798_v49  ;;  %19382 = vst [vmem:[#allocation36_spill] sm:$0xff] %v16562_v0  ;;  %v2829_v6 = vld [vmem:[#allocation4 + $0x350] sm:$0xff]  ;;  %19392 = vst [vmem:[#allocation13_spill] sm:$0xff] %v16592_v11  ;;  %v2741_v31 = vld [vmem:[#allocation2 + $0x298] sm:$0xff] }
 0x850   :  { %11849 = vmatpush1.bf16.msra.mxu0 %v15882_v14  ;;  %11881 = vmatpush1.bf16.msra.mxu1 %v15886_v3  ;;  %v10747_v14 = vld [vmem:[%s18871_s0 + $0x38] sm:$0xff]  ;;  %v16506_v3 = vpack.c.bf16 %v2791_v38, %v2787_v33  ;;  %v16556_v38 = vpack.c.bf16 %v2823_v52, %v2819_v51  ;;  %v2723_v51 = vld [vmem:[#allocation2 + $0x208] sm:$0xff]  ;;  %19393 = vst [vmem:[#allocation14_spill] sm:$0xff] %v16594_v12 }
 0x851   :  { %11851 = vmatprep.subr.bf16.mxu0 %v15888_v15  ;;  %11883 = vmatprep.subr.bf16.mxu1 %v15891_v46  ;;  %v16508_v15 = vpack.c.bf16 %v2793_v42, %v2789_v61  ;;  %v2795_v46 = vld [vmem:[#allocation4 + $0x240] sm:$0xff]  ;;  %v2834_v33 = vld [vmem:[#allocation4 + $0x378] sm:$0xff]  ;;  %v16558_v61 = vpack.c.bf16 %v2825_v10, %v2821_v50  ;;  %v2727_v52 = vld [vmem:[#allocation2 + $0x228] sm:$0xff] }
 0x852   :  { %v16518_v43 = vpack.c.bf16 %v2799_v37, %v2795_v46  ;;  %19380 = vst [vmem:[#allocation34_spill] sm:$0xff] %v16556_v38  ;;  %v2827_v42 = vld [vmem:[#allocation4 + $0x340] sm:$0xff]  ;;  %v16564_v49 = vpack.c.bf16 %v2834_v33, %v2830_v23  ;;  %v2836_v46 = vld [vmem:[#allocation4 + $0x388] sm:$0xff]  ;;  %v2725_v50 = vld [vmem:[#allocation2 + $0x218] sm:$0xff] }
 0x853   :  { %19381 = vst [vmem:[#allocation35_spill] sm:$0xff] %v16558_v61  ;;  %v2840_v37 = vld [vmem:[#allocation4 + $0x3a8] sm:$0xff]  ;;  %v16568_v62 = vpack.c.bf16 %v2831_v21, %v2827_v42  ;;  %v2729_v10 = vld [vmem:[#allocation2 + $0x238] sm:$0xff]  ;;  %v2722_v23 = vld [vmem:[#allocation2 + $0x200] sm:$0xff]  ;;  %v16598_v42 = vpack.c.bf16 %v2727_v52, %v2723_v51  ;;  %v16618_v51 = vpack.c.bf16 %v2734_v19, %v2730_v1  ;;  %v16620_v52 = vpack.c.bf16 %v2736_v53, %v2732_v2 }
 0x854   :  { %11853 = vmatpush1.bf16.msra.mxu0 %v15894_v58  ;;  %11885 = vmatpush1.bf16.msra.mxu1 %v15898_v56  ;;  %v2797_v58 = vld [vmem:[#allocation4 + $0x250] sm:$0xff]  ;;  %19383 = vst [vmem:[#allocation37_spill] sm:$0xff] %v16564_v49  ;;  %v16574_v59 = vpack.c.bf16 %v2840_v37, %v2836_v46  ;;  %v2726_v33 = vld [vmem:[#allocation2 + $0x220] sm:$0xff]  ;;  %v16600_v21 = vpack.c.bf16 %v2729_v10, %v2725_v50  ;;  %v2731_v46 = vld [vmem:[#allocation2 + $0x248] sm:$0xff] }
 0x855   :  { %11887 = vmatprep.subr.bf16.mxu0 %v16497_v41  ;;  %11919 = vmatprep.subr.bf16.mxu1 %v16499_v47  ;;  %v2801_v56 = vld [vmem:[#allocation4 + $0x270] sm:$0xff]  ;;  %19384 = vst [vmem:[#allocation38_spill] sm:$0xff] %v16568_v62  ;;  %19394 = vst [vmem:[#allocation15_spill] sm:$0xff] %v16598_v42  ;;  %v2735_v37 = vld [vmem:[#allocation2 + $0x268] sm:$0xff]  ;;  %v16604_v55 = vpack.c.bf16 %v2726_v33, %v2722_v23  ;;  %v16624_v23 = vpack.c.bf16 %v2743_v22, %v2739_v18 }
 0x856   :  { %v16520_v54 = vpack.c.bf16 %v2801_v56, %v2797_v58  ;;  %v2838_v58 = vld [vmem:[#allocation4 + $0x398] sm:$0xff]  ;;  %19386 = vst [vmem:[#allocation44_spill] sm:$0xff] %v16574_v59  ;;  %19395 = vst [vmem:[#allocation16_spill] sm:$0xff] %v16600_v21  ;;  %v16610_v44 = vpack.c.bf16 %v2735_v37, %v2731_v46  ;;  %v2738_v50 = vld [vmem:[#allocation2 + $0x280] sm:$0xff] }
 0x857   :  { %2614 = vmatmul.mubr.f32.vlgmr.msra.gmra.mrb[14].mxu0 %v10747_v14  ;;  %2685 = vmatmul.mubr.f32.vlgmr.msra.gmra.mrb[14].mxu1 %v10747_v14  ;;  %v2833_v14 = vld [vmem:[#allocation4 + $0x370] sm:$0xff]  ;;  %v2842_v56 = vld [vmem:[#allocation4 + $0x3b8] sm:$0xff]  ;;  %19398 = vst [vmem:[#allocation19_spill] sm:$0xff] %v16618_v51  ;;  %19399 = vst [vmem:[#allocation20_spill] sm:$0xff] %v16620_v52 }
 0x858   :  { %11889 = vmatpush1.bf16.msra.mxu0 %v16506_v3  ;;  %11921 = vmatpush1.bf16.msra.mxu1 %v16508_v15  ;;  %v16570_v48 = vpack.c.bf16 %v2833_v14, %v2829_v6  ;;  %v16576_v28 = vpack.c.bf16 %v2842_v56, %v2838_v58  ;;  %v2724_v6 = vld [vmem:[#allocation2 + $0x210] sm:$0xff]  ;;  %v2733_v58 = vld [vmem:[#allocation2 + $0x258] sm:$0xff]  ;;  %19396 = vst [vmem:[#allocation17_spill] sm:$0xff] %v16610_v44  ;;  %v2742_v10 = vld [vmem:[#allocation2 + $0x2a0] sm:$0xff] }
 0x859   :  { %11891 = vmatprep.subr.bf16.mxu0 %v16512_v32  ;;  %11923 = vmatprep.subr.bf16.mxu1 %v16514_v29  ;;  %v2728_v14 = vld [vmem:[#allocation2 + $0x230] sm:$0xff]  ;;  %v2737_v56 = vld [vmem:[#allocation2 + $0x278] sm:$0xff]  ;;  %19400 = vst [vmem:[#allocation21_spill] sm:$0xff] %v16624_v23  ;;  %v2747_v46 = vld [vmem:[#allocation2 + $0x2c8] sm:$0xff]  ;;  %v16632_v1 = vpack.c.bf16 %v2742_v10, %v2738_v50 }
 0x85a   :  { %2918 = vmatprep.mubr.f32.mxu0 %v19235_v45  ;;  %2989 = vmatprep.mubr.f32.mxu1 %v19235_v45  ;;  %19385 = vst [vmem:[#allocation42_spill] sm:$0xff] %v16570_v48  ;;  %19387 = vst [vmem:[#allocation8_spill] sm:$0xff] %v16576_v28  ;;  %v16606_v60 = vpack.c.bf16 %v2728_v14, %v2724_v6  ;;  %v16612_v24 = vpack.c.bf16 %v2737_v56, %v2733_v58  ;;  %v2745_v35 = vld [vmem:[#allocation2 + $0x2b8] sm:$0xff]  ;;  %v2740_v6 = vld [vmem:[#allocation2 + $0x290] sm:$0xff] }
 0x85b   :  { %v16626_v33 = vpack.c.bf16 %v2745_v35, %v2741_v31  ;;  %v2744_v14 = vld [vmem:[#allocation2 + $0x2b0] sm:$0xff]  ;;  %v2751_v37 = vld [vmem:[#allocation2 + $0x2e8] sm:$0xff]  ;;  %v2749_v58 = vld [vmem:[#allocation2 + $0x2d8] sm:$0xff]  ;;  %19402 = vst [vmem:[#allocation23_spill] sm:$0xff] %v16632_v1 }
 0x85c   :  { %11893 = vmatpush1.bf16.msra.mxu0 %v16518_v43  ;;  %11925 = vmatpush1.bf16.msra.mxu1 %v16520_v54  ;;  %19397 = vst [vmem:[#allocation18_spill] sm:$0xff] %v16612_v24  ;;  %v2753_v56 = vld [vmem:[#allocation2 + $0x2f8] sm:$0xff]  ;;  %v16634_v19 = vpack.c.bf16 %v2744_v14, %v2740_v6  ;;  %v2746_v2 = vld [vmem:[#allocation2 + $0x2c0] sm:$0xff]  ;;  %v16638_v18 = vpack.c.bf16 %v2751_v37, %v2747_v46  ;;  %v2748_v31 = vld [vmem:[#allocation2 + $0x2d0] sm:$0xff] }
 0x85d   :  { %11895 = vmatprep.subr.bf16.mxu0 %v16524_v25  ;;  %11927 = vmatprep.subr.bf16.mxu1 %v16526_v63  ;;  %19401 = vst [vmem:[#allocation22_spill] sm:$0xff] %v16626_v33  ;;  %v2750_v53 = vld [vmem:[#allocation2 + $0x2e0] sm:$0xff]  ;;  %v16640_v22 = vpack.c.bf16 %v2753_v56, %v2749_v58  ;;  %v2752_v35 = vld [vmem:[#allocation2 + $0x2f0] sm:$0xff] }
 0x85e   :  { %19403 = vst [vmem:[#allocation24_spill] sm:$0xff] %v16634_v19  ;;  %19404 = vst [vmem:[#allocation25_spill] sm:$0xff] %v16638_v18  ;;  %v16644_v50 = vpack.c.bf16 %v2750_v53, %v2746_v2  ;;  %v16646_v10 = vpack.c.bf16 %v2752_v35, %v2748_v31  ;;  %v2754_v6 = vld [vmem:[#allocation2 + $0x300] sm:$0xff]  ;;  %v2756_v58 = vld [vmem:[#allocation2 + $0x310] sm:$0xff] }
 0x85f   :  { %19405 = vst [vmem:[#allocation26_spill] sm:$0xff] %v16640_v22  ;;  %v2758_v14 = vld [vmem:[#allocation2 + $0x320] sm:$0xff]  ;;  %v2760_v56 = vld [vmem:[#allocation2 + $0x330] sm:$0xff] }
 0x860   :  { %11897 = vmatpush1.bf16.msra.mxu0 %v16532_v20  ;;  %11929 = vmatpush1.bf16.msra.mxu1 %v16534_v4  ;;  %19406 = vst [vmem:[#allocation27_spill] sm:$0xff] %v16644_v50  ;;  %19407 = vst [vmem:[#allocation28_spill] sm:$0xff] %v16646_v10  ;;  %v16656_v2 = vpack.c.bf16 %v2758_v14, %v2754_v6  ;;  %v16658_v53 = vpack.c.bf16 %v2760_v56, %v2756_v58  ;;  %v2762_v31 = vld [vmem:[#allocation2 + $0x340] sm:$0xff] }
 0x861   :  { %11899 = vmatprep.subr.bf16.mxu0 %v16538_v13  ;;  %11931 = vmatprep.subr.bf16.mxu1 %v16540_v17  ;;  %v2766_v35 = vld [vmem:[#allocation2 + $0x360] sm:$0xff] }
 0x862   :  { %19410 = vst [vmem:[#allocation47_spill] sm:$0xff] %v16656_v2  ;;  %19411 = vst [vmem:[#allocation48_spill] sm:$0xff] %v16658_v53  ;;  %v16668_v6 = vpack.c.bf16 %v2766_v35, %v2762_v31  ;;  %v2770_v58 = vld [vmem:[#allocation2 + $0x380] sm:$0xff] }
 0x863   :  { %v2774_v56 = vld [vmem:[#allocation2 + $0x3a0] sm:$0xff] }
 0x864   :  { %11901 = vmatpush1.bf16.msra.mxu0 %v16544_v39  ;;  %11933 = vmatpush1.bf16.msra.mxu1 %v16546_v40  ;;  %v16680_v31 = vpack.c.bf16 %v2774_v56, %v2770_v58 }
 0x865   :  { %11903 = vmatprep.subr.bf16.mxu0 %v16550_v16  ;;  %11935 = vmatprep.subr.bf16.mxu1 %v16552_v7 }
 0x868   :  { %11905 = vmatpush1.bf16.msra.mxu0 %v16556_v38  ;;  %11937 = vmatpush1.bf16.msra.mxu1 %v16558_v61 }
 0x869   :  { %11907 = vmatprep.subr.bf16.mxu0 %v16562_v0  ;;  %11939 = vmatprep.subr.bf16.mxu1 %v16564_v49 }
 0x86c   :  { %11909 = vmatpush1.bf16.msra.mxu0 %v16568_v62  ;;  %11941 = vmatpush1.bf16.msra.mxu1 %v16570_v48 }
 0x86d   :  { %11911 = vmatprep.subr.bf16.mxu0 %v16574_v59  ;;  %11943 = vmatprep.subr.bf16.mxu1 %v16576_v28 }
 0x870   :  { %11913 = vmatpush1.bf16.msra.mxu0 %v16580_v8  ;;  %11945 = vmatpush1.bf16.msra.mxu1 %v16582_v9 }
 0x871   :  { %11915 = vmatprep.subr.bf16.mxu0 %v16586_v26  ;;  %11947 = vmatprep.subr.bf16.mxu1 %v16588_v27 }
 0x874   :  { %11917 = vmatpush1.bf16.msra.mxu0 %v16592_v11  ;;  %11949 = vmatpush1.bf16.msra.mxu1 %v16594_v12 }
 0x875   :  { %11951 = vmatprep.subr.bf16.mxu0 %v16598_v42  ;;  %11983 = vmatprep.subr.bf16.mxu1 %v16600_v21 }
 0x877   :  { %2919 = vmatmul.mubr.f32.vlgmr.msra.gmra.mrb[16].mxu0 %v19235_v45  ;;  %2990 = vmatmul.mubr.f32.vlgmr.msra.gmra.mrb[16].mxu1 %v19235_v45 }
 0x878   :  { %11953 = vmatpush1.bf16.msra.mxu0 %v16604_v55  ;;  %11985 = vmatpush1.bf16.msra.mxu1 %v16606_v60 }
 0x879   :  { %11955 = vmatprep.subr.bf16.mxu0 %v16610_v44  ;;  %11987 = vmatprep.subr.bf16.mxu1 %v16612_v24  ;;  %v2755_v24 = vld [vmem:[#allocation2 + $0x308] sm:$0xff]  ;;  %v2757_v44 = vld [vmem:[#allocation2 + $0x318] sm:$0xff] }
 0x87a   :  { %3060 = vmatprep.mubr.f32.mxu0 %v19235_v45  ;;  %3131 = vmatprep.mubr.f32.mxu1 %v19235_v45 }
 0x87c   :  { %11957 = vmatpush1.bf16.msra.mxu0 %v16618_v51  ;;  %11989 = vmatpush1.bf16.msra.mxu1 %v16620_v52  ;;  %v2759_v51 = vld [vmem:[#allocation2 + $0x328] sm:$0xff]  ;;  %v2761_v52 = vld [vmem:[#allocation2 + $0x338] sm:$0xff] }
 0x87d   :  { %11959 = vmatprep.subr.bf16.mxu0 %v16624_v23  ;;  %11991 = vmatprep.subr.bf16.mxu1 %v16626_v33  ;;  %v16650_v46 = vpack.c.bf16 %v2759_v51, %v2755_v24  ;;  %v16652_v37 = vpack.c.bf16 %v2761_v52, %v2757_v44  ;;  %v2763_v33 = vld [vmem:[#allocation2 + $0x348] sm:$0xff]  ;;  %v2765_v23 = vld [vmem:[#allocation2 + $0x358] sm:$0xff]  ;;  %v2764_v51 = vld [vmem:[#allocation2 + $0x350] sm:$0xff] }
 0x87e   :  { %v2768_v52 = vld [vmem:[#allocation2 + $0x370] sm:$0xff] }
 0x87f   :  { %19408 = vst [vmem:[#allocation41_spill] sm:$0xff] %v16650_v46  ;;  %19409 = vst [vmem:[#allocation46_spill] sm:$0xff] %v16652_v37  ;;  %v16670_v14 = vpack.c.bf16 %v2768_v52, %v2764_v51  ;;  %v2778_v51 = vld [vmem:[#allocation2 + $0x3c0] sm:$0xff]  ;;  %v2784_v52 = vld [vmem:[#allocation2 + $0x3f0] sm:$0xff] }
 0x880   :  { %11961 = vmatpush1.bf16.msra.mxu0 %v16632_v1  ;;  %11993 = vmatpush1.bf16.msra.mxu1 %v16634_v19  ;;  %v2767_v1 = vld [vmem:[#allocation2 + $0x368] sm:$0xff]  ;;  %v2769_v19 = vld [vmem:[#allocation2 + $0x378] sm:$0xff] }
 0x881   :  { %11963 = vmatprep.subr.bf16.mxu0 %v16638_v18  ;;  %11995 = vmatprep.subr.bf16.mxu1 %v16640_v22  ;;  %v16662_v44 = vpack.c.bf16 %v2767_v1, %v2763_v33  ;;  %v16664_v24 = vpack.c.bf16 %v2769_v19, %v2765_v23  ;;  %v2771_v22 = vld [vmem:[#allocation2 + $0x388] sm:$0xff]  ;;  %v2773_v18 = vld [vmem:[#allocation2 + $0x398] sm:$0xff]  ;;  %v2772_v1 = vld [vmem:[#allocation2 + $0x390] sm:$0xff] }
 0x882   :  { %v2776_v19 = vld [vmem:[#allocation2 + $0x3b0] sm:$0xff] }
 0x883   :  { %v16682_v35 = vpack.c.bf16 %v2776_v19, %v2772_v1 }
 0x884   :  { %11965 = vmatpush1.bf16.msra.mxu0 %v16644_v50  ;;  %11997 = vmatpush1.bf16.msra.mxu1 %v16646_v10  ;;  %v2775_v50 = vld [vmem:[#allocation2 + $0x3a8] sm:$0xff]  ;;  %v2777_v10 = vld [vmem:[#allocation2 + $0x3b8] sm:$0xff] }
 0x885   :  { %11967 = vmatprep.subr.bf16.mxu0 %v16650_v46  ;;  %11999 = vmatprep.subr.bf16.mxu1 %v16652_v37  ;;  %v16674_v23 = vpack.c.bf16 %v2775_v50, %v2771_v22  ;;  %v16676_v33 = vpack.c.bf16 %v2777_v10, %v2773_v18  ;;  %v2779_v37 = vld [vmem:[#allocation2 + $0x3c8] sm:$0xff]  ;;  %v2781_v46 = vld [vmem:[#allocation2 + $0x3d8] sm:$0xff]  ;;  %v2782_v50 = vld [vmem:[#allocation2 + $0x3e0] sm:$0xff] }
 0x886   :  { %v2780_v10 = vld [vmem:[#allocation2 + $0x3d0] sm:$0xff]  ;;  %v16692_v58 = vpack.c.bf16 %v2782_v50, %v2778_v51 }
 0x887   :  { %19412 = vst [vmem:[#allocation49_spill] sm:$0xff] %v16676_v33  ;;  %v16694_v56 = vpack.c.bf16 %v2784_v52, %v2780_v10 }
 0x888   :  { %11969 = vmatpush1.bf16.msra.mxu0 %v16656_v2  ;;  %12001 = vmatpush1.bf16.msra.mxu1 %v16658_v53  ;;  %v2783_v2 = vld [vmem:[#allocation2 + $0x3e8] sm:$0xff]  ;;  %v2785_v53 = vld [vmem:[#allocation2 + $0x3f8] sm:$0xff] }
 0x889   :  { %11971 = vmatprep.subr.bf16.mxu0 %v16662_v44  ;;  %12003 = vmatprep.subr.bf16.mxu1 %v16664_v24  ;;  %v16686_v18 = vpack.c.bf16 %v2783_v2, %v2779_v37  ;;  %v16688_v22 = vpack.c.bf16 %v2785_v53, %v2781_v46  ;;  %v2853_v46 = vld [vmem:[%s18875_s4] sm:$0xff] }
 0x88c   :  { %11973 = vmatpush1.bf16.msra.mxu0 %v16668_v6  ;;  %12005 = vmatpush1.bf16.msra.mxu1 %v16670_v14 }
 0x88d   :  { %11975 = vmatprep.subr.bf16.mxu0 %v16674_v23  ;;  %12007 = vmatprep.subr.bf16.mxu1 %v16676_v33 }
 0x890   :  { %11977 = vmatpush1.bf16.msra.mxu0 %v16680_v31  ;;  %12009 = vmatpush1.bf16.msra.mxu1 %v16682_v35 }
 0x891   :  { %11979 = vmatprep.subr.bf16.mxu0 %v16686_v18  ;;  %12011 = vmatprep.subr.bf16.mxu1 %v16688_v22 }
 0x894   :  { %11981 = vmatpush1.bf16.msra.mxu0 %v16692_v58  ;;  %12013 = vmatpush1.bf16.msra.mxu1 %v16694_v56 }
 0x895   :  { %12015 = vmatprep.subr.bf16.mxu0 %v16497_v41  ;;  %12047 = vmatprep.subr.bf16.mxu1 %v16499_v47 }
 0x897   :  { %3061 = vmatmul.mubr.f32.vlgmr.msra.gmra.mrb[16].mxu0 %v2853_v46  ;;  %3132 = vmatmul.mubr.f32.vlgmr.msra.gmra.mrb[16].mxu1 %v2853_v46 }
 0x898   :  { %12017 = vmatpush1.bf16.msra.mxu0 %v16506_v3  ;;  %12049 = vmatpush1.bf16.msra.mxu1 %v16508_v15 }
 0x899   :  { %12019 = vmatprep.subr.bf16.mxu0 %v16512_v32  ;;  %12051 = vmatprep.subr.bf16.mxu1 %v16514_v29 }
 0x89a   :  { %3253 = vmatprep.mubr.f32.mxu0 %v19235_v45  ;;  %3324 = vmatprep.mubr.f32.mxu1 %v19235_v45 }
 0x89c   :  { %12021 = vmatpush1.bf16.msra.mxu0 %v16518_v43  ;;  %12053 = vmatpush1.bf16.msra.mxu1 %v16520_v54 }
 0x89d   :  { %12023 = vmatprep.subr.bf16.mxu0 %v16524_v25  ;;  %12055 = vmatprep.subr.bf16.mxu1 %v16526_v63 }
 0x8a0   :  { %12025 = vmatpush1.bf16.msra.mxu0 %v16532_v20  ;;  %12057 = vmatpush1.bf16.msra.mxu1 %v16534_v4 }
 0x8a1   :  { %12027 = vmatprep.subr.bf16.mxu0 %v16538_v13  ;;  %12059 = vmatprep.subr.bf16.mxu1 %v16540_v17 }
 0x8a4   :  { %12029 = vmatpush1.bf16.msra.mxu0 %v16544_v39  ;;  %12061 = vmatpush1.bf16.msra.mxu1 %v16546_v40 }
 0x8a5   :  { %12031 = vmatprep.subr.bf16.mxu0 %v16550_v16  ;;  %12063 = vmatprep.subr.bf16.mxu1 %v16552_v7 }
 0x8a8   :  { %12033 = vmatpush1.bf16.msra.mxu0 %v16556_v38  ;;  %12065 = vmatpush1.bf16.msra.mxu1 %v16558_v61 }
 0x8a9   :  { %12035 = vmatprep.subr.bf16.mxu0 %v16562_v0  ;;  %12067 = vmatprep.subr.bf16.mxu1 %v16564_v49 }
 0x8ac   :  { %12037 = vmatpush1.bf16.msra.mxu0 %v16568_v62  ;;  %12069 = vmatpush1.bf16.msra.mxu1 %v16570_v48 }
 0x8ad   :  { %12039 = vmatprep.subr.bf16.mxu0 %v16574_v59  ;;  %12071 = vmatprep.subr.bf16.mxu1 %v16576_v28 }
 0x8b0   :  { %12041 = vmatpush1.bf16.msra.mxu0 %v16580_v8  ;;  %12073 = vmatpush1.bf16.msra.mxu1 %v16582_v9 }
 0x8b1   :  { %12043 = vmatprep.subr.bf16.mxu0 %v16586_v26  ;;  %12075 = vmatprep.subr.bf16.mxu1 %v16588_v27 }
 0x8b4   :  { %12045 = vmatpush1.bf16.msra.mxu0 %v16592_v11  ;;  %12077 = vmatpush1.bf16.msra.mxu1 %v16594_v12 }
 0x8b5   :  { %12079 = vmatprep.subr.bf16.mxu0 %v16598_v42  ;;  %12111 = vmatprep.subr.bf16.mxu1 %v16600_v21 }
 0x92a   :  { %v2615_v37 = vpop.f32.mrb[14].mxu0  ;;  %v2686_v2 = vpop.f32.mrb[14].mxu1 }
 0x92b   :  { %v2691_v53 = vadd.f32 %v2615_v37, %v19374_v5  ;;  %v2617_v1 = vpop.f32.mrb[15].mxu0  ;;  %v2688_v19 = vpop.f32.mrb[15].mxu1  ;;  %v2693_v52 = vadd.f32 %v2686_v2, %v19264_v36 }
 0x92c   :  { %v2692_v51 = vadd.f32 %v2617_v1, %v19263_v57  ;;  %v2694_v46 = vadd.f32 %v2688_v19, %v15966_v34 }
 0x92d   :  { %v10748_v50 = vmul.f32 -1.442695, %v2691_v53  ;;  %v10750_v12 = vmul.f32 -1.442695, %v2693_v52 }
 0x92e   :  { %v10749_v10 = vmul.f32 -1.442695, %v2692_v51 }
 0x92f   :  { %15203 = vpow2.f32 %v10748_v50 }
 0x930   :  { %15205 = vpow2.f32 %v10749_v10 }
 0x931   :  { %15207 = vtanh.f32 %v2694_v46 }
 0x932   :  { %15209 = vpow2.f32 %v10750_v12  ;;  %v19413_v12 = vld [vmem:[#allocation39_spill] sm:$0xff] }
 0x939   :  { %v15204_v42 = vpop.eup %15203 }
 0x93a   :  { %v2704_v11 = vadd.f32 1.0, %v15204_v42  ;;  %v15206_v21 = vpop.eup %15205 }
 0x93b   :  { %v2705_v5 = vadd.f32 1.0, %v15206_v21  ;;  %v15208_v37 = vpop.eup %15207 }
 0x93c   :  { %15211 = vrcp.f32 %v2704_v11  ;;  %v15210_v27 = vpop.eup %15209  ;;  %v10752_v11 = vld [vmem:[%s18874_s3 + $0x4] sm:$0xf] }
 0x93d   :  { %15213 = vrcp.f32 %v2705_v5  ;;  %v2706_v51 = vadd.f32 1.0, %v15210_v27  ;;  %v16751_v21 = vrot.slane %v10752_v11, %v19413_v12  ;;  %v19415_v27 = vld [vmem:[#allocation40_spill] sm:$0xff] }
 0x93e   :  { %v16754_v19 = vrot.slane %v10752_v11, %v19415_v27 }
 0x93f   :  { %15215 = vrcp.f32 %v2706_v51  ;;  %19414 = vst [vmem:[#allocation50_spill] sm:$0xff] %v16751_v21 }
 0x940   :  { %19416 = vst [vmem:[#allocation51_spill] sm:$0xff] %v16754_v19 }
 0x946   :  { %v15212_v57 = vpop.eup %15211 }
 0x947   :  { %v2715_v53 = vmul.f32 %v15212_v57, %v15208_v37  ;;  %v15214_v1 = vpop.eup %15213 }
 0x948   :  { %v2714_v50 = vmul.f32 %v15214_v1, %v16461_v30  ;;  %v19417_v1 = vld [vmem:[#allocation43_spill] sm:$0xff] }
 0x949   :  { %v15216_v34 = vpop.eup %15215  ;;  %v16759_v51 = vrot.slane %v10752_v11, %v19417_v1 }
 0x94a   :  { %v2716_v36 = vadd.f32 %v2715_v53, %v2714_v50  ;;  %v19418_v50 = vld [vmem:[#allocation45_spill] sm:$0xff] }
 0x94c   :  { %15217 = vtanh.f32 %v2716_v36  ;;  %v16762_v36 = vrot.slane %v10752_v11, %v19418_v50 }
 0x956   :  { %v15218_v2 = vpop.eup %15217 }
 0x957   :  { %v2718_v42 = vmul.f32 %v15218_v2, %v15216_v34 }
 0x959   :  { %10751 = vst [vmem:[%s18875_s4 + $0x38] sm:$0xff] %v2718_v42 }
 0x96a   :  { %v3062_v30 = vpop.f32.mrb[16].mxu0  ;;  %v3133_v10 = vpop.f32.mrb[16].mxu1 }
 0x96b   :  { %v3159_v52 = vadd.f32 %v16751_v21, %v3062_v30  ;;  %v3064_v46 = vpop.f32.mrb[17].mxu0  ;;  %v3135_v5 = vpop.f32.mrb[17].mxu1  ;;  %v3161_v34 = vadd.f32 %v16759_v51, %v3133_v10 }
 0x96c   :  { %v3160_v37 = vadd.f32 %v16754_v19, %v3064_v46  ;;  %v3162_v2 = vadd.f32 %v16762_v36, %v3135_v5 }
 0x96d   :  { %v10753_v57 = vmul.f32 -1.442695, %v3159_v52  ;;  %v10755_v42 = vmul.f32 -1.442695, %v3161_v34 }
 0x96e   :  { %v10754_v53 = vmul.f32 -1.442695, %v3160_v37 }
 0x96f   :  { %15219 = vpow2.f32 %v10753_v57 }
 0x970   :  { %15221 = vpow2.f32 %v10754_v53 }
 0x971   :  { %15223 = vtanh.f32 %v3162_v2  ;;  %v19423_v2 = vld [vmem:[#allocation21_spill] sm:$0xff] }
 0x972   :  { %15225 = vpow2.f32 %v10755_v42  ;;  %v19424_v42 = vld [vmem:[#allocation22_spill] sm:$0xff] }
 0x979   :  { %v15220_v30 = vpop.eup %15219 }
 0x97a   :  { %v3172_v27 = vadd.f32 1.0, %v15220_v30  ;;  %v15222_v12 = vpop.eup %15221  ;;  %v19425_v30 = vld [vmem:[#allocation23_spill] sm:$0xff] }
 0x97b   :  { %v3173_v52 = vadd.f32 1.0, %v15222_v12  ;;  %v15224_v46 = vpop.eup %15223  ;;  %v19419_v12 = vld [vmem:[#allocation17_spill] sm:$0xff] }
 0x97c   :  { %15227 = vrcp.f32 %v3172_v27  ;;  %v15226_v37 = vpop.eup %15225  ;;  %v19420_v27 = vld [vmem:[#allocation18_spill] sm:$0xff] }
 0x97d   :  { %15229 = vrcp.f32 %v3173_v52  ;;  %v3174_v11 = vadd.f32 1.0, %v15226_v37  ;;  %v19426_v52 = vld [vmem:[#allocation24_spill] sm:$0xff]  ;;  %v19428_v37 = vld [vmem:[#allocation26_spill] sm:$0xff] }
 0x97f   :  { %15231 = vrcp.f32 %v3174_v11  ;;  %v19431_v11 = vld [vmem:[#allocation41_spill] sm:$0xff] }
 0x986   :  { %v15228_v57 = vpop.eup %15227 }
 0x987   :  { %v3183_v53 = vmul.f32 %v15228_v57, %v15224_v46  ;;  %v15230_v1 = vpop.eup %15229  ;;  %v19427_v46 = vld [vmem:[#allocation25_spill] sm:$0xff]  ;;  %v19429_v57 = vld [vmem:[#allocation27_spill] sm:$0xff] }
 0x988   :  { %v3182_v50 = vmul.f32 0.0, %v15230_v1  ;;  %v19421_v1 = vld [vmem:[#allocation19_spill] sm:$0xff] }
 0x989   :  { %v15232_v10 = vpop.eup %15231 }
 0x98a   :  { %v16766_v19 = vadd.f32 %v3183_v53, %v3182_v50  ;;  %v19422_v50 = vld [vmem:[#allocation20_spill] sm:$0xff] }
 0x98b   :  { %v19430_v53 = vld [vmem:[#allocation28_spill] sm:$0xff] }
 0x98c   :  { %15233 = vtanh.f32 %v16766_v19 }
 0x996   :  { %v15234_v5 = vpop.eup %15233 }
 0x997   :  { %v3186_v34 = vmul.f32 %v15234_v5, %v15232_v10  ;;  %v19432_v10 = vld [vmem:[#allocation46_spill] sm:$0xff]  ;;  %v19433_v5 = vld [vmem:[#allocation47_spill] sm:$0xff] }
 0x999   :  { %3254 = vmatmul.mubr.f32.vlgmr.msra.gmra.mrb[18].mxu0 %v3186_v34  ;;  %3325 = vmatmul.mubr.f32.vlgmr.msra.gmra.mrb[18].mxu1 %v3186_v34  ;;  %v19434_v34 = vld [vmem:[#allocation48_spill] sm:$0xff] }
 0x99a   :  { %12081 = vmatpush1.bf16.msra.mxu0 %v16604_v55  ;;  %12113 = vmatpush1.bf16.msra.mxu1 %v16606_v60 }
 0x99b   :  { %12083 = vmatprep.subr.bf16.mxu0 %v19419_v12  ;;  %12115 = vmatprep.subr.bf16.mxu1 %v19420_v27 }
 0x99c   :  { %3395 = vmatprep.mubr.f32.mxu0 %v19235_v45  ;;  %3466 = vmatprep.mubr.f32.mxu1 %v19235_v45 }
 0x99e   :  { %12085 = vmatpush1.bf16.msra.mxu0 %v19421_v1  ;;  %12117 = vmatpush1.bf16.msra.mxu1 %v19422_v50 }
 0x99f   :  { %12087 = vmatprep.subr.bf16.mxu0 %v19423_v2  ;;  %12119 = vmatprep.subr.bf16.mxu1 %v19424_v42 }
 0x9a2   :  { %12089 = vmatpush1.bf16.msra.mxu0 %v19425_v30  ;;  %12121 = vmatpush1.bf16.msra.mxu1 %v19426_v52 }
 0x9a3   :  { %12091 = vmatprep.subr.bf16.mxu0 %v19427_v46  ;;  %12123 = vmatprep.subr.bf16.mxu1 %v19428_v37 }
 0x9a6   :  { %12093 = vmatpush1.bf16.msra.mxu0 %v19429_v57  ;;  %12125 = vmatpush1.bf16.msra.mxu1 %v19430_v53 }
 0x9a7   :  { %12095 = vmatprep.subr.bf16.mxu0 %v19431_v11  ;;  %12127 = vmatprep.subr.bf16.mxu1 %v19432_v10 }
 0x9aa   :  { %12097 = vmatpush1.bf16.msra.mxu0 %v19433_v5  ;;  %12129 = vmatpush1.bf16.msra.mxu1 %v19434_v34 }
 0x9ab   :  { %12099 = vmatprep.subr.bf16.mxu0 %v16662_v44  ;;  %12131 = vmatprep.subr.bf16.mxu1 %v16664_v24 }
 0x9ae   :  { %12101 = vmatpush1.bf16.msra.mxu0 %v16668_v6  ;;  %12133 = vmatpush1.bf16.msra.mxu1 %v16670_v14 }
 0x9af   :  { %12103 = vmatprep.subr.bf16.mxu0 %v16674_v23  ;;  %12135 = vmatprep.subr.bf16.mxu1 %v16676_v33  ;;  %v10756_v33 = vld [vmem:[%s18875_s4 + $0x8] sm:$0xff] }
 0x9b2   :  { %12105 = vmatpush1.bf16.msra.mxu0 %v16680_v31  ;;  %12137 = vmatpush1.bf16.msra.mxu1 %v16682_v35 }
 0x9b3   :  { %12107 = vmatprep.subr.bf16.mxu0 %v16686_v18  ;;  %12139 = vmatprep.subr.bf16.mxu1 %v16688_v22 }
 0x9b6   :  { %12109 = vmatpush1.bf16.msra.mxu0 %v16692_v58  ;;  %12141 = vmatpush1.bf16.msra.mxu1 %v16694_v56 }
 0x9b7   :  { %12143 = vmatprep.subr.bf16.mxu0 %v16497_v41  ;;  %12175 = vmatprep.subr.bf16.mxu1 %v16499_v47 }
 0x9b9   :  { %3396 = vmatmul.mubr.f32.vlgmr.msra.gmra.mrb[18].mxu0 %v10756_v33  ;;  %3467 = vmatmul.mubr.f32.vlgmr.msra.gmra.mrb[18].mxu1 %v10756_v33  ;;  %v19435_v33 = vld [vmem:[#allocation12_spill] sm:$0xff] }
 0x9ba   :  { %12145 = vmatpush1.bf16.msra.mxu0 %v16506_v3  ;;  %12177 = vmatpush1.bf16.msra.mxu1 %v16508_v15 }
 0x9bb   :  { %12147 = vmatprep.subr.bf16.mxu0 %v16512_v32  ;;  %12179 = vmatprep.subr.bf16.mxu1 %v16514_v29 }
 0x9bc   :  { %3567 = vmatprep.mubr.f32.mxu0 %v19235_v45  ;;  %3638 = vmatprep.mubr.f32.mxu1 %v19235_v45 }
 0x9be   :  { %12149 = vmatpush1.bf16.msra.mxu0 %v16518_v43  ;;  %12181 = vmatpush1.bf16.msra.mxu1 %v16520_v54 }
 0x9bf   :  { %12151 = vmatprep.subr.bf16.mxu0 %v16524_v25  ;;  %12183 = vmatprep.subr.bf16.mxu1 %v16526_v63 }
 0x9c2   :  { %12153 = vmatpush1.bf16.msra.mxu0 %v16532_v20  ;;  %12185 = vmatpush1.bf16.msra.mxu1 %v16534_v4 }
 0x9c3   :  { %12155 = vmatprep.subr.bf16.mxu0 %v16538_v13  ;;  %12187 = vmatprep.subr.bf16.mxu1 %v16540_v17 }
 0x9c6   :  { %12157 = vmatpush1.bf16.msra.mxu0 %v16544_v39  ;;  %12189 = vmatpush1.bf16.msra.mxu1 %v16546_v40 }
 0x9c7   :  { %12159 = vmatprep.subr.bf16.mxu0 %v16550_v16  ;;  %12191 = vmatprep.subr.bf16.mxu1 %v16552_v7  ;;  %v19440_v7 = vld [vmem:[#allocation51_spill] sm:$0xff] }
 0x9ca   :  { %12161 = vmatpush1.bf16.msra.mxu0 %v16556_v38  ;;  %12193 = vmatpush1.bf16.msra.mxu1 %v16558_v61  ;;  %v19436_v61 = vld [vmem:[#allocation13_spill] sm:$0xff] }
 0x9cb   :  { %12163 = vmatprep.subr.bf16.mxu0 %v16562_v0  ;;  %12195 = vmatprep.subr.bf16.mxu1 %v16564_v49  ;;  %v19437_v0 = vld [vmem:[#allocation14_spill] sm:$0xff]  ;;  %v19438_v49 = vld [vmem:[#allocation15_spill] sm:$0xff] }
 0x9ce   :  { %12165 = vmatpush1.bf16.msra.mxu0 %v16568_v62  ;;  %12197 = vmatpush1.bf16.msra.mxu1 %v16570_v48  ;;  %v19439_v62 = vld [vmem:[#allocation16_spill] sm:$0xff] }
 0x9cf   :  { %12167 = vmatprep.subr.bf16.mxu0 %v16574_v59  ;;  %12199 = vmatprep.subr.bf16.mxu1 %v16576_v28 }
 0x9d2   :  { %12169 = vmatpush1.bf16.msra.mxu0 %v16580_v8  ;;  %12201 = vmatpush1.bf16.msra.mxu1 %v16582_v9 }
 0x9d3   :  { %12171 = vmatprep.subr.bf16.mxu0 %v16586_v26  ;;  %12203 = vmatprep.subr.bf16.mxu1 %v19435_v33 }
 0x9d6   :  { %12173 = vmatpush1.bf16.msra.mxu0 %v19436_v61  ;;  %12205 = vmatpush1.bf16.msra.mxu1 %v19437_v0 }
 0x9d7   :  { %12207 = vmatprep.subr.bf16.mxu0 %v19438_v49  ;;  %12239 = vmatprep.subr.bf16.mxu1 %v19439_v62 }
 0xa8c   :  { %v3397_v48 = vpop.f32.mrb[18].mxu0  ;;  %v3468_v59 = vpop.f32.mrb[18].mxu1 }
 0xa8d   :  { %v3473_v28 = vadd.f32 %v3397_v48, %v16751_v21  ;;  %v3399_v38 = vpop.f32.mrb[19].mxu0  ;;  %v3470_v8 = vpop.f32.mrb[19].mxu1  ;;  %v3475_v61 = vadd.f32 %v3468_v59, %v16759_v51 }
 0xa8e   :  { %v3474_v9 = vadd.f32 %v3399_v38, %v19440_v7  ;;  %v3476_v0 = vadd.f32 %v3470_v8, %v16762_v36  ;;  %v19443_v8 = vld [vmem:[#allocation31_spill] sm:$0xff] }
 0xa8f   :  { %v10757_v16 = vmul.f32 -1.442695, %v3473_v28  ;;  %v10759_v33 = vmul.f32 -1.442695, %v3475_v61 }
 0xa90   :  { %v10758_v26 = vmul.f32 -1.442695, %v3474_v9 }
 0xa91   :  { %15235 = vpow2.f32 %v10757_v16 }
 0xa92   :  { %15237 = vpow2.f32 %v10758_v26 }
 0xa93   :  { %15239 = vtanh.f32 %v3476_v0 }
 0xa94   :  { %15241 = vpow2.f32 %v10759_v33  ;;  %v19446_v33 = vld [vmem:[#allocation34_spill] sm:$0xff] }
 0xa9b   :  { %v15236_v49 = vpop.eup %15235 }
 0xa9c   :  { %v3486_v40 = vadd.f32 1.0, %v15236_v49  ;;  %v15238_v62 = vpop.eup %15237 }
 0xa9d   :  { %v3487_v48 = vadd.f32 1.0, %v15238_v62  ;;  %v15240_v21 = vpop.eup %15239  ;;  %v19442_v62 = vld [vmem:[#allocation30_spill] sm:$0xff] }
 0xa9e   :  { %15243 = vrcp.f32 %v3486_v40  ;;  %v15242_v39 = vpop.eup %15241  ;;  %v10761_v40 = vld [vmem:[%s18875_s4 + $0x10] sm:$0xff] }
 0xa9f   :  { %15245 = vrcp.f32 %v3487_v48  ;;  %v3488_v16 = vadd.f32 1.0, %v15242_v39  ;;  %v19441_v39 = vld [vmem:[#allocation49_spill] sm:$0xff]  ;;  %v19447_v48 = vld [vmem:[#allocation35_spill] sm:$0xff] }
 0xaa1   :  { %15247 = vrcp.f32 %v3488_v16  ;;  %v19451_v16 = vld [vmem:[#allocation42_spill] sm:$0xff] }
 0xaa8   :  { %v15244_v38 = vpop.eup %15243 }
 0xaa9   :  { %v3497_v28 = vmul.f32 %v15244_v38, %v15240_v21  ;;  %v15246_v9 = vpop.eup %15245  ;;  %v19444_v21 = vld [vmem:[#allocation32_spill] sm:$0xff] }
 0xaaa   :  { %v3496_v26 = vmul.f32 %v15246_v9, %v16766_v19  ;;  %v19445_v19 = vld [vmem:[#allocation33_spill] sm:$0xff]  ;;  %v19448_v38 = vld [vmem:[#allocation36_spill] sm:$0xff]  ;;  %v19450_v9 = vld [vmem:[#allocation38_spill] sm:$0xff] }
 0xaab   :  { %v15248_v61 = vpop.eup %15247 }
 0xaac   :  { %v16845_v59 = vadd.f32 %v3497_v28, %v3496_v26  ;;  %v19449_v28 = vld [vmem:[#allocation37_spill] sm:$0xff]  ;;  %v19452_v26 = vld [vmem:[#allocation44_spill] sm:$0xff] }
 0xaae   :  { %15249 = vtanh.f32 %v16845_v59 }
 0xab8   :  { %v15250_v0 = vpop.eup %15249 }
 0xab9   :  { %v3500_v49 = vmul.f32 %v15250_v0, %v15248_v61  ;;  %v19453_v61 = vld [vmem:[#allocation8_spill] sm:$0xff]  ;;  %v19454_v0 = vld [vmem:[#allocation9_spill] sm:$0xff] }
 0xabb   :  { %3568 = vmatmul.mubr.f32.vlgmr.msra.gmra.mrb[20].mxu0 %v3500_v49  ;;  %3639 = vmatmul.mubr.f32.vlgmr.msra.gmra.mrb[20].mxu1 %v3500_v49  ;;  %v19455_v49 = vld [vmem:[#allocation10_spill] sm:$0xff] }
 0xabc   :  { %12209 = vmatpush1.bf16.msra.mxu0 %v16604_v55  ;;  %12241 = vmatpush1.bf16.msra.mxu1 %v16606_v60 }
 0xabd   :  { %12211 = vmatprep.subr.bf16.mxu0 %v19419_v12  ;;  %12243 = vmatprep.subr.bf16.mxu1 %v19420_v27 }
 0xabe   :  { %3709 = vmatprep.mubr.f32.mxu0 %v19235_v45  ;;  %3780 = vmatprep.mubr.f32.mxu1 %v19235_v45 }
 0xac0   :  { %12213 = vmatpush1.bf16.msra.mxu0 %v19421_v1  ;;  %12245 = vmatpush1.bf16.msra.mxu1 %v19422_v50 }
 0xac1   :  { %12215 = vmatprep.subr.bf16.mxu0 %v19423_v2  ;;  %12247 = vmatprep.subr.bf16.mxu1 %v19424_v42 }
 0xac4   :  { %12217 = vmatpush1.bf16.msra.mxu0 %v19425_v30  ;;  %12249 = vmatpush1.bf16.msra.mxu1 %v19426_v52 }
 0xac5   :  { %12219 = vmatprep.subr.bf16.mxu0 %v19427_v46  ;;  %12251 = vmatprep.subr.bf16.mxu1 %v19428_v37 }
 0xac8   :  { %12221 = vmatpush1.bf16.msra.mxu0 %v19429_v57  ;;  %12253 = vmatpush1.bf16.msra.mxu1 %v19430_v53 }
 0xac9   :  { %12223 = vmatprep.subr.bf16.mxu0 %v19431_v11  ;;  %12255 = vmatprep.subr.bf16.mxu1 %v19432_v10 }
 0xacc   :  { %12225 = vmatpush1.bf16.msra.mxu0 %v19433_v5  ;;  %12257 = vmatpush1.bf16.msra.mxu1 %v19434_v34 }
 0xacd   :  { %12227 = vmatprep.subr.bf16.mxu0 %v16662_v44  ;;  %12259 = vmatprep.subr.bf16.mxu1 %v16664_v24 }
 0xad0   :  { %12229 = vmatpush1.bf16.msra.mxu0 %v16668_v6  ;;  %12261 = vmatpush1.bf16.msra.mxu1 %v16670_v14 }
 0xad1   :  { %12231 = vmatprep.subr.bf16.mxu0 %v16674_v23  ;;  %12263 = vmatprep.subr.bf16.mxu1 %v19441_v39 }
 0xad4   :  { %12233 = vmatpush1.bf16.msra.mxu0 %v16680_v31  ;;  %12265 = vmatpush1.bf16.msra.mxu1 %v16682_v35 }
 0xad5   :  { %12235 = vmatprep.subr.bf16.mxu0 %v16686_v18  ;;  %12267 = vmatprep.subr.bf16.mxu1 %v16688_v22 }
 0xad8   :  { %12237 = vmatpush1.bf16.msra.mxu0 %v16692_v58  ;;  %12269 = vmatpush1.bf16.msra.mxu1 %v16694_v56 }
 0xad9   :  { %12271 = vmatprep.subr.bf16.mxu0 %v16497_v41  ;;  %12303 = vmatprep.subr.bf16.mxu1 %v16499_v47 }
 0xadb   :  { %3710 = vmatmul.mubr.f32.vlgmr.msra.gmra.mrb[20].mxu0 %v10761_v40  ;;  %3781 = vmatmul.mubr.f32.vlgmr.msra.gmra.mrb[20].mxu1 %v10761_v40  ;;  %v19456_v40 = vld [vmem:[#allocation11_spill] sm:$0xff] }
 0xadc   :  { %12273 = vmatpush1.bf16.msra.mxu0 %v16506_v3  ;;  %12305 = vmatpush1.bf16.msra.mxu1 %v16508_v15 }
 0xadd   :  { %12275 = vmatprep.subr.bf16.mxu0 %v16512_v32  ;;  %12307 = vmatprep.subr.bf16.mxu1 %v16514_v29 }
 0xade   :  { %3881 = vmatprep.mubr.f32.mxu0 %v19235_v45  ;;  %3952 = vmatprep.mubr.f32.mxu1 %v19235_v45 }
 0xae0   :  { %12277 = vmatpush1.bf16.msra.mxu0 %v16518_v43  ;;  %12309 = vmatpush1.bf16.msra.mxu1 %v16520_v54 }
 0xae1   :  { %12279 = vmatprep.subr.bf16.mxu0 %v16524_v25  ;;  %12311 = vmatprep.subr.bf16.mxu1 %v16526_v63 }
 0xae4   :  { %12281 = vmatpush1.bf16.msra.mxu0 %v16532_v20  ;;  %12313 = vmatpush1.bf16.msra.mxu1 %v16534_v4 }
 0xae5   :  { %12283 = vmatprep.subr.bf16.mxu0 %v16538_v13  ;;  %12315 = vmatprep.subr.bf16.mxu1 %v16540_v17 }
 0xae8   :  { %12285 = vmatpush1.bf16.msra.mxu0 %v19442_v62  ;;  %12317 = vmatpush1.bf16.msra.mxu1 %v19443_v8 }
 0xae9   :  { %12287 = vmatprep.subr.bf16.mxu0 %v19444_v21  ;;  %12319 = vmatprep.subr.bf16.mxu1 %v19445_v19  ;;  %v19462_v19 = vld [vmem:[#allocation50_spill] sm:$0xff] }
 0xaec   :  { %12289 = vmatpush1.bf16.msra.mxu0 %v19446_v33  ;;  %12321 = vmatpush1.bf16.msra.mxu1 %v19447_v48  ;;  %v19457_v33 = vld [vmem:[#allocation12_spill] sm:$0xff]  ;;  %v19458_v48 = vld [vmem:[#allocation13_spill] sm:$0xff] }
 0xaed   :  { %12291 = vmatprep.subr.bf16.mxu0 %v19448_v38  ;;  %12323 = vmatprep.subr.bf16.mxu1 %v19449_v28  ;;  %v19459_v38 = vld [vmem:[#allocation14_spill] sm:$0xff]  ;;  %v19460_v28 = vld [vmem:[#allocation15_spill] sm:$0xff] }
 0xaf0   :  { %12293 = vmatpush1.bf16.msra.mxu0 %v19450_v9  ;;  %12325 = vmatpush1.bf16.msra.mxu1 %v19451_v16  ;;  %v19461_v9 = vld [vmem:[#allocation16_spill] sm:$0xff] }
 0xaf1   :  { %12295 = vmatprep.subr.bf16.mxu0 %v19452_v26  ;;  %12327 = vmatprep.subr.bf16.mxu1 %v19453_v61 }
 0xaf4   :  { %12297 = vmatpush1.bf16.msra.mxu0 %v19454_v0  ;;  %12329 = vmatpush1.bf16.msra.mxu1 %v19455_v49 }
 0xaf5   :  { %12299 = vmatprep.subr.bf16.mxu0 %v19456_v40  ;;  %12331 = vmatprep.subr.bf16.mxu1 %v19457_v33 }
 0xaf8   :  { %12301 = vmatpush1.bf16.msra.mxu0 %v19458_v48  ;;  %12333 = vmatpush1.bf16.msra.mxu1 %v19459_v38 }
 0xaf9   :  { %12335 = vmatprep.subr.bf16.mxu0 %v19460_v28  ;;  %12367 = vmatprep.subr.bf16.mxu1 %v19461_v9 }
 0xbae   :  { %v3711_v16 = vpop.f32.mrb[20].mxu0  ;;  %v3782_v26 = vpop.f32.mrb[20].mxu1 }
 0xbaf   :  { %v3787_v61 = vadd.f32 %v3711_v16, %v19462_v19  ;;  %v3713_v21 = vpop.f32.mrb[21].mxu0  ;;  %v3784_v0 = vpop.f32.mrb[21].mxu1  ;;  %v3789_v48 = vadd.f32 %v3782_v26, %v16759_v51 }
 0xbb0   :  { %v3788_v49 = vadd.f32 %v3713_v21, %v19440_v7  ;;  %v3790_v38 = vadd.f32 %v3784_v0, %v16762_v36  ;;  %v19468_v0 = vld [vmem:[#allocation34_spill] sm:$0xff] }
 0xbb1   :  { %v10762_v8 = vmul.f32 -1.442695, %v3787_v61  ;;  %v10764_v33 = vmul.f32 -1.442695, %v3789_v48 }
 0xbb2   :  { %v10763_v40 = vmul.f32 -1.442695, %v3788_v49 }
 0xbb3   :  { %15251 = vpow2.f32 %v10762_v8 }
 0xbb4   :  { %15253 = vpow2.f32 %v10763_v40 }
 0xbb5   :  { %15255 = vtanh.f32 %v3790_v38 }
 0xbb6   :  { %15257 = vpow2.f32 %v10764_v33  ;;  %v19466_v33 = vld [vmem:[#allocation32_spill] sm:$0xff] }
 0xbbd   :  { %v15252_v28 = vpop.eup %15251 }
 0xbbe   :  { %v3800_v62 = vadd.f32 1.0, %v15252_v28  ;;  %v15254_v9 = vpop.eup %15253 }
 0xbbf   :  { %v3801_v16 = vadd.f32 1.0, %v15254_v9  ;;  %v15256_v19 = vpop.eup %15255  ;;  %v19467_v9 = vld [vmem:[#allocation33_spill] sm:$0xff] }
 0xbc0   :  { %15259 = vrcp.f32 %v3800_v62  ;;  %v15258_v17 = vpop.eup %15257  ;;  %v19464_v62 = vld [vmem:[#allocation30_spill] sm:$0xff] }
 0xbc1   :  { %15261 = vrcp.f32 %v3801_v16  ;;  %v3802_v8 = vadd.f32 1.0, %v15258_v17  ;;  %v10766_v17 = vld [vmem:[%s18875_s4 + $0x18] sm:$0xff] }
 0xbc2   :  { %v19469_v16 = vld [vmem:[#allocation35_spill] sm:$0xff] }
 0xbc3   :  { %15263 = vrcp.f32 %v3802_v8  ;;  %v19473_v8 = vld [vmem:[#allocation42_spill] sm:$0xff] }
 0xbca   :  { %v15260_v21 = vpop.eup %15259 }
 0xbcb   :  { %v3811_v61 = vmul.f32 %v15260_v21, %v15256_v19  ;;  %v15262_v49 = vpop.eup %15261  ;;  %v19465_v19 = vld [vmem:[#allocation31_spill] sm:$0xff]  ;;  %v19470_v21 = vld [vmem:[#allocation36_spill] sm:$0xff] }
 0xbcc   :  { %v3810_v40 = vmul.f32 %v15262_v49, %v16845_v59  ;;  %v19463_v59 = vld [vmem:[#allocation29_spill] sm:$0xff]  ;;  %v19472_v49 = vld [vmem:[#allocation38_spill] sm:$0xff] }
 0xbcd   :  { %v15264_v48 = vpop.eup %15263 }
 0xbce   :  { %v16924_v26 = vadd.f32 %v3811_v61, %v3810_v40  ;;  %v19471_v61 = vld [vmem:[#allocation37_spill] sm:$0xff]  ;;  %v19474_v40 = vld [vmem:[#allocation44_spill] sm:$0xff] }
 0xbd0   :  { %15265 = vtanh.f32 %v16924_v26 }
 0xbda   :  { %v15266_v38 = vpop.eup %15265 }
 0xbdb   :  { %v3814_v28 = vmul.f32 %v15266_v38, %v15264_v48  ;;  %v19475_v48 = vld [vmem:[#allocation8_spill] sm:$0xff]  ;;  %v19476_v38 = vld [vmem:[#allocation9_spill] sm:$0xff] }
 0xbdd   :  { %3882 = vmatmul.mubr.f32.vlgmr.msra.gmra.mrb[22].mxu0 %v3814_v28  ;;  %3953 = vmatmul.mubr.f32.vlgmr.msra.gmra.mrb[22].mxu1 %v3814_v28  ;;  %v19477_v28 = vld [vmem:[#allocation10_spill] sm:$0xff] }
 0xbde   :  { %12337 = vmatpush1.bf16.msra.mxu0 %v16604_v55  ;;  %12369 = vmatpush1.bf16.msra.mxu1 %v16606_v60 }
 0xbdf   :  { %12339 = vmatprep.subr.bf16.mxu0 %v19419_v12  ;;  %12371 = vmatprep.subr.bf16.mxu1 %v19420_v27 }
 0xbe0   :  { %4023 = vmatprep.mubr.f32.mxu0 %v19235_v45  ;;  %4094 = vmatprep.mubr.f32.mxu1 %v19235_v45 }
 0xbe2   :  { %12341 = vmatpush1.bf16.msra.mxu0 %v19421_v1  ;;  %12373 = vmatpush1.bf16.msra.mxu1 %v19422_v50 }
 0xbe3   :  { %12343 = vmatprep.subr.bf16.mxu0 %v19423_v2  ;;  %12375 = vmatprep.subr.bf16.mxu1 %v19424_v42 }
 0xbe6   :  { %12345 = vmatpush1.bf16.msra.mxu0 %v19425_v30  ;;  %12377 = vmatpush1.bf16.msra.mxu1 %v19426_v52 }
 0xbe7   :  { %12347 = vmatprep.subr.bf16.mxu0 %v19427_v46  ;;  %12379 = vmatprep.subr.bf16.mxu1 %v19428_v37 }
 0xbea   :  { %12349 = vmatpush1.bf16.msra.mxu0 %v19429_v57  ;;  %12381 = vmatpush1.bf16.msra.mxu1 %v19430_v53 }
 0xbeb   :  { %12351 = vmatprep.subr.bf16.mxu0 %v19431_v11  ;;  %12383 = vmatprep.subr.bf16.mxu1 %v19432_v10 }
 0xbee   :  { %12353 = vmatpush1.bf16.msra.mxu0 %v19433_v5  ;;  %12385 = vmatpush1.bf16.msra.mxu1 %v19434_v34 }
 0xbef   :  { %12355 = vmatprep.subr.bf16.mxu0 %v16662_v44  ;;  %12387 = vmatprep.subr.bf16.mxu1 %v16664_v24 }
 0xbf2   :  { %12357 = vmatpush1.bf16.msra.mxu0 %v16668_v6  ;;  %12389 = vmatpush1.bf16.msra.mxu1 %v16670_v14 }
 0xbf3   :  { %12359 = vmatprep.subr.bf16.mxu0 %v16674_v23  ;;  %12391 = vmatprep.subr.bf16.mxu1 %v19441_v39 }
 0xbf6   :  { %12361 = vmatpush1.bf16.msra.mxu0 %v16680_v31  ;;  %12393 = vmatpush1.bf16.msra.mxu1 %v16682_v35 }
 0xbf7   :  { %12363 = vmatprep.subr.bf16.mxu0 %v16686_v18  ;;  %12395 = vmatprep.subr.bf16.mxu1 %v16688_v22 }
 0xbfa   :  { %12365 = vmatpush1.bf16.msra.mxu0 %v16692_v58  ;;  %12397 = vmatpush1.bf16.msra.mxu1 %v16694_v56 }
 0xbfb   :  { %12399 = vmatprep.subr.bf16.mxu0 %v16497_v41  ;;  %12431 = vmatprep.subr.bf16.mxu1 %v16499_v47 }
 0xbfd   :  { %4024 = vmatmul.mubr.f32.vlgmr.msra.gmra.mrb[22].mxu0 %v10766_v17  ;;  %4095 = vmatmul.mubr.f32.vlgmr.msra.gmra.mrb[22].mxu1 %v10766_v17  ;;  %v19478_v17 = vld [vmem:[#allocation11_spill] sm:$0xff] }
 0xbfe   :  { %12401 = vmatpush1.bf16.msra.mxu0 %v16506_v3  ;;  %12433 = vmatpush1.bf16.msra.mxu1 %v16508_v15 }
 0xbff   :  { %12403 = vmatprep.subr.bf16.mxu0 %v16512_v32  ;;  %12435 = vmatprep.subr.bf16.mxu1 %v16514_v29 }
 0xc00   :  { %4195 = vmatprep.mubr.f32.mxu0 %v19235_v45  ;;  %4266 = vmatprep.mubr.f32.mxu1 %v19235_v45 }
 0xc02   :  { %12405 = vmatpush1.bf16.msra.mxu0 %v16518_v43  ;;  %12437 = vmatpush1.bf16.msra.mxu1 %v16520_v54 }
 0xc03   :  { %12407 = vmatprep.subr.bf16.mxu0 %v16524_v25  ;;  %12439 = vmatprep.subr.bf16.mxu1 %v16526_v63 }
 0xc06   :  { %12409 = vmatpush1.bf16.msra.mxu0 %v16532_v20  ;;  %12441 = vmatpush1.bf16.msra.mxu1 %v16534_v4 }
 0xc07   :  { %12411 = vmatprep.subr.bf16.mxu0 %v16538_v13  ;;  %12443 = vmatprep.subr.bf16.mxu1 %v19463_v59 }
 0xc0a   :  { %12413 = vmatpush1.bf16.msra.mxu0 %v19464_v62  ;;  %12445 = vmatpush1.bf16.msra.mxu1 %v19465_v19 }
 0xc0b   :  { %12415 = vmatprep.subr.bf16.mxu0 %v19466_v33  ;;  %12447 = vmatprep.subr.bf16.mxu1 %v19467_v9  ;;  %v19484_v9 = vld [vmem:[#allocation50_spill] sm:$0xff] }
 0xc0e   :  { %12417 = vmatpush1.bf16.msra.mxu0 %v19468_v0  ;;  %12449 = vmatpush1.bf16.msra.mxu1 %v19469_v16  ;;  %v19479_v0 = vld [vmem:[#allocation12_spill] sm:$0xff]  ;;  %v19480_v16 = vld [vmem:[#allocation13_spill] sm:$0xff] }
 0xc0f   :  { %12419 = vmatprep.subr.bf16.mxu0 %v19470_v21  ;;  %12451 = vmatprep.subr.bf16.mxu1 %v19471_v61  ;;  %v19481_v21 = vld [vmem:[#allocation14_spill] sm:$0xff]  ;;  %v19482_v61 = vld [vmem:[#allocation15_spill] sm:$0xff] }
 0xc12   :  { %12421 = vmatpush1.bf16.msra.mxu0 %v19472_v49  ;;  %12453 = vmatpush1.bf16.msra.mxu1 %v19473_v8  ;;  %v19483_v49 = vld [vmem:[#allocation16_spill] sm:$0xff] }
 0xc13   :  { %12423 = vmatprep.subr.bf16.mxu0 %v19474_v40  ;;  %12455 = vmatprep.subr.bf16.mxu1 %v19475_v48 }
 0xc16   :  { %12425 = vmatpush1.bf16.msra.mxu0 %v19476_v38  ;;  %12457 = vmatpush1.bf16.msra.mxu1 %v19477_v28 }
 0xc17   :  { %12427 = vmatprep.subr.bf16.mxu0 %v19478_v17  ;;  %12459 = vmatprep.subr.bf16.mxu1 %v19479_v0 }
 0xc1a   :  { %12429 = vmatpush1.bf16.msra.mxu0 %v19480_v16  ;;  %12461 = vmatpush1.bf16.msra.mxu1 %v19481_v21 }
 0xc1b   :  { %12463 = vmatprep.subr.bf16.mxu0 %v19482_v61  ;;  %12495 = vmatprep.subr.bf16.mxu1 %v19483_v49 }
 0xcd0   :  { %v4025_v8 = vpop.f32.mrb[22].mxu0  ;;  %v4096_v40 = vpop.f32.mrb[22].mxu1 }
 0xcd1   :  { %v4101_v48 = vadd.f32 %v4025_v8, %v19484_v9  ;;  %v4027_v33 = vpop.f32.mrb[23].mxu0  ;;  %v4098_v38 = vpop.f32.mrb[23].mxu1  ;;  %v4103_v16 = vadd.f32 %v4096_v40, %v16759_v51 }
 0xcd2   :  { %v4102_v28 = vadd.f32 %v4027_v33, %v19440_v7  ;;  %v4104_v21 = vadd.f32 %v4098_v38, %v16762_v36  ;;  %v19490_v38 = vld [vmem:[#allocation34_spill] sm:$0xff] }
 0xcd3   :  { %v10767_v19 = vmul.f32 -1.442695, %v4101_v48  ;;  %v10769_v0 = vmul.f32 -1.442695, %v4103_v16 }
 0xcd4   :  { %v10768_v17 = vmul.f32 -1.442695, %v4102_v28 }
 0xcd5   :  { %15267 = vpow2.f32 %v10767_v19 }
 0xcd6   :  { %15269 = vpow2.f32 %v10768_v17 }
 0xcd7   :  { %15271 = vtanh.f32 %v4104_v21 }
 0xcd8   :  { %15273 = vpow2.f32 %v10769_v0  ;;  %v19488_v0 = vld [vmem:[#allocation32_spill] sm:$0xff] }
 0xcdf   :  { %v15268_v61 = vpop.eup %15267 }
 0xce0   :  { %v4114_v62 = vadd.f32 1.0, %v15268_v61  ;;  %v15270_v49 = vpop.eup %15269 }
 0xce1   :  { %v4115_v8 = vadd.f32 1.0, %v15270_v49  ;;  %v15272_v9 = vpop.eup %15271  ;;  %v19489_v49 = vld [vmem:[#allocation33_spill] sm:$0xff] }
 0xce2   :  { %15275 = vrcp.f32 %v4114_v62  ;;  %v15274_v59 = vpop.eup %15273  ;;  %v19486_v62 = vld [vmem:[#allocation30_spill] sm:$0xff] }
 0xce3   :  { %15277 = vrcp.f32 %v4115_v8  ;;  %v4116_v19 = vadd.f32 1.0, %v15274_v59  ;;  %v19485_v59 = vld [vmem:[#allocation29_spill] sm:$0xff]  ;;  %v19491_v8 = vld [vmem:[#allocation35_spill] sm:$0xff] }
 0xce5   :  { %15279 = vrcp.f32 %v4116_v19  ;;  %v19495_v19 = vld [vmem:[#allocation42_spill] sm:$0xff] }
 0xcec   :  { %v15276_v33 = vpop.eup %15275 }
 0xced   :  { %v4125_v48 = vmul.f32 %v15276_v33, %v15272_v9  ;;  %v15278_v28 = vpop.eup %15277  ;;  %v19487_v9 = vld [vmem:[#allocation31_spill] sm:$0xff]  ;;  %v19492_v33 = vld [vmem:[#allocation36_spill] sm:$0xff] }
 0xcee   :  { %v4124_v17 = vmul.f32 %v15278_v28, %v16924_v26  ;;  %v10771_v26 = vld [vmem:[%s18875_s4 + $0x20] sm:$0xff]  ;;  %v19494_v28 = vld [vmem:[#allocation38_spill] sm:$0xff] }
 0xcef   :  { %v15280_v16 = vpop.eup %15279 }
 0xcf0   :  { %v17003_v40 = vadd.f32 %v4125_v48, %v4124_v17  ;;  %v19493_v48 = vld [vmem:[#allocation37_spill] sm:$0xff]  ;;  %v19496_v17 = vld [vmem:[#allocation44_spill] sm:$0xff] }
 0xcf2   :  { %15281 = vtanh.f32 %v17003_v40 }
 0xcfc   :  { %v15282_v21 = vpop.eup %15281 }
 0xcfd   :  { %v4128_v61 = vmul.f32 %v15282_v21, %v15280_v16  ;;  %v19497_v16 = vld [vmem:[#allocation8_spill] sm:$0xff]  ;;  %v19498_v21 = vld [vmem:[#allocation9_spill] sm:$0xff] }
 0xcff   :  { %4196 = vmatmul.mubr.f32.vlgmr.msra.gmra.mrb[24].mxu0 %v4128_v61  ;;  %4267 = vmatmul.mubr.f32.vlgmr.msra.gmra.mrb[24].mxu1 %v4128_v61  ;;  %v19499_v61 = vld [vmem:[#allocation10_spill] sm:$0xff] }
 0xd00   :  { %12465 = vmatpush1.bf16.msra.mxu0 %v16604_v55  ;;  %12497 = vmatpush1.bf16.msra.mxu1 %v16606_v60 }
 0xd01   :  { %12467 = vmatprep.subr.bf16.mxu0 %v19419_v12  ;;  %12499 = vmatprep.subr.bf16.mxu1 %v19420_v27 }
 0xd02   :  { %4337 = vmatprep.mubr.f32.mxu0 %v19235_v45  ;;  %4408 = vmatprep.mubr.f32.mxu1 %v19235_v45 }
 0xd04   :  { %12469 = vmatpush1.bf16.msra.mxu0 %v19421_v1  ;;  %12501 = vmatpush1.bf16.msra.mxu1 %v19422_v50 }
 0xd05   :  { %12471 = vmatprep.subr.bf16.mxu0 %v19423_v2  ;;  %12503 = vmatprep.subr.bf16.mxu1 %v19424_v42 }
 0xd08   :  { %12473 = vmatpush1.bf16.msra.mxu0 %v19425_v30  ;;  %12505 = vmatpush1.bf16.msra.mxu1 %v19426_v52 }
 0xd09   :  { %12475 = vmatprep.subr.bf16.mxu0 %v19427_v46  ;;  %12507 = vmatprep.subr.bf16.mxu1 %v19428_v37 }
 0xd0c   :  { %12477 = vmatpush1.bf16.msra.mxu0 %v19429_v57  ;;  %12509 = vmatpush1.bf16.msra.mxu1 %v19430_v53 }
 0xd0d   :  { %12479 = vmatprep.subr.bf16.mxu0 %v19431_v11  ;;  %12511 = vmatprep.subr.bf16.mxu1 %v19432_v10 }
 0xd10   :  { %12481 = vmatpush1.bf16.msra.mxu0 %v19433_v5  ;;  %12513 = vmatpush1.bf16.msra.mxu1 %v19434_v34 }
 0xd11   :  { %12483 = vmatprep.subr.bf16.mxu0 %v16662_v44  ;;  %12515 = vmatprep.subr.bf16.mxu1 %v16664_v24 }
 0xd14   :  { %12485 = vmatpush1.bf16.msra.mxu0 %v16668_v6  ;;  %12517 = vmatpush1.bf16.msra.mxu1 %v16670_v14 }
 0xd15   :  { %12487 = vmatprep.subr.bf16.mxu0 %v16674_v23  ;;  %12519 = vmatprep.subr.bf16.mxu1 %v19441_v39 }
 0xd18   :  { %12489 = vmatpush1.bf16.msra.mxu0 %v16680_v31  ;;  %12521 = vmatpush1.bf16.msra.mxu1 %v16682_v35 }
 0xd19   :  { %12491 = vmatprep.subr.bf16.mxu0 %v16686_v18  ;;  %12523 = vmatprep.subr.bf16.mxu1 %v16688_v22 }
 0xd1c   :  { %12493 = vmatpush1.bf16.msra.mxu0 %v16692_v58  ;;  %12525 = vmatpush1.bf16.msra.mxu1 %v16694_v56 }
 0xd1d   :  { %12527 = vmatprep.subr.bf16.mxu0 %v16497_v41  ;;  %12559 = vmatprep.subr.bf16.mxu1 %v16499_v47 }
 0xd1f   :  { %4338 = vmatmul.mubr.f32.vlgmr.msra.gmra.mrb[24].mxu0 %v10771_v26  ;;  %4409 = vmatmul.mubr.f32.vlgmr.msra.gmra.mrb[24].mxu1 %v10771_v26  ;;  %v19500_v26 = vld [vmem:[#allocation11_spill] sm:$0xff] }
 0xd20   :  { %12529 = vmatpush1.bf16.msra.mxu0 %v16506_v3  ;;  %12561 = vmatpush1.bf16.msra.mxu1 %v16508_v15 }
 0xd21   :  { %12531 = vmatprep.subr.bf16.mxu0 %v16512_v32  ;;  %12563 = vmatprep.subr.bf16.mxu1 %v16514_v29 }
 0xd22   :  { %4509 = vmatprep.mubr.f32.mxu0 %v19235_v45  ;;  %4580 = vmatprep.mubr.f32.mxu1 %v19235_v45 }
 0xd24   :  { %12533 = vmatpush1.bf16.msra.mxu0 %v16518_v43  ;;  %12565 = vmatpush1.bf16.msra.mxu1 %v16520_v54 }
 0xd25   :  { %12535 = vmatprep.subr.bf16.mxu0 %v16524_v25  ;;  %12567 = vmatprep.subr.bf16.mxu1 %v16526_v63 }
 0xd28   :  { %12537 = vmatpush1.bf16.msra.mxu0 %v16532_v20  ;;  %12569 = vmatpush1.bf16.msra.mxu1 %v16534_v4 }
 0xd29   :  { %12539 = vmatprep.subr.bf16.mxu0 %v16538_v13  ;;  %12571 = vmatprep.subr.bf16.mxu1 %v19485_v59 }
 0xd2c   :  { %12541 = vmatpush1.bf16.msra.mxu0 %v19486_v62  ;;  %12573 = vmatpush1.bf16.msra.mxu1 %v19487_v9 }
 0xd2d   :  { %12543 = vmatprep.subr.bf16.mxu0 %v19488_v0  ;;  %12575 = vmatprep.subr.bf16.mxu1 %v19489_v49  ;;  %v19506_v49 = vld [vmem:[#allocation50_spill] sm:$0xff] }
 0xd30   :  { %12545 = vmatpush1.bf16.msra.mxu0 %v19490_v38  ;;  %12577 = vmatpush1.bf16.msra.mxu1 %v19491_v8  ;;  %v19501_v38 = vld [vmem:[#allocation12_spill] sm:$0xff]  ;;  %v19502_v8 = vld [vmem:[#allocation13_spill] sm:$0xff] }
 0xd31   :  { %12547 = vmatprep.subr.bf16.mxu0 %v19492_v33  ;;  %12579 = vmatprep.subr.bf16.mxu1 %v19493_v48  ;;  %v19503_v33 = vld [vmem:[#allocation14_spill] sm:$0xff]  ;;  %v19504_v48 = vld [vmem:[#allocation15_spill] sm:$0xff] }
 0xd34   :  { %12549 = vmatpush1.bf16.msra.mxu0 %v19494_v28  ;;  %12581 = vmatpush1.bf16.msra.mxu1 %v19495_v19  ;;  %v19505_v28 = vld [vmem:[#allocation16_spill] sm:$0xff] }
 0xd35   :  { %12551 = vmatprep.subr.bf16.mxu0 %v19496_v17  ;;  %12583 = vmatprep.subr.bf16.mxu1 %v19497_v16 }
 0xd38   :  { %12553 = vmatpush1.bf16.msra.mxu0 %v19498_v21  ;;  %12585 = vmatpush1.bf16.msra.mxu1 %v19499_v61 }
 0xd39   :  { %12555 = vmatprep.subr.bf16.mxu0 %v19500_v26  ;;  %12587 = vmatprep.subr.bf16.mxu1 %v19501_v38 }
 0xd3c   :  { %12557 = vmatpush1.bf16.msra.mxu0 %v19502_v8  ;;  %12589 = vmatpush1.bf16.msra.mxu1 %v19503_v33 }
 0xd3d   :  { %12591 = vmatprep.subr.bf16.mxu0 %v19504_v48  ;;  %12623 = vmatprep.subr.bf16.mxu1 %v19505_v28 }
 0xdf2   :  { %v4339_v19 = vpop.f32.mrb[24].mxu0  ;;  %v4410_v17 = vpop.f32.mrb[24].mxu1 }
 0xdf3   :  { %v4415_v16 = vadd.f32 %v4339_v19, %v19506_v49  ;;  %v4341_v0 = vpop.f32.mrb[25].mxu0  ;;  %v4412_v21 = vpop.f32.mrb[25].mxu1  ;;  %v4417_v8 = vadd.f32 %v4410_v17, %v16759_v51 }
 0xdf4   :  { %v4416_v61 = vadd.f32 %v4341_v0, %v19440_v7  ;;  %v4418_v33 = vadd.f32 %v4412_v21, %v16762_v36  ;;  %v19512_v21 = vld [vmem:[#allocation34_spill] sm:$0xff] }
 0xdf5   :  { %v10772_v9 = vmul.f32 -1.442695, %v4415_v16  ;;  %v10774_v38 = vmul.f32 -1.442695, %v4417_v8 }
 0xdf6   :  { %v10773_v26 = vmul.f32 -1.442695, %v4416_v61 }
 0xdf7   :  { %15283 = vpow2.f32 %v10772_v9 }
 0xdf8   :  { %15285 = vpow2.f32 %v10773_v26 }
 0xdf9   :  { %15287 = vtanh.f32 %v4418_v33 }
 0xdfa   :  { %15289 = vpow2.f32 %v10774_v38  ;;  %v19510_v38 = vld [vmem:[#allocation32_spill] sm:$0xff] }
 0xe01   :  { %v15284_v48 = vpop.eup %15283 }
 0xe02   :  { %v4428_v62 = vadd.f32 1.0, %v15284_v48  ;;  %v15286_v28 = vpop.eup %15285 }
 0xe03   :  { %v4429_v19 = vadd.f32 1.0, %v15286_v28  ;;  %v15288_v49 = vpop.eup %15287  ;;  %v19511_v28 = vld [vmem:[#allocation33_spill] sm:$0xff] }
 0xe04   :  { %15291 = vrcp.f32 %v4428_v62  ;;  %v15290_v59 = vpop.eup %15289  ;;  %v19508_v62 = vld [vmem:[#allocation30_spill] sm:$0xff] }
 0xe05   :  { %15293 = vrcp.f32 %v4429_v19  ;;  %v4430_v9 = vadd.f32 1.0, %v15290_v59  ;;  %v19507_v59 = vld [vmem:[#allocation29_spill] sm:$0xff]  ;;  %v19513_v19 = vld [vmem:[#allocation35_spill] sm:$0xff] }
 0xe07   :  { %15295 = vrcp.f32 %v4430_v9  ;;  %v19517_v9 = vld [vmem:[#allocation42_spill] sm:$0xff] }
 0xe0e   :  { %v15292_v0 = vpop.eup %15291 }
 0xe0f   :  { %v4439_v16 = vmul.f32 %v15292_v0, %v15288_v49  ;;  %v15294_v61 = vpop.eup %15293  ;;  %v19509_v49 = vld [vmem:[#allocation31_spill] sm:$0xff]  ;;  %v19514_v0 = vld [vmem:[#allocation36_spill] sm:$0xff] }
 0xe10   :  { %v4438_v26 = vmul.f32 %v15294_v61, %v17003_v40  ;;  %v10776_v40 = vld [vmem:[%s18875_s4 + $0x28] sm:$0xff]  ;;  %v19516_v61 = vld [vmem:[#allocation38_spill] sm:$0xff] }
 0xe11   :  { %v15296_v8 = vpop.eup %15295 }
 0xe12   :  { %v17082_v17 = vadd.f32 %v4439_v16, %v4438_v26  ;;  %v19515_v16 = vld [vmem:[#allocation37_spill] sm:$0xff]  ;;  %v19518_v26 = vld [vmem:[#allocation44_spill] sm:$0xff] }
 0xe14   :  { %15297 = vtanh.f32 %v17082_v17 }
 0xe1e   :  { %v15298_v33 = vpop.eup %15297 }
 0xe1f   :  { %v4442_v48 = vmul.f32 %v15298_v33, %v15296_v8  ;;  %v19519_v8 = vld [vmem:[#allocation8_spill] sm:$0xff]  ;;  %v19520_v33 = vld [vmem:[#allocation9_spill] sm:$0xff] }
 0xe21   :  { %4510 = vmatmul.mubr.f32.vlgmr.msra.gmra.mrb[26].mxu0 %v4442_v48  ;;  %4581 = vmatmul.mubr.f32.vlgmr.msra.gmra.mrb[26].mxu1 %v4442_v48  ;;  %v19521_v48 = vld [vmem:[#allocation10_spill] sm:$0xff] }
 0xe22   :  { %12593 = vmatpush1.bf16.msra.mxu0 %v16604_v55  ;;  %12625 = vmatpush1.bf16.msra.mxu1 %v16606_v60 }
 0xe23   :  { %12595 = vmatprep.subr.bf16.mxu0 %v19419_v12  ;;  %12627 = vmatprep.subr.bf16.mxu1 %v19420_v27 }
 0xe24   :  { %4651 = vmatprep.mubr.f32.mxu0 %v19235_v45  ;;  %4722 = vmatprep.mubr.f32.mxu1 %v19235_v45 }
 0xe26   :  { %12597 = vmatpush1.bf16.msra.mxu0 %v19421_v1  ;;  %12629 = vmatpush1.bf16.msra.mxu1 %v19422_v50 }
 0xe27   :  { %12599 = vmatprep.subr.bf16.mxu0 %v19423_v2  ;;  %12631 = vmatprep.subr.bf16.mxu1 %v19424_v42 }
 0xe2a   :  { %12601 = vmatpush1.bf16.msra.mxu0 %v19425_v30  ;;  %12633 = vmatpush1.bf16.msra.mxu1 %v19426_v52 }
 0xe2b   :  { %12603 = vmatprep.subr.bf16.mxu0 %v19427_v46  ;;  %12635 = vmatprep.subr.bf16.mxu1 %v19428_v37 }
 0xe2e   :  { %12605 = vmatpush1.bf16.msra.mxu0 %v19429_v57  ;;  %12637 = vmatpush1.bf16.msra.mxu1 %v19430_v53 }
 0xe2f   :  { %12607 = vmatprep.subr.bf16.mxu0 %v19431_v11  ;;  %12639 = vmatprep.subr.bf16.mxu1 %v19432_v10 }
 0xe32   :  { %12609 = vmatpush1.bf16.msra.mxu0 %v19433_v5  ;;  %12641 = vmatpush1.bf16.msra.mxu1 %v19434_v34 }
 0xe33   :  { %12611 = vmatprep.subr.bf16.mxu0 %v16662_v44  ;;  %12643 = vmatprep.subr.bf16.mxu1 %v16664_v24 }
 0xe36   :  { %12613 = vmatpush1.bf16.msra.mxu0 %v16668_v6  ;;  %12645 = vmatpush1.bf16.msra.mxu1 %v16670_v14 }
 0xe37   :  { %12615 = vmatprep.subr.bf16.mxu0 %v16674_v23  ;;  %12647 = vmatprep.subr.bf16.mxu1 %v19441_v39 }
 0xe3a   :  { %12617 = vmatpush1.bf16.msra.mxu0 %v16680_v31  ;;  %12649 = vmatpush1.bf16.msra.mxu1 %v16682_v35 }
 0xe3b   :  { %12619 = vmatprep.subr.bf16.mxu0 %v16686_v18  ;;  %12651 = vmatprep.subr.bf16.mxu1 %v16688_v22 }
 0xe3e   :  { %12621 = vmatpush1.bf16.msra.mxu0 %v16692_v58  ;;  %12653 = vmatpush1.bf16.msra.mxu1 %v16694_v56 }
 0xe3f   :  { %12655 = vmatprep.subr.bf16.mxu0 %v16497_v41  ;;  %12687 = vmatprep.subr.bf16.mxu1 %v16499_v47 }
 0xe41   :  { %4652 = vmatmul.mubr.f32.vlgmr.msra.gmra.mrb[26].mxu0 %v10776_v40  ;;  %4723 = vmatmul.mubr.f32.vlgmr.msra.gmra.mrb[26].mxu1 %v10776_v40  ;;  %v19522_v40 = vld [vmem:[#allocation11_spill] sm:$0xff] }
 0xe42   :  { %12657 = vmatpush1.bf16.msra.mxu0 %v16506_v3  ;;  %12689 = vmatpush1.bf16.msra.mxu1 %v16508_v15 }
 0xe43   :  { %12659 = vmatprep.subr.bf16.mxu0 %v16512_v32  ;;  %12691 = vmatprep.subr.bf16.mxu1 %v16514_v29 }
 0xe44   :  { %4823 = vmatprep.mubr.f32.mxu0 %v19235_v45  ;;  %4894 = vmatprep.mubr.f32.mxu1 %v19235_v45 }
 0xe46   :  { %12661 = vmatpush1.bf16.msra.mxu0 %v16518_v43  ;;  %12693 = vmatpush1.bf16.msra.mxu1 %v16520_v54 }
 0xe47   :  { %12663 = vmatprep.subr.bf16.mxu0 %v16524_v25  ;;  %12695 = vmatprep.subr.bf16.mxu1 %v16526_v63 }
 0xe4a   :  { %12665 = vmatpush1.bf16.msra.mxu0 %v16532_v20  ;;  %12697 = vmatpush1.bf16.msra.mxu1 %v16534_v4 }
 0xe4b   :  { %12667 = vmatprep.subr.bf16.mxu0 %v16538_v13  ;;  %12699 = vmatprep.subr.bf16.mxu1 %v19507_v59 }
 0xe4e   :  { %12669 = vmatpush1.bf16.msra.mxu0 %v19508_v62  ;;  %12701 = vmatpush1.bf16.msra.mxu1 %v19509_v49 }
 0xe4f   :  { %12671 = vmatprep.subr.bf16.mxu0 %v19510_v38  ;;  %12703 = vmatprep.subr.bf16.mxu1 %v19511_v28  ;;  %v19528_v28 = vld [vmem:[#allocation50_spill] sm:$0xff] }
 0xe52   :  { %12673 = vmatpush1.bf16.msra.mxu0 %v19512_v21  ;;  %12705 = vmatpush1.bf16.msra.mxu1 %v19513_v19  ;;  %v19523_v21 = vld [vmem:[#allocation12_spill] sm:$0xff]  ;;  %v19524_v19 = vld [vmem:[#allocation13_spill] sm:$0xff] }
 0xe53   :  { %12675 = vmatprep.subr.bf16.mxu0 %v19514_v0  ;;  %12707 = vmatprep.subr.bf16.mxu1 %v19515_v16  ;;  %v19525_v0 = vld [vmem:[#allocation14_spill] sm:$0xff]  ;;  %v19526_v16 = vld [vmem:[#allocation15_spill] sm:$0xff] }
 0xe56   :  { %12677 = vmatpush1.bf16.msra.mxu0 %v19516_v61  ;;  %12709 = vmatpush1.bf16.msra.mxu1 %v19517_v9  ;;  %v19527_v61 = vld [vmem:[#allocation16_spill] sm:$0xff] }
 0xe57   :  { %12679 = vmatprep.subr.bf16.mxu0 %v19518_v26  ;;  %12711 = vmatprep.subr.bf16.mxu1 %v19519_v8 }
 0xe5a   :  { %12681 = vmatpush1.bf16.msra.mxu0 %v19520_v33  ;;  %12713 = vmatpush1.bf16.msra.mxu1 %v19521_v48 }
 0xe5b   :  { %12683 = vmatprep.subr.bf16.mxu0 %v19522_v40  ;;  %12715 = vmatprep.subr.bf16.mxu1 %v19523_v21 }
 0xe5e   :  { %12685 = vmatpush1.bf16.msra.mxu0 %v19524_v19  ;;  %12717 = vmatpush1.bf16.msra.mxu1 %v19525_v0 }
 0xe5f   :  { %12719 = vmatprep.subr.bf16.mxu0 %v19526_v16  ;;  %12751 = vmatprep.subr.bf16.mxu1 %v19527_v61 }
 0xf14   :  { %v4653_v9 = vpop.f32.mrb[26].mxu0  ;;  %v4724_v26 = vpop.f32.mrb[26].mxu1 }
 0xf15   :  { %v4729_v8 = vadd.f32 %v4653_v9, %v19528_v28  ;;  %v4655_v38 = vpop.f32.mrb[27].mxu0  ;;  %v4726_v33 = vpop.f32.mrb[27].mxu1  ;;  %v4731_v19 = vadd.f32 %v4724_v26, %v16759_v51 }
 0xf16   :  { %v4730_v48 = vadd.f32 %v4655_v38, %v19440_v7  ;;  %v4732_v0 = vadd.f32 %v4726_v33, %v16762_v36  ;;  %v19547_v33 = vld [vmem:[#allocation14_spill] sm:$0xff] }
 0xf17   :  { %v10777_v49 = vmul.f32 -1.442695, %v4729_v8  ;;  %v10779_v21 = vmul.f32 -1.442695, %v4731_v19 }
 0xf18   :  { %v10778_v40 = vmul.f32 -1.442695, %v4730_v48 }
 0xf19   :  { %15299 = vpow2.f32 %v10777_v49 }
 0xf1a   :  { %15301 = vpow2.f32 %v10778_v40 }
 0xf1b   :  { %15303 = vtanh.f32 %v4732_v0 }
 0xf1c   :  { %15305 = vpow2.f32 %v10779_v21  ;;  %v19545_v21 = vld [vmem:[#allocation12_spill] sm:$0xff] }
 0xf23   :  { %v15300_v16 = vpop.eup %15299 }
 0xf24   :  { %v4742_v62 = vadd.f32 1.0, %v15300_v16  ;;  %v15302_v61 = vpop.eup %15301 }
 0xf25   :  { %v4743_v9 = vadd.f32 1.0, %v15302_v61  ;;  %v15304_v28 = vpop.eup %15303  ;;  %v19546_v61 = vld [vmem:[#allocation13_spill] sm:$0xff] }
 0xf26   :  { %15307 = vrcp.f32 %v4742_v62  ;;  %v15306_v59 = vpop.eup %15305  ;;  %v19543_v62 = vld [vmem:[#allocation10_spill] sm:$0xff] }
 0xf27   :  { %15309 = vrcp.f32 %v4743_v9  ;;  %v4744_v49 = vadd.f32 1.0, %v15306_v59  ;;  %v19542_v59 = vld [vmem:[#allocation9_spill] sm:$0xff]  ;;  %v19548_v9 = vld [vmem:[#allocation15_spill] sm:$0xff] }
 0xf29   :  { %15311 = vrcp.f32 %v4744_v49  ;;  %v19550_v49 = vld [vmem:[#allocation50_spill] sm:$0xff] }
 0xf30   :  { %v15308_v38 = vpop.eup %15307 }
 0xf31   :  { %v4753_v8 = vmul.f32 %v15308_v38, %v15304_v28  ;;  %v15310_v48 = vpop.eup %15309  ;;  %v19544_v28 = vld [vmem:[#allocation11_spill] sm:$0xff]  ;;  %v19549_v38 = vld [vmem:[#allocation16_spill] sm:$0xff] }
 0xf32   :  { %v4752_v40 = vmul.f32 %v15310_v48, %v17082_v17  ;;  %v10781_v17 = vld [vmem:[%s18875_s4 + $0x30] sm:$0xff] }
 0xf33   :  { %v15312_v19 = vpop.eup %15311 }
 0xf34   :  { %v17161_v26 = vadd.f32 %v4753_v8, %v4752_v40 }
 0xf36   :  { %15313 = vtanh.f32 %v17161_v26 }
 0xf40   :  { %v15314_v0 = vpop.eup %15313 }
 0xf41   :  { %v4756_v16 = vmul.f32 %v15314_v0, %v15312_v19 }
 0xf43   :  { %4824 = vmatmul.mubr.f32.vlgmr.msra.gmra.mrb[28].mxu0 %v4756_v16  ;;  %4895 = vmatmul.mubr.f32.vlgmr.msra.gmra.mrb[28].mxu1 %v4756_v16 }
 0xf44   :  { %12721 = vmatpush1.bf16.msra.mxu0 %v16604_v55  ;;  %12753 = vmatpush1.bf16.msra.mxu1 %v16606_v60 }
 0xf45   :  { %12723 = vmatprep.subr.bf16.mxu0 %v19419_v12  ;;  %12755 = vmatprep.subr.bf16.mxu1 %v19420_v27 }
 0xf46   :  { %4965 = vmatprep.mubr.f32.mxu0 %v19235_v45  ;;  %5036 = vmatprep.mubr.f32.mxu1 %v19235_v45 }
 0xf48   :  { %12725 = vmatpush1.bf16.msra.mxu0 %v19421_v1  ;;  %12757 = vmatpush1.bf16.msra.mxu1 %v19422_v50 }
 0xf49   :  { %12727 = vmatprep.subr.bf16.mxu0 %v19423_v2  ;;  %12759 = vmatprep.subr.bf16.mxu1 %v19424_v42 }
 0xf4c   :  { %12729 = vmatpush1.bf16.msra.mxu0 %v19425_v30  ;;  %12761 = vmatpush1.bf16.msra.mxu1 %v19426_v52 }
 0xf4d   :  { %12731 = vmatprep.subr.bf16.mxu0 %v19427_v46  ;;  %12763 = vmatprep.subr.bf16.mxu1 %v19428_v37 }
 0xf50   :  { %12733 = vmatpush1.bf16.msra.mxu0 %v19429_v57  ;;  %12765 = vmatpush1.bf16.msra.mxu1 %v19430_v53 }
 0xf51   :  { %12735 = vmatprep.subr.bf16.mxu0 %v19431_v11  ;;  %12767 = vmatprep.subr.bf16.mxu1 %v19432_v10 }
 0xf54   :  { %12737 = vmatpush1.bf16.msra.mxu0 %v19433_v5  ;;  %12769 = vmatpush1.bf16.msra.mxu1 %v19434_v34 }
 0xf55   :  { %12739 = vmatprep.subr.bf16.mxu0 %v16662_v44  ;;  %12771 = vmatprep.subr.bf16.mxu1 %v16664_v24 }
 0xf58   :  { %12741 = vmatpush1.bf16.msra.mxu0 %v16668_v6  ;;  %12773 = vmatpush1.bf16.msra.mxu1 %v16670_v14 }
 0xf59   :  { %12743 = vmatprep.subr.bf16.mxu0 %v16674_v23  ;;  %12775 = vmatprep.subr.bf16.mxu1 %v19441_v39 }
 0xf5c   :  { %12745 = vmatpush1.bf16.msra.mxu0 %v16680_v31  ;;  %12777 = vmatpush1.bf16.msra.mxu1 %v16682_v35 }
 0xf5d   :  { %12747 = vmatprep.subr.bf16.mxu0 %v16686_v18  ;;  %12779 = vmatprep.subr.bf16.mxu1 %v16688_v22 }
 0xf60   :  { %12749 = vmatpush1.bf16.msra.mxu0 %v16692_v58  ;;  %12781 = vmatpush1.bf16.msra.mxu1 %v16694_v56 }
 0xf61   :  { %12783 = vmatprep.subr.bf16.mxu0 %v16497_v41  ;;  %12815 = vmatprep.subr.bf16.mxu1 %v16499_v47  ;;  %v19529_v41 = vld [vmem:[#allocation29_spill] sm:$0xff]  ;;  %v19530_v47 = vld [vmem:[#allocation30_spill] sm:$0xff] }
 0xf63   :  { %4966 = vmatmul.mubr.f32.vlgmr.msra.gmra.mrb[28].mxu0 %v10781_v17  ;;  %5037 = vmatmul.mubr.f32.vlgmr.msra.gmra.mrb[28].mxu1 %v10781_v17 }
 0xf64   :  { %12785 = vmatpush1.bf16.msra.mxu0 %v16506_v3  ;;  %12817 = vmatpush1.bf16.msra.mxu1 %v16508_v15  ;;  %v19531_v3 = vld [vmem:[#allocation31_spill] sm:$0xff]  ;;  %v19532_v15 = vld [vmem:[#allocation32_spill] sm:$0xff] }
 0xf65   :  { %12787 = vmatprep.subr.bf16.mxu0 %v16512_v32  ;;  %12819 = vmatprep.subr.bf16.mxu1 %v16514_v29  ;;  %v19533_v32 = vld [vmem:[#allocation33_spill] sm:$0xff]  ;;  %v19534_v29 = vld [vmem:[#allocation34_spill] sm:$0xff] }
 0xf66   :  { %5137 = vmatprep.mubr.f32.mxu0 %v19235_v45  ;;  %5208 = vmatprep.mubr.f32.mxu1 %v19235_v45 }
 0xf68   :  { %12789 = vmatpush1.bf16.msra.mxu0 %v16518_v43  ;;  %12821 = vmatpush1.bf16.msra.mxu1 %v16520_v54  ;;  %v19535_v43 = vld [vmem:[#allocation35_spill] sm:$0xff]  ;;  %v19536_v54 = vld [vmem:[#allocation36_spill] sm:$0xff] }
 0xf69   :  { %12791 = vmatprep.subr.bf16.mxu0 %v16524_v25  ;;  %12823 = vmatprep.subr.bf16.mxu1 %v16526_v63  ;;  %v19537_v25 = vld [vmem:[#allocation37_spill] sm:$0xff]  ;;  %v19538_v63 = vld [vmem:[#allocation38_spill] sm:$0xff] }
 0xf6c   :  { %12793 = vmatpush1.bf16.msra.mxu0 %v16532_v20  ;;  %12825 = vmatpush1.bf16.msra.mxu1 %v16534_v4  ;;  %v19539_v20 = vld [vmem:[#allocation42_spill] sm:$0xff]  ;;  %v19540_v4 = vld [vmem:[#allocation44_spill] sm:$0xff] }
 0xf6d   :  { %12795 = vmatprep.subr.bf16.mxu0 %v16538_v13  ;;  %12827 = vmatprep.subr.bf16.mxu1 %v19529_v41  ;;  %v19541_v13 = vld [vmem:[#allocation8_spill] sm:$0xff] }
 0xf70   :  { %12797 = vmatpush1.bf16.msra.mxu0 %v19530_v47  ;;  %12829 = vmatpush1.bf16.msra.mxu1 %v19531_v3 }
 0xf71   :  { %12799 = vmatprep.subr.bf16.mxu0 %v19532_v15  ;;  %12831 = vmatprep.subr.bf16.mxu1 %v19533_v32 }
 0xf74   :  { %12801 = vmatpush1.bf16.msra.mxu0 %v19534_v29  ;;  %12833 = vmatpush1.bf16.msra.mxu1 %v19535_v43 }
 0xf75   :  { %12803 = vmatprep.subr.bf16.mxu0 %v19536_v54  ;;  %12835 = vmatprep.subr.bf16.mxu1 %v19537_v25 }
 0xf78   :  { %12805 = vmatpush1.bf16.msra.mxu0 %v19538_v63  ;;  %12837 = vmatpush1.bf16.msra.mxu1 %v19539_v20 }
 0xf79   :  { %12807 = vmatprep.subr.bf16.mxu0 %v19540_v4  ;;  %12839 = vmatprep.subr.bf16.mxu1 %v19541_v13 }
 0xf7c   :  { %12809 = vmatpush1.bf16.msra.mxu0 %v19542_v59  ;;  %12841 = vmatpush1.bf16.msra.mxu1 %v19543_v62 }
 0xf7d   :  { %12811 = vmatprep.subr.bf16.mxu0 %v19544_v28  ;;  %12843 = vmatprep.subr.bf16.mxu1 %v19545_v21 }
 0xf80   :  { %12813 = vmatpush1.bf16.msra.mxu0 %v19546_v61  ;;  %12845 = vmatpush1.bf16.msra.mxu1 %v19547_v33 }
 0xf81   :  { %12847 = vmatprep.subr.bf16.mxu0 %v19548_v9  ;;  %12879 = vmatprep.subr.bf16.mxu1 %v19549_v38 }
0x1036   :  { %v4967_v8 = vpop.f32.mrb[28].mxu0  ;;  %v5038_v48 = vpop.f32.mrb[28].mxu1 }
0x1037   :  { %v5043_v40 = vadd.f32 %v4967_v8, %v19550_v49  ;;  %v4969_v19 = vpop.f32.mrb[29].mxu0  ;;  %v5040_v0 = vpop.f32.mrb[29].mxu1  ;;  %v5045_v47 = vadd.f32 %v5038_v48, %v16759_v51  ;;  %v5470_v8 = vld [vmem:[#allocation4 + $0x490] sm:$0xff] }
0x1038   :  { %v5044_v16 = vadd.f32 %v4969_v19, %v19440_v7  ;;  %v5046_v3 = vadd.f32 %v5040_v0, %v16762_v36  ;;  %v5474_v48 = vld [vmem:[#allocation4 + $0x4b0] sm:$0xff]  ;;  %v5481_v19 = vld [vmem:[#allocation4 + $0x4e8] sm:$0xff]  ;;  %v5479_v0 = vld [vmem:[#allocation4 + $0x4d8] sm:$0xff] }
0x1039   :  { %v10782_v17 = vmul.f32 -1.442695, %v5043_v40  ;;  %v10784_v15 = vmul.f32 -1.442695, %v5045_v47  ;;  %v5477_v40 = vld [vmem:[#allocation4 + $0x4c8] sm:$0xff]  ;;  %v5476_v47 = vld [vmem:[#allocation4 + $0x4c0] sm:$0xff] }
0x103a   :  { %v10783_v41 = vmul.f32 -1.442695, %v5044_v16  ;;  %v5483_v16 = vld [vmem:[#allocation4 + $0x4f8] sm:$0xff] }
0x103b   :  { %15315 = vpow2.f32 %v10782_v17 }
0x103c   :  { %15317 = vpow2.f32 %v10783_v41  ;;  %v17310_v41 = vpack.c.bf16 %v5474_v48, %v5470_v8  ;;  %v5502_v48 = vld [vmem:[#allocation4 + $0x590] sm:$0xff] }
0x103d   :  { %15319 = vtanh.f32 %v5046_v3  ;;  %v5480_v3 = vld [vmem:[#allocation4 + $0x4e0] sm:$0xff] }
0x103e   :  { %15321 = vpow2.f32 %v10784_v15  ;;  %v17314_v15 = vpack.c.bf16 %v5481_v19, %v5477_v40  ;;  %v5506_v40 = vld [vmem:[#allocation4 + $0x5b0] sm:$0xff] }
0x103f   :  { %v17359_v19 = vpack.c.bf16 %v5506_v40, %v5502_v48  ;;  %v5402_v48 = vld [vmem:[#allocation2 + $0x478] sm:$0xff]  ;;  %v5395_v40 = vld [vmem:[#allocation2 + $0x440] sm:$0xff] }
0x1040   :  { %19553 = vst [vmem:[#allocation19_spill] sm:$0xff] %v17314_v15 }
0x1041   :  { %19568 = vst [vmem:[#allocation49_spill] sm:$0xff] %v17359_v19 }
0x1045   :  { %v15316_v32 = vpop.eup %15315 }
0x1046   :  { %v5056_v29 = vadd.f32 1.0, %v15316_v32  ;;  %v15318_v43 = vpop.eup %15317  ;;  %v17316_v32 = vpack.c.bf16 %v5483_v16, %v5479_v0  ;;  %v5509_v0 = vld [vmem:[#allocation4 + $0x5c8] sm:$0xff] }
0x1047   :  { %v5057_v54 = vadd.f32 1.0, %v15318_v43  ;;  %v15320_v25 = vpop.eup %15319  ;;  %v5482_v43 = vld [vmem:[#allocation4 + $0x4f0] sm:$0xff]  ;;  %v5513_v16 = vld [vmem:[#allocation4 + $0x5e8] sm:$0xff] }
0x1048   :  { %15323 = vrcp.f32 %v5056_v29  ;;  %v15322_v63 = vpop.eup %15321  ;;  %19554 = vst [vmem:[#allocation20_spill] sm:$0xff] %v17316_v32  ;;  %v5478_v29 = vld [vmem:[#allocation4 + $0x4d0] sm:$0xff] }
0x1049   :  { %15325 = vrcp.f32 %v5057_v54  ;;  %v5058_v59 = vadd.f32 1.0, %v15322_v63  ;;  %v5485_v54 = vld [vmem:[#allocation4 + $0x508] sm:$0xff]  ;;  %v5487_v63 = vld [vmem:[#allocation4 + $0x518] sm:$0xff] }
0x104b   :  { %15327 = vrcp.f32 %v5058_v59 }
0x1052   :  { %v15324_v20 = vpop.eup %15323 }
0x1053   :  { %v5067_v4 = vmul.f32 %v15324_v20, %v15320_v25  ;;  %v15326_v13 = vpop.eup %15325  ;;  %v5489_v25 = vld [vmem:[#allocation4 + $0x528] sm:$0xff]  ;;  %v5491_v20 = vld [vmem:[#allocation4 + $0x538] sm:$0xff] }
0x1054   :  { %v5066_v62 = vmul.f32 %v15326_v13, %v17161_v26  ;;  %v5472_v26 = vld [vmem:[#allocation4 + $0x4a0] sm:$0xff]  ;;  %v17322_v13 = vpack.c.bf16 %v5482_v43, %v5478_v29  ;;  %v17326_v59 = vpack.c.bf16 %v5489_v25, %v5485_v54  ;;  %v5515_v29 = vld [vmem:[#allocation4 + $0x5f8] sm:$0xff] }
0x1055   :  { %v15328_v21 = vpop.eup %15327  ;;  %v5508_v43 = vld [vmem:[#allocation4 + $0x5c0] sm:$0xff] }
0x1056   :  { %v17240_v28 = vadd.f32 %v5067_v4, %v5066_v62  ;;  %v17320_v4 = vpack.c.bf16 %v5480_v3, %v5476_v47  ;;  %19556 = vst [vmem:[#allocation22_spill] sm:$0xff] %v17322_v13  ;;  %19557 = vst [vmem:[#allocation23_spill] sm:$0xff] %v17326_v59  ;;  %v17328_v62 = vpack.c.bf16 %v5491_v20, %v5487_v63  ;;  %v5511_v47 = vld [vmem:[#allocation4 + $0x5d8] sm:$0xff]  ;;  %v5512_v54 = vld [vmem:[#allocation4 + $0x5e0] sm:$0xff] }
0x1057   :  { %v17364_v3 = vpack.c.bf16 %v5513_v16, %v5509_v0  ;;  %v17366_v25 = vpack.c.bf16 %v5515_v29, %v5511_v47  ;;  %v17368_v63 = vpack.c.bf16 %v5512_v54, %v5508_v43  ;;  %v5510_v20 = vld [vmem:[#allocation4 + $0x5d0] sm:$0xff]  ;;  %v5399_v0 = vld [vmem:[#allocation2 + $0x460] sm:$0xff] }
0x1058   :  { %15329 = vtanh.f32 %v17240_v28  ;;  %19555 = vst [vmem:[#allocation21_spill] sm:$0xff] %v17320_v4  ;;  %19558 = vst [vmem:[#allocation24_spill] sm:$0xff] %v17328_v62  ;;  %v17394_v47 = vpack.c.bf16 %v5399_v0, %v5395_v40  ;;  %v5397_v29 = vld [vmem:[#allocation2 + $0x450] sm:$0xff]  ;;  %v5414_v40 = vld [vmem:[#allocation2 + $0x4d8] sm:$0xff] }
0x1059   :  { %19569 = vst [vmem:[#allocation29_spill] sm:$0xff] %v17364_v3  ;;  %19570 = vst [vmem:[#allocation30_spill] sm:$0xff] %v17366_v25  ;;  %v5401_v43 = vld [vmem:[#allocation2 + $0x470] sm:$0xff] }
0x105a   :  { %19571 = vst [vmem:[#allocation31_spill] sm:$0xff] %v17368_v63  ;;  %v17399_v54 = vpack.c.bf16 %v5401_v43, %v5397_v29  ;;  %v5418_v29 = vld [vmem:[#allocation2 + $0x4f8] sm:$0xff]  ;;  %v5411_v43 = vld [vmem:[#allocation2 + $0x4c0] sm:$0xff] }
0x1062   :  { %v15330_v61 = vpop.eup %15329 }
0x1063   :  { %v5070_v33 = vmul.f32 %v15330_v61, %v15328_v21  ;;  %v5484_v21 = vld [vmem:[#allocation4 + $0x500] sm:$0xff] }
0x1064   :  { %v5488_v61 = vld [vmem:[#allocation4 + $0x520] sm:$0xff] }
0x1065   :  { %5138 = vmatmul.mubr.f32.vlgmr.msra.gmra.mrb[30].mxu0 %v5070_v33  ;;  %5209 = vmatmul.mubr.f32.vlgmr.msra.gmra.mrb[30].mxu1 %v5070_v33  ;;  %v5486_v33 = vld [vmem:[#allocation4 + $0x510] sm:$0xff] }
0x1066   :  { %12849 = vmatpush1.bf16.msra.mxu0 %v16604_v55  ;;  %12881 = vmatpush1.bf16.msra.mxu1 %v16606_v60  ;;  %v5453_v55 = vld [vmem:[#allocation4 + $0x408] sm:$0xff] }
0x1067   :  { %12851 = vmatprep.subr.bf16.mxu0 %v19419_v12  ;;  %12883 = vmatprep.subr.bf16.mxu1 %v19420_v27  ;;  %v5457_v60 = vld [vmem:[#allocation4 + $0x428] sm:$0xff]  ;;  %v5455_v12 = vld [vmem:[#allocation4 + $0x418] sm:$0xff] }
0x1068   :  { %5279 = vmatprep.mubr.f32.mxu0 %v19235_v45  ;;  %5350 = vmatprep.mubr.f32.mxu1 %v19235_v45  ;;  %v5459_v27 = vld [vmem:[#allocation4 + $0x438] sm:$0xff] }
0x106a   :  { %12853 = vmatpush1.bf16.msra.mxu0 %v19421_v1  ;;  %12885 = vmatpush1.bf16.msra.mxu1 %v19422_v50  ;;  %v5452_v1 = vld [vmem:[#allocation4 + $0x400] sm:$0xff]  ;;  %v5461_v50 = vld [vmem:[#allocation4 + $0x448] sm:$0xff] }
0x106b   :  { %12855 = vmatprep.subr.bf16.mxu0 %v19423_v2  ;;  %12887 = vmatprep.subr.bf16.mxu1 %v19424_v42  ;;  %v5465_v2 = vld [vmem:[#allocation4 + $0x468] sm:$0xff]  ;;  %v5463_v42 = vld [vmem:[#allocation4 + $0x458] sm:$0xff] }
0x106e   :  { %12857 = vmatpush1.bf16.msra.mxu0 %v19425_v30  ;;  %12889 = vmatpush1.bf16.msra.mxu1 %v19426_v52  ;;  %v5467_v30 = vld [vmem:[#allocation4 + $0x478] sm:$0xff]  ;;  %v5464_v52 = vld [vmem:[#allocation4 + $0x460] sm:$0xff] }
0x106f   :  { %12859 = vmatprep.subr.bf16.mxu0 %v19427_v46  ;;  %12891 = vmatprep.subr.bf16.mxu1 %v19428_v37  ;;  %v17288_v46 = vpack.c.bf16 %v5465_v2, %v5461_v50  ;;  %v17290_v37 = vpack.c.bf16 %v5467_v30, %v5463_v42  ;;  %v5492_v50 = vld [vmem:[#allocation4 + $0x540] sm:$0xff] }
0x1070   :  { %v5496_v2 = vld [vmem:[#allocation4 + $0x560] sm:$0xff] }
0x1071   :  { %v17344_v30 = vpack.c.bf16 %v5496_v2, %v5492_v50  ;;  %v5391_v50 = vld [vmem:[#allocation2 + $0x420] sm:$0xff] }
0x1072   :  { %12861 = vmatpush1.bf16.msra.mxu0 %v19429_v57  ;;  %12893 = vmatpush1.bf16.msra.mxu1 %v19430_v53  ;;  %v5469_v57 = vld [vmem:[#allocation4 + $0x488] sm:$0xff] }
0x1073   :  { %12863 = vmatprep.subr.bf16.mxu0 %v19431_v11  ;;  %12895 = vmatprep.subr.bf16.mxu1 %v19432_v10  ;;  %v5473_v53 = vld [vmem:[#allocation4 + $0x4a8] sm:$0xff]  ;;  %v5471_v11 = vld [vmem:[#allocation4 + $0x498] sm:$0xff]  ;;  %19563 = vst [vmem:[#allocation41_spill] sm:$0xff] %v17344_v30 }
0x1074   :  { %v5475_v10 = vld [vmem:[#allocation4 + $0x4b8] sm:$0xff]  ;;  %v17300_v9 = vpack.c.bf16 %v5473_v53, %v5469_v57 }
0x1075   :  { %v17302_v38 = vpack.c.bf16 %v5475_v10, %v5471_v11  ;;  %v5503_v57 = vld [vmem:[#allocation4 + $0x598] sm:$0xff]  ;;  %v5500_v10 = vld [vmem:[#allocation4 + $0x580] sm:$0xff] }
0x1076   :  { %12865 = vmatpush1.bf16.msra.mxu0 %v19433_v5  ;;  %12897 = vmatpush1.bf16.msra.mxu1 %v19434_v34  ;;  %v5507_v11 = vld [vmem:[#allocation4 + $0x5b8] sm:$0xff] }
0x1077   :  { %12867 = vmatprep.subr.bf16.mxu0 %v16662_v44  ;;  %12899 = vmatprep.subr.bf16.mxu1 %v16664_v24  ;;  %v5456_v44 = vld [vmem:[#allocation4 + $0x420] sm:$0xff]  ;;  %v17273_v24 = vpack.c.bf16 %v5457_v60, %v5453_v55  ;;  %v17334_v55 = vpack.c.bf16 %v5488_v61, %v5484_v21  ;;  %v5490_v60 = vld [vmem:[#allocation4 + $0x530] sm:$0xff] }
0x1078   :  { %v5514_v21 = vld [vmem:[#allocation4 + $0x5f0] sm:$0xff] }
0x1079   :  { %19551 = vst [vmem:[#allocation17_spill] sm:$0xff] %v17273_v24  ;;  %19559 = vst [vmem:[#allocation25_spill] sm:$0xff] %v17334_v55  ;;  %v17371_v61 = vpack.c.bf16 %v5514_v21, %v5510_v20  ;;  %v5404_v20 = vld [vmem:[#allocation2 + $0x488] sm:$0xff] }
0x107a   :  { %12869 = vmatpush1.bf16.msra.mxu0 %v16668_v6  ;;  %12901 = vmatpush1.bf16.msra.mxu1 %v16670_v14  ;;  %v17275_v6 = vpack.c.bf16 %v5459_v27, %v5455_v12  ;;  %v5454_v14 = vld [vmem:[#allocation4 + $0x410] sm:$0xff]  ;;  %v17336_v12 = vpack.c.bf16 %v5490_v60, %v5486_v33  ;;  %v5493_v27 = vld [vmem:[#allocation4 + $0x548] sm:$0xff] }
0x107b   :  { %12871 = vmatprep.subr.bf16.mxu0 %v16674_v23  ;;  %12903 = vmatprep.subr.bf16.mxu1 %v19441_v39  ;;  %v5458_v23 = vld [vmem:[#allocation4 + $0x430] sm:$0xff]  ;;  %v5468_v39 = vld [vmem:[#allocation4 + $0x480] sm:$0xff]  ;;  %19572 = vst [vmem:[#allocation32_spill] sm:$0xff] %v17371_v61  ;;  %v5388_v33 = vld [vmem:[#allocation2 + $0x408] sm:$0xff] }
0x107c   :  { %19552 = vst [vmem:[#allocation18_spill] sm:$0xff] %v17275_v6  ;;  %v17308_v17 = vpack.c.bf16 %v5472_v26, %v5468_v39  ;;  %19560 = vst [vmem:[#allocation26_spill] sm:$0xff] %v17336_v12  ;;  %v5504_v39 = vld [vmem:[#allocation4 + $0x5a0] sm:$0xff]  ;;  %v17354_v26 = vpack.c.bf16 %v5507_v11, %v5503_v57  ;;  %v5392_v60 = vld [vmem:[#allocation2 + $0x428] sm:$0xff] }
0x107d   :  { %v17356_v8 = vpack.c.bf16 %v5504_v39, %v5500_v10  ;;  %v5396_v57 = vld [vmem:[#allocation2 + $0x448] sm:$0xff]  ;;  %v5398_v10 = vld [vmem:[#allocation2 + $0x458] sm:$0xff] }
0x107e   :  { %12873 = vmatpush1.bf16.msra.mxu0 %v16680_v31  ;;  %12905 = vmatpush1.bf16.msra.mxu1 %v16682_v35  ;;  %v10786_v31 = vld [vmem:[%s18875_s4 + $0x38] sm:$0xff]  ;;  %v17282_v35 = vpack.c.bf16 %v5456_v44, %v5452_v1  ;;  %v5497_v1 = vld [vmem:[#allocation4 + $0x568] sm:$0xff]  ;;  %19566 = vst [vmem:[#allocation48_spill] sm:$0xff] %v17354_v26  ;;  %v17392_v16 = vpack.c.bf16 %v5402_v48, %v5398_v10 }
0x107f   :  { %12875 = vmatprep.subr.bf16.mxu0 %v16686_v18  ;;  %12907 = vmatprep.subr.bf16.mxu1 %v16688_v22  ;;  %v17284_v18 = vpack.c.bf16 %v5458_v23, %v5454_v14  ;;  %v5460_v22 = vld [vmem:[#allocation4 + $0x440] sm:$0xff]  ;;  %v5495_v44 = vld [vmem:[#allocation4 + $0x558] sm:$0xff]  ;;  %v17340_v14 = vpack.c.bf16 %v5497_v1, %v5493_v27  ;;  %19567 = vst [vmem:[#allocation51_spill] sm:$0xff] %v17356_v8  ;;  %v5400_v11 = vld [vmem:[#allocation2 + $0x468] sm:$0xff] }
0x1080   :  { %v17294_v5 = vpack.c.bf16 %v5464_v52, %v5460_v22  ;;  %v5499_v23 = vld [vmem:[#allocation4 + $0x578] sm:$0xff]  ;;  %v5498_v22 = vld [vmem:[#allocation4 + $0x570] sm:$0xff]  ;;  %v17376_v1 = vpack.c.bf16 %v5392_v60, %v5388_v33  ;;  %v17390_v39 = vpack.c.bf16 %v5400_v11, %v5396_v57  ;;  %v5408_v21 = vld [vmem:[#allocation2 + $0x4a8] sm:$0xff] }
0x1081   :  { %19561 = vst [vmem:[#allocation27_spill] sm:$0xff] %v17340_v14  ;;  %v17342_v42 = vpack.c.bf16 %v5499_v23, %v5495_v44  ;;  %v5390_v27 = vld [vmem:[#allocation2 + $0x418] sm:$0xff]  ;;  %v5387_v23 = vld [vmem:[#allocation2 + $0x400] sm:$0xff]  ;;  %v17404_v60 = vpack.c.bf16 %v5408_v21, %v5404_v20  ;;  %v5409_v57 = vld [vmem:[#allocation2 + $0x4b0] sm:$0xff]  ;;  %v17418_v21 = vpack.c.bf16 %v5418_v29, %v5414_v40 }
0x1082   :  { %12877 = vmatpush1.bf16.msra.mxu0 %v16692_v58  ;;  %12909 = vmatpush1.bf16.msra.mxu1 %v16694_v56  ;;  %v5462_v58 = vld [vmem:[#allocation4 + $0x450] sm:$0xff]  ;;  %19573 = vst [vmem:[#allocation33_spill] sm:$0xff] %v17376_v1  ;;  %v5394_v44 = vld [vmem:[#allocation2 + $0x438] sm:$0xff]  ;;  %v5412_v10 = vld [vmem:[#allocation2 + $0x4c8] sm:$0xff] }
0x1083   :  { %12911 = vmatprep.subr.bf16.mxu0 %v17273_v24  ;;  %12943 = vmatprep.subr.bf16.mxu1 %v17275_v6  ;;  %v5466_v56 = vld [vmem:[#allocation4 + $0x470] sm:$0xff]  ;;  %19562 = vst [vmem:[#allocation28_spill] sm:$0xff] %v17342_v42  ;;  %v17378_v2 = vpack.c.bf16 %v5394_v44, %v5390_v27  ;;  %v5406_v33 = vld [vmem:[#allocation2 + $0x498] sm:$0xff]  ;;  %v5403_v44 = vld [vmem:[#allocation2 + $0x480] sm:$0xff] }
0x1084   :  { %v17296_v34 = vpack.c.bf16 %v5466_v56, %v5462_v58  ;;  %v5501_v58 = vld [vmem:[#allocation4 + $0x588] sm:$0xff]  ;;  %v5410_v27 = vld [vmem:[#allocation2 + $0x4b8] sm:$0xff]  ;;  %v5415_v20 = vld [vmem:[#allocation2 + $0x4e0] sm:$0xff]  ;;  %19577 = vst [vmem:[#allocation37_spill] sm:$0xff] %v17418_v21 }
0x1085   :  { %5280 = vmatmul.mubr.f32.vlgmr.msra.gmra.mrb[30].mxu0 %v10786_v31  ;;  %5351 = vmatmul.mubr.f32.vlgmr.msra.gmra.mrb[30].mxu1 %v10786_v31  ;;  %v5494_v31 = vld [vmem:[#allocation4 + $0x550] sm:$0xff]  ;;  %v5505_v56 = vld [vmem:[#allocation4 + $0x5a8] sm:$0xff]  ;;  %19574 = vst [vmem:[#allocation34_spill] sm:$0xff] %v17378_v2  ;;  %v5419_v40 = vld [vmem:[#allocation2 + $0x500] sm:$0xff] }
0x1086   :  { %12913 = vmatpush1.bf16.msra.mxu0 %v17282_v35  ;;  %12945 = vmatpush1.bf16.msra.mxu1 %v17284_v18  ;;  %v17347_v52 = vpack.c.bf16 %v5498_v22, %v5494_v31  ;;  %v17352_v53 = vpack.c.bf16 %v5505_v56, %v5501_v58  ;;  %v17380_v31 = vpack.c.bf16 %v5391_v50, %v5387_v23  ;;  %v5389_v22 = vld [vmem:[#allocation2 + $0x410] sm:$0xff]  ;;  %v5407_v23 = vld [vmem:[#allocation2 + $0x4a0] sm:$0xff]  ;;  %v5416_v48 = vld [vmem:[#allocation2 + $0x4e8] sm:$0xff] }
0x1087   :  { %12915 = vmatprep.subr.bf16.mxu0 %v17288_v46  ;;  %12947 = vmatprep.subr.bf16.mxu1 %v17290_v37  ;;  %v5393_v58 = vld [vmem:[#allocation2 + $0x430] sm:$0xff]  ;;  %v17406_v50 = vpack.c.bf16 %v5410_v27, %v5406_v33  ;;  %v17416_v0 = vpack.c.bf16 %v5416_v48, %v5412_v10  ;;  %v17420_v33 = vpack.c.bf16 %v5415_v20, %v5411_v43  ;;  %v5426_v48 = vld [vmem:[#allocation2 + $0x538] sm:$0xff]  ;;  %v5423_v29 = vld [vmem:[#allocation2 + $0x520] sm:$0xff] }
0x1088   :  { %5582 = vmatprep.mubr.f32.mxu0 %v19235_v45  ;;  %5653 = vmatprep.mubr.f32.mxu1 %v19235_v45  ;;  %19564 = vst [vmem:[#allocation46_spill] sm:$0xff] %v17347_v52  ;;  %19565 = vst [vmem:[#allocation47_spill] sm:$0xff] %v17352_v53  ;;  %v17384_v56 = vpack.c.bf16 %v5393_v58, %v5389_v22  ;;  %v17408_v22 = vpack.c.bf16 %v5407_v23, %v5403_v44  ;;  %v5405_v58 = vld [vmem:[#allocation2 + $0x490] sm:$0xff] }
0x1089   :  { %v17411_v11 = vpack.c.bf16 %v5409_v57, %v5405_v58  ;;  %19576 = vst [vmem:[#allocation36_spill] sm:$0xff] %v17416_v0  ;;  %19578 = vst [vmem:[#allocation38_spill] sm:$0xff] %v17420_v33  ;;  %v5413_v27 = vld [vmem:[#allocation2 + $0x4d0] sm:$0xff]  ;;  %v5420_v58 = vld [vmem:[#allocation2 + $0x508] sm:$0xff]  ;;  %v17432_v20 = vpack.c.bf16 %v5423_v29, %v5419_v40 }
0x108a   :  { %12917 = vmatpush1.bf16.msra.mxu0 %v17294_v5  ;;  %12949 = vmatpush1.bf16.msra.mxu1 %v17296_v34  ;;  %v5417_v44 = vld [vmem:[#allocation2 + $0x4f0] sm:$0xff]  ;;  %v5424_v57 = vld [vmem:[#allocation2 + $0x528] sm:$0xff] }
0x108b   :  { %12919 = vmatprep.subr.bf16.mxu0 %v17300_v9  ;;  %12951 = vmatprep.subr.bf16.mxu1 %v17302_v38  ;;  %19575 = vst [vmem:[#allocation35_spill] sm:$0xff] %v17411_v11  ;;  %v17423_v23 = vpack.c.bf16 %v5417_v44, %v5413_v27  ;;  %v17428_v10 = vpack.c.bf16 %v5424_v57, %v5420_v58  ;;  %19582 = vst [vmem:[#allocation9_spill] sm:$0xff] %v17432_v20  ;;  %v5421_v27 = vld [vmem:[#allocation2 + $0x510] sm:$0xff]  ;;  %v5427_v57 = vld [vmem:[#allocation2 + $0x540] sm:$0xff] }
0x108c   :  { %v5425_v44 = vld [vmem:[#allocation2 + $0x530] sm:$0xff] }
0x108d   :  { %19579 = vst [vmem:[#allocation42_spill] sm:$0xff] %v17423_v23  ;;  %19580 = vst [vmem:[#allocation44_spill] sm:$0xff] %v17428_v10 }
0x108e   :  { %12921 = vmatpush1.bf16.msra.mxu0 %v17308_v17  ;;  %12953 = vmatpush1.bf16.msra.mxu1 %v17310_v41 }
0x108f   :  { %12923 = vmatprep.subr.bf16.mxu0 %v17314_v15  ;;  %12955 = vmatprep.subr.bf16.mxu1 %v17316_v32 }
0x1092   :  { %12925 = vmatpush1.bf16.msra.mxu0 %v17320_v4  ;;  %12957 = vmatpush1.bf16.msra.mxu1 %v17322_v13 }
0x1093   :  { %12927 = vmatprep.subr.bf16.mxu0 %v17326_v59  ;;  %12959 = vmatprep.subr.bf16.mxu1 %v17328_v62 }
0x1096   :  { %12929 = vmatpush1.bf16.msra.mxu0 %v17334_v55  ;;  %12961 = vmatpush1.bf16.msra.mxu1 %v17336_v12 }
0x1097   :  { %12931 = vmatprep.subr.bf16.mxu0 %v17340_v14  ;;  %12963 = vmatprep.subr.bf16.mxu1 %v17342_v42 }
0x109a   :  { %12933 = vmatpush1.bf16.msra.mxu0 %v17344_v30  ;;  %12965 = vmatpush1.bf16.msra.mxu1 %v17347_v52 }
0x109b   :  { %12935 = vmatprep.subr.bf16.mxu0 %v17352_v53  ;;  %12967 = vmatprep.subr.bf16.mxu1 %v17354_v26 }
0x109e   :  { %12937 = vmatpush1.bf16.msra.mxu0 %v17356_v8  ;;  %12969 = vmatpush1.bf16.msra.mxu1 %v17359_v19 }
0x109f   :  { %12939 = vmatprep.subr.bf16.mxu0 %v17364_v3  ;;  %12971 = vmatprep.subr.bf16.mxu1 %v17366_v25 }
0x10a2   :  { %12941 = vmatpush1.bf16.msra.mxu0 %v17368_v63  ;;  %12973 = vmatpush1.bf16.msra.mxu1 %v17371_v61 }
0x10a3   :  { %12975 = vmatprep.subr.bf16.mxu0 %v17376_v1  ;;  %13007 = vmatprep.subr.bf16.mxu1 %v17378_v2 }
0x10a5   :  { %5583 = vmatmul.mubr.f32.vlgmr.msra.gmra.mrb[32].mxu0 %v19235_v45  ;;  %5654 = vmatmul.mubr.f32.vlgmr.msra.gmra.mrb[32].mxu1 %v19235_v45 }
0x10a6   :  { %12977 = vmatpush1.bf16.msra.mxu0 %v17380_v31  ;;  %13009 = vmatpush1.bf16.msra.mxu1 %v17384_v56 }
0x10a7   :  { %5724 = vmatprep.mubr.f32.mxu0 %v19235_v45  ;;  %5795 = vmatprep.mubr.f32.mxu1 %v19235_v45 }
0x10a8   :  { %12979 = vmatprep.subr.bf16.mxu0 %v17390_v39  ;;  %13011 = vmatprep.subr.bf16.mxu1 %v17392_v16 }
0x10aa   :  { %12981 = vmatpush1.bf16.msra.mxu0 %v17394_v47  ;;  %13013 = vmatpush1.bf16.msra.mxu1 %v17399_v54 }
0x10ab   :  { %12983 = vmatprep.subr.bf16.mxu0 %v17404_v60  ;;  %13015 = vmatprep.subr.bf16.mxu1 %v17406_v50 }
0x10ae   :  { %12985 = vmatpush1.bf16.msra.mxu0 %v17408_v22  ;;  %13017 = vmatpush1.bf16.msra.mxu1 %v17411_v11  ;;  %v5422_v11 = vld [vmem:[#allocation2 + $0x518] sm:$0xff] }
0x10af   :  { %12987 = vmatprep.subr.bf16.mxu0 %v17416_v0  ;;  %13019 = vmatprep.subr.bf16.mxu1 %v17418_v21  ;;  %v17430_v43 = vpack.c.bf16 %v5426_v48, %v5422_v11  ;;  %v17435_v21 = vpack.c.bf16 %v5425_v44, %v5421_v27  ;;  %v5432_v0 = vld [vmem:[#allocation2 + $0x568] sm:$0xff]  ;;  %v5434_v11 = vld [vmem:[#allocation2 + $0x578] sm:$0xff]  ;;  %v5431_v48 = vld [vmem:[#allocation2 + $0x560] sm:$0xff] }
0x10b0   :  { %v17444_v29 = vpack.c.bf16 %v5431_v48, %v5427_v57  ;;  %v5429_v27 = vld [vmem:[#allocation2 + $0x550] sm:$0xff] }
0x10b1   :  { %19581 = vst [vmem:[#allocation8_spill] sm:$0xff] %v17430_v43  ;;  %19583 = vst [vmem:[#allocation10_spill] sm:$0xff] %v17435_v21  ;;  %v5433_v44 = vld [vmem:[#allocation2 + $0x570] sm:$0xff] }
0x10b2   :  { %12989 = vmatpush1.bf16.msra.mxu0 %v17420_v33  ;;  %13021 = vmatpush1.bf16.msra.mxu1 %v17423_v23  ;;  %v5428_v33 = vld [vmem:[#allocation2 + $0x548] sm:$0xff]  ;;  %v5430_v23 = vld [vmem:[#allocation2 + $0x558] sm:$0xff]  ;;  %19586 = vst [vmem:[#allocation13_spill] sm:$0xff] %v17444_v29 }
0x10b3   :  { %12991 = vmatprep.subr.bf16.mxu0 %v17428_v10  ;;  %13023 = vmatprep.subr.bf16.mxu1 %v17430_v43  ;;  %v17440_v58 = vpack.c.bf16 %v5432_v0, %v5428_v33  ;;  %v17442_v40 = vpack.c.bf16 %v5434_v11, %v5430_v23  ;;  %v17447_v43 = vpack.c.bf16 %v5433_v44, %v5429_v27  ;;  %v5440_v10 = vld [vmem:[#allocation2 + $0x5a8] sm:$0xff]  ;;  %v5442_v33 = vld [vmem:[#allocation2 + $0x5b8] sm:$0xff]  ;;  %v5435_v23 = vld [vmem:[#allocation2 + $0x580] sm:$0xff] }
0x10b4   :  { %v5439_v11 = vld [vmem:[#allocation2 + $0x5a0] sm:$0xff]  ;;  %v5437_v27 = vld [vmem:[#allocation2 + $0x590] sm:$0xff] }
0x10b5   :  { %19584 = vst [vmem:[#allocation11_spill] sm:$0xff] %v17440_v58  ;;  %19585 = vst [vmem:[#allocation12_spill] sm:$0xff] %v17442_v40  ;;  %v17456_v48 = vpack.c.bf16 %v5439_v11, %v5435_v23  ;;  %v5441_v44 = vld [vmem:[#allocation2 + $0x5b0] sm:$0xff] }
0x10b6   :  { %12993 = vmatpush1.bf16.msra.mxu0 %v17432_v20  ;;  %13025 = vmatpush1.bf16.msra.mxu1 %v17435_v21  ;;  %19587 = vst [vmem:[#allocation14_spill] sm:$0xff] %v17447_v43  ;;  %v5436_v20 = vld [vmem:[#allocation2 + $0x588] sm:$0xff]  ;;  %v5438_v21 = vld [vmem:[#allocation2 + $0x598] sm:$0xff] }
0x10b7   :  { %12995 = vmatprep.subr.bf16.mxu0 %v17440_v58  ;;  %13027 = vmatprep.subr.bf16.mxu1 %v17442_v40  ;;  %v17452_v0 = vpack.c.bf16 %v5440_v10, %v5436_v20  ;;  %v17454_v57 = vpack.c.bf16 %v5442_v33, %v5438_v21  ;;  %v17459_v40 = vpack.c.bf16 %v5441_v44, %v5437_v27  ;;  %v5448_v58 = vld [vmem:[#allocation2 + $0x5e8] sm:$0xff]  ;;  %v5450_v21 = vld [vmem:[#allocation2 + $0x5f8] sm:$0xff]  ;;  %v5443_v20 = vld [vmem:[#allocation2 + $0x5c0] sm:$0xff] }
0x10b8   :  { %v5447_v33 = vld [vmem:[#allocation2 + $0x5e0] sm:$0xff]  ;;  %v5445_v27 = vld [vmem:[#allocation2 + $0x5d0] sm:$0xff] }
0x10b9   :  { %19588 = vst [vmem:[#allocation15_spill] sm:$0xff] %v17454_v57  ;;  %19589 = vst [vmem:[#allocation16_spill] sm:$0xff] %v17459_v40  ;;  %v17468_v11 = vpack.c.bf16 %v5447_v33, %v5443_v20  ;;  %v5449_v44 = vld [vmem:[#allocation2 + $0x5f0] sm:$0xff] }
0x10ba   :  { %12997 = vmatpush1.bf16.msra.mxu0 %v17444_v29  ;;  %13029 = vmatpush1.bf16.msra.mxu1 %v17447_v43  ;;  %v5444_v29 = vld [vmem:[#allocation2 + $0x5c8] sm:$0xff]  ;;  %v5446_v43 = vld [vmem:[#allocation2 + $0x5d8] sm:$0xff] }
0x10bb   :  { %12999 = vmatprep.subr.bf16.mxu0 %v17452_v0  ;;  %13031 = vmatprep.subr.bf16.mxu1 %v17454_v57  ;;  %v17464_v10 = vpack.c.bf16 %v5448_v58, %v5444_v29  ;;  %v17466_v23 = vpack.c.bf16 %v5450_v21, %v5446_v43  ;;  %19592 = vst [vmem:[#allocation53_spill] sm:$0xff] %v17468_v11 }
0x10bc   :  { %v17471_v57 = vpack.c.bf16 %v5449_v44, %v5445_v27 }
0x10bd   :  { %19590 = vst [vmem:[#allocation50_spill] sm:$0xff] %v17464_v10  ;;  %19591 = vst [vmem:[#allocation52_spill] sm:$0xff] %v17466_v23 }
0x10be   :  { %13001 = vmatpush1.bf16.msra.mxu0 %v17456_v48  ;;  %13033 = vmatpush1.bf16.msra.mxu1 %v17459_v40  ;;  %19593 = vst [vmem:[#allocation54_spill] sm:$0xff] %v17471_v57 }
0x10bf   :  { %13003 = vmatprep.subr.bf16.mxu0 %v17464_v10  ;;  %13035 = vmatprep.subr.bf16.mxu1 %v17466_v23 }
0x10c2   :  { %13005 = vmatpush1.bf16.msra.mxu0 %v17468_v11  ;;  %13037 = vmatpush1.bf16.msra.mxu1 %v17471_v57 }
0x10c3   :  { %13039 = vmatprep.subr.bf16.mxu0 %v17273_v24  ;;  %13071 = vmatprep.subr.bf16.mxu1 %v17275_v6 }
0x1158   :  { %v5281_v43 = vpop.f32.mrb[30].mxu0  ;;  %v5352_v58 = vpop.f32.mrb[30].mxu1 }
0x1159   :  { %v5357_v29 = vadd.f32 %v5281_v43, %v19550_v49  ;;  %v5283_v21 = vpop.f32.mrb[31].mxu0  ;;  %v5354_v20 = vpop.f32.mrb[31].mxu1  ;;  %v5359_v11 = vadd.f32 %v5352_v58, %v16759_v51 }
0x115a   :  { %v5358_v33 = vadd.f32 %v5283_v21, %v19440_v7  ;;  %v5360_v57 = vadd.f32 %v5354_v20, %v16762_v36 }
0x115b   :  { %v10787_v27 = vmul.f32 -1.442695, %v5357_v29  ;;  %v10789_v23 = vmul.f32 -1.442695, %v5359_v11 }
0x115c   :  { %v10788_v44 = vmul.f32 -1.442695, %v5358_v33 }
0x115d   :  { %15331 = vpow2.f32 %v10787_v27 }
0x115e   :  { %15333 = vpow2.f32 %v10788_v44 }
0x115f   :  { %15335 = vtanh.f32 %v5360_v57  ;;  %v19596_v57 = vld [vmem:[#allocation40_spill] sm:$0xff] }
0x1160   :  { %15337 = vpow2.f32 %v10789_v23 }
0x1167   :  { %v15332_v24 = vpop.eup %15331 }
0x1168   :  { %v5370_v10 = vadd.f32 1.0, %v15332_v24  ;;  %v15334_v6 = vpop.eup %15333 }
0x1169   :  { %v5371_v49 = vadd.f32 1.0, %v15334_v6  ;;  %v15336_v43 = vpop.eup %15335  ;;  %v19594_v6 = vld [vmem:[#allocation39_spill] sm:$0xff] }
0x116a   :  { %15339 = vrcp.f32 %v5370_v10  ;;  %v15338_v40 = vpop.eup %15337 }
0x116b   :  { %15341 = vrcp.f32 %v5371_v49  ;;  %v5372_v33 = vadd.f32 1.0, %v15338_v40 }
0x116d   :  { %15343 = vrcp.f32 %v5372_v33 }
0x1174   :  { %v15340_v7 = vpop.eup %15339 }
0x1175   :  { %v5381_v29 = vmul.f32 %v15340_v7, %v15336_v43  ;;  %v15342_v21 = vpop.eup %15341 }
0x1176   :  { %v5380_v27 = vmul.f32 %v15342_v21, %v17240_v28  ;;  %v10791_v28 = vld [vmem:[%s18874_s3 + $0x8] sm:$0xf]  ;;  %v19598_v21 = vld [vmem:[#allocation43_spill] sm:$0xff] }
0x1177   :  { %v15344_v36 = vpop.eup %15343  ;;  %v17525_v40 = vrot.slane %v10791_v28, %v19594_v6  ;;  %v17528_v10 = vrot.slane %v10791_v28, %v19596_v57  ;;  %v17533_v33 = vrot.slane %v10791_v28, %v19598_v21 }
0x1178   :  { %v5382_v51 = vadd.f32 %v5381_v29, %v5380_v27  ;;  %v19599_v27 = vld [vmem:[#allocation45_spill] sm:$0xff] }
0x1179   :  { %19595 = vst [vmem:[#allocation55_spill] sm:$0xff] %v17525_v40  ;;  %19597 = vst [vmem:[#allocation56_spill] sm:$0xff] %v17528_v10 }
0x117a   :  { %15345 = vtanh.f32 %v5382_v51  ;;  %v17536_v51 = vrot.slane %v10791_v28, %v19599_v27 }
0x1184   :  { %v15346_v11 = vpop.eup %15345 }
0x1185   :  { %v17483_v24 = vmul.f32 %v15346_v11, %v15344_v36 }
0x1187   :  { %5725 = vmatmul.mubr.f32.vlgmr.msra.gmra.mrb[32].mxu0 %v17483_v24  ;;  %5796 = vmatmul.mubr.f32.vlgmr.msra.gmra.mrb[32].mxu1 %v17483_v24 }
0x1188   :  { %13041 = vmatpush1.bf16.msra.mxu0 %v17282_v35  ;;  %13073 = vmatpush1.bf16.msra.mxu1 %v17284_v18 }
0x1189   :  { %13043 = vmatprep.subr.bf16.mxu0 %v17288_v46  ;;  %13075 = vmatprep.subr.bf16.mxu1 %v17290_v37 }
0x118a   :  { %5916 = vmatprep.mubr.f32.mxu0 %v19235_v45  ;;  %5987 = vmatprep.mubr.f32.mxu1 %v19235_v45 }
0x118c   :  { %13045 = vmatpush1.bf16.msra.mxu0 %v17294_v5  ;;  %13077 = vmatpush1.bf16.msra.mxu1 %v17296_v34 }
0x118d   :  { %13047 = vmatprep.subr.bf16.mxu0 %v17300_v9  ;;  %13079 = vmatprep.subr.bf16.mxu1 %v17302_v38 }
0x1190   :  { %13049 = vmatpush1.bf16.msra.mxu0 %v17308_v17  ;;  %13081 = vmatpush1.bf16.msra.mxu1 %v17310_v41 }
0x1191   :  { %13051 = vmatprep.subr.bf16.mxu0 %v17314_v15  ;;  %13083 = vmatprep.subr.bf16.mxu1 %v17316_v32 }
0x1194   :  { %13053 = vmatpush1.bf16.msra.mxu0 %v17320_v4  ;;  %13085 = vmatpush1.bf16.msra.mxu1 %v17322_v13 }
0x1195   :  { %13055 = vmatprep.subr.bf16.mxu0 %v17326_v59  ;;  %13087 = vmatprep.subr.bf16.mxu1 %v17328_v62 }
0x1198   :  { %13057 = vmatpush1.bf16.msra.mxu0 %v17334_v55  ;;  %13089 = vmatpush1.bf16.msra.mxu1 %v17336_v12 }
0x1199   :  { %13059 = vmatprep.subr.bf16.mxu0 %v17340_v14  ;;  %13091 = vmatprep.subr.bf16.mxu1 %v17342_v42 }
0x119c   :  { %13061 = vmatpush1.bf16.msra.mxu0 %v17344_v30  ;;  %13093 = vmatpush1.bf16.msra.mxu1 %v17347_v52 }
0x119d   :  { %13063 = vmatprep.subr.bf16.mxu0 %v17352_v53  ;;  %13095 = vmatprep.subr.bf16.mxu1 %v17354_v26 }
0x11a0   :  { %13065 = vmatpush1.bf16.msra.mxu0 %v17356_v8  ;;  %13097 = vmatpush1.bf16.msra.mxu1 %v17359_v19 }
0x11a1   :  { %13067 = vmatprep.subr.bf16.mxu0 %v17364_v3  ;;  %13099 = vmatprep.subr.bf16.mxu1 %v17366_v25 }
0x11a4   :  { %13069 = vmatpush1.bf16.msra.mxu0 %v17368_v63  ;;  %13101 = vmatpush1.bf16.msra.mxu1 %v17371_v61 }
0x11a5   :  { %13103 = vmatprep.subr.bf16.mxu0 %v17376_v1  ;;  %13135 = vmatprep.subr.bf16.mxu1 %v17378_v2 }
0x125a   :  { %v5726_v23 = vpop.f32.mrb[32].mxu0  ;;  %v5797_v58 = vpop.f32.mrb[32].mxu1 }
0x125b   :  { %v5823_v20 = vadd.f32 %v17525_v40, %v5726_v23  ;;  %v5728_v44 = vpop.f32.mrb[33].mxu0  ;;  %v5799_v49 = vpop.f32.mrb[33].mxu1  ;;  %v5825_v36 = vadd.f32 %v17533_v33, %v5797_v58 }
0x125c   :  { %v5824_v43 = vadd.f32 %v17528_v10, %v5728_v44  ;;  %v5826_v11 = vadd.f32 %v17536_v51, %v5799_v49 }
0x125d   :  { %v10792_v7 = vmul.f32 -1.442695, %v5823_v20  ;;  %v10794_v57 = vmul.f32 -1.442695, %v5825_v36 }
0x125e   :  { %v10793_v29 = vmul.f32 -1.442695, %v5824_v43 }
0x125f   :  { %15347 = vpow2.f32 %v10792_v7 }
0x1260   :  { %15349 = vpow2.f32 %v10793_v29 }
0x1261   :  { %15351 = vtanh.f32 %v5826_v11  ;;  %v19605_v11 = vld [vmem:[#allocation44_spill] sm:$0xff] }
0x1262   :  { %15353 = vpow2.f32 %v10794_v57  ;;  %v19602_v57 = vld [vmem:[#allocation37_spill] sm:$0xff] }
0x1269   :  { %v15348_v23 = vpop.eup %15347 }
0x126a   :  { %v5836_v6 = vadd.f32 1.0, %v15348_v23  ;;  %v15350_v40 = vpop.eup %15349  ;;  %v19606_v23 = vld [vmem:[#allocation8_spill] sm:$0xff] }
0x126b   :  { %v5837_v20 = vadd.f32 1.0, %v15350_v40  ;;  %v15352_v44 = vpop.eup %15351  ;;  %v19601_v40 = vld [vmem:[#allocation36_spill] sm:$0xff] }
0x126c   :  { %15355 = vrcp.f32 %v5836_v6  ;;  %v15354_v43 = vpop.eup %15353  ;;  %v19600_v6 = vld [vmem:[#allocation35_spill] sm:$0xff] }
0x126d   :  { %15357 = vrcp.f32 %v5837_v20  ;;  %v5838_v28 = vadd.f32 1.0, %v15354_v43  ;;  %v19607_v20 = vld [vmem:[#allocation9_spill] sm:$0xff]  ;;  %v19609_v43 = vld [vmem:[#allocation11_spill] sm:$0xff] }
0x126f   :  { %15359 = vrcp.f32 %v5838_v28  ;;  %v19612_v28 = vld [vmem:[#allocation14_spill] sm:$0xff] }
0x1276   :  { %v15356_v7 = vpop.eup %15355 }
0x1277   :  { %v5847_v29 = vmul.f32 %v15356_v7, %v15352_v44  ;;  %v15358_v21 = vpop.eup %15357  ;;  %v19608_v44 = vld [vmem:[#allocation10_spill] sm:$0xff]  ;;  %v19610_v7 = vld [vmem:[#allocation12_spill] sm:$0xff] }
0x1278   :  { %v5846_v27 = vmul.f32 0.0, %v15358_v21  ;;  %v19603_v21 = vld [vmem:[#allocation38_spill] sm:$0xff] }
0x1279   :  { %v15360_v58 = vpop.eup %15359 }
0x127a   :  { %v17540_v10 = vadd.f32 %v5847_v29, %v5846_v27  ;;  %v19604_v27 = vld [vmem:[#allocation42_spill] sm:$0xff]  ;;  %v19611_v29 = vld [vmem:[#allocation13_spill] sm:$0xff] }
0x127c   :  { %15361 = vtanh.f32 %v17540_v10 }
0x1286   :  { %v15362_v49 = vpop.eup %15361 }
0x1287   :  { %v5850_v36 = vmul.f32 %v15362_v49, %v15360_v58  ;;  %v19613_v58 = vld [vmem:[#allocation15_spill] sm:$0xff]  ;;  %v19614_v49 = vld [vmem:[#allocation16_spill] sm:$0xff] }
0x1289   :  { %5851 = vst [vmem:[%s18875_s4] sm:$0xff] %v5850_v36  ;;  %5917 = vmatmul.mubr.f32.vlgmr.msra.gmra.mrb[34].mxu0 %v5850_v36  ;;  %5988 = vmatmul.mubr.f32.vlgmr.msra.gmra.mrb[34].mxu1 %v5850_v36  ;;  %v19615_v36 = vld [vmem:[#allocation50_spill] sm:$0xff] }
0x128a   :  { %13105 = vmatpush1.bf16.msra.mxu0 %v17380_v31  ;;  %13137 = vmatpush1.bf16.msra.mxu1 %v17384_v56 }
0x128b   :  { %13107 = vmatprep.subr.bf16.mxu0 %v17390_v39  ;;  %13139 = vmatprep.subr.bf16.mxu1 %v17392_v16 }
0x128c   :  { %6058 = vmatprep.mubr.f32.mxu0 %v19235_v45  ;;  %6129 = vmatprep.mubr.f32.mxu1 %v19235_v45 }
0x128e   :  { %13109 = vmatpush1.bf16.msra.mxu0 %v17394_v47  ;;  %13141 = vmatpush1.bf16.msra.mxu1 %v17399_v54 }
0x128f   :  { %13111 = vmatprep.subr.bf16.mxu0 %v17404_v60  ;;  %13143 = vmatprep.subr.bf16.mxu1 %v17406_v50 }
0x1292   :  { %13113 = vmatpush1.bf16.msra.mxu0 %v17408_v22  ;;  %13145 = vmatpush1.bf16.msra.mxu1 %v19600_v6 }
0x1293   :  { %13115 = vmatprep.subr.bf16.mxu0 %v19601_v40  ;;  %13147 = vmatprep.subr.bf16.mxu1 %v19602_v57 }
0x1296   :  { %13117 = vmatpush1.bf16.msra.mxu0 %v19603_v21  ;;  %13149 = vmatpush1.bf16.msra.mxu1 %v19604_v27 }
0x1297   :  { %13119 = vmatprep.subr.bf16.mxu0 %v19605_v11  ;;  %13151 = vmatprep.subr.bf16.mxu1 %v19606_v23 }
0x129a   :  { %13121 = vmatpush1.bf16.msra.mxu0 %v19607_v20  ;;  %13153 = vmatpush1.bf16.msra.mxu1 %v19608_v44  ;;  %v19616_v20 = vld [vmem:[#allocation52_spill] sm:$0xff]  ;;  %v19617_v44 = vld [vmem:[#allocation53_spill] sm:$0xff] }
0x129b   :  { %13123 = vmatprep.subr.bf16.mxu0 %v19609_v43  ;;  %13155 = vmatprep.subr.bf16.mxu1 %v19610_v7  ;;  %v19618_v43 = vld [vmem:[#allocation54_spill] sm:$0xff]  ;;  %v19619_v7 = vld [vmem:[#allocation17_spill] sm:$0xff] }
0x129e   :  { %13125 = vmatpush1.bf16.msra.mxu0 %v19611_v29  ;;  %13157 = vmatpush1.bf16.msra.mxu1 %v19612_v28  ;;  %v19620_v29 = vld [vmem:[#allocation18_spill] sm:$0xff] }
0x129f   :  { %13127 = vmatprep.subr.bf16.mxu0 %v17452_v0  ;;  %13159 = vmatprep.subr.bf16.mxu1 %v19613_v58 }
0x12a2   :  { %13129 = vmatpush1.bf16.msra.mxu0 %v17456_v48  ;;  %13161 = vmatpush1.bf16.msra.mxu1 %v19614_v49 }
0x12a3   :  { %13131 = vmatprep.subr.bf16.mxu0 %v19615_v36  ;;  %13163 = vmatprep.subr.bf16.mxu1 %v19616_v20 }
0x12a6   :  { %13133 = vmatpush1.bf16.msra.mxu0 %v19617_v44  ;;  %13165 = vmatpush1.bf16.msra.mxu1 %v19618_v43 }
0x12a7   :  { %13167 = vmatprep.subr.bf16.mxu0 %v19619_v7  ;;  %13199 = vmatprep.subr.bf16.mxu1 %v19620_v29 }
0x12a9   :  { %6059 = vmatmul.mubr.f32.vlgmr.msra.gmra.mrb[34].mxu0 %v17483_v24  ;;  %6130 = vmatmul.mubr.f32.vlgmr.msra.gmra.mrb[34].mxu1 %v17483_v24 }
0x12aa   :  { %13169 = vmatpush1.bf16.msra.mxu0 %v17282_v35  ;;  %13201 = vmatpush1.bf16.msra.mxu1 %v17284_v18 }
0x12ab   :  { %13171 = vmatprep.subr.bf16.mxu0 %v17288_v46  ;;  %13203 = vmatprep.subr.bf16.mxu1 %v17290_v37 }
0x12ac   :  { %6229 = vmatprep.mubr.f32.mxu0 %v19235_v45  ;;  %6300 = vmatprep.mubr.f32.mxu1 %v19235_v45 }
0x12ae   :  { %13173 = vmatpush1.bf16.msra.mxu0 %v17294_v5  ;;  %13205 = vmatpush1.bf16.msra.mxu1 %v17296_v34 }
0x12af   :  { %13175 = vmatprep.subr.bf16.mxu0 %v17300_v9  ;;  %13207 = vmatprep.subr.bf16.mxu1 %v17302_v38 }
0x12b2   :  { %13177 = vmatpush1.bf16.msra.mxu0 %v17308_v17  ;;  %13209 = vmatpush1.bf16.msra.mxu1 %v17310_v41 }
0x12b3   :  { %13179 = vmatprep.subr.bf16.mxu0 %v17314_v15  ;;  %13211 = vmatprep.subr.bf16.mxu1 %v17316_v32 }
0x12b6   :  { %13181 = vmatpush1.bf16.msra.mxu0 %v17320_v4  ;;  %13213 = vmatpush1.bf16.msra.mxu1 %v17322_v13 }
0x12b7   :  { %13183 = vmatprep.subr.bf16.mxu0 %v17326_v59  ;;  %13215 = vmatprep.subr.bf16.mxu1 %v17328_v62 }
0x12ba   :  { %13185 = vmatpush1.bf16.msra.mxu0 %v17334_v55  ;;  %13217 = vmatpush1.bf16.msra.mxu1 %v17336_v12 }
0x12bb   :  { %13187 = vmatprep.subr.bf16.mxu0 %v17340_v14  ;;  %13219 = vmatprep.subr.bf16.mxu1 %v17342_v42  ;;  %v19622_v14 = vld [vmem:[#allocation56_spill] sm:$0xff] }
0x12be   :  { %13189 = vmatpush1.bf16.msra.mxu0 %v17344_v30  ;;  %13221 = vmatpush1.bf16.msra.mxu1 %v17347_v52  ;;  %v19621_v30 = vld [vmem:[#allocation55_spill] sm:$0xff] }
0x12bf   :  { %13191 = vmatprep.subr.bf16.mxu0 %v17352_v53  ;;  %13223 = vmatprep.subr.bf16.mxu1 %v17354_v26 }
0x12c2   :  { %13193 = vmatpush1.bf16.msra.mxu0 %v17356_v8  ;;  %13225 = vmatpush1.bf16.msra.mxu1 %v17359_v19 }
0x12c3   :  { %13195 = vmatprep.subr.bf16.mxu0 %v17364_v3  ;;  %13227 = vmatprep.subr.bf16.mxu1 %v17366_v25 }
0x12c6   :  { %13197 = vmatpush1.bf16.msra.mxu0 %v17368_v63  ;;  %13229 = vmatpush1.bf16.msra.mxu1 %v17371_v61 }
0x12c7   :  { %13231 = vmatprep.subr.bf16.mxu0 %v17376_v1  ;;  %13263 = vmatprep.subr.bf16.mxu1 %v17378_v2 }
0x137c   :  { %v6060_v52 = vpop.f32.mrb[34].mxu0  ;;  %v6131_v53 = vpop.f32.mrb[34].mxu1 }
0x137d   :  { %v6136_v26 = vadd.f32 %v6060_v52, %v19621_v30  ;;  %v6062_v42 = vpop.f32.mrb[35].mxu0  ;;  %v6133_v8 = vpop.f32.mrb[35].mxu1  ;;  %v6138_v63 = vadd.f32 %v6131_v53, %v17533_v33 }
0x137e   :  { %v6137_v19 = vadd.f32 %v6062_v42, %v19622_v14  ;;  %v6139_v61 = vadd.f32 %v6133_v8, %v17536_v51 }
0x137f   :  { %v10795_v12 = vmul.f32 -1.442695, %v6136_v26  ;;  %v10797_v25 = vmul.f32 -1.442695, %v6138_v63 }
0x1380   :  { %v10796_v3 = vmul.f32 -1.442695, %v6137_v19 }
0x1381   :  { %15363 = vpow2.f32 %v10795_v12 }
0x1382   :  { %15365 = vpow2.f32 %v10796_v3 }
0x1383   :  { %15367 = vtanh.f32 %v6139_v61 }
0x1384   :  { %15369 = vpow2.f32 %v10797_v25  ;;  %v19626_v25 = vld [vmem:[#allocation12_spill] sm:$0xff] }
0x138b   :  { %v15364_v1 = vpop.eup %15363 }
0x138c   :  { %v6149_v55 = vadd.f32 1.0, %v15364_v1  ;;  %v15366_v2 = vpop.eup %15365  ;;  %v19627_v1 = vld [vmem:[#allocation13_spill] sm:$0xff] }
0x138d   :  { %v6150_v52 = vadd.f32 1.0, %v15366_v2  ;;  %v15368_v30 = vpop.eup %15367  ;;  %v19628_v2 = vld [vmem:[#allocation24_spill] sm:$0xff] }
0x138e   :  { %15371 = vrcp.f32 %v6149_v55  ;;  %v15370_v62 = vpop.eup %15369  ;;  %v19624_v55 = vld [vmem:[#allocation10_spill] sm:$0xff] }
0x138f   :  { %15373 = vrcp.f32 %v6150_v52  ;;  %v6151_v12 = vadd.f32 1.0, %v15370_v62  ;;  %v19623_v62 = vld [vmem:[#allocation9_spill] sm:$0xff]  ;;  %v19630_v52 = vld [vmem:[#allocation26_spill] sm:$0xff] }
0x1391   :  { %15375 = vrcp.f32 %v6151_v12  ;;  %v19634_v12 = vld [vmem:[#allocation46_spill] sm:$0xff] }
0x1398   :  { %v15372_v42 = vpop.eup %15371 }
0x1399   :  { %v6160_v26 = vmul.f32 %v15372_v42, %v15368_v30  ;;  %v15374_v19 = vpop.eup %15373  ;;  %v19625_v30 = vld [vmem:[#allocation11_spill] sm:$0xff] }
0x139a   :  { %v6159_v3 = vmul.f32 %v15374_v19, %v17540_v10  ;;  %v19629_v10 = vld [vmem:[#allocation25_spill] sm:$0xff]  ;;  %v19631_v42 = vld [vmem:[#allocation27_spill] sm:$0xff] }
0x139b   :  { %v15376_v8 = vpop.eup %15375  ;;  %v19633_v19 = vld [vmem:[#allocation41_spill] sm:$0xff] }
0x139c   :  { %v17621_v53 = vadd.f32 %v6160_v26, %v6159_v3  ;;  %v19632_v26 = vld [vmem:[#allocation28_spill] sm:$0xff]  ;;  %v19635_v3 = vld [vmem:[#allocation47_spill] sm:$0xff] }
0x139e   :  { %15377 = vtanh.f32 %v17621_v53 }
0x13a8   :  { %v15378_v63 = vpop.eup %15377 }
0x13a9   :  { %v6163_v61 = vmul.f32 %v15378_v63, %v15376_v8  ;;  %v19636_v8 = vld [vmem:[#allocation48_spill] sm:$0xff]  ;;  %v19637_v63 = vld [vmem:[#allocation51_spill] sm:$0xff] }
0x13ab   :  { %10798 = vst [vmem:[%s18875_s4 + $0x8] sm:$0xff] %v6163_v61  ;;  %6230 = vmatmul.mubr.f32.vlgmr.msra.gmra.mrb[36].mxu0 %v6163_v61  ;;  %6301 = vmatmul.mubr.f32.vlgmr.msra.gmra.mrb[36].mxu1 %v6163_v61  ;;  %v19638_v61 = vld [vmem:[#allocation49_spill] sm:$0xff] }
0x13ac   :  { %13233 = vmatpush1.bf16.msra.mxu0 %v17380_v31  ;;  %13265 = vmatpush1.bf16.msra.mxu1 %v17384_v56 }
0x13ad   :  { %13235 = vmatprep.subr.bf16.mxu0 %v17390_v39  ;;  %13267 = vmatprep.subr.bf16.mxu1 %v17392_v16 }
0x13ae   :  { %6371 = vmatprep.mubr.f32.mxu0 %v19235_v45  ;;  %6442 = vmatprep.mubr.f32.mxu1 %v19235_v45 }
0x13b0   :  { %13237 = vmatpush1.bf16.msra.mxu0 %v17394_v47  ;;  %13269 = vmatpush1.bf16.msra.mxu1 %v17399_v54 }
0x13b1   :  { %13239 = vmatprep.subr.bf16.mxu0 %v17404_v60  ;;  %13271 = vmatprep.subr.bf16.mxu1 %v17406_v50 }
0x13b4   :  { %13241 = vmatpush1.bf16.msra.mxu0 %v17408_v22  ;;  %13273 = vmatpush1.bf16.msra.mxu1 %v19600_v6 }
0x13b5   :  { %13243 = vmatprep.subr.bf16.mxu0 %v19601_v40  ;;  %13275 = vmatprep.subr.bf16.mxu1 %v19602_v57 }
0x13b8   :  { %13245 = vmatpush1.bf16.msra.mxu0 %v19603_v21  ;;  %13277 = vmatpush1.bf16.msra.mxu1 %v19604_v27 }
0x13b9   :  { %13247 = vmatprep.subr.bf16.mxu0 %v19605_v11  ;;  %13279 = vmatprep.subr.bf16.mxu1 %v19606_v23 }
0x13bc   :  { %13249 = vmatpush1.bf16.msra.mxu0 %v19623_v62  ;;  %13281 = vmatpush1.bf16.msra.mxu1 %v19624_v55 }
0x13bd   :  { %13251 = vmatprep.subr.bf16.mxu0 %v19625_v30  ;;  %13283 = vmatprep.subr.bf16.mxu1 %v19626_v25 }
0x13c0   :  { %13253 = vmatpush1.bf16.msra.mxu0 %v19627_v1  ;;  %13285 = vmatpush1.bf16.msra.mxu1 %v19612_v28 }
0x13c1   :  { %13255 = vmatprep.subr.bf16.mxu0 %v17452_v0  ;;  %13287 = vmatprep.subr.bf16.mxu1 %v19613_v58 }
0x13c4   :  { %13257 = vmatpush1.bf16.msra.mxu0 %v17456_v48  ;;  %13289 = vmatpush1.bf16.msra.mxu1 %v19614_v49 }
0x13c5   :  { %13259 = vmatprep.subr.bf16.mxu0 %v19615_v36  ;;  %13291 = vmatprep.subr.bf16.mxu1 %v19616_v20 }
0x13c8   :  { %13261 = vmatpush1.bf16.msra.mxu0 %v19617_v44  ;;  %13293 = vmatpush1.bf16.msra.mxu1 %v19618_v43 }
0x13c9   :  { %13295 = vmatprep.subr.bf16.mxu0 %v19619_v7  ;;  %13327 = vmatprep.subr.bf16.mxu1 %v19620_v29 }
0x13cb   :  { %6372 = vmatmul.mubr.f32.vlgmr.msra.gmra.mrb[36].mxu0 %v17483_v24  ;;  %6443 = vmatmul.mubr.f32.vlgmr.msra.gmra.mrb[36].mxu1 %v17483_v24 }
0x13cc   :  { %13297 = vmatpush1.bf16.msra.mxu0 %v17282_v35  ;;  %13329 = vmatpush1.bf16.msra.mxu1 %v17284_v18 }
0x13cd   :  { %13299 = vmatprep.subr.bf16.mxu0 %v17288_v46  ;;  %13331 = vmatprep.subr.bf16.mxu1 %v17290_v37 }
0x13ce   :  { %6542 = vmatprep.mubr.f32.mxu0 %v19235_v45  ;;  %6613 = vmatprep.mubr.f32.mxu1 %v19235_v45 }
0x13d0   :  { %13301 = vmatpush1.bf16.msra.mxu0 %v17294_v5  ;;  %13333 = vmatpush1.bf16.msra.mxu1 %v17296_v34 }
0x13d1   :  { %13303 = vmatprep.subr.bf16.mxu0 %v17300_v9  ;;  %13335 = vmatprep.subr.bf16.mxu1 %v17302_v38 }
0x13d4   :  { %13305 = vmatpush1.bf16.msra.mxu0 %v17308_v17  ;;  %13337 = vmatpush1.bf16.msra.mxu1 %v17310_v41 }
0x13d5   :  { %13307 = vmatprep.subr.bf16.mxu0 %v17314_v15  ;;  %13339 = vmatprep.subr.bf16.mxu1 %v17316_v32 }
0x13d8   :  { %13309 = vmatpush1.bf16.msra.mxu0 %v17320_v4  ;;  %13341 = vmatpush1.bf16.msra.mxu1 %v17322_v13 }
0x13d9   :  { %13311 = vmatprep.subr.bf16.mxu0 %v17326_v59  ;;  %13343 = vmatprep.subr.bf16.mxu1 %v19628_v2  ;;  %v19639_v2 = vld [vmem:[#allocation29_spill] sm:$0xff]  ;;  %v19645_v59 = vld [vmem:[#allocation55_spill] sm:$0xff] }
0x13dc   :  { %13313 = vmatpush1.bf16.msra.mxu0 %v19629_v10  ;;  %13345 = vmatpush1.bf16.msra.mxu1 %v19630_v52  ;;  %v19640_v10 = vld [vmem:[#allocation30_spill] sm:$0xff]  ;;  %v19641_v52 = vld [vmem:[#allocation31_spill] sm:$0xff] }
0x13dd   :  { %13315 = vmatprep.subr.bf16.mxu0 %v19631_v42  ;;  %13347 = vmatprep.subr.bf16.mxu1 %v19632_v26  ;;  %v19642_v42 = vld [vmem:[#allocation32_spill] sm:$0xff]  ;;  %v19643_v26 = vld [vmem:[#allocation33_spill] sm:$0xff] }
0x13e0   :  { %13317 = vmatpush1.bf16.msra.mxu0 %v19633_v19  ;;  %13349 = vmatpush1.bf16.msra.mxu1 %v19634_v12  ;;  %v19644_v19 = vld [vmem:[#allocation34_spill] sm:$0xff] }
0x13e1   :  { %13319 = vmatprep.subr.bf16.mxu0 %v19635_v3  ;;  %13351 = vmatprep.subr.bf16.mxu1 %v19636_v8 }
0x13e4   :  { %13321 = vmatpush1.bf16.msra.mxu0 %v19637_v63  ;;  %13353 = vmatpush1.bf16.msra.mxu1 %v19638_v61 }
0x13e5   :  { %13323 = vmatprep.subr.bf16.mxu0 %v19639_v2  ;;  %13355 = vmatprep.subr.bf16.mxu1 %v19640_v10 }
0x13e8   :  { %13325 = vmatpush1.bf16.msra.mxu0 %v19641_v52  ;;  %13357 = vmatpush1.bf16.msra.mxu1 %v19642_v42 }
0x13e9   :  { %13359 = vmatprep.subr.bf16.mxu0 %v19643_v26  ;;  %13391 = vmatprep.subr.bf16.mxu1 %v19644_v19 }
0x149e   :  { %v6373_v12 = vpop.f32.mrb[36].mxu0  ;;  %v6444_v3 = vpop.f32.mrb[36].mxu1 }
0x149f   :  { %v6449_v8 = vadd.f32 %v6373_v12, %v19645_v59  ;;  %v6375_v13 = vpop.f32.mrb[37].mxu0  ;;  %v6446_v63 = vpop.f32.mrb[37].mxu1  ;;  %v6451_v52 = vadd.f32 %v6444_v3, %v17533_v33 }
0x14a0   :  { %v6450_v61 = vadd.f32 %v6375_v13, %v19622_v14  ;;  %v6452_v42 = vadd.f32 %v6446_v63, %v17536_v51  ;;  %v19652_v63 = vld [vmem:[#allocation25_spill] sm:$0xff] }
0x14a1   :  { %v10799_v4 = vmul.f32 -1.442695, %v6449_v8  ;;  %v10801_v10 = vmul.f32 -1.442695, %v6451_v52 }
0x14a2   :  { %v10800_v2 = vmul.f32 -1.442695, %v6450_v61 }
0x14a3   :  { %15379 = vpow2.f32 %v10799_v4 }
0x14a4   :  { %15381 = vpow2.f32 %v10800_v2 }
0x14a5   :  { %15383 = vtanh.f32 %v6452_v42 }
0x14a6   :  { %15385 = vpow2.f32 %v10801_v10  ;;  %v19650_v10 = vld [vmem:[#allocation23_spill] sm:$0xff] }
0x14ad   :  { %v15380_v26 = vpop.eup %15379 }
0x14ae   :  { %v6462_v32 = vadd.f32 1.0, %v15380_v26  ;;  %v15382_v19 = vpop.eup %15381 }
0x14af   :  { %v6463_v12 = vadd.f32 1.0, %v15382_v19  ;;  %v15384_v59 = vpop.eup %15383  ;;  %v19651_v19 = vld [vmem:[#allocation24_spill] sm:$0xff] }
0x14b0   :  { %15387 = vrcp.f32 %v6462_v32  ;;  %v15386_v15 = vpop.eup %15385  ;;  %v19647_v32 = vld [vmem:[#allocation20_spill] sm:$0xff] }
0x14b1   :  { %15389 = vrcp.f32 %v6463_v12  ;;  %v6464_v4 = vadd.f32 1.0, %v15386_v15  ;;  %v19646_v15 = vld [vmem:[#allocation19_spill] sm:$0xff]  ;;  %v19653_v12 = vld [vmem:[#allocation26_spill] sm:$0xff] }
0x14b3   :  { %15391 = vrcp.f32 %v6464_v4  ;;  %v19657_v4 = vld [vmem:[#allocation46_spill] sm:$0xff] }
0x14ba   :  { %v15388_v13 = vpop.eup %15387 }
0x14bb   :  { %v6473_v8 = vmul.f32 %v15388_v13, %v15384_v59  ;;  %v15390_v61 = vpop.eup %15389  ;;  %v19648_v59 = vld [vmem:[#allocation21_spill] sm:$0xff]  ;;  %v19654_v13 = vld [vmem:[#allocation27_spill] sm:$0xff] }
0x14bc   :  { %v6472_v2 = vmul.f32 %v15390_v61, %v17621_v53  ;;  %v19649_v53 = vld [vmem:[#allocation22_spill] sm:$0xff]  ;;  %v19656_v61 = vld [vmem:[#allocation41_spill] sm:$0xff] }
0x14bd   :  { %v15392_v52 = vpop.eup %15391 }
0x14be   :  { %v17702_v3 = vadd.f32 %v6473_v8, %v6472_v2  ;;  %v19655_v8 = vld [vmem:[#allocation28_spill] sm:$0xff]  ;;  %v19658_v2 = vld [vmem:[#allocation47_spill] sm:$0xff] }
0x14c0   :  { %15393 = vtanh.f32 %v17702_v3 }
0x14ca   :  { %v15394_v42 = vpop.eup %15393 }
0x14cb   :  { %v6476_v26 = vmul.f32 %v15394_v42, %v15392_v52  ;;  %v19659_v52 = vld [vmem:[#allocation48_spill] sm:$0xff]  ;;  %v19660_v42 = vld [vmem:[#allocation51_spill] sm:$0xff] }
0x14cd   :  { %10802 = vst [vmem:[%s18875_s4 + $0x10] sm:$0xff] %v6476_v26  ;;  %6543 = vmatmul.mubr.f32.vlgmr.msra.gmra.mrb[38].mxu0 %v6476_v26  ;;  %6614 = vmatmul.mubr.f32.vlgmr.msra.gmra.mrb[38].mxu1 %v6476_v26  ;;  %v19661_v26 = vld [vmem:[#allocation49_spill] sm:$0xff] }
0x14ce   :  { %13361 = vmatpush1.bf16.msra.mxu0 %v17380_v31  ;;  %13393 = vmatpush1.bf16.msra.mxu1 %v17384_v56 }
0x14cf   :  { %13363 = vmatprep.subr.bf16.mxu0 %v17390_v39  ;;  %13395 = vmatprep.subr.bf16.mxu1 %v17392_v16 }
0x14d0   :  { %6684 = vmatprep.mubr.f32.mxu0 %v19235_v45  ;;  %6755 = vmatprep.mubr.f32.mxu1 %v19235_v45 }
0x14d2   :  { %13365 = vmatpush1.bf16.msra.mxu0 %v17394_v47  ;;  %13397 = vmatpush1.bf16.msra.mxu1 %v17399_v54 }
0x14d3   :  { %13367 = vmatprep.subr.bf16.mxu0 %v17404_v60  ;;  %13399 = vmatprep.subr.bf16.mxu1 %v17406_v50 }
0x14d6   :  { %13369 = vmatpush1.bf16.msra.mxu0 %v17408_v22  ;;  %13401 = vmatpush1.bf16.msra.mxu1 %v19600_v6 }
0x14d7   :  { %13371 = vmatprep.subr.bf16.mxu0 %v19601_v40  ;;  %13403 = vmatprep.subr.bf16.mxu1 %v19602_v57 }
0x14da   :  { %13373 = vmatpush1.bf16.msra.mxu0 %v19603_v21  ;;  %13405 = vmatpush1.bf16.msra.mxu1 %v19604_v27 }
0x14db   :  { %13375 = vmatprep.subr.bf16.mxu0 %v19605_v11  ;;  %13407 = vmatprep.subr.bf16.mxu1 %v19606_v23 }
0x14de   :  { %13377 = vmatpush1.bf16.msra.mxu0 %v19623_v62  ;;  %13409 = vmatpush1.bf16.msra.mxu1 %v19624_v55 }
0x14df   :  { %13379 = vmatprep.subr.bf16.mxu0 %v19625_v30  ;;  %13411 = vmatprep.subr.bf16.mxu1 %v19626_v25 }
0x14e2   :  { %13381 = vmatpush1.bf16.msra.mxu0 %v19627_v1  ;;  %13413 = vmatpush1.bf16.msra.mxu1 %v19612_v28 }
0x14e3   :  { %13383 = vmatprep.subr.bf16.mxu0 %v17452_v0  ;;  %13415 = vmatprep.subr.bf16.mxu1 %v19613_v58 }
0x14e6   :  { %13385 = vmatpush1.bf16.msra.mxu0 %v17456_v48  ;;  %13417 = vmatpush1.bf16.msra.mxu1 %v19614_v49 }
0x14e7   :  { %13387 = vmatprep.subr.bf16.mxu0 %v19615_v36  ;;  %13419 = vmatprep.subr.bf16.mxu1 %v19616_v20 }
0x14ea   :  { %13389 = vmatpush1.bf16.msra.mxu0 %v19617_v44  ;;  %13421 = vmatpush1.bf16.msra.mxu1 %v19618_v43 }
0x14eb   :  { %13423 = vmatprep.subr.bf16.mxu0 %v19619_v7  ;;  %13455 = vmatprep.subr.bf16.mxu1 %v19620_v29 }
0x14ed   :  { %6685 = vmatmul.mubr.f32.vlgmr.msra.gmra.mrb[38].mxu0 %v17483_v24  ;;  %6756 = vmatmul.mubr.f32.vlgmr.msra.gmra.mrb[38].mxu1 %v17483_v24 }
0x14ee   :  { %13425 = vmatpush1.bf16.msra.mxu0 %v17282_v35  ;;  %13457 = vmatpush1.bf16.msra.mxu1 %v17284_v18 }
0x14ef   :  { %13427 = vmatprep.subr.bf16.mxu0 %v17288_v46  ;;  %13459 = vmatprep.subr.bf16.mxu1 %v17290_v37 }
0x14f0   :  { %6855 = vmatprep.mubr.f32.mxu0 %v19235_v45  ;;  %6926 = vmatprep.mubr.f32.mxu1 %v19235_v45 }
0x14f2   :  { %13429 = vmatpush1.bf16.msra.mxu0 %v17294_v5  ;;  %13461 = vmatpush1.bf16.msra.mxu1 %v17296_v34 }
0x14f3   :  { %13431 = vmatprep.subr.bf16.mxu0 %v17300_v9  ;;  %13463 = vmatprep.subr.bf16.mxu1 %v17302_v38 }
0x14f6   :  { %13433 = vmatpush1.bf16.msra.mxu0 %v17308_v17  ;;  %13465 = vmatpush1.bf16.msra.mxu1 %v17310_v41 }
0x14f7   :  { %13435 = vmatprep.subr.bf16.mxu0 %v19646_v15  ;;  %13467 = vmatprep.subr.bf16.mxu1 %v19647_v32 }
0x14fa   :  { %13437 = vmatpush1.bf16.msra.mxu0 %v19648_v59  ;;  %13469 = vmatpush1.bf16.msra.mxu1 %v19649_v53 }
0x14fb   :  { %13439 = vmatprep.subr.bf16.mxu0 %v19650_v10  ;;  %13471 = vmatprep.subr.bf16.mxu1 %v19651_v19  ;;  %v19662_v19 = vld [vmem:[#allocation29_spill] sm:$0xff]  ;;  %v19668_v10 = vld [vmem:[#allocation55_spill] sm:$0xff] }
0x14fe   :  { %13441 = vmatpush1.bf16.msra.mxu0 %v19652_v63  ;;  %13473 = vmatpush1.bf16.msra.mxu1 %v19653_v12  ;;  %v19663_v63 = vld [vmem:[#allocation30_spill] sm:$0xff]  ;;  %v19664_v12 = vld [vmem:[#allocation31_spill] sm:$0xff] }
0x14ff   :  { %13443 = vmatprep.subr.bf16.mxu0 %v19654_v13  ;;  %13475 = vmatprep.subr.bf16.mxu1 %v19655_v8  ;;  %v19665_v13 = vld [vmem:[#allocation32_spill] sm:$0xff]  ;;  %v19666_v8 = vld [vmem:[#allocation33_spill] sm:$0xff] }
0x1502   :  { %13445 = vmatpush1.bf16.msra.mxu0 %v19656_v61  ;;  %13477 = vmatpush1.bf16.msra.mxu1 %v19657_v4  ;;  %v19667_v61 = vld [vmem:[#allocation34_spill] sm:$0xff] }
0x1503   :  { %13447 = vmatprep.subr.bf16.mxu0 %v19658_v2  ;;  %13479 = vmatprep.subr.bf16.mxu1 %v19659_v52 }
0x1506   :  { %13449 = vmatpush1.bf16.msra.mxu0 %v19660_v42  ;;  %13481 = vmatpush1.bf16.msra.mxu1 %v19661_v26 }
0x1507   :  { %13451 = vmatprep.subr.bf16.mxu0 %v19662_v19  ;;  %13483 = vmatprep.subr.bf16.mxu1 %v19663_v63 }
0x150a   :  { %13453 = vmatpush1.bf16.msra.mxu0 %v19664_v12  ;;  %13485 = vmatpush1.bf16.msra.mxu1 %v19665_v13 }
0x150b   :  { %13487 = vmatprep.subr.bf16.mxu0 %v19666_v8  ;;  %13519 = vmatprep.subr.bf16.mxu1 %v19667_v61 }
0x15c0   :  { %v6686_v4 = vpop.f32.mrb[38].mxu0  ;;  %v6757_v2 = vpop.f32.mrb[38].mxu1 }
0x15c1   :  { %v6762_v52 = vadd.f32 %v6686_v4, %v19668_v10  ;;  %v6688_v53 = vpop.f32.mrb[39].mxu0  ;;  %v6759_v42 = vpop.f32.mrb[39].mxu1  ;;  %v6764_v12 = vadd.f32 %v6757_v2, %v17533_v33 }
0x15c2   :  { %v6763_v26 = vadd.f32 %v6688_v53, %v19622_v14  ;;  %v6765_v13 = vadd.f32 %v6759_v42, %v17536_v51  ;;  %v19675_v42 = vld [vmem:[#allocation25_spill] sm:$0xff] }
0x15c3   :  { %v10803_v59 = vmul.f32 -1.442695, %v6762_v52  ;;  %v10805_v63 = vmul.f32 -1.442695, %v6764_v12 }
0x15c4   :  { %v10804_v19 = vmul.f32 -1.442695, %v6763_v26 }
0x15c5   :  { %15395 = vpow2.f32 %v10803_v59 }
0x15c6   :  { %15397 = vpow2.f32 %v10804_v19 }
0x15c7   :  { %15399 = vtanh.f32 %v6765_v13 }
0x15c8   :  { %15401 = vpow2.f32 %v10805_v63  ;;  %v19673_v63 = vld [vmem:[#allocation23_spill] sm:$0xff] }
0x15cf   :  { %v15396_v8 = vpop.eup %15395 }
0x15d0   :  { %v6775_v32 = vadd.f32 1.0, %v15396_v8  ;;  %v15398_v61 = vpop.eup %15397 }
0x15d1   :  { %v6776_v4 = vadd.f32 1.0, %v15398_v61  ;;  %v15400_v10 = vpop.eup %15399  ;;  %v19674_v61 = vld [vmem:[#allocation24_spill] sm:$0xff] }
0x15d2   :  { %15403 = vrcp.f32 %v6775_v32  ;;  %v15402_v15 = vpop.eup %15401  ;;  %v19671_v32 = vld [vmem:[#allocation21_spill] sm:$0xff] }
0x15d3   :  { %15405 = vrcp.f32 %v6776_v4  ;;  %v6777_v59 = vadd.f32 1.0, %v15402_v15  ;;  %v19670_v15 = vld [vmem:[#allocation20_spill] sm:$0xff]  ;;  %v19676_v4 = vld [vmem:[#allocation26_spill] sm:$0xff] }
0x15d5   :  { %15407 = vrcp.f32 %v6777_v59  ;;  %v19680_v59 = vld [vmem:[#allocation46_spill] sm:$0xff] }
0x15dc   :  { %v15404_v53 = vpop.eup %15403 }
0x15dd   :  { %v6786_v52 = vmul.f32 %v15404_v53, %v15400_v10  ;;  %v15406_v26 = vpop.eup %15405  ;;  %v19672_v10 = vld [vmem:[#allocation22_spill] sm:$0xff]  ;;  %v19677_v53 = vld [vmem:[#allocation27_spill] sm:$0xff] }
0x15de   :  { %v6785_v19 = vmul.f32 %v15406_v26, %v17702_v3  ;;  %v19669_v3 = vld [vmem:[#allocation19_spill] sm:$0xff]  ;;  %v19679_v26 = vld [vmem:[#allocation41_spill] sm:$0xff] }
0x15df   :  { %v15408_v12 = vpop.eup %15407 }
0x15e0   :  { %v17783_v2 = vadd.f32 %v6786_v52, %v6785_v19  ;;  %v19678_v52 = vld [vmem:[#allocation28_spill] sm:$0xff]  ;;  %v19681_v19 = vld [vmem:[#allocation47_spill] sm:$0xff] }
0x15e2   :  { %15409 = vtanh.f32 %v17783_v2 }
0x15ec   :  { %v15410_v13 = vpop.eup %15409 }
0x15ed   :  { %v6789_v8 = vmul.f32 %v15410_v13, %v15408_v12  ;;  %v19682_v12 = vld [vmem:[#allocation48_spill] sm:$0xff]  ;;  %v19683_v13 = vld [vmem:[#allocation51_spill] sm:$0xff] }
0x15ef   :  { %10806 = vst [vmem:[%s18875_s4 + $0x18] sm:$0xff] %v6789_v8  ;;  %6856 = vmatmul.mubr.f32.vlgmr.msra.gmra.mrb[40].mxu0 %v6789_v8  ;;  %6927 = vmatmul.mubr.f32.vlgmr.msra.gmra.mrb[40].mxu1 %v6789_v8  ;;  %v19684_v8 = vld [vmem:[#allocation49_spill] sm:$0xff] }
0x15f0   :  { %13489 = vmatpush1.bf16.msra.mxu0 %v17380_v31  ;;  %13521 = vmatpush1.bf16.msra.mxu1 %v17384_v56 }
0x15f1   :  { %13491 = vmatprep.subr.bf16.mxu0 %v17390_v39  ;;  %13523 = vmatprep.subr.bf16.mxu1 %v17392_v16 }
0x15f2   :  { %6997 = vmatprep.mubr.f32.mxu0 %v19235_v45  ;;  %7068 = vmatprep.mubr.f32.mxu1 %v19235_v45 }
0x15f4   :  { %13493 = vmatpush1.bf16.msra.mxu0 %v17394_v47  ;;  %13525 = vmatpush1.bf16.msra.mxu1 %v17399_v54 }
0x15f5   :  { %13495 = vmatprep.subr.bf16.mxu0 %v17404_v60  ;;  %13527 = vmatprep.subr.bf16.mxu1 %v17406_v50 }
0x15f8   :  { %13497 = vmatpush1.bf16.msra.mxu0 %v17408_v22  ;;  %13529 = vmatpush1.bf16.msra.mxu1 %v19600_v6 }
0x15f9   :  { %13499 = vmatprep.subr.bf16.mxu0 %v19601_v40  ;;  %13531 = vmatprep.subr.bf16.mxu1 %v19602_v57 }
0x15fc   :  { %13501 = vmatpush1.bf16.msra.mxu0 %v19603_v21  ;;  %13533 = vmatpush1.bf16.msra.mxu1 %v19604_v27 }
0x15fd   :  { %13503 = vmatprep.subr.bf16.mxu0 %v19605_v11  ;;  %13535 = vmatprep.subr.bf16.mxu1 %v19606_v23 }
0x1600   :  { %13505 = vmatpush1.bf16.msra.mxu0 %v19623_v62  ;;  %13537 = vmatpush1.bf16.msra.mxu1 %v19624_v55 }
0x1601   :  { %13507 = vmatprep.subr.bf16.mxu0 %v19625_v30  ;;  %13539 = vmatprep.subr.bf16.mxu1 %v19626_v25 }
0x1604   :  { %13509 = vmatpush1.bf16.msra.mxu0 %v19627_v1  ;;  %13541 = vmatpush1.bf16.msra.mxu1 %v19612_v28 }
0x1605   :  { %13511 = vmatprep.subr.bf16.mxu0 %v17452_v0  ;;  %13543 = vmatprep.subr.bf16.mxu1 %v19613_v58 }
0x1608   :  { %13513 = vmatpush1.bf16.msra.mxu0 %v17456_v48  ;;  %13545 = vmatpush1.bf16.msra.mxu1 %v19614_v49 }
0x1609   :  { %13515 = vmatprep.subr.bf16.mxu0 %v19615_v36  ;;  %13547 = vmatprep.subr.bf16.mxu1 %v19616_v20 }
0x160c   :  { %13517 = vmatpush1.bf16.msra.mxu0 %v19617_v44  ;;  %13549 = vmatpush1.bf16.msra.mxu1 %v19618_v43 }
0x160d   :  { %13551 = vmatprep.subr.bf16.mxu0 %v19619_v7  ;;  %13583 = vmatprep.subr.bf16.mxu1 %v19620_v29 }
0x160f   :  { %6998 = vmatmul.mubr.f32.vlgmr.msra.gmra.mrb[40].mxu0 %v17483_v24  ;;  %7069 = vmatmul.mubr.f32.vlgmr.msra.gmra.mrb[40].mxu1 %v17483_v24 }
0x1610   :  { %13553 = vmatpush1.bf16.msra.mxu0 %v17282_v35  ;;  %13585 = vmatpush1.bf16.msra.mxu1 %v17284_v18 }
0x1611   :  { %13555 = vmatprep.subr.bf16.mxu0 %v17288_v46  ;;  %13587 = vmatprep.subr.bf16.mxu1 %v17290_v37 }
0x1612   :  { %7168 = vmatprep.mubr.f32.mxu0 %v19235_v45  ;;  %7239 = vmatprep.mubr.f32.mxu1 %v19235_v45 }
0x1614   :  { %13557 = vmatpush1.bf16.msra.mxu0 %v17294_v5  ;;  %13589 = vmatpush1.bf16.msra.mxu1 %v17296_v34 }
0x1615   :  { %13559 = vmatprep.subr.bf16.mxu0 %v17300_v9  ;;  %13591 = vmatprep.subr.bf16.mxu1 %v17302_v38 }
0x1618   :  { %13561 = vmatpush1.bf16.msra.mxu0 %v17308_v17  ;;  %13593 = vmatpush1.bf16.msra.mxu1 %v17310_v41 }
0x1619   :  { %13563 = vmatprep.subr.bf16.mxu0 %v19669_v3  ;;  %13595 = vmatprep.subr.bf16.mxu1 %v19670_v15 }
0x161c   :  { %13565 = vmatpush1.bf16.msra.mxu0 %v19671_v32  ;;  %13597 = vmatpush1.bf16.msra.mxu1 %v19672_v10 }
0x161d   :  { %13567 = vmatprep.subr.bf16.mxu0 %v19673_v63  ;;  %13599 = vmatprep.subr.bf16.mxu1 %v19674_v61  ;;  %v19685_v61 = vld [vmem:[#allocation29_spill] sm:$0xff]  ;;  %v19691_v63 = vld [vmem:[#allocation55_spill] sm:$0xff] }
0x1620   :  { %13569 = vmatpush1.bf16.msra.mxu0 %v19675_v42  ;;  %13601 = vmatpush1.bf16.msra.mxu1 %v19676_v4  ;;  %v19686_v42 = vld [vmem:[#allocation30_spill] sm:$0xff]  ;;  %v19687_v4 = vld [vmem:[#allocation31_spill] sm:$0xff] }
0x1621   :  { %13571 = vmatprep.subr.bf16.mxu0 %v19677_v53  ;;  %13603 = vmatprep.subr.bf16.mxu1 %v19678_v52  ;;  %v19688_v53 = vld [vmem:[#allocation32_spill] sm:$0xff]  ;;  %v19689_v52 = vld [vmem:[#allocation33_spill] sm:$0xff] }
0x1624   :  { %13573 = vmatpush1.bf16.msra.mxu0 %v19679_v26  ;;  %13605 = vmatpush1.bf16.msra.mxu1 %v19680_v59  ;;  %v19690_v26 = vld [vmem:[#allocation34_spill] sm:$0xff] }
0x1625   :  { %13575 = vmatprep.subr.bf16.mxu0 %v19681_v19  ;;  %13607 = vmatprep.subr.bf16.mxu1 %v19682_v12 }
0x1628   :  { %13577 = vmatpush1.bf16.msra.mxu0 %v19683_v13  ;;  %13609 = vmatpush1.bf16.msra.mxu1 %v19684_v8 }
0x1629   :  { %13579 = vmatprep.subr.bf16.mxu0 %v19685_v61  ;;  %13611 = vmatprep.subr.bf16.mxu1 %v19686_v42 }
0x162c   :  { %13581 = vmatpush1.bf16.msra.mxu0 %v19687_v4  ;;  %13613 = vmatpush1.bf16.msra.mxu1 %v19688_v53 }
0x162d   :  { %13615 = vmatprep.subr.bf16.mxu0 %v19689_v52  ;;  %13647 = vmatprep.subr.bf16.mxu1 %v19690_v26 }
0x16e2   :  { %v6999_v59 = vpop.f32.mrb[40].mxu0  ;;  %v7070_v19 = vpop.f32.mrb[40].mxu1 }
0x16e3   :  { %v7075_v12 = vadd.f32 %v6999_v59, %v19691_v63  ;;  %v7001_v10 = vpop.f32.mrb[41].mxu0  ;;  %v7072_v13 = vpop.f32.mrb[41].mxu1  ;;  %v7077_v4 = vadd.f32 %v7070_v19, %v17533_v33 }
0x16e4   :  { %v7076_v8 = vadd.f32 %v7001_v10, %v19622_v14  ;;  %v7078_v53 = vadd.f32 %v7072_v13, %v17536_v51  ;;  %v19698_v13 = vld [vmem:[#allocation25_spill] sm:$0xff] }
0x16e5   :  { %v10807_v32 = vmul.f32 -1.442695, %v7075_v12  ;;  %v10809_v42 = vmul.f32 -1.442695, %v7077_v4 }
0x16e6   :  { %v10808_v61 = vmul.f32 -1.442695, %v7076_v8 }
0x16e7   :  { %15411 = vpow2.f32 %v10807_v32 }
0x16e8   :  { %15413 = vpow2.f32 %v10808_v61 }
0x16e9   :  { %15415 = vtanh.f32 %v7078_v53 }
0x16ea   :  { %15417 = vpow2.f32 %v10809_v42  ;;  %v19696_v42 = vld [vmem:[#allocation23_spill] sm:$0xff] }
0x16f1   :  { %v15412_v52 = vpop.eup %15411 }
0x16f2   :  { %v7088_v15 = vadd.f32 1.0, %v15412_v52  ;;  %v15414_v26 = vpop.eup %15413 }
0x16f3   :  { %v7089_v59 = vadd.f32 1.0, %v15414_v26  ;;  %v15416_v63 = vpop.eup %15415  ;;  %v19697_v26 = vld [vmem:[#allocation24_spill] sm:$0xff] }
0x16f4   :  { %15419 = vrcp.f32 %v7088_v15  ;;  %v15418_v3 = vpop.eup %15417  ;;  %v19694_v15 = vld [vmem:[#allocation21_spill] sm:$0xff] }
0x16f5   :  { %15421 = vrcp.f32 %v7089_v59  ;;  %v7090_v32 = vadd.f32 1.0, %v15418_v3  ;;  %v19693_v3 = vld [vmem:[#allocation20_spill] sm:$0xff]  ;;  %v19699_v59 = vld [vmem:[#allocation26_spill] sm:$0xff] }
0x16f7   :  { %15423 = vrcp.f32 %v7090_v32  ;;  %v19703_v32 = vld [vmem:[#allocation46_spill] sm:$0xff] }
0x16fe   :  { %v15420_v10 = vpop.eup %15419 }
0x16ff   :  { %v7099_v12 = vmul.f32 %v15420_v10, %v15416_v63  ;;  %v15422_v8 = vpop.eup %15421  ;;  %v19695_v63 = vld [vmem:[#allocation22_spill] sm:$0xff]  ;;  %v19700_v10 = vld [vmem:[#allocation27_spill] sm:$0xff] }
0x1700   :  { %v7098_v61 = vmul.f32 %v15422_v8, %v17783_v2  ;;  %v19692_v2 = vld [vmem:[#allocation19_spill] sm:$0xff]  ;;  %v19702_v8 = vld [vmem:[#allocation41_spill] sm:$0xff] }
0x1701   :  { %v15424_v4 = vpop.eup %15423 }
0x1702   :  { %v17864_v19 = vadd.f32 %v7099_v12, %v7098_v61  ;;  %v19701_v12 = vld [vmem:[#allocation28_spill] sm:$0xff]  ;;  %v19704_v61 = vld [vmem:[#allocation47_spill] sm:$0xff] }
0x1704   :  { %15425 = vtanh.f32 %v17864_v19 }
0x170e   :  { %v15426_v53 = vpop.eup %15425 }
0x170f   :  { %v7102_v52 = vmul.f32 %v15426_v53, %v15424_v4  ;;  %v19705_v4 = vld [vmem:[#allocation48_spill] sm:$0xff]  ;;  %v19706_v53 = vld [vmem:[#allocation51_spill] sm:$0xff] }
0x1711   :  { %10810 = vst [vmem:[%s18875_s4 + $0x20] sm:$0xff] %v7102_v52  ;;  %7169 = vmatmul.mubr.f32.vlgmr.msra.gmra.mrb[42].mxu0 %v7102_v52  ;;  %7240 = vmatmul.mubr.f32.vlgmr.msra.gmra.mrb[42].mxu1 %v7102_v52  ;;  %v19707_v52 = vld [vmem:[#allocation49_spill] sm:$0xff] }
0x1712   :  { %13617 = vmatpush1.bf16.msra.mxu0 %v17380_v31  ;;  %13649 = vmatpush1.bf16.msra.mxu1 %v17384_v56 }
0x1713   :  { %13619 = vmatprep.subr.bf16.mxu0 %v17390_v39  ;;  %13651 = vmatprep.subr.bf16.mxu1 %v17392_v16 }
0x1714   :  { %7310 = vmatprep.mubr.f32.mxu0 %v19235_v45  ;;  %7381 = vmatprep.mubr.f32.mxu1 %v19235_v45 }
0x1716   :  { %13621 = vmatpush1.bf16.msra.mxu0 %v17394_v47  ;;  %13653 = vmatpush1.bf16.msra.mxu1 %v17399_v54 }
0x1717   :  { %13623 = vmatprep.subr.bf16.mxu0 %v17404_v60  ;;  %13655 = vmatprep.subr.bf16.mxu1 %v17406_v50 }
0x171a   :  { %13625 = vmatpush1.bf16.msra.mxu0 %v17408_v22  ;;  %13657 = vmatpush1.bf16.msra.mxu1 %v19600_v6 }
0x171b   :  { %13627 = vmatprep.subr.bf16.mxu0 %v19601_v40  ;;  %13659 = vmatprep.subr.bf16.mxu1 %v19602_v57 }
0x171e   :  { %13629 = vmatpush1.bf16.msra.mxu0 %v19603_v21  ;;  %13661 = vmatpush1.bf16.msra.mxu1 %v19604_v27 }
0x171f   :  { %13631 = vmatprep.subr.bf16.mxu0 %v19605_v11  ;;  %13663 = vmatprep.subr.bf16.mxu1 %v19606_v23 }
0x1722   :  { %13633 = vmatpush1.bf16.msra.mxu0 %v19623_v62  ;;  %13665 = vmatpush1.bf16.msra.mxu1 %v19624_v55 }
0x1723   :  { %13635 = vmatprep.subr.bf16.mxu0 %v19625_v30  ;;  %13667 = vmatprep.subr.bf16.mxu1 %v19626_v25 }
0x1726   :  { %13637 = vmatpush1.bf16.msra.mxu0 %v19627_v1  ;;  %13669 = vmatpush1.bf16.msra.mxu1 %v19612_v28 }
0x1727   :  { %13639 = vmatprep.subr.bf16.mxu0 %v17452_v0  ;;  %13671 = vmatprep.subr.bf16.mxu1 %v19613_v58 }
0x172a   :  { %13641 = vmatpush1.bf16.msra.mxu0 %v17456_v48  ;;  %13673 = vmatpush1.bf16.msra.mxu1 %v19614_v49 }
0x172b   :  { %13643 = vmatprep.subr.bf16.mxu0 %v19615_v36  ;;  %13675 = vmatprep.subr.bf16.mxu1 %v19616_v20 }
0x172e   :  { %13645 = vmatpush1.bf16.msra.mxu0 %v19617_v44  ;;  %13677 = vmatpush1.bf16.msra.mxu1 %v19618_v43 }
0x172f   :  { %13679 = vmatprep.subr.bf16.mxu0 %v19619_v7  ;;  %13711 = vmatprep.subr.bf16.mxu1 %v19620_v29 }
0x1731   :  { %7311 = vmatmul.mubr.f32.vlgmr.msra.gmra.mrb[42].mxu0 %v17483_v24  ;;  %7382 = vmatmul.mubr.f32.vlgmr.msra.gmra.mrb[42].mxu1 %v17483_v24 }
0x1732   :  { %13681 = vmatpush1.bf16.msra.mxu0 %v17282_v35  ;;  %13713 = vmatpush1.bf16.msra.mxu1 %v17284_v18 }
0x1733   :  { %13683 = vmatprep.subr.bf16.mxu0 %v17288_v46  ;;  %13715 = vmatprep.subr.bf16.mxu1 %v17290_v37 }
0x1734   :  { %7481 = vmatprep.mubr.f32.mxu0 %v19235_v45  ;;  %7552 = vmatprep.mubr.f32.mxu1 %v19235_v45 }
0x1736   :  { %13685 = vmatpush1.bf16.msra.mxu0 %v17294_v5  ;;  %13717 = vmatpush1.bf16.msra.mxu1 %v17296_v34 }
0x1737   :  { %13687 = vmatprep.subr.bf16.mxu0 %v17300_v9  ;;  %13719 = vmatprep.subr.bf16.mxu1 %v17302_v38 }
0x173a   :  { %13689 = vmatpush1.bf16.msra.mxu0 %v17308_v17  ;;  %13721 = vmatpush1.bf16.msra.mxu1 %v17310_v41 }
0x173b   :  { %13691 = vmatprep.subr.bf16.mxu0 %v19692_v2  ;;  %13723 = vmatprep.subr.bf16.mxu1 %v19693_v3 }
0x173e   :  { %13693 = vmatpush1.bf16.msra.mxu0 %v19694_v15  ;;  %13725 = vmatpush1.bf16.msra.mxu1 %v19695_v63 }
0x173f   :  { %13695 = vmatprep.subr.bf16.mxu0 %v19696_v42  ;;  %13727 = vmatprep.subr.bf16.mxu1 %v19697_v26  ;;  %v19708_v26 = vld [vmem:[#allocation29_spill] sm:$0xff]  ;;  %v19714_v42 = vld [vmem:[#allocation55_spill] sm:$0xff] }
0x1742   :  { %13697 = vmatpush1.bf16.msra.mxu0 %v19698_v13  ;;  %13729 = vmatpush1.bf16.msra.mxu1 %v19699_v59  ;;  %v19709_v13 = vld [vmem:[#allocation30_spill] sm:$0xff]  ;;  %v19710_v59 = vld [vmem:[#allocation31_spill] sm:$0xff] }
0x1743   :  { %13699 = vmatprep.subr.bf16.mxu0 %v19700_v10  ;;  %13731 = vmatprep.subr.bf16.mxu1 %v19701_v12  ;;  %v19711_v10 = vld [vmem:[#allocation32_spill] sm:$0xff]  ;;  %v19712_v12 = vld [vmem:[#allocation33_spill] sm:$0xff] }
0x1746   :  { %13701 = vmatpush1.bf16.msra.mxu0 %v19702_v8  ;;  %13733 = vmatpush1.bf16.msra.mxu1 %v19703_v32  ;;  %v19713_v8 = vld [vmem:[#allocation34_spill] sm:$0xff] }
0x1747   :  { %13703 = vmatprep.subr.bf16.mxu0 %v19704_v61  ;;  %13735 = vmatprep.subr.bf16.mxu1 %v19705_v4 }
0x174a   :  { %13705 = vmatpush1.bf16.msra.mxu0 %v19706_v53  ;;  %13737 = vmatpush1.bf16.msra.mxu1 %v19707_v52 }
0x174b   :  { %13707 = vmatprep.subr.bf16.mxu0 %v19708_v26  ;;  %13739 = vmatprep.subr.bf16.mxu1 %v19709_v13 }
0x174e   :  { %13709 = vmatpush1.bf16.msra.mxu0 %v19710_v59  ;;  %13741 = vmatpush1.bf16.msra.mxu1 %v19711_v10 }
0x174f   :  { %13743 = vmatprep.subr.bf16.mxu0 %v19712_v12  ;;  %13775 = vmatprep.subr.bf16.mxu1 %v19713_v8 }
0x1804   :  { %v7312_v32 = vpop.f32.mrb[42].mxu0  ;;  %v7383_v61 = vpop.f32.mrb[42].mxu1 }
0x1805   :  { %v7388_v4 = vadd.f32 %v7312_v32, %v19714_v42  ;;  %v7314_v63 = vpop.f32.mrb[43].mxu0  ;;  %v7385_v53 = vpop.f32.mrb[43].mxu1  ;;  %v7390_v59 = vadd.f32 %v7383_v61, %v17533_v33 }
0x1806   :  { %v7389_v52 = vadd.f32 %v7314_v63, %v19622_v14  ;;  %v7391_v10 = vadd.f32 %v7385_v53, %v17536_v51  ;;  %v19733_v53 = vld [vmem:[#allocation31_spill] sm:$0xff] }
0x1807   :  { %v10811_v15 = vmul.f32 -1.442695, %v7388_v4  ;;  %v10813_v13 = vmul.f32 -1.442695, %v7390_v59 }
0x1808   :  { %v10812_v26 = vmul.f32 -1.442695, %v7389_v52 }
0x1809   :  { %15427 = vpow2.f32 %v10811_v15 }
0x180a   :  { %15429 = vpow2.f32 %v10812_v26 }
0x180b   :  { %15431 = vtanh.f32 %v7391_v10 }
0x180c   :  { %15433 = vpow2.f32 %v10813_v13  ;;  %v19731_v13 = vld [vmem:[#allocation29_spill] sm:$0xff] }
0x1813   :  { %v15428_v12 = vpop.eup %15427 }
0x1814   :  { %v7401_v3 = vadd.f32 1.0, %v15428_v12  ;;  %v15430_v8 = vpop.eup %15429 }
0x1815   :  { %v7402_v32 = vadd.f32 1.0, %v15430_v8  ;;  %v15432_v42 = vpop.eup %15431  ;;  %v19732_v8 = vld [vmem:[#allocation30_spill] sm:$0xff] }
0x1816   :  { %15435 = vrcp.f32 %v7401_v3  ;;  %v15434_v2 = vpop.eup %15433  ;;  %v19729_v3 = vld [vmem:[#allocation51_spill] sm:$0xff] }
0x1817   :  { %15437 = vrcp.f32 %v7402_v32  ;;  %v7403_v15 = vadd.f32 1.0, %v15434_v2  ;;  %v19728_v2 = vld [vmem:[#allocation48_spill] sm:$0xff] }
0x1818   :  { %v19734_v32 = vld [vmem:[#allocation32_spill] sm:$0xff] }
0x1819   :  { %15439 = vrcp.f32 %v7403_v15 }
0x1820   :  { %v15436_v63 = vpop.eup %15435 }
0x1821   :  { %v7412_v4 = vmul.f32 %v15436_v63, %v15432_v42  ;;  %v15438_v52 = vpop.eup %15437  ;;  %v19730_v42 = vld [vmem:[#allocation49_spill] sm:$0xff] }
0x1822   :  { %v7411_v26 = vmul.f32 %v15438_v52, %v17864_v19  ;;  %v19727_v19 = vld [vmem:[#allocation47_spill] sm:$0xff]  ;;  %v19735_v63 = vld [vmem:[#allocation33_spill] sm:$0xff] }
0x1823   :  { %v15440_v59 = vpop.eup %15439 }
0x1824   :  { %v17945_v61 = vadd.f32 %v7412_v4, %v7411_v26  ;;  %v19736_v4 = vld [vmem:[#allocation34_spill] sm:$0xff]  ;;  %v19737_v26 = vld [vmem:[#allocation55_spill] sm:$0xff] }
0x1826   :  { %15441 = vtanh.f32 %v17945_v61 }
0x1830   :  { %v15442_v10 = vpop.eup %15441 }
0x1831   :  { %v7415_v12 = vmul.f32 %v15442_v10, %v15440_v59 }
0x1833   :  { %10814 = vst [vmem:[%s18875_s4 + $0x28] sm:$0xff] %v7415_v12  ;;  %7482 = vmatmul.mubr.f32.vlgmr.msra.gmra.mrb[44].mxu0 %v7415_v12  ;;  %7553 = vmatmul.mubr.f32.vlgmr.msra.gmra.mrb[44].mxu1 %v7415_v12 }
0x1834   :  { %13745 = vmatpush1.bf16.msra.mxu0 %v17380_v31  ;;  %13777 = vmatpush1.bf16.msra.mxu1 %v17384_v56 }
0x1835   :  { %13747 = vmatprep.subr.bf16.mxu0 %v17390_v39  ;;  %13779 = vmatprep.subr.bf16.mxu1 %v17392_v16 }
0x1836   :  { %7623 = vmatprep.mubr.f32.mxu0 %v19235_v45  ;;  %7694 = vmatprep.mubr.f32.mxu1 %v19235_v45 }
0x1838   :  { %13749 = vmatpush1.bf16.msra.mxu0 %v17394_v47  ;;  %13781 = vmatpush1.bf16.msra.mxu1 %v17399_v54 }
0x1839   :  { %13751 = vmatprep.subr.bf16.mxu0 %v17404_v60  ;;  %13783 = vmatprep.subr.bf16.mxu1 %v17406_v50 }
0x183c   :  { %13753 = vmatpush1.bf16.msra.mxu0 %v17408_v22  ;;  %13785 = vmatpush1.bf16.msra.mxu1 %v19600_v6 }
0x183d   :  { %13755 = vmatprep.subr.bf16.mxu0 %v19601_v40  ;;  %13787 = vmatprep.subr.bf16.mxu1 %v19602_v57 }
0x1840   :  { %13757 = vmatpush1.bf16.msra.mxu0 %v19603_v21  ;;  %13789 = vmatpush1.bf16.msra.mxu1 %v19604_v27 }
0x1841   :  { %13759 = vmatprep.subr.bf16.mxu0 %v19605_v11  ;;  %13791 = vmatprep.subr.bf16.mxu1 %v19606_v23 }
0x1844   :  { %13761 = vmatpush1.bf16.msra.mxu0 %v19623_v62  ;;  %13793 = vmatpush1.bf16.msra.mxu1 %v19624_v55 }
0x1845   :  { %13763 = vmatprep.subr.bf16.mxu0 %v19625_v30  ;;  %13795 = vmatprep.subr.bf16.mxu1 %v19626_v25 }
0x1848   :  { %13765 = vmatpush1.bf16.msra.mxu0 %v19627_v1  ;;  %13797 = vmatpush1.bf16.msra.mxu1 %v19612_v28 }
0x1849   :  { %13767 = vmatprep.subr.bf16.mxu0 %v17452_v0  ;;  %13799 = vmatprep.subr.bf16.mxu1 %v19613_v58 }
0x184c   :  { %13769 = vmatpush1.bf16.msra.mxu0 %v17456_v48  ;;  %13801 = vmatpush1.bf16.msra.mxu1 %v19614_v49 }
0x184d   :  { %13771 = vmatprep.subr.bf16.mxu0 %v19615_v36  ;;  %13803 = vmatprep.subr.bf16.mxu1 %v19616_v20 }
0x1850   :  { %13773 = vmatpush1.bf16.msra.mxu0 %v19617_v44  ;;  %13805 = vmatpush1.bf16.msra.mxu1 %v19618_v43 }
0x1851   :  { %13807 = vmatprep.subr.bf16.mxu0 %v19619_v7  ;;  %13839 = vmatprep.subr.bf16.mxu1 %v19620_v29  ;;  %v19719_v7 = vld [vmem:[#allocation23_spill] sm:$0xff]  ;;  %v19726_v29 = vld [vmem:[#allocation46_spill] sm:$0xff] }
0x1853   :  { %7624 = vmatmul.mubr.f32.vlgmr.msra.gmra.mrb[44].mxu0 %v17483_v24  ;;  %7695 = vmatmul.mubr.f32.vlgmr.msra.gmra.mrb[44].mxu1 %v17483_v24 }
0x1854   :  { %13809 = vmatpush1.bf16.msra.mxu0 %v17282_v35  ;;  %13841 = vmatpush1.bf16.msra.mxu1 %v17284_v18  ;;  %v19715_v35 = vld [vmem:[#allocation19_spill] sm:$0xff]  ;;  %v19716_v18 = vld [vmem:[#allocation20_spill] sm:$0xff] }
0x1855   :  { %13811 = vmatprep.subr.bf16.mxu0 %v17288_v46  ;;  %13843 = vmatprep.subr.bf16.mxu1 %v17290_v37  ;;  %v19717_v46 = vld [vmem:[#allocation21_spill] sm:$0xff]  ;;  %v19718_v37 = vld [vmem:[#allocation22_spill] sm:$0xff] }
0x1856   :  { %7794 = vmatprep.mubr.f32.mxu0 %v19235_v45  ;;  %7865 = vmatprep.mubr.f32.mxu1 %v19235_v45 }
0x1858   :  { %13813 = vmatpush1.bf16.msra.mxu0 %v17294_v5  ;;  %13845 = vmatpush1.bf16.msra.mxu1 %v17296_v34  ;;  %v19720_v5 = vld [vmem:[#allocation24_spill] sm:$0xff]  ;;  %v19721_v34 = vld [vmem:[#allocation25_spill] sm:$0xff] }
0x1859   :  { %13815 = vmatprep.subr.bf16.mxu0 %v17300_v9  ;;  %13847 = vmatprep.subr.bf16.mxu1 %v17302_v38  ;;  %v19722_v9 = vld [vmem:[#allocation26_spill] sm:$0xff]  ;;  %v19723_v38 = vld [vmem:[#allocation27_spill] sm:$0xff] }
0x185c   :  { %13817 = vmatpush1.bf16.msra.mxu0 %v17308_v17  ;;  %13849 = vmatpush1.bf16.msra.mxu1 %v17310_v41  ;;  %v19724_v17 = vld [vmem:[#allocation28_spill] sm:$0xff]  ;;  %v19725_v41 = vld [vmem:[#allocation41_spill] sm:$0xff] }
0x185d   :  { %13819 = vmatprep.subr.bf16.mxu0 %v19715_v35  ;;  %13851 = vmatprep.subr.bf16.mxu1 %v19716_v18 }
0x1860   :  { %13821 = vmatpush1.bf16.msra.mxu0 %v19717_v46  ;;  %13853 = vmatpush1.bf16.msra.mxu1 %v19718_v37 }
0x1861   :  { %13823 = vmatprep.subr.bf16.mxu0 %v19719_v7  ;;  %13855 = vmatprep.subr.bf16.mxu1 %v19720_v5 }
0x1864   :  { %13825 = vmatpush1.bf16.msra.mxu0 %v19721_v34  ;;  %13857 = vmatpush1.bf16.msra.mxu1 %v19722_v9 }
0x1865   :  { %13827 = vmatprep.subr.bf16.mxu0 %v19723_v38  ;;  %13859 = vmatprep.subr.bf16.mxu1 %v19724_v17 }
0x1868   :  { %13829 = vmatpush1.bf16.msra.mxu0 %v19725_v41  ;;  %13861 = vmatpush1.bf16.msra.mxu1 %v19726_v29 }
0x1869   :  { %13831 = vmatprep.subr.bf16.mxu0 %v19727_v19  ;;  %13863 = vmatprep.subr.bf16.mxu1 %v19728_v2 }
0x186c   :  { %13833 = vmatpush1.bf16.msra.mxu0 %v19729_v3  ;;  %13865 = vmatpush1.bf16.msra.mxu1 %v19730_v42 }
0x186d   :  { %13835 = vmatprep.subr.bf16.mxu0 %v19731_v13  ;;  %13867 = vmatprep.subr.bf16.mxu1 %v19732_v8 }
0x1870   :  { %13837 = vmatpush1.bf16.msra.mxu0 %v19733_v53  ;;  %13869 = vmatpush1.bf16.msra.mxu1 %v19734_v32 }
0x1871   :  { %13871 = vmatprep.subr.bf16.mxu0 %v19735_v63  ;;  %13903 = vmatprep.subr.bf16.mxu1 %v19736_v4 }
0x1926   :  { %v7625_v52 = vpop.f32.mrb[44].mxu0  ;;  %v7696_v15 = vpop.f32.mrb[44].mxu1 }
0x1927   :  { %v7701_v59 = vadd.f32 %v7625_v52, %v19737_v26  ;;  %v7627_v10 = vpop.f32.mrb[45].mxu0  ;;  %v7698_v12 = vpop.f32.mrb[45].mxu1  ;;  %v7703_v37 = vadd.f32 %v7696_v15, %v17533_v33  ;;  %v8127_v52 = vld [vmem:[#allocation4 + $0x690] sm:$0xff]  ;;  %v8134_v15 = vld [vmem:[#allocation4 + $0x6c8] sm:$0xff] }
0x1928   :  { %v7702_v35 = vadd.f32 %v7627_v10, %v19622_v14  ;;  %v7704_v7 = vadd.f32 %v7698_v12, %v17536_v51  ;;  %v8136_v10 = vld [vmem:[#allocation4 + $0x6d8] sm:$0xff] }
0x1929   :  { %v10815_v18 = vmul.f32 -1.442695, %v7701_v59  ;;  %v10817_v5 = vmul.f32 -1.442695, %v7703_v37  ;;  %v8138_v59 = vld [vmem:[#allocation4 + $0x6e8] sm:$0xff]  ;;  %v8140_v12 = vld [vmem:[#allocation4 + $0x6f8] sm:$0xff] }
0x192a   :  { %v10816_v46 = vmul.f32 -1.442695, %v7702_v35  ;;  %v8137_v37 = vld [vmem:[#allocation4 + $0x6e0] sm:$0xff] }
0x192b   :  { %15443 = vpow2.f32 %v10815_v18 }
0x192c   :  { %15445 = vpow2.f32 %v10816_v46  ;;  %v8133_v46 = vld [vmem:[#allocation4 + $0x6c0] sm:$0xff] }
0x192d   :  { %15447 = vtanh.f32 %v7704_v7  ;;  %v18102_v7 = vpack.c.bf16 %v8138_v59, %v8134_v15  ;;  %v8166_v15 = vld [vmem:[#allocation4 + $0x7c8] sm:$0xff] }
0x192e   :  { %15449 = vpow2.f32 %v10817_v5  ;;  %v18104_v5 = vpack.c.bf16 %v8140_v12, %v8136_v10  ;;  %v8170_v59 = vld [vmem:[#allocation4 + $0x7e8] sm:$0xff]  ;;  %v8168_v10 = vld [vmem:[#allocation4 + $0x7d8] sm:$0xff] }
0x192f   :  { %v8172_v12 = vld [vmem:[#allocation4 + $0x7f8] sm:$0xff] }
0x1930   :  { %19738 = vst [vmem:[#allocation35_spill] sm:$0xff] %v18104_v5 }
0x1935   :  { %v15444_v34 = vpop.eup %15443 }
0x1936   :  { %v7714_v9 = vadd.f32 1.0, %v15444_v34  ;;  %v15446_v38 = vpop.eup %15445  ;;  %v8135_v34 = vld [vmem:[#allocation4 + $0x6d0] sm:$0xff] }
0x1937   :  { %v7715_v17 = vadd.f32 1.0, %v15446_v38  ;;  %v15448_v41 = vpop.eup %15447  ;;  %v8142_v38 = vld [vmem:[#allocation4 + $0x708] sm:$0xff] }
0x1938   :  { %15451 = vrcp.f32 %v7714_v9  ;;  %v15450_v29 = vpop.eup %15449  ;;  %v8139_v9 = vld [vmem:[#allocation4 + $0x6f0] sm:$0xff] }
0x1939   :  { %15453 = vrcp.f32 %v7715_v17  ;;  %v7716_v42 = vadd.f32 1.0, %v15450_v29  ;;  %v8146_v17 = vld [vmem:[#allocation4 + $0x728] sm:$0xff]  ;;  %v8148_v29 = vld [vmem:[#allocation4 + $0x738] sm:$0xff] }
0x193b   :  { %15455 = vrcp.f32 %v7716_v42  ;;  %v8145_v42 = vld [vmem:[#allocation4 + $0x720] sm:$0xff] }
0x1942   :  { %v15452_v19 = vpop.eup %15451 }
0x1943   :  { %v7725_v2 = vmul.f32 %v15452_v19, %v15448_v41  ;;  %v15454_v3 = vpop.eup %15453  ;;  %v8144_v41 = vld [vmem:[#allocation4 + $0x718] sm:$0xff]  ;;  %v18108_v19 = vpack.c.bf16 %v8137_v37, %v8133_v46 }
0x1944   :  { %v7724_v13 = vmul.f32 %v15454_v3, %v17945_v61  ;;  %v8141_v3 = vld [vmem:[#allocation4 + $0x700] sm:$0xff] }
0x1945   :  { %v15456_v53 = vpop.eup %15455  ;;  %19739 = vst [vmem:[#allocation36_spill] sm:$0xff] %v18108_v19 }
0x1946   :  { %v18026_v8 = vadd.f32 %v7725_v2, %v7724_v13  ;;  %v18110_v2 = vpack.c.bf16 %v8139_v9, %v8135_v34  ;;  %v18114_v13 = vpack.c.bf16 %v8146_v17, %v8142_v38  ;;  %v8165_v34 = vld [vmem:[#allocation4 + $0x7c0] sm:$0xff]  ;;  %v18150_v38 = vpack.c.bf16 %v8170_v59, %v8166_v15 }
0x1947   :  { %v8169_v9 = vld [vmem:[#allocation4 + $0x7e0] sm:$0xff]  ;;  %v18152_v17 = vpack.c.bf16 %v8172_v12, %v8168_v10  ;;  %v8054_v10 = vld [vmem:[#allocation2 + $0x650] sm:$0xff] }
0x1948   :  { %15457 = vtanh.f32 %v18026_v8  ;;  %19740 = vst [vmem:[#allocation37_spill] sm:$0xff] %v18110_v2  ;;  %19741 = vst [vmem:[#allocation38_spill] sm:$0xff] %v18114_v13  ;;  %v8058_v12 = vld [vmem:[#allocation2 + $0x670] sm:$0xff] }
0x1949   :  { %19753 = vst [vmem:[#allocation18_spill] sm:$0xff] %v18150_v38  ;;  %19754 = vst [vmem:[#allocation56_spill] sm:$0xff] %v18152_v17 }
0x1952   :  { %v15458_v32 = vpop.eup %15457 }
0x1953   :  { %v7728_v63 = vmul.f32 %v15458_v32, %v15456_v53  ;;  %v18116_v53 = vpack.c.bf16 %v8148_v29, %v8144_v41  ;;  %v8143_v32 = vld [vmem:[#allocation4 + $0x710] sm:$0xff] }
0x1954   :  { %v8167_v41 = vld [vmem:[#allocation4 + $0x7d0] sm:$0xff] }
0x1955   :  { %10818 = vst [vmem:[%s18875_s4 + $0x30] sm:$0xff] %v7728_v63  ;;  %7795 = vmatmul.mubr.f32.vlgmr.msra.gmra.mrb[46].mxu0 %v7728_v63  ;;  %7866 = vmatmul.mubr.f32.vlgmr.msra.gmra.mrb[46].mxu1 %v7728_v63  ;;  %19742 = vst [vmem:[#allocation42_spill] sm:$0xff] %v18116_v53  ;;  %v8147_v63 = vld [vmem:[#allocation4 + $0x730] sm:$0xff] }
0x1956   :  { %13873 = vmatpush1.bf16.msra.mxu0 %v17380_v31  ;;  %13905 = vmatpush1.bf16.msra.mxu1 %v17384_v56  ;;  %v8110_v31 = vld [vmem:[#allocation4 + $0x608] sm:$0xff]  ;;  %v8171_v29 = vld [vmem:[#allocation4 + $0x7f0] sm:$0xff] }
0x1957   :  { %13875 = vmatprep.subr.bf16.mxu0 %v17390_v39  ;;  %13907 = vmatprep.subr.bf16.mxu1 %v17392_v16  ;;  %v8114_v56 = vld [vmem:[#allocation4 + $0x628] sm:$0xff]  ;;  %v8112_v39 = vld [vmem:[#allocation4 + $0x618] sm:$0xff] }
0x1958   :  { %7936 = vmatprep.mubr.f32.mxu0 %v19235_v45  ;;  %8007 = vmatprep.mubr.f32.mxu1 %v19235_v45  ;;  %v8116_v16 = vld [vmem:[#allocation4 + $0x638] sm:$0xff] }
0x195a   :  { %13877 = vmatpush1.bf16.msra.mxu0 %v17394_v47  ;;  %13909 = vmatpush1.bf16.msra.mxu1 %v17399_v54  ;;  %v8109_v47 = vld [vmem:[#allocation4 + $0x600] sm:$0xff] }
0x195b   :  { %13879 = vmatprep.subr.bf16.mxu0 %v17404_v60  ;;  %13911 = vmatprep.subr.bf16.mxu1 %v17406_v50  ;;  %v8113_v54 = vld [vmem:[#allocation4 + $0x620] sm:$0xff]  ;;  %v18062_v60 = vpack.c.bf16 %v8114_v56, %v8110_v31  ;;  %v18064_v50 = vpack.c.bf16 %v8116_v16, %v8112_v39  ;;  %v8150_v31 = vld [vmem:[#allocation4 + $0x748] sm:$0xff]  ;;  %v8152_v39 = vld [vmem:[#allocation4 + $0x758] sm:$0xff] }
0x195c   :  { %v8154_v56 = vld [vmem:[#allocation4 + $0x768] sm:$0xff]  ;;  %v8156_v16 = vld [vmem:[#allocation4 + $0x778] sm:$0xff] }
0x195e   :  { %13881 = vmatpush1.bf16.msra.mxu0 %v17408_v22  ;;  %13913 = vmatpush1.bf16.msra.mxu1 %v19600_v6  ;;  %v8111_v22 = vld [vmem:[#allocation4 + $0x610] sm:$0xff]  ;;  %v8118_v6 = vld [vmem:[#allocation4 + $0x648] sm:$0xff] }
0x195f   :  { %13883 = vmatprep.subr.bf16.mxu0 %v19601_v40  ;;  %13915 = vmatprep.subr.bf16.mxu1 %v19602_v57  ;;  %v8122_v40 = vld [vmem:[#allocation4 + $0x668] sm:$0xff]  ;;  %v8120_v57 = vld [vmem:[#allocation4 + $0x658] sm:$0xff] }
0x1962   :  { %13885 = vmatpush1.bf16.msra.mxu0 %v19603_v21  ;;  %13917 = vmatpush1.bf16.msra.mxu1 %v19604_v27  ;;  %v8124_v21 = vld [vmem:[#allocation4 + $0x678] sm:$0xff] }
0x1963   :  { %13887 = vmatprep.subr.bf16.mxu0 %v19605_v11  ;;  %13919 = vmatprep.subr.bf16.mxu1 %v19606_v23  ;;  %v8117_v11 = vld [vmem:[#allocation4 + $0x640] sm:$0xff] }
0x1964   :  { %v8121_v23 = vld [vmem:[#allocation4 + $0x660] sm:$0xff] }
0x1966   :  { %13889 = vmatpush1.bf16.msra.mxu0 %v19623_v62  ;;  %13921 = vmatpush1.bf16.msra.mxu1 %v19624_v55  ;;  %v8128_v62 = vld [vmem:[#allocation4 + $0x698] sm:$0xff]  ;;  %v18082_v55 = vpack.c.bf16 %v8121_v23, %v8117_v11  ;;  %v8158_v11 = vld [vmem:[#allocation4 + $0x788] sm:$0xff] }
0x1967   :  { %13891 = vmatprep.subr.bf16.mxu0 %v19625_v30  ;;  %13923 = vmatprep.subr.bf16.mxu1 %v19626_v25  ;;  %v8125_v25 = vld [vmem:[#allocation4 + $0x680] sm:$0xff]  ;;  %v8162_v23 = vld [vmem:[#allocation4 + $0x7a8] sm:$0xff] }
0x196a   :  { %13893 = vmatpush1.bf16.msra.mxu0 %v19627_v1  ;;  %13925 = vmatpush1.bf16.msra.mxu1 %v19612_v28  ;;  %v18076_v28 = vpack.c.bf16 %v8124_v21, %v8120_v57  ;;  %v8129_v1 = vld [vmem:[#allocation4 + $0x6a0] sm:$0xff]  ;;  %v8151_v57 = vld [vmem:[#allocation4 + $0x750] sm:$0xff] }
0x196b   :  { %13895 = vmatprep.subr.bf16.mxu0 %v17452_v0  ;;  %13927 = vmatprep.subr.bf16.mxu1 %v19613_v58  ;;  %v8115_v0 = vld [vmem:[#allocation4 + $0x630] sm:$0xff]  ;;  %v18096_v35 = vpack.c.bf16 %v8129_v1, %v8125_v25  ;;  %v18138_v25 = vpack.c.bf16 %v8162_v23, %v8158_v11  ;;  %v8053_v11 = vld [vmem:[#allocation2 + $0x648] sm:$0xff] }
0x196c   :  { %v18070_v27 = vpack.c.bf16 %v8115_v0, %v8111_v22  ;;  %v8119_v58 = vld [vmem:[#allocation4 + $0x650] sm:$0xff]  ;;  %v8149_v22 = vld [vmem:[#allocation4 + $0x740] sm:$0xff]  ;;  %v8057_v23 = vld [vmem:[#allocation2 + $0x668] sm:$0xff] }
0x196d   :  { %v8153_v0 = vld [vmem:[#allocation4 + $0x760] sm:$0xff]  ;;  %v8155_v21 = vld [vmem:[#allocation4 + $0x770] sm:$0xff]  ;;  %19749 = vst [vmem:[#allocation52_spill] sm:$0xff] %v18138_v25  ;;  %v18174_v15 = vpack.c.bf16 %v8057_v23, %v8053_v11  ;;  %v8069_v11 = vld [vmem:[#allocation2 + $0x6c8] sm:$0xff] }
0x196e   :  { %13897 = vmatpush1.bf16.msra.mxu0 %v17456_v48  ;;  %13929 = vmatpush1.bf16.msra.mxu1 %v19614_v49  ;;  %v18068_v48 = vpack.c.bf16 %v8113_v54, %v8109_v47  ;;  %v8123_v49 = vld [vmem:[#allocation4 + $0x670] sm:$0xff]  ;;  %v18120_v47 = vpack.c.bf16 %v8145_v42, %v8141_v3  ;;  %v18122_v54 = vpack.c.bf16 %v8147_v63, %v8143_v32  ;;  %v8045_v3 = vld [vmem:[#allocation2 + $0x608] sm:$0xff]  ;;  %v8047_v32 = vld [vmem:[#allocation2 + $0x618] sm:$0xff] }
0x196f   :  { %13899 = vmatprep.subr.bf16.mxu0 %v19615_v36  ;;  %13931 = vmatprep.subr.bf16.mxu1 %v19616_v20  ;;  %v18074_v20 = vpack.c.bf16 %v8122_v40, %v8118_v6  ;;  %v8126_v36 = vld [vmem:[#allocation4 + $0x688] sm:$0xff]  ;;  %v18084_v30 = vpack.c.bf16 %v8123_v49, %v8119_v58  ;;  %v18126_v6 = vpack.c.bf16 %v8154_v56, %v8150_v31  ;;  %v8160_v58 = vld [vmem:[#allocation4 + $0x798] sm:$0xff] }
0x1970   :  { %19743 = vst [vmem:[#allocation44_spill] sm:$0xff] %v18120_v47  ;;  %19744 = vst [vmem:[#allocation8_spill] sm:$0xff] %v18122_v54  ;;  %v18128_v40 = vpack.c.bf16 %v8156_v16, %v8152_v39  ;;  %v8164_v49 = vld [vmem:[#allocation4 + $0x7b8] sm:$0xff]  ;;  %v8049_v42 = vld [vmem:[#allocation2 + $0x628] sm:$0xff]  ;;  %v18156_v31 = vpack.c.bf16 %v8169_v9, %v8165_v34  ;;  %v18158_v56 = vpack.c.bf16 %v8171_v29, %v8167_v41 }
0x1971   :  { %19745 = vst [vmem:[#allocation14_spill] sm:$0xff] %v18126_v6  ;;  %v18140_v1 = vpack.c.bf16 %v8164_v49, %v8160_v58  ;;  %v8051_v63 = vld [vmem:[#allocation2 + $0x638] sm:$0xff]  ;;  %v8044_v39 = vld [vmem:[#allocation2 + $0x600] sm:$0xff]  ;;  %19759 = vst [vmem:[#allocation13_spill] sm:$0xff] %v18174_v15 }
0x1972   :  { %13901 = vmatpush1.bf16.msra.mxu0 %v19617_v44  ;;  %13933 = vmatpush1.bf16.msra.mxu1 %v19618_v43  ;;  %v8130_v44 = vld [vmem:[#allocation4 + $0x6a8] sm:$0xff]  ;;  %v8132_v43 = vld [vmem:[#allocation4 + $0x6b8] sm:$0xff]  ;;  %19746 = vst [vmem:[#allocation15_spill] sm:$0xff] %v18128_v40  ;;  %19755 = vst [vmem:[#allocation9_spill] sm:$0xff] %v18156_v31 }
0x1973   :  { %13935 = vmatprep.subr.bf16.mxu0 %v18062_v60  ;;  %13967 = vmatprep.subr.bf16.mxu1 %v18064_v50  ;;  %v18088_v61 = vpack.c.bf16 %v8130_v44, %v8126_v36  ;;  %v18090_v4 = vpack.c.bf16 %v8132_v43, %v8128_v62  ;;  %v18132_v36 = vpack.c.bf16 %v8153_v0, %v8149_v22  ;;  %v8157_v62 = vld [vmem:[#allocation4 + $0x780] sm:$0xff]  ;;  %v8055_v58 = vld [vmem:[#allocation2 + $0x658] sm:$0xff]  ;;  %v8061_v34 = vld [vmem:[#allocation2 + $0x688] sm:$0xff] }
0x1974   :  { %v18134_v44 = vpack.c.bf16 %v8155_v21, %v8151_v57  ;;  %v8161_v43 = vld [vmem:[#allocation4 + $0x7a0] sm:$0xff]  ;;  %19750 = vst [vmem:[#allocation53_spill] sm:$0xff] %v18140_v1  ;;  %19756 = vst [vmem:[#allocation10_spill] sm:$0xff] %v18158_v56  ;;  %v18162_v22 = vpack.c.bf16 %v8049_v42, %v8045_v3  ;;  %v18164_v0 = vpack.c.bf16 %v8051_v63, %v8047_v32  ;;  %v8046_v57 = vld [vmem:[#allocation2 + $0x610] sm:$0xff] }
0x1975   :  { %7937 = vmatmul.mubr.f32.vlgmr.msra.gmra.mrb[46].mxu0 %v17483_v24  ;;  %8008 = vmatmul.mubr.f32.vlgmr.msra.gmra.mrb[46].mxu1 %v17483_v24  ;;  %v8131_v24 = vld [vmem:[#allocation4 + $0x6b0] sm:$0xff]  ;;  %19747 = vst [vmem:[#allocation16_spill] sm:$0xff] %v18132_v36  ;;  %v18144_v46 = vpack.c.bf16 %v8161_v43, %v8157_v62  ;;  %v8048_v16 = vld [vmem:[#allocation2 + $0x620] sm:$0xff]  ;;  %v8059_v49 = vld [vmem:[#allocation2 + $0x678] sm:$0xff]  ;;  %v18184_v42 = vpack.c.bf16 %v8058_v12, %v8054_v10 }
0x1976   :  { %13937 = vmatpush1.bf16.msra.mxu0 %v18068_v48  ;;  %13969 = vmatpush1.bf16.msra.mxu1 %v18070_v27  ;;  %v18098_v18 = vpack.c.bf16 %v8131_v24, %v8127_v52  ;;  %19748 = vst [vmem:[#allocation50_spill] sm:$0xff] %v18134_v44  ;;  %v8159_v52 = vld [vmem:[#allocation4 + $0x790] sm:$0xff]  ;;  %19757 = vst [vmem:[#allocation11_spill] sm:$0xff] %v18162_v22  ;;  %v18168_v62 = vpack.c.bf16 %v8048_v16, %v8044_v39  ;;  %v8065_v9 = vld [vmem:[#allocation2 + $0x6a8] sm:$0xff] }
0x1977   :  { %13939 = vmatprep.subr.bf16.mxu0 %v18074_v20  ;;  %13971 = vmatprep.subr.bf16.mxu1 %v18076_v28  ;;  %v8163_v24 = vld [vmem:[#allocation4 + $0x7b0] sm:$0xff]  ;;  %19751 = vst [vmem:[#allocation54_spill] sm:$0xff] %v18144_v46  ;;  %19758 = vst [vmem:[#allocation12_spill] sm:$0xff] %v18164_v0  ;;  %v18176_v59 = vpack.c.bf16 %v8059_v49, %v8055_v58  ;;  %v8063_v41 = vld [vmem:[#allocation2 + $0x698] sm:$0xff]  ;;  %v18188_v39 = vpack.c.bf16 %v8065_v9, %v8061_v34 }
0x1978   :  { %8240 = vmatprep.mubr.f32.mxu0 %v19235_v45  ;;  %8311 = vmatprep.mubr.f32.mxu1 %v19235_v45  ;;  %v18146_v37 = vpack.c.bf16 %v8163_v24, %v8159_v52  ;;  %v8050_v21 = vld [vmem:[#allocation2 + $0x630] sm:$0xff]  ;;  %v8052_v52 = vld [vmem:[#allocation2 + $0x640] sm:$0xff]  ;;  %v8067_v29 = vld [vmem:[#allocation2 + $0x6b8] sm:$0xff]  ;;  %19762 = vst [vmem:[#allocation21_spill] sm:$0xff] %v18184_v42 }
0x1979   :  { %v18170_v43 = vpack.c.bf16 %v8050_v21, %v8046_v57  ;;  %v8056_v24 = vld [vmem:[#allocation2 + $0x660] sm:$0xff]  ;;  %19760 = vst [vmem:[#allocation19_spill] sm:$0xff] %v18176_v59  ;;  %19763 = vst [vmem:[#allocation22_spill] sm:$0xff] %v18188_v39  ;;  %v18190_v16 = vpack.c.bf16 %v8067_v29, %v8063_v41  ;;  %v8062_v57 = vld [vmem:[#allocation2 + $0x690] sm:$0xff] }
0x197a   :  { %13941 = vmatpush1.bf16.msra.mxu0 %v18082_v55  ;;  %13973 = vmatpush1.bf16.msra.mxu1 %v18084_v30  ;;  %19752 = vst [vmem:[#allocation17_spill] sm:$0xff] %v18146_v37  ;;  %v18182_v3 = vpack.c.bf16 %v8056_v24, %v8052_v52  ;;  %v8060_v32 = vld [vmem:[#allocation2 + $0x680] sm:$0xff]  ;;  %v8066_v21 = vld [vmem:[#allocation2 + $0x6b0] sm:$0xff]  ;;  %v8073_v23 = vld [vmem:[#allocation2 + $0x6e8] sm:$0xff] }
0x197b   :  { %13943 = vmatprep.subr.bf16.mxu0 %v18088_v61  ;;  %13975 = vmatprep.subr.bf16.mxu1 %v18090_v4  ;;  %v8064_v63 = vld [vmem:[#allocation2 + $0x6a0] sm:$0xff]  ;;  %19764 = vst [vmem:[#allocation23_spill] sm:$0xff] %v18190_v16  ;;  %v8071_v58 = vld [vmem:[#allocation2 + $0x6d8] sm:$0xff]  ;;  %v18198_v24 = vpack.c.bf16 %v8066_v21, %v8062_v57  ;;  %v18202_v34 = vpack.c.bf16 %v8073_v23, %v8069_v11  ;;  %v8070_v41 = vld [vmem:[#allocation2 + $0x6d0] sm:$0xff] }
0x197c   :  { %19761 = vst [vmem:[#allocation20_spill] sm:$0xff] %v18182_v3  ;;  %v8075_v49 = vld [vmem:[#allocation2 + $0x6f8] sm:$0xff]  ;;  %v18196_v52 = vpack.c.bf16 %v8064_v63, %v8060_v32  ;;  %v8068_v10 = vld [vmem:[#allocation2 + $0x6c0] sm:$0xff]  ;;  %v8074_v29 = vld [vmem:[#allocation2 + $0x6f0] sm:$0xff] }
0x197d   :  { %19766 = vst [vmem:[#allocation25_spill] sm:$0xff] %v18198_v24  ;;  %v8072_v12 = vld [vmem:[#allocation2 + $0x6e0] sm:$0xff]  ;;  %19767 = vst [vmem:[#allocation26_spill] sm:$0xff] %v18202_v34  ;;  %v18204_v9 = vpack.c.bf16 %v8075_v49, %v8071_v58  ;;  %v18210_v63 = vpack.c.bf16 %v8074_v29, %v8070_v41  ;;  %v8078_v58 = vld [vmem:[#allocation2 + $0x710] sm:$0xff] }
0x197e   :  { %13945 = vmatpush1.bf16.msra.mxu0 %v18096_v35  ;;  %13977 = vmatpush1.bf16.msra.mxu1 %v18098_v18  ;;  %19765 = vst [vmem:[#allocation24_spill] sm:$0xff] %v18196_v52  ;;  %v18208_v32 = vpack.c.bf16 %v8072_v12, %v8068_v10  ;;  %v8076_v57 = vld [vmem:[#allocation2 + $0x700] sm:$0xff]  ;;  %v8082_v49 = vld [vmem:[#allocation2 + $0x730] sm:$0xff] }
0x197f   :  { %13947 = vmatprep.subr.bf16.mxu0 %v18102_v7  ;;  %13979 = vmatprep.subr.bf16.mxu1 %v18104_v5  ;;  %19768 = vst [vmem:[#allocation27_spill] sm:$0xff] %v18204_v9  ;;  %19770 = vst [vmem:[#allocation41_spill] sm:$0xff] %v18210_v63  ;;  %v8080_v21 = vld [vmem:[#allocation2 + $0x720] sm:$0xff]  ;;  %v18222_v12 = vpack.c.bf16 %v8082_v49, %v8078_v58 }
0x1980   :  { %19769 = vst [vmem:[#allocation28_spill] sm:$0xff] %v18208_v32  ;;  %v18220_v10 = vpack.c.bf16 %v8080_v21, %v8076_v57  ;;  %v8084_v41 = vld [vmem:[#allocation2 + $0x740] sm:$0xff] }
0x1981   :  { %19774 = vst [vmem:[#allocation51_spill] sm:$0xff] %v18222_v12  ;;  %v8088_v29 = vld [vmem:[#allocation2 + $0x760] sm:$0xff] }
0x1982   :  { %13949 = vmatpush1.bf16.msra.mxu0 %v18108_v19  ;;  %13981 = vmatpush1.bf16.msra.mxu1 %v18110_v2  ;;  %19773 = vst [vmem:[#allocation48_spill] sm:$0xff] %v18220_v10  ;;  %v18232_v57 = vpack.c.bf16 %v8088_v29, %v8084_v41  ;;  %v8092_v58 = vld [vmem:[#allocation2 + $0x780] sm:$0xff] }
0x1983   :  { %13951 = vmatprep.subr.bf16.mxu0 %v18114_v13  ;;  %13983 = vmatprep.subr.bf16.mxu1 %v18116_v53  ;;  %v8096_v49 = vld [vmem:[#allocation2 + $0x7a0] sm:$0xff] }
0x1984   :  { %v18244_v41 = vpack.c.bf16 %v8096_v49, %v8092_v58 }
0x1986   :  { %13953 = vmatpush1.bf16.msra.mxu0 %v18120_v47  ;;  %13985 = vmatpush1.bf16.msra.mxu1 %v18122_v54 }
0x1987   :  { %13955 = vmatprep.subr.bf16.mxu0 %v18126_v6  ;;  %13987 = vmatprep.subr.bf16.mxu1 %v18128_v40 }
0x198a   :  { %13957 = vmatpush1.bf16.msra.mxu0 %v18132_v36  ;;  %13989 = vmatpush1.bf16.msra.mxu1 %v18134_v44 }
0x198b   :  { %13959 = vmatprep.subr.bf16.mxu0 %v18138_v25  ;;  %13991 = vmatprep.subr.bf16.mxu1 %v18140_v1 }
0x198e   :  { %13961 = vmatpush1.bf16.msra.mxu0 %v18144_v46  ;;  %13993 = vmatpush1.bf16.msra.mxu1 %v18146_v37 }
0x198f   :  { %13963 = vmatprep.subr.bf16.mxu0 %v18150_v38  ;;  %13995 = vmatprep.subr.bf16.mxu1 %v18152_v17 }
0x1992   :  { %13965 = vmatpush1.bf16.msra.mxu0 %v18156_v31  ;;  %13997 = vmatpush1.bf16.msra.mxu1 %v18158_v56 }
0x1993   :  { %13999 = vmatprep.subr.bf16.mxu0 %v18162_v22  ;;  %14031 = vmatprep.subr.bf16.mxu1 %v18164_v0 }
0x1995   :  { %8241 = vmatmul.mubr.f32.vlgmr.msra.gmra.mrb[48].mxu0 %v19235_v45  ;;  %8312 = vmatmul.mubr.f32.vlgmr.msra.gmra.mrb[48].mxu1 %v19235_v45 }
0x1996   :  { %14001 = vmatpush1.bf16.msra.mxu0 %v18168_v62  ;;  %14033 = vmatpush1.bf16.msra.mxu1 %v18170_v43 }
0x1997   :  { %14003 = vmatprep.subr.bf16.mxu0 %v18174_v15  ;;  %14035 = vmatprep.subr.bf16.mxu1 %v18176_v59  ;;  %v8077_v59 = vld [vmem:[#allocation2 + $0x708] sm:$0xff]  ;;  %v8079_v15 = vld [vmem:[#allocation2 + $0x718] sm:$0xff] }
0x1998   :  { %8382 = vmatprep.mubr.f32.mxu0 %v19235_v45  ;;  %8453 = vmatprep.mubr.f32.mxu1 %v19235_v45 }
0x199a   :  { %14005 = vmatpush1.bf16.msra.mxu0 %v18182_v3  ;;  %14037 = vmatpush1.bf16.msra.mxu1 %v18184_v42  ;;  %v8081_v3 = vld [vmem:[#allocation2 + $0x728] sm:$0xff]  ;;  %v8083_v42 = vld [vmem:[#allocation2 + $0x738] sm:$0xff] }
0x199b   :  { %14007 = vmatprep.subr.bf16.mxu0 %v18188_v39  ;;  %14039 = vmatprep.subr.bf16.mxu1 %v18190_v16  ;;  %v18214_v11 = vpack.c.bf16 %v8081_v3, %v8077_v59  ;;  %v18216_v23 = vpack.c.bf16 %v8083_v42, %v8079_v15  ;;  %v8085_v16 = vld [vmem:[#allocation2 + $0x748] sm:$0xff]  ;;  %v8087_v39 = vld [vmem:[#allocation2 + $0x758] sm:$0xff]  ;;  %v8086_v3 = vld [vmem:[#allocation2 + $0x750] sm:$0xff] }
0x199c   :  { %v8090_v42 = vld [vmem:[#allocation2 + $0x770] sm:$0xff] }
0x199d   :  { %19771 = vst [vmem:[#allocation46_spill] sm:$0xff] %v18214_v11  ;;  %19772 = vst [vmem:[#allocation47_spill] sm:$0xff] %v18216_v23  ;;  %v18234_v21 = vpack.c.bf16 %v8090_v42, %v8086_v3  ;;  %v8100_v3 = vld [vmem:[#allocation2 + $0x7c0] sm:$0xff]  ;;  %v8106_v42 = vld [vmem:[#allocation2 + $0x7f0] sm:$0xff] }
0x199e   :  { %14009 = vmatpush1.bf16.msra.mxu0 %v18196_v52  ;;  %14041 = vmatpush1.bf16.msra.mxu1 %v18198_v24  ;;  %v8089_v52 = vld [vmem:[#allocation2 + $0x768] sm:$0xff]  ;;  %v8091_v24 = vld [vmem:[#allocation2 + $0x778] sm:$0xff] }
0x199f   :  { %14011 = vmatprep.subr.bf16.mxu0 %v18202_v34  ;;  %14043 = vmatprep.subr.bf16.mxu1 %v18204_v9  ;;  %v18226_v15 = vpack.c.bf16 %v8089_v52, %v8085_v16  ;;  %v18228_v59 = vpack.c.bf16 %v8091_v24, %v8087_v39  ;;  %v8093_v9 = vld [vmem:[#allocation2 + $0x788] sm:$0xff]  ;;  %v8095_v34 = vld [vmem:[#allocation2 + $0x798] sm:$0xff]  ;;  %v8094_v52 = vld [vmem:[#allocation2 + $0x790] sm:$0xff] }
0x19a0   :  { %v8098_v24 = vld [vmem:[#allocation2 + $0x7b0] sm:$0xff] }
0x19a1   :  { %v18246_v29 = vpack.c.bf16 %v8098_v24, %v8094_v52 }
0x19a2   :  { %14013 = vmatpush1.bf16.msra.mxu0 %v18208_v32  ;;  %14045 = vmatpush1.bf16.msra.mxu1 %v18210_v63  ;;  %v8097_v32 = vld [vmem:[#allocation2 + $0x7a8] sm:$0xff]  ;;  %v8099_v63 = vld [vmem:[#allocation2 + $0x7b8] sm:$0xff] }
0x19a3   :  { %14015 = vmatprep.subr.bf16.mxu0 %v18214_v11  ;;  %14047 = vmatprep.subr.bf16.mxu1 %v18216_v23  ;;  %v18238_v39 = vpack.c.bf16 %v8097_v32, %v8093_v9  ;;  %v18240_v16 = vpack.c.bf16 %v8099_v63, %v8095_v34  ;;  %v8101_v23 = vld [vmem:[#allocation2 + $0x7c8] sm:$0xff]  ;;  %v8103_v11 = vld [vmem:[#allocation2 + $0x7d8] sm:$0xff]  ;;  %v8104_v32 = vld [vmem:[#allocation2 + $0x7e0] sm:$0xff] }
0x19a4   :  { %v8102_v63 = vld [vmem:[#allocation2 + $0x7d0] sm:$0xff]  ;;  %v18256_v58 = vpack.c.bf16 %v8104_v32, %v8100_v3 }
0x19a5   :  { %19775 = vst [vmem:[#allocation49_spill] sm:$0xff] %v18240_v16  ;;  %v18258_v49 = vpack.c.bf16 %v8106_v42, %v8102_v63 }
0x19a6   :  { %14017 = vmatpush1.bf16.msra.mxu0 %v18220_v10  ;;  %14049 = vmatpush1.bf16.msra.mxu1 %v18222_v12  ;;  %v8105_v10 = vld [vmem:[#allocation2 + $0x7e8] sm:$0xff]  ;;  %v8107_v12 = vld [vmem:[#allocation2 + $0x7f8] sm:$0xff] }
0x19a7   :  { %14019 = vmatprep.subr.bf16.mxu0 %v18226_v15  ;;  %14051 = vmatprep.subr.bf16.mxu1 %v18228_v59  ;;  %v18250_v34 = vpack.c.bf16 %v8105_v10, %v8101_v23  ;;  %v18252_v9 = vpack.c.bf16 %v8107_v12, %v8103_v11  ;;  %v8175_v11 = vld [vmem:[%s18875_s4] sm:$0xff] }
0x19aa   :  { %14021 = vmatpush1.bf16.msra.mxu0 %v18232_v57  ;;  %14053 = vmatpush1.bf16.msra.mxu1 %v18234_v21 }
0x19ab   :  { %14023 = vmatprep.subr.bf16.mxu0 %v18238_v39  ;;  %14055 = vmatprep.subr.bf16.mxu1 %v18240_v16 }
0x19ae   :  { %14025 = vmatpush1.bf16.msra.mxu0 %v18244_v41  ;;  %14057 = vmatpush1.bf16.msra.mxu1 %v18246_v29 }
0x19af   :  { %14027 = vmatprep.subr.bf16.mxu0 %v18250_v34  ;;  %14059 = vmatprep.subr.bf16.mxu1 %v18252_v9 }
0x19b2   :  { %14029 = vmatpush1.bf16.msra.mxu0 %v18256_v58  ;;  %14061 = vmatpush1.bf16.msra.mxu1 %v18258_v49 }
0x19b3   :  { %14063 = vmatprep.subr.bf16.mxu0 %v18062_v60  ;;  %14095 = vmatprep.subr.bf16.mxu1 %v18064_v50 }
0x19b5   :  { %8383 = vmatmul.mubr.f32.vlgmr.msra.gmra.mrb[48].mxu0 %v8175_v11  ;;  %8454 = vmatmul.mubr.f32.vlgmr.msra.gmra.mrb[48].mxu1 %v8175_v11 }
0x19b6   :  { %14065 = vmatpush1.bf16.msra.mxu0 %v18068_v48  ;;  %14097 = vmatpush1.bf16.msra.mxu1 %v18070_v27 }
0x19b7   :  { %14067 = vmatprep.subr.bf16.mxu0 %v18074_v20  ;;  %14099 = vmatprep.subr.bf16.mxu1 %v18076_v28 }
0x19b8   :  { %8575 = vmatprep.mubr.f32.mxu0 %v19235_v45  ;;  %8646 = vmatprep.mubr.f32.mxu1 %v19235_v45 }
0x19ba   :  { %14069 = vmatpush1.bf16.msra.mxu0 %v18082_v55  ;;  %14101 = vmatpush1.bf16.msra.mxu1 %v18084_v30 }
0x19bb   :  { %14071 = vmatprep.subr.bf16.mxu0 %v18088_v61  ;;  %14103 = vmatprep.subr.bf16.mxu1 %v18090_v4 }
0x19be   :  { %14073 = vmatpush1.bf16.msra.mxu0 %v18096_v35  ;;  %14105 = vmatpush1.bf16.msra.mxu1 %v18098_v18 }
0x19bf   :  { %14075 = vmatprep.subr.bf16.mxu0 %v18102_v7  ;;  %14107 = vmatprep.subr.bf16.mxu1 %v18104_v5 }
0x19c2   :  { %14077 = vmatpush1.bf16.msra.mxu0 %v18108_v19  ;;  %14109 = vmatpush1.bf16.msra.mxu1 %v18110_v2 }
0x19c3   :  { %14079 = vmatprep.subr.bf16.mxu0 %v18114_v13  ;;  %14111 = vmatprep.subr.bf16.mxu1 %v18116_v53 }
0x19c6   :  { %14081 = vmatpush1.bf16.msra.mxu0 %v18120_v47  ;;  %14113 = vmatpush1.bf16.msra.mxu1 %v18122_v54 }
0x19c7   :  { %14083 = vmatprep.subr.bf16.mxu0 %v18126_v6  ;;  %14115 = vmatprep.subr.bf16.mxu1 %v18128_v40 }
0x19ca   :  { %14085 = vmatpush1.bf16.msra.mxu0 %v18132_v36  ;;  %14117 = vmatpush1.bf16.msra.mxu1 %v18134_v44 }
0x19cb   :  { %14087 = vmatprep.subr.bf16.mxu0 %v18138_v25  ;;  %14119 = vmatprep.subr.bf16.mxu1 %v18140_v1 }
0x19ce   :  { %14089 = vmatpush1.bf16.msra.mxu0 %v18144_v46  ;;  %14121 = vmatpush1.bf16.msra.mxu1 %v18146_v37 }
0x19cf   :  { %14091 = vmatprep.subr.bf16.mxu0 %v18150_v38  ;;  %14123 = vmatprep.subr.bf16.mxu1 %v18152_v17 }
0x19d2   :  { %14093 = vmatpush1.bf16.msra.mxu0 %v18156_v31  ;;  %14125 = vmatpush1.bf16.msra.mxu1 %v18158_v56 }
0x19d3   :  { %14127 = vmatprep.subr.bf16.mxu0 %v18162_v22  ;;  %14159 = vmatprep.subr.bf16.mxu1 %v18164_v0 }
0x1a48   :  { %v7938_v23 = vpop.f32.mrb[46].mxu0  ;;  %v8009_v10 = vpop.f32.mrb[46].mxu1 }
0x1a49   :  { %v8014_v12 = vadd.f32 %v7938_v23, %v19737_v26  ;;  %v7940_v52 = vpop.f32.mrb[47].mxu0  ;;  %v8011_v24 = vpop.f32.mrb[47].mxu1  ;;  %v8016_v42 = vadd.f32 %v8009_v10, %v17533_v33 }
0x1a4a   :  { %v8015_v3 = vadd.f32 %v7940_v52, %v19622_v14  ;;  %v8017_v11 = vadd.f32 %v8011_v24, %v17536_v51 }
0x1a4b   :  { %v10819_v32 = vmul.f32 -1.442695, %v8014_v12  ;;  %v10821_v56 = vmul.f32 -1.442695, %v8016_v42 }
0x1a4c   :  { %v10820_v63 = vmul.f32 -1.442695, %v8015_v3 }
0x1a4d   :  { %15459 = vpow2.f32 %v10819_v32 }
0x1a4e   :  { %15461 = vpow2.f32 %v10820_v63 }
0x1a4f   :  { %15463 = vtanh.f32 %v8017_v11 }
0x1a50   :  { %15465 = vpow2.f32 %v10821_v56  ;;  %v19776_v56 = vld [vmem:[#allocation39_spill] sm:$0xff] }
0x1a57   :  { %v15460_v22 = vpop.eup %15459 }
0x1a58   :  { %v8027_v31 = vadd.f32 1.0, %v15460_v22  ;;  %v15462_v0 = vpop.eup %15461 }
0x1a59   :  { %v8028_v26 = vadd.f32 1.0, %v15462_v0  ;;  %v15464_v23 = vpop.eup %15463 }
0x1a5a   :  { %15467 = vrcp.f32 %v8027_v31  ;;  %v15466_v17 = vpop.eup %15465  ;;  %v10823_v31 = vld [vmem:[%s18874_s3 + $0xc] sm:$0xf] }
0x1a5b   :  { %15469 = vrcp.f32 %v8028_v26  ;;  %v8029_v3 = vadd.f32 1.0, %v15466_v17  ;;  %v18315_v0 = vrot.slane %v10823_v31, %v19776_v56  ;;  %v19778_v17 = vld [vmem:[#allocation40_spill] sm:$0xff] }
0x1a5c   :  { %v18318_v24 = vrot.slane %v10823_v31, %v19778_v17 }
0x1a5d   :  { %15471 = vrcp.f32 %v8029_v3  ;;  %19777 = vst [vmem:[#allocation29_spill] sm:$0xff] %v18315_v0 }
0x1a5e   :  { %19779 = vst [vmem:[#allocation30_spill] sm:$0xff] %v18318_v24 }
0x1a64   :  { %v15468_v14 = vpop.eup %15467 }
0x1a65   :  { %v8038_v12 = vmul.f32 %v15468_v14, %v15464_v23  ;;  %v15470_v52 = vpop.eup %15469 }
0x1a66   :  { %v8037_v32 = vmul.f32 %v15470_v52, %v18026_v8  ;;  %v19780_v52 = vld [vmem:[#allocation43_spill] sm:$0xff] }
0x1a67   :  { %v15472_v51 = vpop.eup %15471  ;;  %v18323_v3 = vrot.slane %v10823_v31, %v19780_v52 }
0x1a68   :  { %v8039_v33 = vadd.f32 %v8038_v12, %v8037_v32  ;;  %v19781_v32 = vld [vmem:[#allocation45_spill] sm:$0xff] }
0x1a6a   :  { %15473 = vtanh.f32 %v8039_v33  ;;  %v18326_v33 = vrot.slane %v10823_v31, %v19781_v32 }
0x1a74   :  { %v15474_v10 = vpop.eup %15473 }
0x1a75   :  { %v8041_v22 = vmul.f32 %v15474_v10, %v15472_v51 }
0x1a77   :  { %10822 = vst [vmem:[%s18875_s4 + $0x38] sm:$0xff] %v8041_v22 }
0x1a88   :  { %v8384_v8 = vpop.f32.mrb[48].mxu0  ;;  %v8455_v63 = vpop.f32.mrb[48].mxu1 }
0x1a89   :  { %v8481_v42 = vadd.f32 %v18315_v0, %v8384_v8  ;;  %v8386_v11 = vpop.f32.mrb[49].mxu0  ;;  %v8457_v26 = vpop.f32.mrb[49].mxu1  ;;  %v8483_v51 = vadd.f32 %v18323_v3, %v8455_v63 }
0x1a8a   :  { %v8482_v23 = vadd.f32 %v18318_v24, %v8386_v11  ;;  %v8484_v10 = vadd.f32 %v18326_v33, %v8457_v26 }
0x1a8b   :  { %v10824_v14 = vmul.f32 -1.442695, %v8481_v42  ;;  %v10826_v22 = vmul.f32 -1.442695, %v8483_v51 }
0x1a8c   :  { %v10825_v12 = vmul.f32 -1.442695, %v8482_v23 }
0x1a8d   :  { %15475 = vpow2.f32 %v10824_v14 }
0x1a8e   :  { %15477 = vpow2.f32 %v10825_v12 }
0x1a8f   :  { %15479 = vtanh.f32 %v8484_v10  ;;  %v19782_v10 = vld [vmem:[#allocation13_spill] sm:$0xff] }
0x1a90   :  { %15481 = vpow2.f32 %v10826_v22  ;;  %v19783_v22 = vld [vmem:[#allocation19_spill] sm:$0xff] }
0x1a97   :  { %v15476_v56 = vpop.eup %15475 }
0x1a98   :  { %v8494_v17 = vadd.f32 1.0, %v15476_v56  ;;  %v15478_v8 = vpop.eup %15477  ;;  %v19784_v56 = vld [vmem:[#allocation20_spill] sm:$0xff] }
0x1a99   :  { %v8495_v42 = vadd.f32 1.0, %v15478_v8  ;;  %v15480_v11 = vpop.eup %15479  ;;  %v19786_v8 = vld [vmem:[#allocation22_spill] sm:$0xff] }
0x1a9a   :  { %15483 = vrcp.f32 %v8494_v17  ;;  %v15482_v23 = vpop.eup %15481  ;;  %v19785_v17 = vld [vmem:[#allocation21_spill] sm:$0xff] }
0x1a9b   :  { %15485 = vrcp.f32 %v8495_v42  ;;  %v8496_v31 = vadd.f32 1.0, %v15482_v23  ;;  %v19787_v42 = vld [vmem:[#allocation23_spill] sm:$0xff]  ;;  %v19789_v23 = vld [vmem:[#allocation25_spill] sm:$0xff] }
0x1a9d   :  { %15487 = vrcp.f32 %v8496_v31  ;;  %v19793_v31 = vld [vmem:[#allocation41_spill] sm:$0xff] }
0x1aa4   :  { %v15484_v14 = vpop.eup %15483 }
0x1aa5   :  { %v8505_v12 = vmul.f32 %v15484_v14, %v15480_v11  ;;  %v15486_v52 = vpop.eup %15485  ;;  %v19788_v11 = vld [vmem:[#allocation24_spill] sm:$0xff]  ;;  %v19790_v14 = vld [vmem:[#allocation26_spill] sm:$0xff] }
0x1aa6   :  { %v8504_v32 = vmul.f32 0.0, %v15486_v52  ;;  %v19792_v52 = vld [vmem:[#allocation28_spill] sm:$0xff] }
0x1aa7   :  { %v15488_v63 = vpop.eup %15487 }
0x1aa8   :  { %v18330_v24 = vadd.f32 %v8505_v12, %v8504_v32  ;;  %v19791_v12 = vld [vmem:[#allocation27_spill] sm:$0xff]  ;;  %v19794_v32 = vld [vmem:[#allocation46_spill] sm:$0xff] }
0x1aaa   :  { %15489 = vtanh.f32 %v18330_v24 }
0x1ab4   :  { %v15490_v26 = vpop.eup %15489 }
0x1ab5   :  { %v8508_v51 = vmul.f32 %v15490_v26, %v15488_v63  ;;  %v19795_v63 = vld [vmem:[#allocation47_spill] sm:$0xff]  ;;  %v19796_v26 = vld [vmem:[#allocation48_spill] sm:$0xff] }
0x1ab7   :  { %8509 = vst [vmem:[%s18875_s4] sm:$0xff] %v8508_v51  ;;  %8576 = vmatmul.mubr.f32.vlgmr.msra.gmra.mrb[50].mxu0 %v8508_v51  ;;  %8647 = vmatmul.mubr.f32.vlgmr.msra.gmra.mrb[50].mxu1 %v8508_v51  ;;  %v19797_v51 = vld [vmem:[#allocation51_spill] sm:$0xff] }
0x1ab8   :  { %14129 = vmatpush1.bf16.msra.mxu0 %v18168_v62  ;;  %14161 = vmatpush1.bf16.msra.mxu1 %v18170_v43 }
0x1ab9   :  { %14131 = vmatprep.subr.bf16.mxu0 %v19782_v10  ;;  %14163 = vmatprep.subr.bf16.mxu1 %v19783_v22 }
0x1aba   :  { %8717 = vmatprep.mubr.f32.mxu0 %v19235_v45  ;;  %8788 = vmatprep.mubr.f32.mxu1 %v19235_v45 }
0x1abc   :  { %14133 = vmatpush1.bf16.msra.mxu0 %v19784_v56  ;;  %14165 = vmatpush1.bf16.msra.mxu1 %v19785_v17 }
0x1abd   :  { %14135 = vmatprep.subr.bf16.mxu0 %v19786_v8  ;;  %14167 = vmatprep.subr.bf16.mxu1 %v19787_v42 }
0x1ac0   :  { %14137 = vmatpush1.bf16.msra.mxu0 %v19788_v11  ;;  %14169 = vmatpush1.bf16.msra.mxu1 %v19789_v23 }
0x1ac1   :  { %14139 = vmatprep.subr.bf16.mxu0 %v19790_v14  ;;  %14171 = vmatprep.subr.bf16.mxu1 %v19791_v12 }
0x1ac4   :  { %14141 = vmatpush1.bf16.msra.mxu0 %v19792_v52  ;;  %14173 = vmatpush1.bf16.msra.mxu1 %v19793_v31 }
0x1ac5   :  { %14143 = vmatprep.subr.bf16.mxu0 %v19794_v32  ;;  %14175 = vmatprep.subr.bf16.mxu1 %v19795_v63 }
0x1ac8   :  { %14145 = vmatpush1.bf16.msra.mxu0 %v19796_v26  ;;  %14177 = vmatpush1.bf16.msra.mxu1 %v19797_v51 }
0x1ac9   :  { %14147 = vmatprep.subr.bf16.mxu0 %v18226_v15  ;;  %14179 = vmatprep.subr.bf16.mxu1 %v18228_v59 }
0x1acc   :  { %14149 = vmatpush1.bf16.msra.mxu0 %v18232_v57  ;;  %14181 = vmatpush1.bf16.msra.mxu1 %v18234_v21 }
0x1acd   :  { %14151 = vmatprep.subr.bf16.mxu0 %v18238_v39  ;;  %14183 = vmatprep.subr.bf16.mxu1 %v18240_v16  ;;  %v10827_v16 = vld [vmem:[%s18875_s4 + $0x8] sm:$0xff] }
0x1ad0   :  { %14153 = vmatpush1.bf16.msra.mxu0 %v18244_v41  ;;  %14185 = vmatpush1.bf16.msra.mxu1 %v18246_v29 }
0x1ad1   :  { %14155 = vmatprep.subr.bf16.mxu0 %v18250_v34  ;;  %14187 = vmatprep.subr.bf16.mxu1 %v18252_v9 }
0x1ad4   :  { %14157 = vmatpush1.bf16.msra.mxu0 %v18256_v58  ;;  %14189 = vmatpush1.bf16.msra.mxu1 %v18258_v49 }
0x1ad5   :  { %14191 = vmatprep.subr.bf16.mxu0 %v18062_v60  ;;  %14223 = vmatprep.subr.bf16.mxu1 %v18064_v50 }
0x1ad7   :  { %8718 = vmatmul.mubr.f32.vlgmr.msra.gmra.mrb[50].mxu0 %v10827_v16  ;;  %8789 = vmatmul.mubr.f32.vlgmr.msra.gmra.mrb[50].mxu1 %v10827_v16  ;;  %v19798_v16 = vld [vmem:[#allocation56_spill] sm:$0xff] }
0x1ad8   :  { %14193 = vmatpush1.bf16.msra.mxu0 %v18068_v48  ;;  %14225 = vmatpush1.bf16.msra.mxu1 %v18070_v27 }
0x1ad9   :  { %14195 = vmatprep.subr.bf16.mxu0 %v18074_v20  ;;  %14227 = vmatprep.subr.bf16.mxu1 %v18076_v28 }
0x1ada   :  { %8889 = vmatprep.mubr.f32.mxu0 %v19235_v45  ;;  %8960 = vmatprep.mubr.f32.mxu1 %v19235_v45 }
0x1adc   :  { %14197 = vmatpush1.bf16.msra.mxu0 %v18082_v55  ;;  %14229 = vmatpush1.bf16.msra.mxu1 %v18084_v30 }
0x1add   :  { %14199 = vmatprep.subr.bf16.mxu0 %v18088_v61  ;;  %14231 = vmatprep.subr.bf16.mxu1 %v18090_v4 }
0x1ae0   :  { %14201 = vmatpush1.bf16.msra.mxu0 %v18096_v35  ;;  %14233 = vmatpush1.bf16.msra.mxu1 %v18098_v18 }
0x1ae1   :  { %14203 = vmatprep.subr.bf16.mxu0 %v18102_v7  ;;  %14235 = vmatprep.subr.bf16.mxu1 %v18104_v5 }
0x1ae4   :  { %14205 = vmatpush1.bf16.msra.mxu0 %v18108_v19  ;;  %14237 = vmatpush1.bf16.msra.mxu1 %v18110_v2 }
0x1ae5   :  { %14207 = vmatprep.subr.bf16.mxu0 %v18114_v13  ;;  %14239 = vmatprep.subr.bf16.mxu1 %v18116_v53  ;;  %v19803_v53 = vld [vmem:[#allocation30_spill] sm:$0xff] }
0x1ae8   :  { %14209 = vmatpush1.bf16.msra.mxu0 %v18120_v47  ;;  %14241 = vmatpush1.bf16.msra.mxu1 %v18122_v54  ;;  %v19799_v54 = vld [vmem:[#allocation9_spill] sm:$0xff] }
0x1ae9   :  { %14211 = vmatprep.subr.bf16.mxu0 %v18126_v6  ;;  %14243 = vmatprep.subr.bf16.mxu1 %v18128_v40  ;;  %v19800_v6 = vld [vmem:[#allocation10_spill] sm:$0xff]  ;;  %v19801_v40 = vld [vmem:[#allocation11_spill] sm:$0xff] }
0x1aec   :  { %14213 = vmatpush1.bf16.msra.mxu0 %v18132_v36  ;;  %14245 = vmatpush1.bf16.msra.mxu1 %v18134_v44  ;;  %v19802_v36 = vld [vmem:[#allocation12_spill] sm:$0xff] }
0x1aed   :  { %14215 = vmatprep.subr.bf16.mxu0 %v18138_v25  ;;  %14247 = vmatprep.subr.bf16.mxu1 %v18140_v1 }
0x1af0   :  { %14217 = vmatpush1.bf16.msra.mxu0 %v18144_v46  ;;  %14249 = vmatpush1.bf16.msra.mxu1 %v18146_v37 }
0x1af1   :  { %14219 = vmatprep.subr.bf16.mxu0 %v18150_v38  ;;  %14251 = vmatprep.subr.bf16.mxu1 %v19798_v16 }
0x1af4   :  { %14221 = vmatpush1.bf16.msra.mxu0 %v19799_v54  ;;  %14253 = vmatpush1.bf16.msra.mxu1 %v19800_v6 }
0x1af5   :  { %14255 = vmatprep.subr.bf16.mxu0 %v19801_v40  ;;  %14287 = vmatprep.subr.bf16.mxu1 %v19802_v36 }
0x1baa   :  { %v8719_v44 = vpop.f32.mrb[50].mxu0  ;;  %v8790_v25 = vpop.f32.mrb[50].mxu1 }
0x1bab   :  { %v8795_v1 = vadd.f32 %v8719_v44, %v18315_v0  ;;  %v8721_v47 = vpop.f32.mrb[51].mxu0  ;;  %v8792_v46 = vpop.f32.mrb[51].mxu1  ;;  %v8797_v54 = vadd.f32 %v8790_v25, %v18323_v3 }
0x1bac   :  { %v8796_v37 = vadd.f32 %v8721_v47, %v19803_v53  ;;  %v8798_v6 = vadd.f32 %v8792_v46, %v18326_v33  ;;  %v19806_v46 = vld [vmem:[#allocation37_spill] sm:$0xff] }
0x1bad   :  { %v10828_v13 = vmul.f32 -1.442695, %v8795_v1  ;;  %v10830_v16 = vmul.f32 -1.442695, %v8797_v54 }
0x1bae   :  { %v10829_v38 = vmul.f32 -1.442695, %v8796_v37 }
0x1baf   :  { %15491 = vpow2.f32 %v10828_v13 }
0x1bb0   :  { %15493 = vpow2.f32 %v10829_v38 }
0x1bb1   :  { %15495 = vtanh.f32 %v8798_v6 }
0x1bb2   :  { %15497 = vpow2.f32 %v10830_v16  ;;  %v19809_v16 = vld [vmem:[#allocation44_spill] sm:$0xff] }
0x1bb9   :  { %v15492_v40 = vpop.eup %15491 }
0x1bba   :  { %v8808_v2 = vadd.f32 1.0, %v15492_v40  ;;  %v15494_v36 = vpop.eup %15493 }
0x1bbb   :  { %v8809_v44 = vadd.f32 1.0, %v15494_v36  ;;  %v15496_v0 = vpop.eup %15495  ;;  %v19805_v36 = vld [vmem:[#allocation36_spill] sm:$0xff] }
0x1bbc   :  { %15499 = vrcp.f32 %v8808_v2  ;;  %v15498_v19 = vpop.eup %15497  ;;  %v10832_v2 = vld [vmem:[%s18875_s4 + $0x10] sm:$0xff] }
0x1bbd   :  { %15501 = vrcp.f32 %v8809_v44  ;;  %v8810_v13 = vadd.f32 1.0, %v15498_v19  ;;  %v19804_v19 = vld [vmem:[#allocation49_spill] sm:$0xff]  ;;  %v19810_v44 = vld [vmem:[#allocation8_spill] sm:$0xff] }
0x1bbf   :  { %15503 = vrcp.f32 %v8810_v13  ;;  %v19814_v13 = vld [vmem:[#allocation50_spill] sm:$0xff] }
0x1bc6   :  { %v15500_v47 = vpop.eup %15499 }
0x1bc7   :  { %v8819_v1 = vmul.f32 %v15500_v47, %v15496_v0  ;;  %v15502_v37 = vpop.eup %15501  ;;  %v19807_v0 = vld [vmem:[#allocation38_spill] sm:$0xff] }
0x1bc8   :  { %v8818_v38 = vmul.f32 %v15502_v37, %v18330_v24  ;;  %v19808_v24 = vld [vmem:[#allocation42_spill] sm:$0xff]  ;;  %v19813_v37 = vld [vmem:[#allocation16_spill] sm:$0xff] }
0x1bc9   :  { %v15504_v54 = vpop.eup %15503  ;;  %v19811_v47 = vld [vmem:[#allocation14_spill] sm:$0xff] }
0x1bca   :  { %v18412_v25 = vadd.f32 %v8819_v1, %v8818_v38  ;;  %v19812_v1 = vld [vmem:[#allocation15_spill] sm:$0xff]  ;;  %v19815_v38 = vld [vmem:[#allocation52_spill] sm:$0xff] }
0x1bcc   :  { %15505 = vtanh.f32 %v18412_v25 }
0x1bd6   :  { %v15506_v6 = vpop.eup %15505 }
0x1bd7   :  { %v8822_v40 = vmul.f32 %v15506_v6, %v15504_v54  ;;  %v19816_v54 = vld [vmem:[#allocation53_spill] sm:$0xff]  ;;  %v19817_v6 = vld [vmem:[#allocation54_spill] sm:$0xff] }
0x1bd9   :  { %10831 = vst [vmem:[%s18875_s4 + $0x8] sm:$0xff] %v8822_v40  ;;  %8890 = vmatmul.mubr.f32.vlgmr.msra.gmra.mrb[52].mxu0 %v8822_v40  ;;  %8961 = vmatmul.mubr.f32.vlgmr.msra.gmra.mrb[52].mxu1 %v8822_v40  ;;  %v19818_v40 = vld [vmem:[#allocation17_spill] sm:$0xff] }
0x1bda   :  { %14257 = vmatpush1.bf16.msra.mxu0 %v18168_v62  ;;  %14289 = vmatpush1.bf16.msra.mxu1 %v18170_v43 }
0x1bdb   :  { %14259 = vmatprep.subr.bf16.mxu0 %v19782_v10  ;;  %14291 = vmatprep.subr.bf16.mxu1 %v19783_v22 }
0x1bdc   :  { %9031 = vmatprep.mubr.f32.mxu0 %v19235_v45  ;;  %9102 = vmatprep.mubr.f32.mxu1 %v19235_v45 }
0x1bde   :  { %14261 = vmatpush1.bf16.msra.mxu0 %v19784_v56  ;;  %14293 = vmatpush1.bf16.msra.mxu1 %v19785_v17 }
0x1bdf   :  { %14263 = vmatprep.subr.bf16.mxu0 %v19786_v8  ;;  %14295 = vmatprep.subr.bf16.mxu1 %v19787_v42 }
0x1be2   :  { %14265 = vmatpush1.bf16.msra.mxu0 %v19788_v11  ;;  %14297 = vmatpush1.bf16.msra.mxu1 %v19789_v23 }
0x1be3   :  { %14267 = vmatprep.subr.bf16.mxu0 %v19790_v14  ;;  %14299 = vmatprep.subr.bf16.mxu1 %v19791_v12 }
0x1be6   :  { %14269 = vmatpush1.bf16.msra.mxu0 %v19792_v52  ;;  %14301 = vmatpush1.bf16.msra.mxu1 %v19793_v31 }
0x1be7   :  { %14271 = vmatprep.subr.bf16.mxu0 %v19794_v32  ;;  %14303 = vmatprep.subr.bf16.mxu1 %v19795_v63 }
0x1bea   :  { %14273 = vmatpush1.bf16.msra.mxu0 %v19796_v26  ;;  %14305 = vmatpush1.bf16.msra.mxu1 %v19797_v51 }
0x1beb   :  { %14275 = vmatprep.subr.bf16.mxu0 %v18226_v15  ;;  %14307 = vmatprep.subr.bf16.mxu1 %v18228_v59 }
0x1bee   :  { %14277 = vmatpush1.bf16.msra.mxu0 %v18232_v57  ;;  %14309 = vmatpush1.bf16.msra.mxu1 %v18234_v21 }
0x1bef   :  { %14279 = vmatprep.subr.bf16.mxu0 %v18238_v39  ;;  %14311 = vmatprep.subr.bf16.mxu1 %v19804_v19 }
0x1bf2   :  { %14281 = vmatpush1.bf16.msra.mxu0 %v18244_v41  ;;  %14313 = vmatpush1.bf16.msra.mxu1 %v18246_v29 }
0x1bf3   :  { %14283 = vmatprep.subr.bf16.mxu0 %v18250_v34  ;;  %14315 = vmatprep.subr.bf16.mxu1 %v18252_v9 }
0x1bf6   :  { %14285 = vmatpush1.bf16.msra.mxu0 %v18256_v58  ;;  %14317 = vmatpush1.bf16.msra.mxu1 %v18258_v49 }
0x1bf7   :  { %14319 = vmatprep.subr.bf16.mxu0 %v18062_v60  ;;  %14351 = vmatprep.subr.bf16.mxu1 %v18064_v50 }
0x1bf9   :  { %9032 = vmatmul.mubr.f32.vlgmr.msra.gmra.mrb[52].mxu0 %v10832_v2  ;;  %9103 = vmatmul.mubr.f32.vlgmr.msra.gmra.mrb[52].mxu1 %v10832_v2  ;;  %v19819_v2 = vld [vmem:[#allocation18_spill] sm:$0xff] }
0x1bfa   :  { %14321 = vmatpush1.bf16.msra.mxu0 %v18068_v48  ;;  %14353 = vmatpush1.bf16.msra.mxu1 %v18070_v27 }
0x1bfb   :  { %14323 = vmatprep.subr.bf16.mxu0 %v18074_v20  ;;  %14355 = vmatprep.subr.bf16.mxu1 %v18076_v28 }
0x1bfc   :  { %9203 = vmatprep.mubr.f32.mxu0 %v19235_v45  ;;  %9274 = vmatprep.mubr.f32.mxu1 %v19235_v45 }
0x1bfe   :  { %14325 = vmatpush1.bf16.msra.mxu0 %v18082_v55  ;;  %14357 = vmatpush1.bf16.msra.mxu1 %v18084_v30 }
0x1bff   :  { %14327 = vmatprep.subr.bf16.mxu0 %v18088_v61  ;;  %14359 = vmatprep.subr.bf16.mxu1 %v18090_v4 }
0x1c02   :  { %14329 = vmatpush1.bf16.msra.mxu0 %v18096_v35  ;;  %14361 = vmatpush1.bf16.msra.mxu1 %v18098_v18 }
0x1c03   :  { %14331 = vmatprep.subr.bf16.mxu0 %v18102_v7  ;;  %14363 = vmatprep.subr.bf16.mxu1 %v18104_v5 }
0x1c06   :  { %14333 = vmatpush1.bf16.msra.mxu0 %v19805_v36  ;;  %14365 = vmatpush1.bf16.msra.mxu1 %v19806_v46 }
0x1c07   :  { %14335 = vmatprep.subr.bf16.mxu0 %v19807_v0  ;;  %14367 = vmatprep.subr.bf16.mxu1 %v19808_v24  ;;  %v19825_v24 = vld [vmem:[#allocation29_spill] sm:$0xff] }
0x1c0a   :  { %14337 = vmatpush1.bf16.msra.mxu0 %v19809_v16  ;;  %14369 = vmatpush1.bf16.msra.mxu1 %v19810_v44  ;;  %v19820_v16 = vld [vmem:[#allocation56_spill] sm:$0xff]  ;;  %v19821_v44 = vld [vmem:[#allocation9_spill] sm:$0xff] }
0x1c0b   :  { %14339 = vmatprep.subr.bf16.mxu0 %v19811_v47  ;;  %14371 = vmatprep.subr.bf16.mxu1 %v19812_v1  ;;  %v19822_v47 = vld [vmem:[#allocation10_spill] sm:$0xff]  ;;  %v19823_v1 = vld [vmem:[#allocation11_spill] sm:$0xff] }
0x1c0e   :  { %14341 = vmatpush1.bf16.msra.mxu0 %v19813_v37  ;;  %14373 = vmatpush1.bf16.msra.mxu1 %v19814_v13  ;;  %v19824_v37 = vld [vmem:[#allocation12_spill] sm:$0xff] }
0x1c0f   :  { %14343 = vmatprep.subr.bf16.mxu0 %v19815_v38  ;;  %14375 = vmatprep.subr.bf16.mxu1 %v19816_v54 }
0x1c12   :  { %14345 = vmatpush1.bf16.msra.mxu0 %v19817_v6  ;;  %14377 = vmatpush1.bf16.msra.mxu1 %v19818_v40 }
0x1c13   :  { %14347 = vmatprep.subr.bf16.mxu0 %v19819_v2  ;;  %14379 = vmatprep.subr.bf16.mxu1 %v19820_v16 }
0x1c16   :  { %14349 = vmatpush1.bf16.msra.mxu0 %v19821_v44  ;;  %14381 = vmatpush1.bf16.msra.mxu1 %v19822_v47 }
0x1c17   :  { %14383 = vmatprep.subr.bf16.mxu0 %v19823_v1  ;;  %14415 = vmatprep.subr.bf16.mxu1 %v19824_v37 }
0x1ccc   :  { %v9033_v13 = vpop.f32.mrb[52].mxu0  ;;  %v9104_v38 = vpop.f32.mrb[52].mxu1 }
0x1ccd   :  { %v9109_v54 = vadd.f32 %v9033_v13, %v19825_v24  ;;  %v9035_v0 = vpop.f32.mrb[53].mxu0  ;;  %v9106_v6 = vpop.f32.mrb[53].mxu1  ;;  %v9111_v44 = vadd.f32 %v9104_v38, %v18323_v3 }
0x1cce   :  { %v9110_v40 = vadd.f32 %v9035_v0, %v19803_v53  ;;  %v9112_v47 = vadd.f32 %v9106_v6, %v18326_v33  ;;  %v19831_v6 = vld [vmem:[#allocation44_spill] sm:$0xff] }
0x1ccf   :  { %v10833_v46 = vmul.f32 -1.442695, %v9109_v54  ;;  %v10835_v16 = vmul.f32 -1.442695, %v9111_v44 }
0x1cd0   :  { %v10834_v2 = vmul.f32 -1.442695, %v9110_v40 }
0x1cd1   :  { %15507 = vpow2.f32 %v10833_v46 }
0x1cd2   :  { %15509 = vpow2.f32 %v10834_v2 }
0x1cd3   :  { %15511 = vtanh.f32 %v9112_v47 }
0x1cd4   :  { %15513 = vpow2.f32 %v10835_v16  ;;  %v19829_v16 = vld [vmem:[#allocation38_spill] sm:$0xff] }
0x1cdb   :  { %v15508_v1 = vpop.eup %15507 }
0x1cdc   :  { %v9122_v36 = vadd.f32 1.0, %v15508_v1  ;;  %v15510_v37 = vpop.eup %15509 }
0x1cdd   :  { %v9123_v13 = vadd.f32 1.0, %v15510_v37  ;;  %v15512_v24 = vpop.eup %15511  ;;  %v19830_v37 = vld [vmem:[#allocation42_spill] sm:$0xff] }
0x1cde   :  { %15515 = vrcp.f32 %v9122_v36  ;;  %v15514_v5 = vpop.eup %15513  ;;  %v19827_v36 = vld [vmem:[#allocation36_spill] sm:$0xff] }
0x1cdf   :  { %15517 = vrcp.f32 %v9123_v13  ;;  %v9124_v46 = vadd.f32 1.0, %v15514_v5  ;;  %v10837_v5 = vld [vmem:[%s18875_s4 + $0x18] sm:$0xff]  ;;  %v19832_v13 = vld [vmem:[#allocation8_spill] sm:$0xff] }
0x1ce1   :  { %15519 = vrcp.f32 %v9124_v46  ;;  %v19836_v46 = vld [vmem:[#allocation50_spill] sm:$0xff] }
0x1ce8   :  { %v15516_v0 = vpop.eup %15515 }
0x1ce9   :  { %v9133_v54 = vmul.f32 %v15516_v0, %v15512_v24  ;;  %v15518_v40 = vpop.eup %15517  ;;  %v19828_v24 = vld [vmem:[#allocation37_spill] sm:$0xff]  ;;  %v19833_v0 = vld [vmem:[#allocation14_spill] sm:$0xff] }
0x1cea   :  { %v9132_v2 = vmul.f32 %v15518_v40, %v18412_v25  ;;  %v19826_v25 = vld [vmem:[#allocation35_spill] sm:$0xff]  ;;  %v19835_v40 = vld [vmem:[#allocation16_spill] sm:$0xff] }
0x1ceb   :  { %v15520_v44 = vpop.eup %15519 }
0x1cec   :  { %v18494_v38 = vadd.f32 %v9133_v54, %v9132_v2  ;;  %v19834_v54 = vld [vmem:[#allocation15_spill] sm:$0xff]  ;;  %v19837_v2 = vld [vmem:[#allocation52_spill] sm:$0xff] }
0x1cee   :  { %15521 = vtanh.f32 %v18494_v38 }
0x1cf8   :  { %v15522_v47 = vpop.eup %15521 }
0x1cf9   :  { %v9136_v1 = vmul.f32 %v15522_v47, %v15520_v44  ;;  %v19838_v44 = vld [vmem:[#allocation53_spill] sm:$0xff]  ;;  %v19839_v47 = vld [vmem:[#allocation54_spill] sm:$0xff] }
0x1cfb   :  { %10836 = vst [vmem:[%s18875_s4 + $0x10] sm:$0xff] %v9136_v1  ;;  %9204 = vmatmul.mubr.f32.vlgmr.msra.gmra.mrb[54].mxu0 %v9136_v1  ;;  %9275 = vmatmul.mubr.f32.vlgmr.msra.gmra.mrb[54].mxu1 %v9136_v1  ;;  %v19840_v1 = vld [vmem:[#allocation17_spill] sm:$0xff] }
0x1cfc   :  { %14385 = vmatpush1.bf16.msra.mxu0 %v18168_v62  ;;  %14417 = vmatpush1.bf16.msra.mxu1 %v18170_v43 }
0x1cfd   :  { %14387 = vmatprep.subr.bf16.mxu0 %v19782_v10  ;;  %14419 = vmatprep.subr.bf16.mxu1 %v19783_v22 }
0x1cfe   :  { %9345 = vmatprep.mubr.f32.mxu0 %v19235_v45  ;;  %9416 = vmatprep.mubr.f32.mxu1 %v19235_v45 }
0x1d00   :  { %14389 = vmatpush1.bf16.msra.mxu0 %v19784_v56  ;;  %14421 = vmatpush1.bf16.msra.mxu1 %v19785_v17 }
0x1d01   :  { %14391 = vmatprep.subr.bf16.mxu0 %v19786_v8  ;;  %14423 = vmatprep.subr.bf16.mxu1 %v19787_v42 }
0x1d04   :  { %14393 = vmatpush1.bf16.msra.mxu0 %v19788_v11  ;;  %14425 = vmatpush1.bf16.msra.mxu1 %v19789_v23 }
0x1d05   :  { %14395 = vmatprep.subr.bf16.mxu0 %v19790_v14  ;;  %14427 = vmatprep.subr.bf16.mxu1 %v19791_v12 }
0x1d08   :  { %14397 = vmatpush1.bf16.msra.mxu0 %v19792_v52  ;;  %14429 = vmatpush1.bf16.msra.mxu1 %v19793_v31 }
0x1d09   :  { %14399 = vmatprep.subr.bf16.mxu0 %v19794_v32  ;;  %14431 = vmatprep.subr.bf16.mxu1 %v19795_v63 }
0x1d0c   :  { %14401 = vmatpush1.bf16.msra.mxu0 %v19796_v26  ;;  %14433 = vmatpush1.bf16.msra.mxu1 %v19797_v51 }
0x1d0d   :  { %14403 = vmatprep.subr.bf16.mxu0 %v18226_v15  ;;  %14435 = vmatprep.subr.bf16.mxu1 %v18228_v59 }
0x1d10   :  { %14405 = vmatpush1.bf16.msra.mxu0 %v18232_v57  ;;  %14437 = vmatpush1.bf16.msra.mxu1 %v18234_v21 }
0x1d11   :  { %14407 = vmatprep.subr.bf16.mxu0 %v18238_v39  ;;  %14439 = vmatprep.subr.bf16.mxu1 %v19804_v19 }
0x1d14   :  { %14409 = vmatpush1.bf16.msra.mxu0 %v18244_v41  ;;  %14441 = vmatpush1.bf16.msra.mxu1 %v18246_v29 }
0x1d15   :  { %14411 = vmatprep.subr.bf16.mxu0 %v18250_v34  ;;  %14443 = vmatprep.subr.bf16.mxu1 %v18252_v9 }
0x1d18   :  { %14413 = vmatpush1.bf16.msra.mxu0 %v18256_v58  ;;  %14445 = vmatpush1.bf16.msra.mxu1 %v18258_v49 }
0x1d19   :  { %14447 = vmatprep.subr.bf16.mxu0 %v18062_v60  ;;  %14479 = vmatprep.subr.bf16.mxu1 %v18064_v50 }
0x1d1b   :  { %9346 = vmatmul.mubr.f32.vlgmr.msra.gmra.mrb[54].mxu0 %v10837_v5  ;;  %9417 = vmatmul.mubr.f32.vlgmr.msra.gmra.mrb[54].mxu1 %v10837_v5  ;;  %v19841_v5 = vld [vmem:[#allocation18_spill] sm:$0xff] }
0x1d1c   :  { %14449 = vmatpush1.bf16.msra.mxu0 %v18068_v48  ;;  %14481 = vmatpush1.bf16.msra.mxu1 %v18070_v27 }
0x1d1d   :  { %14451 = vmatprep.subr.bf16.mxu0 %v18074_v20  ;;  %14483 = vmatprep.subr.bf16.mxu1 %v18076_v28 }
0x1d1e   :  { %9517 = vmatprep.mubr.f32.mxu0 %v19235_v45  ;;  %9588 = vmatprep.mubr.f32.mxu1 %v19235_v45 }
0x1d20   :  { %14453 = vmatpush1.bf16.msra.mxu0 %v18082_v55  ;;  %14485 = vmatpush1.bf16.msra.mxu1 %v18084_v30 }
0x1d21   :  { %14455 = vmatprep.subr.bf16.mxu0 %v18088_v61  ;;  %14487 = vmatprep.subr.bf16.mxu1 %v18090_v4 }
0x1d24   :  { %14457 = vmatpush1.bf16.msra.mxu0 %v18096_v35  ;;  %14489 = vmatpush1.bf16.msra.mxu1 %v18098_v18 }
0x1d25   :  { %14459 = vmatprep.subr.bf16.mxu0 %v18102_v7  ;;  %14491 = vmatprep.subr.bf16.mxu1 %v19826_v25 }
0x1d28   :  { %14461 = vmatpush1.bf16.msra.mxu0 %v19827_v36  ;;  %14493 = vmatpush1.bf16.msra.mxu1 %v19828_v24 }
0x1d29   :  { %14463 = vmatprep.subr.bf16.mxu0 %v19829_v16  ;;  %14495 = vmatprep.subr.bf16.mxu1 %v19830_v37  ;;  %v19847_v37 = vld [vmem:[#allocation29_spill] sm:$0xff] }
0x1d2c   :  { %14465 = vmatpush1.bf16.msra.mxu0 %v19831_v6  ;;  %14497 = vmatpush1.bf16.msra.mxu1 %v19832_v13  ;;  %v19842_v6 = vld [vmem:[#allocation56_spill] sm:$0xff]  ;;  %v19843_v13 = vld [vmem:[#allocation9_spill] sm:$0xff] }
0x1d2d   :  { %14467 = vmatprep.subr.bf16.mxu0 %v19833_v0  ;;  %14499 = vmatprep.subr.bf16.mxu1 %v19834_v54  ;;  %v19844_v0 = vld [vmem:[#allocation10_spill] sm:$0xff]  ;;  %v19845_v54 = vld [vmem:[#allocation11_spill] sm:$0xff] }
0x1d30   :  { %14469 = vmatpush1.bf16.msra.mxu0 %v19835_v40  ;;  %14501 = vmatpush1.bf16.msra.mxu1 %v19836_v46  ;;  %v19846_v40 = vld [vmem:[#allocation12_spill] sm:$0xff] }
0x1d31   :  { %14471 = vmatprep.subr.bf16.mxu0 %v19837_v2  ;;  %14503 = vmatprep.subr.bf16.mxu1 %v19838_v44 }
0x1d34   :  { %14473 = vmatpush1.bf16.msra.mxu0 %v19839_v47  ;;  %14505 = vmatpush1.bf16.msra.mxu1 %v19840_v1 }
0x1d35   :  { %14475 = vmatprep.subr.bf16.mxu0 %v19841_v5  ;;  %14507 = vmatprep.subr.bf16.mxu1 %v19842_v6 }
0x1d38   :  { %14477 = vmatpush1.bf16.msra.mxu0 %v19843_v13  ;;  %14509 = vmatpush1.bf16.msra.mxu1 %v19844_v0 }
0x1d39   :  { %14511 = vmatprep.subr.bf16.mxu0 %v19845_v54  ;;  %14543 = vmatprep.subr.bf16.mxu1 %v19846_v40 }
0x1dee   :  { %v9347_v46 = vpop.f32.mrb[54].mxu0  ;;  %v9418_v2 = vpop.f32.mrb[54].mxu1 }
0x1def   :  { %v9423_v44 = vadd.f32 %v9347_v46, %v19847_v37  ;;  %v9349_v16 = vpop.f32.mrb[55].mxu0  ;;  %v9420_v47 = vpop.f32.mrb[55].mxu1  ;;  %v9425_v13 = vadd.f32 %v9418_v2, %v18323_v3 }
0x1df0   :  { %v9424_v1 = vadd.f32 %v9349_v16, %v19803_v53  ;;  %v9426_v0 = vadd.f32 %v9420_v47, %v18326_v33  ;;  %v19853_v47 = vld [vmem:[#allocation44_spill] sm:$0xff] }
0x1df1   :  { %v10838_v24 = vmul.f32 -1.442695, %v9423_v44  ;;  %v10840_v6 = vmul.f32 -1.442695, %v9425_v13 }
0x1df2   :  { %v10839_v5 = vmul.f32 -1.442695, %v9424_v1 }
0x1df3   :  { %15523 = vpow2.f32 %v10838_v24 }
0x1df4   :  { %15525 = vpow2.f32 %v10839_v5 }
0x1df5   :  { %15527 = vtanh.f32 %v9426_v0 }
0x1df6   :  { %15529 = vpow2.f32 %v10840_v6  ;;  %v19851_v6 = vld [vmem:[#allocation38_spill] sm:$0xff] }
0x1dfd   :  { %v15524_v54 = vpop.eup %15523 }
0x1dfe   :  { %v9436_v36 = vadd.f32 1.0, %v15524_v54  ;;  %v15526_v40 = vpop.eup %15525 }
0x1dff   :  { %v9437_v46 = vadd.f32 1.0, %v15526_v40  ;;  %v15528_v37 = vpop.eup %15527  ;;  %v19852_v40 = vld [vmem:[#allocation42_spill] sm:$0xff] }
0x1e00   :  { %15531 = vrcp.f32 %v9436_v36  ;;  %v15530_v25 = vpop.eup %15529  ;;  %v19849_v36 = vld [vmem:[#allocation36_spill] sm:$0xff] }
0x1e01   :  { %15533 = vrcp.f32 %v9437_v46  ;;  %v9438_v24 = vadd.f32 1.0, %v15530_v25  ;;  %v19848_v25 = vld [vmem:[#allocation35_spill] sm:$0xff]  ;;  %v19854_v46 = vld [vmem:[#allocation8_spill] sm:$0xff] }
0x1e03   :  { %15535 = vrcp.f32 %v9438_v24  ;;  %v19858_v24 = vld [vmem:[#allocation50_spill] sm:$0xff] }
0x1e0a   :  { %v15532_v16 = vpop.eup %15531 }
0x1e0b   :  { %v9447_v44 = vmul.f32 %v15532_v16, %v15528_v37  ;;  %v15534_v1 = vpop.eup %15533  ;;  %v19850_v37 = vld [vmem:[#allocation37_spill] sm:$0xff]  ;;  %v19855_v16 = vld [vmem:[#allocation14_spill] sm:$0xff] }
0x1e0c   :  { %v9446_v5 = vmul.f32 %v15534_v1, %v18494_v38  ;;  %v10842_v38 = vld [vmem:[%s18875_s4 + $0x20] sm:$0xff] }
0x1e0d   :  { %v15536_v13 = vpop.eup %15535  ;;  %v19857_v1 = vld [vmem:[#allocation16_spill] sm:$0xff] }
0x1e0e   :  { %v18576_v2 = vadd.f32 %v9447_v44, %v9446_v5  ;;  %v19856_v44 = vld [vmem:[#allocation15_spill] sm:$0xff]  ;;  %v19859_v5 = vld [vmem:[#allocation52_spill] sm:$0xff] }
0x1e10   :  { %15537 = vtanh.f32 %v18576_v2 }
0x1e1a   :  { %v15538_v0 = vpop.eup %15537 }
0x1e1b   :  { %v9450_v54 = vmul.f32 %v15538_v0, %v15536_v13  ;;  %v19860_v13 = vld [vmem:[#allocation53_spill] sm:$0xff]  ;;  %v19861_v0 = vld [vmem:[#allocation54_spill] sm:$0xff] }
0x1e1d   :  { %10841 = vst [vmem:[%s18875_s4 + $0x18] sm:$0xff] %v9450_v54  ;;  %9518 = vmatmul.mubr.f32.vlgmr.msra.gmra.mrb[56].mxu0 %v9450_v54  ;;  %9589 = vmatmul.mubr.f32.vlgmr.msra.gmra.mrb[56].mxu1 %v9450_v54  ;;  %v19862_v54 = vld [vmem:[#allocation17_spill] sm:$0xff] }
0x1e1e   :  { %14513 = vmatpush1.bf16.msra.mxu0 %v18168_v62  ;;  %14545 = vmatpush1.bf16.msra.mxu1 %v18170_v43 }
0x1e1f   :  { %14515 = vmatprep.subr.bf16.mxu0 %v19782_v10  ;;  %14547 = vmatprep.subr.bf16.mxu1 %v19783_v22 }
0x1e20   :  { %9659 = vmatprep.mubr.f32.mxu0 %v19235_v45  ;;  %9730 = vmatprep.mubr.f32.mxu1 %v19235_v45 }
0x1e22   :  { %14517 = vmatpush1.bf16.msra.mxu0 %v19784_v56  ;;  %14549 = vmatpush1.bf16.msra.mxu1 %v19785_v17 }
0x1e23   :  { %14519 = vmatprep.subr.bf16.mxu0 %v19786_v8  ;;  %14551 = vmatprep.subr.bf16.mxu1 %v19787_v42 }
0x1e26   :  { %14521 = vmatpush1.bf16.msra.mxu0 %v19788_v11  ;;  %14553 = vmatpush1.bf16.msra.mxu1 %v19789_v23 }
0x1e27   :  { %14523 = vmatprep.subr.bf16.mxu0 %v19790_v14  ;;  %14555 = vmatprep.subr.bf16.mxu1 %v19791_v12 }
0x1e2a   :  { %14525 = vmatpush1.bf16.msra.mxu0 %v19792_v52  ;;  %14557 = vmatpush1.bf16.msra.mxu1 %v19793_v31 }
0x1e2b   :  { %14527 = vmatprep.subr.bf16.mxu0 %v19794_v32  ;;  %14559 = vmatprep.subr.bf16.mxu1 %v19795_v63 }
0x1e2e   :  { %14529 = vmatpush1.bf16.msra.mxu0 %v19796_v26  ;;  %14561 = vmatpush1.bf16.msra.mxu1 %v19797_v51 }
0x1e2f   :  { %14531 = vmatprep.subr.bf16.mxu0 %v18226_v15  ;;  %14563 = vmatprep.subr.bf16.mxu1 %v18228_v59 }
0x1e32   :  { %14533 = vmatpush1.bf16.msra.mxu0 %v18232_v57  ;;  %14565 = vmatpush1.bf16.msra.mxu1 %v18234_v21 }
0x1e33   :  { %14535 = vmatprep.subr.bf16.mxu0 %v18238_v39  ;;  %14567 = vmatprep.subr.bf16.mxu1 %v19804_v19 }
0x1e36   :  { %14537 = vmatpush1.bf16.msra.mxu0 %v18244_v41  ;;  %14569 = vmatpush1.bf16.msra.mxu1 %v18246_v29 }
0x1e37   :  { %14539 = vmatprep.subr.bf16.mxu0 %v18250_v34  ;;  %14571 = vmatprep.subr.bf16.mxu1 %v18252_v9 }
0x1e3a   :  { %14541 = vmatpush1.bf16.msra.mxu0 %v18256_v58  ;;  %14573 = vmatpush1.bf16.msra.mxu1 %v18258_v49 }
0x1e3b   :  { %14575 = vmatprep.subr.bf16.mxu0 %v18062_v60  ;;  %14607 = vmatprep.subr.bf16.mxu1 %v18064_v50 }
0x1e3d   :  { %9660 = vmatmul.mubr.f32.vlgmr.msra.gmra.mrb[56].mxu0 %v10842_v38  ;;  %9731 = vmatmul.mubr.f32.vlgmr.msra.gmra.mrb[56].mxu1 %v10842_v38  ;;  %v19863_v38 = vld [vmem:[#allocation18_spill] sm:$0xff] }
0x1e3e   :  { %14577 = vmatpush1.bf16.msra.mxu0 %v18068_v48  ;;  %14609 = vmatpush1.bf16.msra.mxu1 %v18070_v27 }
0x1e3f   :  { %14579 = vmatprep.subr.bf16.mxu0 %v18074_v20  ;;  %14611 = vmatprep.subr.bf16.mxu1 %v18076_v28 }
0x1e40   :  { %9831 = vmatprep.mubr.f32.mxu0 %v19235_v45  ;;  %9902 = vmatprep.mubr.f32.mxu1 %v19235_v45 }
0x1e42   :  { %14581 = vmatpush1.bf16.msra.mxu0 %v18082_v55  ;;  %14613 = vmatpush1.bf16.msra.mxu1 %v18084_v30 }
0x1e43   :  { %14583 = vmatprep.subr.bf16.mxu0 %v18088_v61  ;;  %14615 = vmatprep.subr.bf16.mxu1 %v18090_v4 }
0x1e46   :  { %14585 = vmatpush1.bf16.msra.mxu0 %v18096_v35  ;;  %14617 = vmatpush1.bf16.msra.mxu1 %v18098_v18 }
0x1e47   :  { %14587 = vmatprep.subr.bf16.mxu0 %v18102_v7  ;;  %14619 = vmatprep.subr.bf16.mxu1 %v19848_v25 }
0x1e4a   :  { %14589 = vmatpush1.bf16.msra.mxu0 %v19849_v36  ;;  %14621 = vmatpush1.bf16.msra.mxu1 %v19850_v37 }
0x1e4b   :  { %14591 = vmatprep.subr.bf16.mxu0 %v19851_v6  ;;  %14623 = vmatprep.subr.bf16.mxu1 %v19852_v40  ;;  %v19869_v40 = vld [vmem:[#allocation29_spill] sm:$0xff] }
0x1e4e   :  { %14593 = vmatpush1.bf16.msra.mxu0 %v19853_v47  ;;  %14625 = vmatpush1.bf16.msra.mxu1 %v19854_v46  ;;  %v19864_v47 = vld [vmem:[#allocation56_spill] sm:$0xff]  ;;  %v19865_v46 = vld [vmem:[#allocation9_spill] sm:$0xff] }
0x1e4f   :  { %14595 = vmatprep.subr.bf16.mxu0 %v19855_v16  ;;  %14627 = vmatprep.subr.bf16.mxu1 %v19856_v44  ;;  %v19866_v16 = vld [vmem:[#allocation10_spill] sm:$0xff]  ;;  %v19867_v44 = vld [vmem:[#allocation11_spill] sm:$0xff] }
0x1e52   :  { %14597 = vmatpush1.bf16.msra.mxu0 %v19857_v1  ;;  %14629 = vmatpush1.bf16.msra.mxu1 %v19858_v24  ;;  %v19868_v1 = vld [vmem:[#allocation12_spill] sm:$0xff] }
0x1e53   :  { %14599 = vmatprep.subr.bf16.mxu0 %v19859_v5  ;;  %14631 = vmatprep.subr.bf16.mxu1 %v19860_v13 }
0x1e56   :  { %14601 = vmatpush1.bf16.msra.mxu0 %v19861_v0  ;;  %14633 = vmatpush1.bf16.msra.mxu1 %v19862_v54 }
0x1e57   :  { %14603 = vmatprep.subr.bf16.mxu0 %v19863_v38  ;;  %14635 = vmatprep.subr.bf16.mxu1 %v19864_v47 }
0x1e5a   :  { %14605 = vmatpush1.bf16.msra.mxu0 %v19865_v46  ;;  %14637 = vmatpush1.bf16.msra.mxu1 %v19866_v16 }
0x1e5b   :  { %14639 = vmatprep.subr.bf16.mxu0 %v19867_v44  ;;  %14671 = vmatprep.subr.bf16.mxu1 %v19868_v1 }
0x1f10   :  { %v9661_v24 = vpop.f32.mrb[56].mxu0  ;;  %v9732_v5 = vpop.f32.mrb[56].mxu1 }
0x1f11   :  { %v9737_v13 = vadd.f32 %v9661_v24, %v19869_v40  ;;  %v9663_v6 = vpop.f32.mrb[57].mxu0  ;;  %v9734_v0 = vpop.f32.mrb[57].mxu1  ;;  %v9739_v46 = vadd.f32 %v9732_v5, %v18323_v3 }
0x1f12   :  { %v9738_v54 = vadd.f32 %v9663_v6, %v19803_v53  ;;  %v9740_v16 = vadd.f32 %v9734_v0, %v18326_v33  ;;  %v19875_v0 = vld [vmem:[#allocation44_spill] sm:$0xff] }
0x1f13   :  { %v10843_v37 = vmul.f32 -1.442695, %v9737_v13  ;;  %v10845_v47 = vmul.f32 -1.442695, %v9739_v46 }
0x1f14   :  { %v10844_v38 = vmul.f32 -1.442695, %v9738_v54 }
0x1f15   :  { %15539 = vpow2.f32 %v10843_v37 }
0x1f16   :  { %15541 = vpow2.f32 %v10844_v38 }
0x1f17   :  { %15543 = vtanh.f32 %v9740_v16 }
0x1f18   :  { %15545 = vpow2.f32 %v10845_v47  ;;  %v19873_v47 = vld [vmem:[#allocation38_spill] sm:$0xff] }
0x1f1f   :  { %v15540_v44 = vpop.eup %15539 }
0x1f20   :  { %v9750_v36 = vadd.f32 1.0, %v15540_v44  ;;  %v15542_v1 = vpop.eup %15541 }
0x1f21   :  { %v9751_v24 = vadd.f32 1.0, %v15542_v1  ;;  %v15544_v40 = vpop.eup %15543  ;;  %v19874_v1 = vld [vmem:[#allocation42_spill] sm:$0xff] }
0x1f22   :  { %15547 = vrcp.f32 %v9750_v36  ;;  %v15546_v25 = vpop.eup %15545  ;;  %v19871_v36 = vld [vmem:[#allocation36_spill] sm:$0xff] }
0x1f23   :  { %15549 = vrcp.f32 %v9751_v24  ;;  %v9752_v37 = vadd.f32 1.0, %v15546_v25  ;;  %v19870_v25 = vld [vmem:[#allocation35_spill] sm:$0xff]  ;;  %v19876_v24 = vld [vmem:[#allocation8_spill] sm:$0xff] }
0x1f25   :  { %15551 = vrcp.f32 %v9752_v37  ;;  %v19880_v37 = vld [vmem:[#allocation50_spill] sm:$0xff] }
0x1f2c   :  { %v15548_v6 = vpop.eup %15547 }
0x1f2d   :  { %v9761_v13 = vmul.f32 %v15548_v6, %v15544_v40  ;;  %v15550_v54 = vpop.eup %15549  ;;  %v19872_v40 = vld [vmem:[#allocation37_spill] sm:$0xff]  ;;  %v19877_v6 = vld [vmem:[#allocation14_spill] sm:$0xff] }
0x1f2e   :  { %v9760_v38 = vmul.f32 %v15550_v54, %v18576_v2  ;;  %v10847_v2 = vld [vmem:[%s18875_s4 + $0x28] sm:$0xff]  ;;  %v19879_v54 = vld [vmem:[#allocation16_spill] sm:$0xff] }
0x1f2f   :  { %v15552_v46 = vpop.eup %15551 }
0x1f30   :  { %v18658_v5 = vadd.f32 %v9761_v13, %v9760_v38  ;;  %v19878_v13 = vld [vmem:[#allocation15_spill] sm:$0xff]  ;;  %v19881_v38 = vld [vmem:[#allocation52_spill] sm:$0xff] }
0x1f32   :  { %15553 = vtanh.f32 %v18658_v5 }
0x1f3c   :  { %v15554_v16 = vpop.eup %15553 }
0x1f3d   :  { %v9764_v44 = vmul.f32 %v15554_v16, %v15552_v46  ;;  %v19882_v46 = vld [vmem:[#allocation53_spill] sm:$0xff]  ;;  %v19883_v16 = vld [vmem:[#allocation54_spill] sm:$0xff] }
0x1f3f   :  { %10846 = vst [vmem:[%s18875_s4 + $0x20] sm:$0xff] %v9764_v44  ;;  %9832 = vmatmul.mubr.f32.vlgmr.msra.gmra.mrb[58].mxu0 %v9764_v44  ;;  %9903 = vmatmul.mubr.f32.vlgmr.msra.gmra.mrb[58].mxu1 %v9764_v44  ;;  %v19884_v44 = vld [vmem:[#allocation17_spill] sm:$0xff] }
0x1f40   :  { %14641 = vmatpush1.bf16.msra.mxu0 %v18168_v62  ;;  %14673 = vmatpush1.bf16.msra.mxu1 %v18170_v43 }
0x1f41   :  { %14643 = vmatprep.subr.bf16.mxu0 %v19782_v10  ;;  %14675 = vmatprep.subr.bf16.mxu1 %v19783_v22 }
0x1f42   :  { %9973 = vmatprep.mubr.f32.mxu0 %v19235_v45  ;;  %10044 = vmatprep.mubr.f32.mxu1 %v19235_v45 }
0x1f44   :  { %14645 = vmatpush1.bf16.msra.mxu0 %v19784_v56  ;;  %14677 = vmatpush1.bf16.msra.mxu1 %v19785_v17 }
0x1f45   :  { %14647 = vmatprep.subr.bf16.mxu0 %v19786_v8  ;;  %14679 = vmatprep.subr.bf16.mxu1 %v19787_v42 }
0x1f48   :  { %14649 = vmatpush1.bf16.msra.mxu0 %v19788_v11  ;;  %14681 = vmatpush1.bf16.msra.mxu1 %v19789_v23 }
0x1f49   :  { %14651 = vmatprep.subr.bf16.mxu0 %v19790_v14  ;;  %14683 = vmatprep.subr.bf16.mxu1 %v19791_v12 }
0x1f4c   :  { %14653 = vmatpush1.bf16.msra.mxu0 %v19792_v52  ;;  %14685 = vmatpush1.bf16.msra.mxu1 %v19793_v31 }
0x1f4d   :  { %14655 = vmatprep.subr.bf16.mxu0 %v19794_v32  ;;  %14687 = vmatprep.subr.bf16.mxu1 %v19795_v63 }
0x1f50   :  { %14657 = vmatpush1.bf16.msra.mxu0 %v19796_v26  ;;  %14689 = vmatpush1.bf16.msra.mxu1 %v19797_v51 }
0x1f51   :  { %14659 = vmatprep.subr.bf16.mxu0 %v18226_v15  ;;  %14691 = vmatprep.subr.bf16.mxu1 %v18228_v59 }
0x1f54   :  { %14661 = vmatpush1.bf16.msra.mxu0 %v18232_v57  ;;  %14693 = vmatpush1.bf16.msra.mxu1 %v18234_v21 }
0x1f55   :  { %14663 = vmatprep.subr.bf16.mxu0 %v18238_v39  ;;  %14695 = vmatprep.subr.bf16.mxu1 %v19804_v19 }
0x1f58   :  { %14665 = vmatpush1.bf16.msra.mxu0 %v18244_v41  ;;  %14697 = vmatpush1.bf16.msra.mxu1 %v18246_v29 }
0x1f59   :  { %14667 = vmatprep.subr.bf16.mxu0 %v18250_v34  ;;  %14699 = vmatprep.subr.bf16.mxu1 %v18252_v9 }
0x1f5c   :  { %14669 = vmatpush1.bf16.msra.mxu0 %v18256_v58  ;;  %14701 = vmatpush1.bf16.msra.mxu1 %v18258_v49 }
0x1f5d   :  { %14703 = vmatprep.subr.bf16.mxu0 %v18062_v60  ;;  %14735 = vmatprep.subr.bf16.mxu1 %v18064_v50 }
0x1f5f   :  { %9974 = vmatmul.mubr.f32.vlgmr.msra.gmra.mrb[58].mxu0 %v10847_v2  ;;  %10045 = vmatmul.mubr.f32.vlgmr.msra.gmra.mrb[58].mxu1 %v10847_v2  ;;  %v19885_v2 = vld [vmem:[#allocation18_spill] sm:$0xff] }
0x1f60   :  { %14705 = vmatpush1.bf16.msra.mxu0 %v18068_v48  ;;  %14737 = vmatpush1.bf16.msra.mxu1 %v18070_v27 }
0x1f61   :  { %14707 = vmatprep.subr.bf16.mxu0 %v18074_v20  ;;  %14739 = vmatprep.subr.bf16.mxu1 %v18076_v28 }
0x1f62   :  { %10145 = vmatprep.mubr.f32.mxu0 %v19235_v45  ;;  %10216 = vmatprep.mubr.f32.mxu1 %v19235_v45 }
0x1f64   :  { %14709 = vmatpush1.bf16.msra.mxu0 %v18082_v55  ;;  %14741 = vmatpush1.bf16.msra.mxu1 %v18084_v30 }
0x1f65   :  { %14711 = vmatprep.subr.bf16.mxu0 %v18088_v61  ;;  %14743 = vmatprep.subr.bf16.mxu1 %v18090_v4 }
0x1f68   :  { %14713 = vmatpush1.bf16.msra.mxu0 %v18096_v35  ;;  %14745 = vmatpush1.bf16.msra.mxu1 %v18098_v18 }
0x1f69   :  { %14715 = vmatprep.subr.bf16.mxu0 %v18102_v7  ;;  %14747 = vmatprep.subr.bf16.mxu1 %v19870_v25 }
0x1f6c   :  { %14717 = vmatpush1.bf16.msra.mxu0 %v19871_v36  ;;  %14749 = vmatpush1.bf16.msra.mxu1 %v19872_v40 }
0x1f6d   :  { %14719 = vmatprep.subr.bf16.mxu0 %v19873_v47  ;;  %14751 = vmatprep.subr.bf16.mxu1 %v19874_v1  ;;  %v19891_v1 = vld [vmem:[#allocation29_spill] sm:$0xff] }
0x1f70   :  { %14721 = vmatpush1.bf16.msra.mxu0 %v19875_v0  ;;  %14753 = vmatpush1.bf16.msra.mxu1 %v19876_v24  ;;  %v19886_v0 = vld [vmem:[#allocation56_spill] sm:$0xff]  ;;  %v19887_v24 = vld [vmem:[#allocation9_spill] sm:$0xff] }
0x1f71   :  { %14723 = vmatprep.subr.bf16.mxu0 %v19877_v6  ;;  %14755 = vmatprep.subr.bf16.mxu1 %v19878_v13  ;;  %v19888_v6 = vld [vmem:[#allocation10_spill] sm:$0xff]  ;;  %v19889_v13 = vld [vmem:[#allocation11_spill] sm:$0xff] }
0x1f74   :  { %14725 = vmatpush1.bf16.msra.mxu0 %v19879_v54  ;;  %14757 = vmatpush1.bf16.msra.mxu1 %v19880_v37  ;;  %v19890_v54 = vld [vmem:[#allocation12_spill] sm:$0xff] }
0x1f75   :  { %14727 = vmatprep.subr.bf16.mxu0 %v19881_v38  ;;  %14759 = vmatprep.subr.bf16.mxu1 %v19882_v46 }
0x1f78   :  { %14729 = vmatpush1.bf16.msra.mxu0 %v19883_v16  ;;  %14761 = vmatpush1.bf16.msra.mxu1 %v19884_v44 }
0x1f79   :  { %14731 = vmatprep.subr.bf16.mxu0 %v19885_v2  ;;  %14763 = vmatprep.subr.bf16.mxu1 %v19886_v0 }
0x1f7c   :  { %14733 = vmatpush1.bf16.msra.mxu0 %v19887_v24  ;;  %14765 = vmatpush1.bf16.msra.mxu1 %v19888_v6 }
0x1f7d   :  { %14767 = vmatprep.subr.bf16.mxu0 %v19889_v13  ;;  %14799 = vmatprep.subr.bf16.mxu1 %v19890_v54 }
0x2032   :  { %v9975_v37 = vpop.f32.mrb[58].mxu0  ;;  %v10046_v38 = vpop.f32.mrb[58].mxu1 }
0x2033   :  { %v10051_v46 = vadd.f32 %v9975_v37, %v19891_v1  ;;  %v9977_v47 = vpop.f32.mrb[59].mxu0  ;;  %v10048_v16 = vpop.f32.mrb[59].mxu1  ;;  %v10053_v24 = vadd.f32 %v10046_v38, %v18323_v3 }
0x2034   :  { %v10052_v44 = vadd.f32 %v9977_v47, %v19803_v53  ;;  %v10054_v6 = vadd.f32 %v10048_v16, %v18326_v33  ;;  %v19910_v16 = vld [vmem:[#allocation10_spill] sm:$0xff] }
0x2035   :  { %v10848_v40 = vmul.f32 -1.442695, %v10051_v46  ;;  %v10850_v0 = vmul.f32 -1.442695, %v10053_v24 }
0x2036   :  { %v10849_v2 = vmul.f32 -1.442695, %v10052_v44 }
0x2037   :  { %15555 = vpow2.f32 %v10848_v40 }
0x2038   :  { %15557 = vpow2.f32 %v10849_v2 }
0x2039   :  { %15559 = vtanh.f32 %v10054_v6 }
0x203a   :  { %15561 = vpow2.f32 %v10850_v0  ;;  %v19908_v0 = vld [vmem:[#allocation56_spill] sm:$0xff] }
0x2041   :  { %v15556_v13 = vpop.eup %15555 }
0x2042   :  { %v10064_v36 = vadd.f32 1.0, %v15556_v13  ;;  %v15558_v54 = vpop.eup %15557 }
0x2043   :  { %v10065_v37 = vadd.f32 1.0, %v15558_v54  ;;  %v15560_v1 = vpop.eup %15559  ;;  %v19909_v54 = vld [vmem:[#allocation9_spill] sm:$0xff] }
0x2044   :  { %15563 = vrcp.f32 %v10064_v36  ;;  %v15562_v25 = vpop.eup %15561  ;;  %v19906_v36 = vld [vmem:[#allocation17_spill] sm:$0xff] }
0x2045   :  { %15565 = vrcp.f32 %v10065_v37  ;;  %v10066_v40 = vadd.f32 1.0, %v15562_v25  ;;  %v19905_v25 = vld [vmem:[#allocation54_spill] sm:$0xff]  ;;  %v19911_v37 = vld [vmem:[#allocation11_spill] sm:$0xff] }
0x2047   :  { %15567 = vrcp.f32 %v10066_v40  ;;  %v19913_v40 = vld [vmem:[#allocation29_spill] sm:$0xff] }
0x204e   :  { %v15564_v47 = vpop.eup %15563 }
0x204f   :  { %v10075_v46 = vmul.f32 %v15564_v47, %v15560_v1  ;;  %v15566_v44 = vpop.eup %15565  ;;  %v19907_v1 = vld [vmem:[#allocation18_spill] sm:$0xff]  ;;  %v19912_v47 = vld [vmem:[#allocation12_spill] sm:$0xff] }
0x2050   :  { %v10074_v2 = vmul.f32 %v15566_v44, %v18658_v5  ;;  %v10852_v5 = vld [vmem:[%s18875_s4 + $0x30] sm:$0xff] }
0x2051   :  { %v15568_v24 = vpop.eup %15567 }
0x2052   :  { %v18740_v38 = vadd.f32 %v10075_v46, %v10074_v2 }
0x2054   :  { %15569 = vtanh.f32 %v18740_v38 }
0x205e   :  { %v15570_v6 = vpop.eup %15569 }
0x205f   :  { %v10078_v13 = vmul.f32 %v15570_v6, %v15568_v24 }
0x2061   :  { %10851 = vst [vmem:[%s18875_s4 + $0x28] sm:$0xff] %v10078_v13  ;;  %10146 = vmatmul.mubr.f32.vlgmr.msra.gmra.mrb[60].mxu0 %v10078_v13  ;;  %10217 = vmatmul.mubr.f32.vlgmr.msra.gmra.mrb[60].mxu1 %v10078_v13 }
0x2062   :  { %14769 = vmatpush1.bf16.msra.mxu0 %v18168_v62  ;;  %14801 = vmatpush1.bf16.msra.mxu1 %v18170_v43 }
0x2063   :  { %14771 = vmatprep.subr.bf16.mxu0 %v19782_v10  ;;  %14803 = vmatprep.subr.bf16.mxu1 %v19783_v22 }
0x2064   :  { %10287 = vmatprep.mubr.f32.mxu0 %v19235_v45  ;;  %10358 = vmatprep.mubr.f32.mxu1 %v19235_v45 }
0x2066   :  { %14773 = vmatpush1.bf16.msra.mxu0 %v19784_v56  ;;  %14805 = vmatpush1.bf16.msra.mxu1 %v19785_v17 }
0x2067   :  { %14775 = vmatprep.subr.bf16.mxu0 %v19786_v8  ;;  %14807 = vmatprep.subr.bf16.mxu1 %v19787_v42 }
0x206a   :  { %14777 = vmatpush1.bf16.msra.mxu0 %v19788_v11  ;;  %14809 = vmatpush1.bf16.msra.mxu1 %v19789_v23 }
0x206b   :  { %14779 = vmatprep.subr.bf16.mxu0 %v19790_v14  ;;  %14811 = vmatprep.subr.bf16.mxu1 %v19791_v12 }
0x206e   :  { %14781 = vmatpush1.bf16.msra.mxu0 %v19792_v52  ;;  %14813 = vmatpush1.bf16.msra.mxu1 %v19793_v31 }
0x206f   :  { %14783 = vmatprep.subr.bf16.mxu0 %v19794_v32  ;;  %14815 = vmatprep.subr.bf16.mxu1 %v19795_v63 }
0x2072   :  { %14785 = vmatpush1.bf16.msra.mxu0 %v19796_v26  ;;  %14817 = vmatpush1.bf16.msra.mxu1 %v19797_v51 }
0x2073   :  { %14787 = vmatprep.subr.bf16.mxu0 %v18226_v15  ;;  %14819 = vmatprep.subr.bf16.mxu1 %v18228_v59 }
0x2076   :  { %14789 = vmatpush1.bf16.msra.mxu0 %v18232_v57  ;;  %14821 = vmatpush1.bf16.msra.mxu1 %v18234_v21 }
0x2077   :  { %14791 = vmatprep.subr.bf16.mxu0 %v18238_v39  ;;  %14823 = vmatprep.subr.bf16.mxu1 %v19804_v19 }
0x207a   :  { %14793 = vmatpush1.bf16.msra.mxu0 %v18244_v41  ;;  %14825 = vmatpush1.bf16.msra.mxu1 %v18246_v29 }
0x207b   :  { %14795 = vmatprep.subr.bf16.mxu0 %v18250_v34  ;;  %14827 = vmatprep.subr.bf16.mxu1 %v18252_v9 }
0x207e   :  { %14797 = vmatpush1.bf16.msra.mxu0 %v18256_v58  ;;  %14829 = vmatpush1.bf16.msra.mxu1 %v18258_v49 }
0x207f   :  { %14831 = vmatprep.subr.bf16.mxu0 %v18062_v60  ;;  %14863 = vmatprep.subr.bf16.mxu1 %v18064_v50  ;;  %v19892_v60 = vld [vmem:[#allocation35_spill] sm:$0xff]  ;;  %v19893_v50 = vld [vmem:[#allocation36_spill] sm:$0xff] }
0x2081   :  { %10288 = vmatmul.mubr.f32.vlgmr.msra.gmra.mrb[60].mxu0 %v10852_v5  ;;  %10359 = vmatmul.mubr.f32.vlgmr.msra.gmra.mrb[60].mxu1 %v10852_v5 }
0x2082   :  { %14833 = vmatpush1.bf16.msra.mxu0 %v18068_v48  ;;  %14865 = vmatpush1.bf16.msra.mxu1 %v18070_v27  ;;  %v19894_v48 = vld [vmem:[#allocation37_spill] sm:$0xff]  ;;  %v19895_v27 = vld [vmem:[#allocation38_spill] sm:$0xff] }
0x2083   :  { %14835 = vmatprep.subr.bf16.mxu0 %v18074_v20  ;;  %14867 = vmatprep.subr.bf16.mxu1 %v18076_v28  ;;  %v19896_v20 = vld [vmem:[#allocation42_spill] sm:$0xff]  ;;  %v19897_v28 = vld [vmem:[#allocation44_spill] sm:$0xff] }
0x2084   :  { %10459 = vmatprep.mubr.f32.mxu0 %v19235_v45  ;;  %10530 = vmatprep.mubr.f32.mxu1 %v19235_v45 }
0x2086   :  { %14837 = vmatpush1.bf16.msra.mxu0 %v18082_v55  ;;  %14869 = vmatpush1.bf16.msra.mxu1 %v18084_v30  ;;  %v19898_v55 = vld [vmem:[#allocation8_spill] sm:$0xff]  ;;  %v19899_v30 = vld [vmem:[#allocation14_spill] sm:$0xff] }
0x2087   :  { %14839 = vmatprep.subr.bf16.mxu0 %v18088_v61  ;;  %14871 = vmatprep.subr.bf16.mxu1 %v18090_v4  ;;  %v19900_v61 = vld [vmem:[#allocation15_spill] sm:$0xff]  ;;  %v19901_v4 = vld [vmem:[#allocation16_spill] sm:$0xff] }
0x208a   :  { %14841 = vmatpush1.bf16.msra.mxu0 %v18096_v35  ;;  %14873 = vmatpush1.bf16.msra.mxu1 %v18098_v18  ;;  %v19902_v35 = vld [vmem:[#allocation50_spill] sm:$0xff]  ;;  %v19903_v18 = vld [vmem:[#allocation52_spill] sm:$0xff] }
0x208b   :  { %14843 = vmatprep.subr.bf16.mxu0 %v18102_v7  ;;  %14875 = vmatprep.subr.bf16.mxu1 %v19892_v60  ;;  %v19904_v7 = vld [vmem:[#allocation53_spill] sm:$0xff] }
0x208e   :  { %14845 = vmatpush1.bf16.msra.mxu0 %v19893_v50  ;;  %14877 = vmatpush1.bf16.msra.mxu1 %v19894_v48 }
0x208f   :  { %14847 = vmatprep.subr.bf16.mxu0 %v19895_v27  ;;  %14879 = vmatprep.subr.bf16.mxu1 %v19896_v20 }
0x2092   :  { %14849 = vmatpush1.bf16.msra.mxu0 %v19897_v28  ;;  %14881 = vmatpush1.bf16.msra.mxu1 %v19898_v55 }
0x2093   :  { %14851 = vmatprep.subr.bf16.mxu0 %v19899_v30  ;;  %14883 = vmatprep.subr.bf16.mxu1 %v19900_v61 }
0x2096   :  { %14853 = vmatpush1.bf16.msra.mxu0 %v19901_v4  ;;  %14885 = vmatpush1.bf16.msra.mxu1 %v19902_v35 }
0x2097   :  { %14855 = vmatprep.subr.bf16.mxu0 %v19903_v18  ;;  %14887 = vmatprep.subr.bf16.mxu1 %v19904_v7 }
0x209a   :  { %14857 = vmatpush1.bf16.msra.mxu0 %v19905_v25  ;;  %14889 = vmatpush1.bf16.msra.mxu1 %v19906_v36 }
0x209b   :  { %14859 = vmatprep.subr.bf16.mxu0 %v19907_v1  ;;  %14891 = vmatprep.subr.bf16.mxu1 %v19908_v0 }
0x209e   :  { %14861 = vmatpush1.bf16.msra.mxu0 %v19909_v54  ;;  %14893 = vmatpush1.bf16.msra.mxu1 %v19910_v16 }
0x209f   :  { %14895 = vmatprep.subr.bf16.mxu0 %v19911_v37  ;;  %14927 = vmatprep.subr.bf16.mxu1 %v19912_v47 }
0x2154   :  { %v10289_v46 = vpop.f32.mrb[60].mxu0  ;;  %v10360_v44 = vpop.f32.mrb[60].mxu1 }
0x2155   :  { %v10365_v2 = vadd.f32 %v10289_v46, %v19913_v40  ;;  %v10291_v24 = vpop.f32.mrb[61].mxu0  ;;  %v10362_v6 = vpop.f32.mrb[61].mxu1  ;;  %v10367_v50 = vadd.f32 %v10360_v44, %v18323_v3 }
0x2156   :  { %v10366_v13 = vadd.f32 %v10291_v24, %v19803_v53  ;;  %v10368_v48 = vadd.f32 %v10362_v6, %v18326_v33 }
0x2157   :  { %v10853_v5 = vmul.f32 -1.442695, %v10365_v2  ;;  %v10855_v27 = vmul.f32 -1.442695, %v10367_v50 }
0x2158   :  { %v10854_v60 = vmul.f32 -1.442695, %v10366_v13 }
0x2159   :  { %15571 = vpow2.f32 %v10853_v5 }
0x215a   :  { %15573 = vpow2.f32 %v10854_v60 }
0x215b   :  { %15575 = vtanh.f32 %v10368_v48 }
0x215c   :  { %15577 = vpow2.f32 %v10855_v27 }
0x2163   :  { %v15572_v20 = vpop.eup %15571 }
0x2164   :  { %v10378_v28 = vadd.f32 1.0, %v15572_v20  ;;  %v15574_v55 = vpop.eup %15573 }
0x2165   :  { %v10379_v30 = vadd.f32 1.0, %v15574_v55  ;;  %v15576_v61 = vpop.eup %15575 }
0x2166   :  { %15579 = vrcp.f32 %v10378_v28  ;;  %v15578_v4 = vpop.eup %15577 }
0x2167   :  { %15581 = vrcp.f32 %v10379_v30  ;;  %v10380_v25 = vadd.f32 1.0, %v15578_v4 }
0x2169   :  { %15583 = vrcp.f32 %v10380_v25 }
0x2170   :  { %v15580_v35 = vpop.eup %15579 }
0x2171   :  { %v10389_v18 = vmul.f32 %v15580_v35, %v15576_v61  ;;  %v15582_v7 = vpop.eup %15581 }
0x2172   :  { %v10388_v36 = vmul.f32 %v15582_v7, %v18740_v38 }
0x2173   :  { %v15584_v0 = vpop.eup %15583 }
0x2174   :  { %v18822_v1 = vadd.f32 %v10389_v18, %v10388_v36 }
0x2176   :  { %15585 = vtanh.f32 %v18822_v1 }
0x2180   :  { %v15586_v54 = vpop.eup %15585 }
0x2181   :  { %v10392_v16 = vmul.f32 %v15586_v54, %v15584_v0 }
0x2183   :  { %10856 = vst [vmem:[%s18875_s4 + $0x30] sm:$0xff] %v10392_v16  ;;  %10460 = vmatmul.mubr.f32.vlgmr.msra.gmra.mrb[62].mxu0 %v10392_v16  ;;  %10531 = vmatmul.mubr.f32.vlgmr.msra.gmra.mrb[62].mxu1 %v10392_v16 }
0x2184   :  { %14897 = vmatpush1.bf16.msra.mxu0 %v18168_v62  ;;  %14929 = vmatpush1.bf16.msra.mxu1 %v18170_v43 }
0x2185   :  { %14899 = vmatprep.subr.bf16.mxu0 %v19782_v10  ;;  %14931 = vmatprep.subr.bf16.mxu1 %v19783_v22 }
0x2186   :  { %10601 = vmatprep.mubr.f32.mxu0 %v19235_v45  ;;  %10672 = vmatprep.mubr.f32.mxu1 %v19235_v45  ;;  %v10857_v45 = vld [vmem:[%s18875_s4 + $0x38] sm:$0xff] }
0x2188   :  { %14901 = vmatpush1.bf16.msra.mxu0 %v19784_v56  ;;  %14933 = vmatpush1.bf16.msra.mxu1 %v19785_v17 }
0x2189   :  { %14903 = vmatprep.subr.bf16.mxu0 %v19786_v8  ;;  %14935 = vmatprep.subr.bf16.mxu1 %v19787_v42 }
0x218c   :  { %14905 = vmatpush1.bf16.msra.mxu0 %v19788_v11  ;;  %14937 = vmatpush1.bf16.msra.mxu1 %v19789_v23 }
0x218d   :  { %14907 = vmatprep.subr.bf16.mxu0 %v19790_v14  ;;  %14939 = vmatprep.subr.bf16.mxu1 %v19791_v12 }
0x2190   :  { %14909 = vmatpush1.bf16.msra.mxu0 %v19792_v52  ;;  %14941 = vmatpush1.bf16.msra.mxu1 %v19793_v31 }
0x2191   :  { %14911 = vmatprep.subr.bf16.mxu0 %v19794_v32  ;;  %14943 = vmatprep.subr.bf16.mxu1 %v19795_v63 }
0x2194   :  { %14913 = vmatpush1.bf16.msra.mxu0 %v19796_v26  ;;  %14945 = vmatpush1.bf16.msra.mxu1 %v19797_v51 }
0x2195   :  { %14915 = vmatprep.subr.bf16.mxu0 %v18226_v15  ;;  %14947 = vmatprep.subr.bf16.mxu1 %v18228_v59 }
0x2198   :  { %14917 = vmatpush1.bf16.msra.mxu0 %v18232_v57  ;;  %14949 = vmatpush1.bf16.msra.mxu1 %v18234_v21 }
0x2199   :  { %14919 = vmatprep.subr.bf16.mxu0 %v18238_v39  ;;  %14951 = vmatprep.subr.bf16.mxu1 %v19804_v19 }
0x219c   :  { %14921 = vmatpush1.bf16.msra.mxu0 %v18244_v41  ;;  %14953 = vmatpush1.bf16.msra.mxu1 %v18246_v29 }
0x219d   :  { %14923 = vmatprep.subr.bf16.mxu0 %v18250_v34  ;;  %14955 = vmatprep.subr.bf16.mxu1 %v18252_v9 }
0x21a0   :  { %14925 = vmatpush1.bf16.msra.mxu0 %v18256_v58  ;;  %14957 = vmatpush1.bf16.msra.mxu1 %v18258_v49 }
0x21a3   :  { %10602 = vmatmul.mubr.f32.vlgmr.msra.gmra.mrb[62].mxu0 %v10857_v45  ;;  %10673 = vmatmul.mubr.f32.vlgmr.msra.gmra.mrb[62].mxu1 %v10857_v45 }
0x2276   :  { %v10603_v62 = vpop.f32.mrb[62].mxu0  ;;  %v10674_v43 = vpop.f32.mrb[62].mxu1 }
0x2277   :  { %v10679_v15 = vadd.f32 %v10603_v62, %v19913_v40  ;;  %v10605_v59 = vpop.f32.mrb[63].mxu0  ;;  %v10676_v57 = vpop.f32.mrb[63].mxu1  ;;  %v10681_v29 = vadd.f32 %v10674_v43, %v18323_v3 }
0x2278   :  { %v10680_v21 = vadd.f32 %v10605_v59, %v19803_v53  ;;  %v10682_v34 = vadd.f32 %v10676_v57, %v18326_v33 }
0x2279   :  { %v10858_v39 = vmul.f32 -1.442695, %v10679_v15  ;;  %v10860_v9 = vmul.f32 -1.442695, %v10681_v29 }
0x227a   :  { %v10859_v41 = vmul.f32 -1.442695, %v10680_v21 }
0x227b   :  { %15587 = vpow2.f32 %v10858_v39 }
0x227c   :  { %15589 = vpow2.f32 %v10859_v41 }
0x227d   :  { %15591 = vtanh.f32 %v10682_v34 }
0x227e   :  { %15593 = vpow2.f32 %v10860_v9 }
0x2285   :  { %v15588_v58 = vpop.eup %15587 }
0x2286   :  { %v10692_v49 = vadd.f32 1.0, %v15588_v58  ;;  %v15590_v10 = vpop.eup %15589 }
0x2287   :  { %v10693_v22 = vadd.f32 1.0, %v15590_v10  ;;  %v15592_v56 = vpop.eup %15591 }
0x2288   :  { %15595 = vrcp.f32 %v10692_v49  ;;  %v15594_v17 = vpop.eup %15593 }
0x2289   :  { %15597 = vrcp.f32 %v10693_v22  ;;  %v10694_v11 = vadd.f32 1.0, %v15594_v17 }
0x228b   :  { %15599 = vrcp.f32 %v10694_v11 }
0x2292   :  { %v15596_v53 = vpop.eup %15595 }
0x2293   :  { %v10703_v8 = vmul.f32 %v15596_v53, %v15592_v56  ;;  %v15598_v42 = vpop.eup %15597 }
0x2294   :  { %v10702_v23 = vmul.f32 %v15598_v42, %v18822_v1 }
0x2295   :  { %v15600_v33 = vpop.eup %15599 }
0x2296   :  { %v10704_v3 = vadd.f32 %v10703_v8, %v10702_v23 }
0x2298   :  { %15601 = vtanh.f32 %v10704_v3 }
0x22a2   :  { %v15602_v14 = vpop.eup %15601 }
0x22a3   :  { %v10706_v12 = vmul.f32 %v15602_v14, %v15600_v33 }
0x22a5   :  { %10861 = vst [vmem:[%s18875_s4 + $0x38] sm:$0xff] %v10706_v12 }
0x22a6   :  { %10712 = vsyncpa [#allocation3], 1 }
0x22a7   :  { %10713 = vsyncpa [#allocation5], 1 }

</bundles_post_ra>
